<compile_context>
chip_gen: v6e
topology: v6e:2x2x1
jax: 0.10.0
libtpu: 0.0.40
codegen_flags: <defaults>
</compile_context>

<pallas_src>
import jax
import jax.numpy as jnp
from jax.experimental import pallas as pl
from jax.experimental.pallas import tpu as pltpu

MODES = 5
H = W = 28   # required by fc1 = Linear(64 * 14 * 14, 120) after the 2x2 max-pool

_VMEM_SPEC = pl.BlockSpec(memory_space=pltpu.MemorySpace.VMEM)


# ----------------------------------------------------------------------------
# Pallas kernels
# ----------------------------------------------------------------------------
def _spectral_mul_kernel(x_ref, wr_ref, wi_ref, o_ref):
    """Complex per-mode channel mixing for a block of modes.

    x_ref : (P, 2B, Cin)   rows [:B] = real(x_ft), rows [B:] = imag(x_ft)
    wr/wi : (P, Cin, Cout) real / imag weights
    o_ref : (P, 2B, Cout)  rows [:B] = real(out), rows [B:] = imag(out)
    """
    x = x_ref[...]
    wr = wr_ref[...]
    wi = wi_ref[...]
    b = x.shape[1] // 2
    if x.shape[2] == 1:
        # Single input channel: the contraction is just a broadcast multiply.
        dr = x * wr                       # (P,2B,1)*(P,1,Cout) -> (P,2B,Cout)
        di = x * wi
    else:
        # Batched MXU matmuls: one (2B, Cin) x (Cin, Cout) per mode.
        dr = jnp.einsum('pbc,pcd->pbd', x, wr,
                        preferred_element_type=jnp.float32)
        di = jnp.einsum('pbc,pcd->pbd', x, wi,
                        preferred_element_type=jnp.float32)
    # complex multiply: (xr + i xi) @ (wr + i wi)
    o_ref[:, :b, :] = dr[:, :b, :] - di[:, b:, :]   # real part
    o_ref[:, b:, :] = dr[:, b:, :] + di[:, :b, :]   # imag part


def spectral_mul(x2, wr, wi):
    """x2: (P, 2B, Cin); wr, wi: (P, Cin, Cout) -> (P, 2B, Cout) f32."""
    P, B2, Cin = x2.shape
    Cout = wr.shape[2]
    ph = P // 2          # P = 2*modes*modes is even; one grid step per corner
    return pl.pallas_call(
        _spectral_mul_kernel,
        out_shape=jax.ShapeDtypeStruct((P, B2, Cout), jnp.float32),
        grid=(2,),
        in_specs=[pl.BlockSpec((ph, B2, Cin), lambda g: (g, 0, 0)),
                  pl.BlockSpec((ph, Cin, Cout), lambda g: (g, 0, 0)),
                  pl.BlockSpec((ph, Cin, Cout), lambda g: (g, 0, 0))],
        out_specs=pl.BlockSpec((ph, B2, Cout), lambda g: (g, 0, 0)),
        compiler_params=pltpu.CompilerParams(
            dimension_semantics=("parallel",)),   # v7x: one corner per TensorCore
    )(x2, wr, wi)


def _mlp_kernel(x_ref, w1_ref, b1_ref, w2_ref, b2_ref, w3_ref, b3_ref, o_ref):
    # fc1 operands are bf16 (f32 accumulation on the MXU); fc2/fc3 are tiny.
    h = jnp.dot(x_ref[...], w1_ref[...],
                preferred_element_type=jnp.float32) + b1_ref[...]
    h = jnp.maximum(h, 0.0)
    h = jnp.dot(h, w2_ref[...], preferred_element_type=jnp.float32) + b2_ref[...]
    h = jnp.maximum(h, 0.0)
    o_ref[...] = jnp.dot(h, w3_ref[...],
                         preferred_element_type=jnp.float32) + b3_ref[...]


def mlp_head(x, fc_params):
    w1, b1, w2, b2, w3, b3 = fc_params
    B = x.shape[0]
    xb = x.astype(jnp.bfloat16)          # halve the dominant fc1 DMA bytes
    w1b = w1.astype(jnp.bfloat16)
    return pl.pallas_call(
        _mlp_kernel,
        out_shape=jax.ShapeDtypeStruct((B, w3.shape[1]), jnp.float32),
        in_specs=[_VMEM_SPEC] * 7,
        out_specs=_VMEM_SPEC,
        compiler_params=pltpu.CompilerParams(
            vmem_limit_bytes=16 * 1024 * 1024),   # fits v7x's 64 MiB VMEM easily
    )(xb, w1b, b1, w2, b2, w3, b3)


# ----------------------------------------------------------------------------
# SpectralConv2d (FFT in plain JAX, mode mixing in a single Pallas call)
# ----------------------------------------------------------------------------
def spectral_conv2d(x, w1, w2, modes=MODES):
    """x: (B, Cin, H, W) f32; w1, w2: (Cout, Cin, modes, modes, 2) f32."""
    B, Cin, h, w = x.shape
    Cout = w1.shape[0]
    wh = w // 2 + 1
    m = modes
    # TODO(synk): rfft2/irfft2 have no Pallas TPU equivalent; XLA FFT is used.
    x_ft = jnp.fft.rfft2(x)                                  # (B, Cin, h, wh) c64

    # Gather both low-frequency corners and fuse them along the mode axis.
    blk = jnp.concatenate([x_ft[:, :, :m, :m],
                           x_ft[:, :, -m:, :m]], axis=2)     # (B, Cin, 2m, m)
    P = 2 * m * m
    xr = jnp.transpose(jnp.real(blk), (2, 3, 0, 1)).reshape(P, B, Cin)
    xi = jnp.transpose(jnp.imag(blk), (2, 3, 0, 1)).reshape(P, B, Cin)
    x2 = jnp.concatenate([xr, xi], axis=1)                   # (P, 2B, Cin)

    def wprep(wt, comp):  # (Cout, Cin, m, m, 2)[..., comp] -> (m*m, Cin, Cout)
        return jnp.transpose(wt[..., comp], (2, 3, 1, 0)).reshape(m * m, Cin, Cout)

    wr = jnp.concatenate([wprep(w1, 0), wprep(w2, 0)], axis=0)   # (P, Cin, Cout)
    wi = jnp.concatenate([wprep(w1, 1), wprep(w2, 1)], axis=0)

    o = spectral_mul(x2, wr, wi)                             # (P, 2B, Cout)
    our = jnp.transpose(o[:, :B].reshape(2 * m, m, B, Cout), (2, 3, 0, 1))
    oui = jnp.transpose(o[:, B:].reshape(2 * m, m, B, Cout), (2, 3, 0, 1))
    corners = jax.lax.complex(our, oui)                      # (B, Cout, 2m, m)

    # Assemble out_ft with concat + pad (no zeros + dynamic-update-slice pair).
    mid = jnp.zeros((B, Cout, h - 2 * m, m), dtype=corners.dtype)
    out_ft = jnp.concatenate([corners[:, :, :m], mid, corners[:, :, m:]], axis=2)
    out_ft = jnp.pad(out_ft, ((0, 0), (0, 0), (0, 0), (0, wh - m)))
    return jnp.fft.irfft2(out_ft, s=(h, w))                  # (B, Cout, h, w) f32


# ----------------------------------------------------------------------------
# Net2d forward
# ----------------------------------------------------------------------------
def net2d_forward(x, params):
    (s1a, s1b, s2a, s2b, s3a, s3b) = params["spectral"]

    x = spectral_conv2d(x, s1a, s1b)                         # (B, 16, 28, 28)
    x = jnp.maximum(x, 0.0)                                  # fused by XLA
    x = spectral_conv2d(x, s2a, s2b)                         # (B, 32, 28, 28)
    x = jnp.maximum(x, 0.0)
    x = spectral_conv2d(x, s3a, s3b)                         # (B, 64, 28, 28)

    # 2x2 max-pool + flatten in plain JAX (tiny; a dedicated kernel is pure
    # launch overhead).  Flatten order matches torch .view on contiguous NCHW.
    B, C, h, w = x.shape
    x = x.reshape(B, C, h // 2, 2, w // 2, 2).max(axis=(3, 5))   # (B, 64, 14, 14)
    x = x.reshape(B, C * (h // 2) * (w // 2))                    # (B, 12544)

    out = mlp_head(x, params["fc"])                          # (B, 10)
    # torch's .squeeze(-1) is a no-op here (last dim == 10).
    return out


def init_params(key):
    keys = jax.random.split(key, 12)

    def spec_w(k, co, ci, m=MODES):
        scale = 1.0 / (ci * co)
        return scale * jax.random.uniform(k, (co, ci, m, m, 2), dtype=jnp.float32)

    def linear(kw, kb, fin, fout):
        bound = 1.0 / (fin ** 0.5)
        w = jax.random.uniform(kw, (fin, fout), dtype=jnp.float32,
                               minval=-bound, maxval=bound)   # stored as (in, out)
        b = jax.random.uniform(kb, (1, fout), dtype=jnp.float32,
                               minval=-bound, maxval=bound)
        return w, b

    spectral = (spec_w(keys[0], 16, 1), spec_w(keys[1], 16, 1),
                spec_w(keys[2], 32, 16), spec_w(keys[3], 32, 16),
                spec_w(keys[4], 64, 32), spec_w(keys[5], 64, 32))
    w1, b1 = linear(keys[6], keys[7], 64 * 14 * 14, 120)
    w2, b2 = linear(keys[8], keys[9], 120, 84)
    w3, b3 = linear(keys[10], keys[11], 84, 10)
    return {"spectral": spectral, "fc": (w1, b1, w2, b2, w3, b3)}


if __name__ == "__main__":
    key = jax.random.PRNGKey(0)
    pkey, xkey = jax.random.split(key)
    params = init_params(pkey)
    x = jax.random.normal(xkey, (2, 1, H, W), dtype=jnp.float32)  # NCHW, like PyTorch

    fwd = jax.jit(net2d_forward)
    out = fwd(x, params)
    out = jax.block_until_ready(out)

    assert out.shape == (2, 10), out.shape
    assert out.dtype == jnp.float32
    assert bool(jnp.all(jnp.isfinite(out)))
    print("KERNEL_OK")
</pallas_src>

<mosaic_0001>
module attributes {stable_mosaic.version = 11 : i64} {
  func.func @_spectral_mul_kernel(%arg0: i32, %arg1: memref<25x4x1xf32, #tpu.memory_space<vmem>>, %arg2: memref<25x1x16xf32, #tpu.memory_space<vmem>>, %arg3: memref<25x1x16xf32, #tpu.memory_space<vmem>>, %arg4: memref<25x4x16xf32, #tpu.memory_space<vmem>>) attributes {dimension_semantics = [#tpu.dimension_semantics<parallel>], iteration_bounds = array<i64: 2>, scalar_prefetch = 0 : i64, scratch_operands = 0 : i64, tpu.core_type = #tpu.core_type<tc>, window_params = [{transform_indices = @transform_0, window_bounds = array<i64: 25, 4, 1>}, {transform_indices = @transform_1, window_bounds = array<i64: 25, 1, 16>}, {transform_indices = @transform_2, window_bounds = array<i64: 25, 1, 16>}, {transform_indices = @transform_3, window_bounds = array<i64: 25, 4, 16>}]} {
    %c0 = arith.constant 0 : index
    %c0_0 = arith.constant 0 : index
    %c0_1 = arith.constant 0 : index
    %0 = vector.load %arg1[%c0, %c0_0, %c0_1] : memref<25x4x1xf32, #tpu.memory_space<vmem>>, vector<25x4x1xf32>
    %c0_2 = arith.constant 0 : index
    %c0_3 = arith.constant 0 : index
    %c0_4 = arith.constant 0 : index
    %1 = vector.load %arg2[%c0_2, %c0_3, %c0_4] : memref<25x1x16xf32, #tpu.memory_space<vmem>>, vector<25x1x16xf32>
    %c0_5 = arith.constant 0 : index
    %c0_6 = arith.constant 0 : index
    %c0_7 = arith.constant 0 : index
    %2 = vector.load %arg3[%c0_5, %c0_6, %c0_7] : memref<25x1x16xf32, #tpu.memory_space<vmem>>, vector<25x1x16xf32>
    %3 = vector.broadcast %0 : vector<25x4x1xf32> to vector<25x4x16xf32>
    %4 = vector.broadcast %1 : vector<25x1x16xf32> to vector<25x4x16xf32>
    %5 = arith.mulf %3, %4 : vector<25x4x16xf32>
    %6 = vector.broadcast %0 : vector<25x4x1xf32> to vector<25x4x16xf32>
    %7 = vector.broadcast %2 : vector<25x1x16xf32> to vector<25x4x16xf32>
    %8 = arith.mulf %6, %7 : vector<25x4x16xf32>
    %9 = vector.extract_strided_slice %5 {offsets = [0, 0, 0], sizes = [25, 2, 16], strides = [1, 1, 1]} : vector<25x4x16xf32> to vector<25x2x16xf32>
    %10 = vector.extract_strided_slice %8 {offsets = [0, 2, 0], sizes = [25, 2, 16], strides = [1, 1, 1]} : vector<25x4x16xf32> to vector<25x2x16xf32>
    %11 = arith.subf %9, %10 : vector<25x2x16xf32>
    %c0_8 = arith.constant 0 : index
    %c0_9 = arith.constant 0 : index
    %c0_10 = arith.constant 0 : index
    %12 = vector.load %arg4[%c0_8, %c0_9, %c0_10] : memref<25x4x16xf32, #tpu.memory_space<vmem>>, vector<25x2x16xf32>
    tpu.vector_store %arg4[%c0_8, %c0_9, %c0_10], %11 {strides = array<i32>} : memref<25x4x16xf32, #tpu.memory_space<vmem>>, vector<25x2x16xf32>,
    %13 = vector.extract_strided_slice %5 {offsets = [0, 2, 0], sizes = [25, 2, 16], strides = [1, 1, 1]} : vector<25x4x16xf32> to vector<25x2x16xf32>
    %14 = vector.extract_strided_slice %8 {offsets = [0, 0, 0], sizes = [25, 2, 16], strides = [1, 1, 1]} : vector<25x4x16xf32> to vector<25x2x16xf32>
    %15 = arith.addf %13, %14 : vector<25x2x16xf32>
    %c0_11 = arith.constant 0 : index
    %c2 = arith.constant 2 : index
    %c0_12 = arith.constant 0 : index
    %16 = vector.load %arg4[%c0_11, %c2, %c0_12] : memref<25x4x16xf32, #tpu.memory_space<vmem>>, vector<25x2x16xf32>
    tpu.vector_store %arg4[%c0_11, %c2, %c0_12], %15 {strides = array<i32>} : memref<25x4x16xf32, #tpu.memory_space<vmem>>, vector<25x2x16xf32>,
    return
  }
  func.func @transform_0(%arg0: i32) -> (i32, i32, i32) {
    %c0_i32 = arith.constant 0 : i32
    %c0_i32_0 = arith.constant 0 : i32
    %c0_i32_1 = arith.constant 0 : i32
    return %arg0, %c0_i32, %c0_i32_0 : i32, i32, i32
  }
  func.func @transform_1(%arg0: i32) -> (i32, i32, i32) {
    %c0_i32 = arith.constant 0 : i32
    %c0_i32_0 = arith.constant 0 : i32
    %c0_i32_1 = arith.constant 0 : i32
    return %arg0, %c0_i32, %c0_i32_0 : i32, i32, i32
  }
  func.func @transform_2(%arg0: i32) -> (i32, i32, i32) {
    %c0_i32 = arith.constant 0 : i32
    %c0_i32_0 = arith.constant 0 : i32
    %c0_i32_1 = arith.constant 0 : i32
    return %arg0, %c0_i32, %c0_i32_0 : i32, i32, i32
  }
  func.func @transform_3(%arg0: i32) -> (i32, i32, i32) {
    %c0_i32 = arith.constant 0 : i32
    %c0_i32_0 = arith.constant 0 : i32
    %c0_i32_1 = arith.constant 0 : i32
    return %arg0, %c0_i32, %c0_i32_0 : i32, i32, i32
  }
}

module attributes {stable_mosaic.version = 11 : i64} {
  func.func @_spectral_mul_kernel(%arg0: i32, %arg1: memref<25x4x16xf32, #tpu.memory_space<vmem>>, %arg2: memref<25x16x32xf32, #tpu.memory_space<vmem>>, %arg3: memref<25x16x32xf32, #tpu.memory_space<vmem>>, %arg4: memref<25x4x32xf32, #tpu.memory_space<vmem>>) attributes {dimension_semantics = [#tpu.dimension_semantics<parallel>], iteration_bounds = array<i64: 2>, scalar_prefetch = 0 : i64, scratch_operands = 0 : i64, tpu.core_type = #tpu.core_type<tc>, window_params = [{transform_indices = @transform_0, window_bounds = array<i64: 25, 4, 16>}, {transform_indices = @transform_1, window_bounds = array<i64: 25, 16, 32>}, {transform_indices = @transform_2, window_bounds = array<i64: 25, 16, 32>}, {transform_indices = @transform_3, window_bounds = array<i64: 25, 4, 32>}]} {
    %c0 = arith.constant 0 : index
    %c0_0 = arith.constant 0 : index
    %c0_1 = arith.constant 0 : index
    %0 = vector.load %arg1[%c0, %c0_0, %c0_1] : memref<25x4x16xf32, #tpu.memory_space<vmem>>, vector<25x4x16xf32>
    %c0_2 = arith.constant 0 : index
    %c0_3 = arith.constant 0 : index
    %c0_4 = arith.constant 0 : index
    %1 = vector.load %arg2[%c0_2, %c0_3, %c0_4] : memref<25x16x32xf32, #tpu.memory_space<vmem>>, vector<25x16x32xf32>
    %c0_5 = arith.constant 0 : index
    %c0_6 = arith.constant 0 : index
    %c0_7 = arith.constant 0 : index
    %2 = vector.load %arg3[%c0_5, %c0_6, %c0_7] : memref<25x16x32xf32, #tpu.memory_space<vmem>>, vector<25x16x32xf32>
    "tpu.trace_start"() <{level = 10 : i32, message = "pbc,pcd->pbd"}> : () -> ()
    %cst = arith.constant dense<0.000000e+00> : vector<25x4x32xf32>
    %3 = tpu.matmul %0, %1, %cst {dimension_numbers = #tpu.dot_dimension_numbers<[2], [1], [1], [2], [0, 0, 0, 1, 1, 2], [0], [0]>} : vector<25x4x16xf32>, vector<25x16x32xf32>, vector<25x4x32xf32> -> vector<25x4x32xf32>
    %cst_8 = arith.constant dense<0.000000e+00> : vector<25x4x32xf32>
    %4 = tpu.matmul %0, %2, %cst_8 {dimension_numbers = #tpu.dot_dimension_numbers<[2], [1], [1], [2], [0, 0, 0, 1, 1, 2], [0], [0]>} : vector<25x4x16xf32>, vector<25x16x32xf32>, vector<25x4x32xf32> -> vector<25x4x32xf32>
    "tpu.trace_stop"() : () -> ()
    %5 = vector.extract_strided_slice %3 {offsets = [0, 0, 0], sizes = [25, 2, 32], strides = [1, 1, 1]} : vector<25x4x32xf32> to vector<25x2x32xf32>
    %6 = vector.extract_strided_slice %4 {offsets = [0, 2, 0], sizes = [25, 2, 32], strides = [1, 1, 1]} : vector<25x4x32xf32> to vector<25x2x32xf32>
    %7 = arith.subf %5, %6 : vector<25x2x32xf32>
    %c0_9 = arith.constant 0 : index
    %c0_10 = arith.constant 0 : index
    %c0_11 = arith.constant 0 : index
    %8 = vector.load %arg4[%c0_9, %c0_10, %c0_11] : memref<25x4x32xf32, #tpu.memory_space<vmem>>, vector<25x2x32xf32>
    tpu.vector_store %arg4[%c0_9, %c0_10, %c0_11], %7 {strides = array<i32>} : memref<25x4x32xf32, #tpu.memory_space<vmem>>, vector<25x2x32xf32>,
    %9 = vector.extract_strided_slice %3 {offsets = [0, 2, 0], sizes = [25, 2, 32], strides = [1, 1, 1]} : vector<25x4x32xf32> to vector<25x2x32xf32>
    %10 = vector.extract_strided_slice %4 {offsets = [0, 0, 0], sizes = [25, 2, 32], strides = [1, 1, 1]} : vector<25x4x32xf32> to vector<25x2x32xf32>
    %11 = arith.addf %9, %10 : vector<25x2x32xf32>
    %c0_12 = arith.constant 0 : index
    %c2 = arith.constant 2 : index
    %c0_13 = arith.constant 0 : index
    %12 = vector.load %arg4[%c0_12, %c2, %c0_13] : memref<25x4x32xf32, #tpu.memory_space<vmem>>, vector<25x2x32xf32>
    tpu.vector_store %arg4[%c0_12, %c2, %c0_13], %11 {strides = array<i32>} : memref<25x4x32xf32, #tpu.memory_space<vmem>>, vector<25x2x32xf32>,
    return
  }
  func.func @transform_0(%arg0: i32) -> (i32, i32, i32) {
    %c0_i32 = arith.constant 0 : i32
    %c0_i32_0 = arith.constant 0 : i32
    %c0_i32_1 = arith.constant 0 : i32
    return %arg0, %c0_i32, %c0_i32_0 : i32, i32, i32
  }
  func.func @transform_1(%arg0: i32) -> (i32, i32, i32) {
    %c0_i32 = arith.constant 0 : i32
    %c0_i32_0 = arith.constant 0 : i32
    %c0_i32_1 = arith.constant 0 : i32
    return %arg0, %c0_i32, %c0_i32_0 : i32, i32, i32
  }
  func.func @transform_2(%arg0: i32) -> (i32, i32, i32) {
    %c0_i32 = arith.constant 0 : i32
    %c0_i32_0 = arith.constant 0 : i32
    %c0_i32_1 = arith.constant 0 : i32
    return %arg0, %c0_i32, %c0_i32_0 : i32, i32, i32
  }
  func.func @transform_3(%arg0: i32) -> (i32, i32, i32) {
    %c0_i32 = arith.constant 0 : i32
    %c0_i32_0 = arith.constant 0 : i32
    %c0_i32_1 = arith.constant 0 : i32
    return %arg0, %c0_i32, %c0_i32_0 : i32, i32, i32
  }
}

module attributes {stable_mosaic.version = 11 : i64} {
  func.func @_spectral_mul_kernel(%arg0: i32, %arg1: memref<25x4x32xf32, #tpu.memory_space<vmem>>, %arg2: memref<25x32x64xf32, #tpu.memory_space<vmem>>, %arg3: memref<25x32x64xf32, #tpu.memory_space<vmem>>, %arg4: memref<25x4x64xf32, #tpu.memory_space<vmem>>) attributes {dimension_semantics = [#tpu.dimension_semantics<parallel>], iteration_bounds = array<i64: 2>, scalar_prefetch = 0 : i64, scratch_operands = 0 : i64, tpu.core_type = #tpu.core_type<tc>, window_params = [{transform_indices = @transform_0, window_bounds = array<i64: 25, 4, 32>}, {transform_indices = @transform_1, window_bounds = array<i64: 25, 32, 64>}, {transform_indices = @transform_2, window_bounds = array<i64: 25, 32, 64>}, {transform_indices = @transform_3, window_bounds = array<i64: 25, 4, 64>}]} {
    %c0 = arith.constant 0 : index
    %c0_0 = arith.constant 0 : index
    %c0_1 = arith.constant 0 : index
    %0 = vector.load %arg1[%c0, %c0_0, %c0_1] : memref<25x4x32xf32, #tpu.memory_space<vmem>>, vector<25x4x32xf32>
    %c0_2 = arith.constant 0 : index
    %c0_3 = arith.constant 0 : index
    %c0_4 = arith.constant 0 : index
    %1 = vector.load %arg2[%c0_2, %c0_3, %c0_4] : memref<25x32x64xf32, #tpu.memory_space<vmem>>, vector<25x32x64xf32>
    %c0_5 = arith.constant 0 : index
    %c0_6 = arith.constant 0 : index
    %c0_7 = arith.constant 0 : index
    %2 = vector.load %arg3[%c0_5, %c0_6, %c0_7] : memref<25x32x64xf32, #tpu.memory_space<vmem>>, vector<25x32x64xf32>
    "tpu.trace_start"() <{level = 10 : i32, message = "pbc,pcd->pbd"}> : () -> ()
    %cst = arith.constant dense<0.000000e+00> : vector<25x4x64xf32>
    %3 = tpu.matmul %0, %1, %cst {dimension_numbers = #tpu.dot_dimension_numbers<[2], [1], [1], [2], [0, 0, 0, 1, 1, 2], [0], [0]>} : vector<25x4x32xf32>, vector<25x32x64xf32>, vector<25x4x64xf32> -> vector<25x4x64xf32>
    %cst_8 = arith.constant dense<0.000000e+00> : vector<25x4x64xf32>
    %4 = tpu.matmul %0, %2, %cst_8 {dimension_numbers = #tpu.dot_dimension_numbers<[2], [1], [1], [2], [0, 0, 0, 1, 1, 2], [0], [0]>} : vector<25x4x32xf32>, vector<25x32x64xf32>, vector<25x4x64xf32> -> vector<25x4x64xf32>
    "tpu.trace_stop"() : () -> ()
    %5 = vector.extract_strided_slice %3 {offsets = [0, 0, 0], sizes = [25, 2, 64], strides = [1, 1, 1]} : vector<25x4x64xf32> to vector<25x2x64xf32>
    %6 = vector.extract_strided_slice %4 {offsets = [0, 2, 0], sizes = [25, 2, 64], strides = [1, 1, 1]} : vector<25x4x64xf32> to vector<25x2x64xf32>
    %7 = arith.subf %5, %6 : vector<25x2x64xf32>
    %c0_9 = arith.constant 0 : index
    %c0_10 = arith.constant 0 : index
    %c0_11 = arith.constant 0 : index
    %8 = vector.load %arg4[%c0_9, %c0_10, %c0_11] : memref<25x4x64xf32, #tpu.memory_space<vmem>>, vector<25x2x64xf32>
    tpu.vector_store %arg4[%c0_9, %c0_10, %c0_11], %7 {strides = array<i32>} : memref<25x4x64xf32, #tpu.memory_space<vmem>>, vector<25x2x64xf32>,
    %9 = vector.extract_strided_slice %3 {offsets = [0, 2, 0], sizes = [25, 2, 64], strides = [1, 1, 1]} : vector<25x4x64xf32> to vector<25x2x64xf32>
    %10 = vector.extract_strided_slice %4 {offsets = [0, 0, 0], sizes = [25, 2, 64], strides = [1, 1, 1]} : vector<25x4x64xf32> to vector<25x2x64xf32>
    %11 = arith.addf %9, %10 : vector<25x2x64xf32>
    %c0_12 = arith.constant 0 : index
    %c2 = arith.constant 2 : index
    %c0_13 = arith.constant 0 : index
    %12 = vector.load %arg4[%c0_12, %c2, %c0_13] : memref<25x4x64xf32, #tpu.memory_space<vmem>>, vector<25x2x64xf32>
    tpu.vector_store %arg4[%c0_12, %c2, %c0_13], %11 {strides = array<i32>} : memref<25x4x64xf32, #tpu.memory_space<vmem>>, vector<25x2x64xf32>,
    return
  }
  func.func @transform_0(%arg0: i32) -> (i32, i32, i32) {
    %c0_i32 = arith.constant 0 : i32
    %c0_i32_0 = arith.constant 0 : i32
    %c0_i32_1 = arith.constant 0 : i32
    return %arg0, %c0_i32, %c0_i32_0 : i32, i32, i32
  }
  func.func @transform_1(%arg0: i32) -> (i32, i32, i32) {
    %c0_i32 = arith.constant 0 : i32
    %c0_i32_0 = arith.constant 0 : i32
    %c0_i32_1 = arith.constant 0 : i32
    return %arg0, %c0_i32, %c0_i32_0 : i32, i32, i32
  }
  func.func @transform_2(%arg0: i32) -> (i32, i32, i32) {
    %c0_i32 = arith.constant 0 : i32
    %c0_i32_0 = arith.constant 0 : i32
    %c0_i32_1 = arith.constant 0 : i32
    return %arg0, %c0_i32, %c0_i32_0 : i32, i32, i32
  }
  func.func @transform_3(%arg0: i32) -> (i32, i32, i32) {
    %c0_i32 = arith.constant 0 : i32
    %c0_i32_0 = arith.constant 0 : i32
    %c0_i32_1 = arith.constant 0 : i32
    return %arg0, %c0_i32, %c0_i32_0 : i32, i32, i32
  }
}

module attributes {stable_mosaic.version = 11 : i64} {
  func.func @_mlp_kernel(%arg0: memref<2x12544xbf16, #tpu.memory_space<vmem>>, %arg1: memref<12544x120xbf16, #tpu.memory_space<vmem>>, %arg2: memref<1x120xf32, #tpu.memory_space<vmem>>, %arg3: memref<120x84xf32, #tpu.memory_space<vmem>>, %arg4: memref<1x84xf32, #tpu.memory_space<vmem>>, %arg5: memref<84x10xf32, #tpu.memory_space<vmem>>, %arg6: memref<1x10xf32, #tpu.memory_space<vmem>>, %arg7: memref<2x10xf32, #tpu.memory_space<vmem>>) attributes {dimension_semantics = [], scalar_prefetch = 0 : i64, scratch_operands = 0 : i64, tpu.core_type = #tpu.core_type<tc>} {
    %c0 = arith.constant 0 : index
    %c0_0 = arith.constant 0 : index
    %0 = vector.load %arg0[%c0, %c0_0] : memref<2x12544xbf16, #tpu.memory_space<vmem>>, vector<2x12544xbf16>
    %c0_1 = arith.constant 0 : index
    %c0_2 = arith.constant 0 : index
    %1 = vector.load %arg1[%c0_1, %c0_2] : memref<12544x120xbf16, #tpu.memory_space<vmem>>, vector<12544x120xbf16>
    %cst = arith.constant dense<0.000000e+00> : vector<2x120xf32>
    %2 = tpu.matmul %0, %1, %cst {dimension_numbers = #tpu.dot_dimension_numbers<[1], [0], [0], [1], [0, 0, 1, 1], [], []>} : vector<2x12544xbf16>, vector<12544x120xbf16>, vector<2x120xf32> -> vector<2x120xf32>
    %c0_3 = arith.constant 0 : index
    %c0_4 = arith.constant 0 : index
    %3 = vector.load %arg2[%c0_3, %c0_4] : memref<1x120xf32, #tpu.memory_space<vmem>>, vector<1x120xf32>
    %4 = vector.broadcast %3 : vector<1x120xf32> to vector<2x120xf32>
    %5 = arith.addf %2, %4 : vector<2x120xf32>
    %cst_5 = arith.constant 0.000000e+00 : f32
    %6 = vector.broadcast %cst_5 : f32 to vector<2x120xf32>
    %7 = arith.maximumf %5, %6 : vector<2x120xf32>
    %c0_6 = arith.constant 0 : index
    %c0_7 = arith.constant 0 : index
    %8 = vector.load %arg3[%c0_6, %c0_7] : memref<120x84xf32, #tpu.memory_space<vmem>>, vector<120x84xf32>
    %cst_8 = arith.constant dense<0.000000e+00> : vector<2x84xf32>
    %9 = tpu.matmul %7, %8, %cst_8 {dimension_numbers = #tpu.dot_dimension_numbers<[1], [0], [0], [1], [0, 0, 1, 1], [], []>} : vector<2x120xf32>, vector<120x84xf32>, vector<2x84xf32> -> vector<2x84xf32>
    %c0_9 = arith.constant 0 : index
    %c0_10 = arith.constant 0 : index
    %10 = vector.load %arg4[%c0_9, %c0_10] : memref<1x84xf32, #tpu.memory_space<vmem>>, vector<1x84xf32>
    %11 = vector.broadcast %10 : vector<1x84xf32> to vector<2x84xf32>
    %12 = arith.addf %9, %11 : vector<2x84xf32>
    %cst_11 = arith.constant 0.000000e+00 : f32
    %13 = vector.broadcast %cst_11 : f32 to vector<2x84xf32>
    %14 = arith.maximumf %12, %13 : vector<2x84xf32>
    %c0_12 = arith.constant 0 : index
    %c0_13 = arith.constant 0 : index
    %15 = vector.load %arg5[%c0_12, %c0_13] : memref<84x10xf32, #tpu.memory_space<vmem>>, vector<84x10xf32>
    %cst_14 = arith.constant dense<0.000000e+00> : vector<2x10xf32>
    %16 = tpu.matmul %14, %15, %cst_14 {dimension_numbers = #tpu.dot_dimension_numbers<[1], [0], [0], [1], [0, 0, 1, 1], [], []>} : vector<2x84xf32>, vector<84x10xf32>, vector<2x10xf32> -> vector<2x10xf32>
    %c0_15 = arith.constant 0 : index
    %c0_16 = arith.constant 0 : index
    %17 = vector.load %arg6[%c0_15, %c0_16] : memref<1x10xf32, #tpu.memory_space<vmem>>, vector<1x10xf32>
    %18 = vector.broadcast %17 : vector<1x10xf32> to vector<2x10xf32>
    %19 = arith.addf %16, %18 : vector<2x10xf32>
    %c0_17 = arith.constant 0 : index
    %c0_18 = arith.constant 0 : index
    %20 = vector.load %arg7[%c0_17, %c0_18] : memref<2x10xf32, #tpu.memory_space<vmem>>, vector<2x10xf32>
    tpu.vector_store %arg7[%c0_17, %c0_18], %19 {strides = array<i32>} : memref<2x10xf32, #tpu.memory_space<vmem>>, vector<2x10xf32>,
    return
  }
}

</mosaic_0001>

<bundles_post_ra>
// kernel: net2d_forward.4
= control target key start
LH: loop header
LB: loop body
LE: loop exit
PB: predicated region body
PF: predicated region fallthrough
CT: control target
= control target key end

     0   :  { %s1162_s12 = smov 0   ;;  %s1377_s0 = inlined_call_operand.vmem [shape: f32[50,4,1], index: 0, kind: input, shape index: {}]   ;;  %s1378_s1 = inlined_call_operand.vmem [shape: f32[50,1,16], index: 1, kind: input, shape index: {}]   ;;  %s1379_s2 = inlined_call_operand.vmem [shape: f32[50,1,16], index: 2, kind: input, shape index: {}]   ;;  %s1380_s3 = inlined_call_operand.vmem [shape: f32[50,4,16], index: 3, kind: output, shape index: {}]  }
   0x1 LB: > { %s1063_s13 = sadd.s32 4294967295, %s1139_s12   ;;  %p1067_p0 = scmp.ge.s32.totalorder %s1139_s12, 1  ;;  %s1139_s12 = sphi %s1162_s12, %s13_s12  }
   0x2   : > { %p158_p1 = scmp.lt.s32.totalorder %s1139_s12, 3 }
   0x4   : > { %p159_p2 = pnand %p1067_p0, %p158_p1 }
   0x5   : > { %s190_s14 = smul.u32 (!%p159_p2), 25, %s1063_s13 }
   0x6   : > { %162 = sbr.rel (%p159_p2) target bundleno = 195 (0xc3), region = 32 }
   0x7   : > { %p191_p3 = scmp.lt.s32.totalorder (!%p159_p2), %s190_s14, 49 }
   0xb   : > { %v1141_v0 = vmov 0   ;;  %s1382_s14 = smov (!%p191_p3, %s190_s14), 49  ;;  %vm862_vm0 = vcmask 123904   ;;  %vm963_vm1 = vcmask 125954  }
   0xc   : > { %1132 = vset.pattern.permute.xlu1 %v1141_v0  ;;  %1131 = vset.pattern.permute.xlu0 %v1141_v0  ;;  %s1068_s15 = sshll.u32 %s1382_s14, 2  ;;  %s1209_s21 = scalar_lea.vmem %s1379_s2, %s1382_s14 }
   0xd   : > { %s1178_s18 = scalar_lea.vmem %s1377_s0, %s1068_s15  ;;  %s1215_s24 = scalar_lea.vmem %s1378_s1, %s1382_s14  ;;  %v1097_v27 = vld [vmem:[%s1209_s21 + $0x2] ss:$0 sm:$0xff]  ;;  %v1095_v28 = vld [vmem:[%s1209_s21] ss:$0 sm:$0xff]  ;;  %v1098_v36 = vld [vmem:[%s1209_s21 + $0x3] ss:$0 sm:$0xff] }
   0xe   : > { %v214_v1 = vld [vmem:[%s1178_s18 + $0x8] sm:$0xf]  ;;  %v212_v2 = vld [vmem:[%s1178_s18] sm:$0xf]  ;;  %v215_v3 = vld [vmem:[%s1178_s18 + $0xc] sm:$0xf]  ;;  %s1228_s27 = scalar_lea.vmem %s1380_s3, %s1068_s15 }
   0xf   : > { %299 = vperm.xlu1 %1132, %v214_v1   ;;  %289 = vperm.xlu0 %1131, %v212_v2   ;;  %v213_v4 = vld [vmem:[%s1178_s18 + $0x4] sm:$0xf]  ;;  %v217_v5 = vld [vmem:[%s1178_s18 + $0x14] sm:$0xf]  ;;  %v216_v6 = vld [vmem:[%s1178_s18 + $0x10] sm:$0xf] }
  0x10   : > { %v219_v7 = vld [vmem:[%s1178_s18 + $0x1c] sm:$0xf]  ;;  %v218_v8 = vld [vmem:[%s1178_s18 + $0x18] sm:$0xf]  ;;  %v221_v9 = vld [vmem:[%s1178_s18 + $0x24] sm:$0xf] }
  0x11   : > { %v220_v10 = vld [vmem:[%s1178_s18 + $0x20] sm:$0xf]  ;;  %v223_v11 = vld [vmem:[%s1178_s18 + $0x2c] sm:$0xf]  ;;  %v222_v12 = vld [vmem:[%s1178_s18 + $0x28] sm:$0xf] }
  0x12   : > { %v225_v13 = vld [vmem:[%s1178_s18 + $0x34] sm:$0xf]  ;;  %v224_v14 = vld [vmem:[%s1178_s18 + $0x30] sm:$0xf]  ;;  %v227_v15 = vld [vmem:[%s1178_s18 + $0x3c] sm:$0xf] }
  0x13   : > { %304 = vperm.xlu1 %1132, %v215_v3   ;;  %294 = vperm.xlu0 %1131, %v213_v4   ;;  %v226_v16 = vld [vmem:[%s1178_s18 + $0x38] sm:$0xf]  ;;  %v229_v17 = vld [vmem:[%s1178_s18 + $0x44] sm:$0xf]  ;;  %v228_v18 = vld [vmem:[%s1178_s18 + $0x40] sm:$0xf] }
  0x14   : > { %v231_v19 = vld [vmem:[%s1178_s18 + $0x4c] sm:$0xf]  ;;  %v230_v20 = vld [vmem:[%s1178_s18 + $0x48] sm:$0xf]  ;;  %v233_v21 = vld [vmem:[%s1178_s18 + $0x54] sm:$0xf] }
  0x15   : > { %v232_v22 = vld [vmem:[%s1178_s18 + $0x50] sm:$0xf]  ;;  %v235_v23 = vld [vmem:[%s1178_s18 + $0x5c] sm:$0xf]  ;;  %v234_v24 = vld [vmem:[%s1178_s18 + $0x58] sm:$0xf] }
  0x16   : > { %v236_v25 = vld [vmem:[%s1178_s18 + $0x60] sm:$0xf]  ;;  %v1075_v50 = vld [vmem:[%s1215_s24 + $0x5] ss:$0 sm:$0xff]  ;;  %v1074_v54 = vld [vmem:[%s1215_s24 + $0x4] ss:$0 sm:$0xff] }
  0x17   : > { %314 = vperm.xlu1 %1132, %v217_v5   ;;  %309 = vperm.xlu0 %1131, %v216_v6   ;;  %v1072_v26 = vld [vmem:[%s1215_s24 + $0x2] ss:$0 sm:$0xff]  ;;  %v1070_v29 = vld [vmem:[%s1215_s24] ss:$0 sm:$0xff]  ;;  %v1096_v41 = vld [vmem:[%s1209_s21 + $0x1] ss:$0 sm:$0xff] }
  0x18   : > { %v1073_v42 = vld [vmem:[%s1215_s24 + $0x3] ss:$0 sm:$0xff]  ;;  %v1071_v44 = vld [vmem:[%s1215_s24 + $0x1] ss:$0 sm:$0xff]  ;;  %v1100_v53 = vld [vmem:[%s1209_s21 + $0x5] ss:$0 sm:$0xff] }
  0x19   : > { %v1099_v55 = vld [vmem:[%s1209_s21 + $0x4] ss:$0 sm:$0xff] }
  0x1b   : > { %324 = vperm.xlu1 %1132, %v219_v7   ;;  %319 = vperm.xlu0 %1131, %v218_v8   ;;  %v1102_v8 = vld [vmem:[%s1209_s21 + $0x7] ss:$0 sm:$0xff] }
  0x1f   : > { %334 = vperm.xlu1 %1132, %v221_v9   ;;  %329 = vperm.xlu0 %1131, %v220_v10  }
  0x23   : > { %344 = vperm.xlu1 %1132, %v223_v11   ;;  %339 = vperm.xlu0 %1131, %v222_v12  }
  0x27   : > { %354 = vperm.xlu1 %1132, %v225_v13   ;;  %349 = vperm.xlu0 %1131, %v224_v14   ;;  %v1101_v13 = vld [vmem:[%s1209_s21 + $0x6] ss:$0 sm:$0xff]  ;;  %v1077_v14 = vld [vmem:[%s1215_s24 + $0x7] ss:$0 sm:$0xff] }
  0x2b   : > { %364 = vperm.xlu1 %1132, %v227_v15   ;;  %359 = vperm.xlu0 %1131, %v226_v16   ;;  %v1076_v16 = vld [vmem:[%s1215_s24 + $0x6] ss:$0 sm:$0xff] }
  0x2f   : > { %374 = vperm.xlu1 %1132, %v229_v17   ;;  %369 = vperm.xlu0 %1131, %v228_v18  }
  0x33   : > { %384 = vperm.xlu1 %1132, %v231_v19   ;;  %379 = vperm.xlu0 %1131, %v230_v20  }
  0x37   : > { %394 = vperm.xlu1 %1132, %v233_v21   ;;  %389 = vperm.xlu0 %1131, %v232_v22   ;;  %v1079_v22 = vld [vmem:[%s1215_s24 + $0x9] ss:$0 sm:$0xff] }
  0x3b   : > { %404 = vperm.xlu1 %1132, %v235_v23   ;;  %399 = vperm.xlu0 %1131, %v234_v24  }
  0x3f   : > { %409 = vperm.xlu0 %1131, %v236_v25   ;;  %v1104_v25 = vld [vmem:[%s1209_s21 + $0x9] ss:$0 sm:$0xff] }
  0x8a   : > { %v300_v30 = vpop.permute.xlu1 %299  ;;  %v290_v31 = vpop.permute.xlu0 %289 }
  0x8b   : > { %v564_v32 = vmul.f32 %v1072_v26, %v300_v30  ;;  %v739_v33 = vmul.f32 %v1097_v27, %v300_v30  ;;  %v737_v34 = vmul.f32 %v1095_v28, %v290_v31  ;;  %v562_v35 = vmul.f32 %v1070_v29, %v290_v31  ;;  %v1078_v26 = vld [vmem:[%s1215_s24 + $0x8] ss:$0 sm:$0xff] }
  0x8c   : > { %v1103_v27 = vld [vmem:[%s1209_s21 + $0x8] ss:$0 sm:$0xff] }
  0x8d   : > { %v789_v37 = vrot.slane %v739_v33, 2  ;;  %v890_v38 = vrot.slane %v739_v33, 6  ;;  %v787_v39 = vrot.slane %v737_v34, 2  ;;  %v888_v40 = vrot.slane %v737_v34, 6 }
  0x8e   : > { %v305_v43 = vpop.permute.xlu1 %304  ;;  %v295_v45 = vpop.permute.xlu0 %294 }
  0x8f   : > { %v839_v46 = vsub.f32 %v564_v32, %v789_v37  ;;  %v940_v47 = vadd.f32 %v890_v38, %v564_v32  ;;  %v837_v48 = vsub.f32 %v562_v35, %v787_v39  ;;  %v938_v49 = vadd.f32 %v888_v40, %v562_v35 }
  0x90   : > { %v740_v51 = vmul.f32 %v1098_v36, %v305_v43  ;;  %v738_v52 = vmul.f32 %v1096_v41, %v295_v45  ;;  %v565_v56 = vmul.f32 %v1073_v42, %v305_v43  ;;  %v563_v57 = vmul.f32 %v1071_v44, %v295_v45  ;;  %v1106_v44 = vld [vmem:[%s1209_s21 + $0xb] ss:$0 sm:$0xff] }
  0x91   : > { %865 = vst.msk [vmem:[%s1228_s27 + $0x8] sm:$0x3] %vm862_vm0, %v839_v46  ;;  %863 = vst.msk [vmem:[%s1228_s27] sm:$0x3] %vm862_vm0, %v837_v48 }
  0x92   : > { %966 = vst.msk [vmem:[%s1228_s27 + $0x8] sm:$0xc] %vm963_vm1, %v940_v47  ;;  %964 = vst.msk [vmem:[%s1228_s27] sm:$0xc] %vm963_vm1, %v938_v49  ;;  %v790_v58 = vrot.slane %v740_v51, 2  ;;  %v891_v59 = vrot.slane %v740_v51, 6  ;;  %v315_v62 = vpop.permute.xlu1 %314  ;;  %v310_v63 = vpop.permute.xlu0 %309 }
  0x93   : > { %v788_v60 = vrot.slane %v738_v52, 2  ;;  %v889_v61 = vrot.slane %v738_v52, 6  ;;  %v567_v0 = vmul.f32 %v1075_v50, %v315_v62  ;;  %v742_v1 = vmul.f32 %v1100_v53, %v315_v62  ;;  %v1105_v49 = vld [vmem:[%s1209_s21 + $0xa] ss:$0 sm:$0xff]  ;;  %v1081_v50 = vld [vmem:[%s1215_s24 + $0xb] ss:$0 sm:$0xff] }
  0x94   : > { %v566_v2 = vmul.f32 %v1074_v54, %v310_v63  ;;  %v741_v3 = vmul.f32 %v1099_v55, %v310_v63  ;;  %v840_v4 = vsub.f32 %v565_v56, %v790_v58  ;;  %v941_v5 = vadd.f32 %v891_v59, %v565_v56  ;;  %v1080_v52 = vld [vmem:[%s1215_s24 + $0xa] ss:$0 sm:$0xff]  ;;  %v1083_v58 = vld [vmem:[%s1215_s24 + $0xd] ss:$0 sm:$0xff]  ;;  %v1082_v62 = vld [vmem:[%s1215_s24 + $0xc] ss:$0 sm:$0xff] }
  0x95   : > { %v838_v6 = vsub.f32 %v563_v57, %v788_v60  ;;  %v939_v7 = vadd.f32 %v889_v61, %v563_v57  ;;  %v792_v9 = vrot.slane %v742_v1, 2  ;;  %v893_v10 = vrot.slane %v742_v1, 6  ;;  %v1108_v61 = vld [vmem:[%s1209_s21 + $0xd] ss:$0 sm:$0xff]  ;;  %v1107_v63 = vld [vmem:[%s1209_s21 + $0xc] ss:$0 sm:$0xff] }
  0x96   : > { %v791_v11 = vrot.slane %v741_v3, 2  ;;  %v892_v12 = vrot.slane %v741_v3, 6  ;;  %866 = vst.msk [vmem:[%s1228_s27 + $0xc] sm:$0x3] %vm862_vm0, %v840_v4  ;;  %v325_v15 = vpop.permute.xlu1 %324  ;;  %v320_v17 = vpop.permute.xlu0 %319 }
  0x97   : > { %967 = vst.msk [vmem:[%s1228_s27 + $0xc] sm:$0xc] %vm963_vm1, %v941_v5  ;;  %965 = vst.msk [vmem:[%s1228_s27 + $0x4] sm:$0xc] %vm963_vm1, %v939_v7  ;;  %v842_v18 = vsub.f32 %v567_v0, %v792_v9  ;;  %v943_v19 = vadd.f32 %v893_v10, %v567_v0  ;;  %v744_v23 = vmul.f32 %v1102_v8, %v325_v15 }
  0x98   : > { %864 = vst.msk [vmem:[%s1228_s27 + $0x4] sm:$0x3] %vm862_vm0, %v838_v6  ;;  %v841_v20 = vsub.f32 %v566_v2, %v791_v11  ;;  %v942_v21 = vadd.f32 %v892_v12, %v566_v2  ;;  %v743_v24 = vmul.f32 %v1101_v13, %v320_v17  ;;  %v569_v28 = vmul.f32 %v1077_v14, %v325_v15 }
  0x99   : > { %868 = vst.msk [vmem:[%s1228_s27 + $0x14] sm:$0x3] %vm862_vm0, %v842_v18  ;;  %v568_v29 = vmul.f32 %v1076_v16, %v320_v17  ;;  %v794_v30 = vrot.slane %v744_v23, 2  ;;  %v895_v31 = vrot.slane %v744_v23, 6  ;;  %v1110_v16 = vld [vmem:[%s1209_s21 + $0xf] ss:$0 sm:$0xff] }
  0x9a   : > { %969 = vst.msk [vmem:[%s1228_s27 + $0x14] sm:$0xc] %vm963_vm1, %v943_v19  ;;  %968 = vst.msk [vmem:[%s1228_s27 + $0x10] sm:$0xc] %vm963_vm1, %v942_v21  ;;  %v793_v32 = vrot.slane %v743_v24, 2  ;;  %v894_v33 = vrot.slane %v743_v24, 6  ;;  %v335_v34 = vpop.permute.xlu1 %334  ;;  %v330_v35 = vpop.permute.xlu0 %329 }
  0x9b   : > { %867 = vst.msk [vmem:[%s1228_s27 + $0x10] sm:$0x3] %vm862_vm0, %v841_v20  ;;  %v571_v36 = vmul.f32 %v1079_v22, %v335_v34  ;;  %v746_v37 = vmul.f32 %v1104_v25, %v335_v34  ;;  %v570_v38 = vmul.f32 %v1078_v26, %v330_v35  ;;  %v745_v39 = vmul.f32 %v1103_v27, %v330_v35  ;;  %v1109_v21 = vld [vmem:[%s1209_s21 + $0xe] ss:$0 sm:$0xff]  ;;  %v1085_v22 = vld [vmem:[%s1215_s24 + $0xf] ss:$0 sm:$0xff] }
  0x9c   : > { %v844_v40 = vsub.f32 %v569_v28, %v794_v30  ;;  %v945_v41 = vadd.f32 %v895_v31, %v569_v28  ;;  %v843_v42 = vsub.f32 %v568_v29, %v793_v32  ;;  %v944_v43 = vadd.f32 %v894_v33, %v568_v29  ;;  %v1084_v24 = vld [vmem:[%s1215_s24 + $0xe] ss:$0 sm:$0xff]  ;;  %v1087_v30 = vld [vmem:[%s1215_s24 + $0x11] ss:$0 sm:$0xff]  ;;  %v1086_v34 = vld [vmem:[%s1215_s24 + $0x10] ss:$0 sm:$0xff] }
  0x9d   : > { %v796_v45 = vrot.slane %v746_v37, 2  ;;  %v897_v46 = vrot.slane %v746_v37, 6  ;;  %v795_v47 = vrot.slane %v745_v39, 2  ;;  %v896_v48 = vrot.slane %v745_v39, 6  ;;  %v1112_v33 = vld [vmem:[%s1209_s21 + $0x11] ss:$0 sm:$0xff] }
  0x9e   : > { %870 = vst.msk [vmem:[%s1228_s27 + $0x1c] sm:$0x3] %vm862_vm0, %v844_v40  ;;  %869 = vst.msk [vmem:[%s1228_s27 + $0x18] sm:$0x3] %vm862_vm0, %v843_v42  ;;  %v345_v51 = vpop.permute.xlu1 %344  ;;  %v340_v53 = vpop.permute.xlu0 %339  ;;  %v1111_v35 = vld [vmem:[%s1209_s21 + $0x10] ss:$0 sm:$0xff] }
  0x9f   : > { %971 = vst.msk [vmem:[%s1228_s27 + $0x1c] sm:$0xc] %vm963_vm1, %v945_v41  ;;  %970 = vst.msk [vmem:[%s1228_s27 + $0x18] sm:$0xc] %vm963_vm1, %v944_v43  ;;  %v846_v54 = vsub.f32 %v571_v36, %v796_v45  ;;  %v947_v55 = vadd.f32 %v897_v46, %v571_v36  ;;  %v845_v56 = vsub.f32 %v570_v38, %v795_v47 }
  0xa0   : > { %v946_v57 = vadd.f32 %v896_v48, %v570_v38  ;;  %v748_v59 = vmul.f32 %v1106_v44, %v345_v51  ;;  %v747_v60 = vmul.f32 %v1105_v49, %v340_v53  ;;  %v573_v0 = vmul.f32 %v1081_v50, %v345_v51 }
  0xa1   : > { %872 = vst.msk [vmem:[%s1228_s27 + $0x24] sm:$0x3] %vm862_vm0, %v846_v54  ;;  %871 = vst.msk [vmem:[%s1228_s27 + $0x20] sm:$0x3] %vm862_vm0, %v845_v56  ;;  %v572_v1 = vmul.f32 %v1080_v52, %v340_v53  ;;  %v1114_v52 = vld [vmem:[%s1209_s21 + $0x13] ss:$0 sm:$0xff] }
  0xa2   : > { %973 = vst.msk [vmem:[%s1228_s27 + $0x24] sm:$0xc] %vm963_vm1, %v947_v55  ;;  %972 = vst.msk [vmem:[%s1228_s27 + $0x20] sm:$0xc] %vm963_vm1, %v946_v57  ;;  %v798_v2 = vrot.slane %v748_v59, 2  ;;  %v899_v3 = vrot.slane %v748_v59, 6  ;;  %v355_v6 = vpop.permute.xlu1 %354  ;;  %v350_v7 = vpop.permute.xlu0 %349 }
  0xa3   : > { %v797_v4 = vrot.slane %v747_v60, 2  ;;  %v898_v5 = vrot.slane %v747_v60, 6  ;;  %v575_v8 = vmul.f32 %v1083_v58, %v355_v6  ;;  %v750_v9 = vmul.f32 %v1108_v61, %v355_v6  ;;  %v1113_v57 = vld [vmem:[%s1209_s21 + $0x12] ss:$0 sm:$0xff]  ;;  %v1089_v58 = vld [vmem:[%s1215_s24 + $0x13] ss:$0 sm:$0xff] }
  0xa4   : > { %v574_v10 = vmul.f32 %v1082_v62, %v350_v7  ;;  %v749_v11 = vmul.f32 %v1107_v63, %v350_v7  ;;  %v848_v12 = vsub.f32 %v573_v0, %v798_v2  ;;  %v949_v13 = vadd.f32 %v899_v3, %v573_v0  ;;  %v1088_v60 = vld [vmem:[%s1215_s24 + $0x12] ss:$0 sm:$0xff]  ;;  %v1091_v2 = vld [vmem:[%s1215_s24 + $0x15] ss:$0 sm:$0xff]  ;;  %v1090_v6 = vld [vmem:[%s1215_s24 + $0x14] ss:$0 sm:$0xff] }
  0xa5   : > { %v847_v14 = vsub.f32 %v572_v1, %v797_v4  ;;  %v948_v15 = vadd.f32 %v898_v5, %v572_v1  ;;  %v800_v17 = vrot.slane %v750_v9, 2  ;;  %v901_v18 = vrot.slane %v750_v9, 6  ;;  %v1116_v5 = vld [vmem:[%s1209_s21 + $0x15] ss:$0 sm:$0xff]  ;;  %v1115_v7 = vld [vmem:[%s1209_s21 + $0x14] ss:$0 sm:$0xff] }
  0xa6   : > { %v799_v19 = vrot.slane %v749_v11, 2  ;;  %v900_v20 = vrot.slane %v749_v11, 6  ;;  %874 = vst.msk [vmem:[%s1228_s27 + $0x2c] sm:$0x3] %vm862_vm0, %v848_v12  ;;  %v365_v23 = vpop.permute.xlu1 %364  ;;  %v360_v25 = vpop.permute.xlu0 %359 }
  0xa7   : > { %975 = vst.msk [vmem:[%s1228_s27 + $0x2c] sm:$0xc] %vm963_vm1, %v949_v13  ;;  %974 = vst.msk [vmem:[%s1228_s27 + $0x28] sm:$0xc] %vm963_vm1, %v948_v15  ;;  %v850_v26 = vsub.f32 %v575_v8, %v800_v17  ;;  %v951_v27 = vadd.f32 %v901_v18, %v575_v8  ;;  %v752_v31 = vmul.f32 %v1110_v16, %v365_v23 }
  0xa8   : > { %873 = vst.msk [vmem:[%s1228_s27 + $0x28] sm:$0x3] %vm862_vm0, %v847_v14  ;;  %v849_v28 = vsub.f32 %v574_v10, %v799_v19  ;;  %v950_v29 = vadd.f32 %v900_v20, %v574_v10  ;;  %v751_v32 = vmul.f32 %v1109_v21, %v360_v25  ;;  %v577_v36 = vmul.f32 %v1085_v22, %v365_v23 }
  0xa9   : > { %876 = vst.msk [vmem:[%s1228_s27 + $0x34] sm:$0x3] %vm862_vm0, %v850_v26  ;;  %v576_v37 = vmul.f32 %v1084_v24, %v360_v25  ;;  %v802_v38 = vrot.slane %v752_v31, 2  ;;  %v903_v39 = vrot.slane %v752_v31, 6  ;;  %v1118_v24 = vld [vmem:[%s1209_s21 + $0x17] ss:$0 sm:$0xff] }
  0xaa   : > { %977 = vst.msk [vmem:[%s1228_s27 + $0x34] sm:$0xc] %vm963_vm1, %v951_v27  ;;  %976 = vst.msk [vmem:[%s1228_s27 + $0x30] sm:$0xc] %vm963_vm1, %v950_v29  ;;  %v801_v40 = vrot.slane %v751_v32, 2  ;;  %v902_v41 = vrot.slane %v751_v32, 6  ;;  %v375_v42 = vpop.permute.xlu1 %374  ;;  %v370_v43 = vpop.permute.xlu0 %369 }
  0xab   : > { %875 = vst.msk [vmem:[%s1228_s27 + $0x30] sm:$0x3] %vm862_vm0, %v849_v28  ;;  %v579_v44 = vmul.f32 %v1087_v30, %v375_v42  ;;  %v754_v45 = vmul.f32 %v1112_v33, %v375_v42  ;;  %v578_v46 = vmul.f32 %v1086_v34, %v370_v43  ;;  %v753_v47 = vmul.f32 %v1111_v35, %v370_v43  ;;  %v1117_v29 = vld [vmem:[%s1209_s21 + $0x16] ss:$0 sm:$0xff]  ;;  %v1093_v30 = vld [vmem:[%s1215_s24 + $0x17] ss:$0 sm:$0xff] }
  0xac   : > { %v852_v48 = vsub.f32 %v577_v36, %v802_v38  ;;  %v953_v49 = vadd.f32 %v903_v39, %v577_v36  ;;  %v851_v50 = vsub.f32 %v576_v37, %v801_v40  ;;  %v952_v51 = vadd.f32 %v902_v41, %v576_v37  ;;  %v1092_v32 = vld [vmem:[%s1215_s24 + $0x16] ss:$0 sm:$0xff]  ;;  %v1119_v40 = vld [vmem:[%s1209_s21 + $0x18] ss:$0 sm:$0xff] }
  0xad   : > { %v804_v53 = vrot.slane %v754_v45, 2  ;;  %v905_v54 = vrot.slane %v754_v45, 6  ;;  %v803_v55 = vrot.slane %v753_v47, 2  ;;  %v904_v56 = vrot.slane %v753_v47, 6  ;;  %v1094_v47 = vld [vmem:[%s1215_s24 + $0x18] ss:$0 sm:$0xff] }
  0xae   : > { %878 = vst.msk [vmem:[%s1228_s27 + $0x3c] sm:$0x3] %vm862_vm0, %v852_v48  ;;  %877 = vst.msk [vmem:[%s1228_s27 + $0x38] sm:$0x3] %vm862_vm0, %v851_v50  ;;  %v385_v59 = vpop.permute.xlu1 %384  ;;  %v380_v61 = vpop.permute.xlu0 %379 }
  0xaf   : > { %979 = vst.msk [vmem:[%s1228_s27 + $0x3c] sm:$0xc] %vm963_vm1, %v953_v49  ;;  %978 = vst.msk [vmem:[%s1228_s27 + $0x38] sm:$0xc] %vm963_vm1, %v952_v51  ;;  %v854_v62 = vsub.f32 %v579_v44, %v804_v53  ;;  %v955_v63 = vadd.f32 %v905_v54, %v579_v44  ;;  %v853_v0 = vsub.f32 %v578_v46, %v803_v55 }
  0xb0   : > { %v954_v1 = vadd.f32 %v904_v56, %v578_v46  ;;  %v756_v3 = vmul.f32 %v1114_v52, %v385_v59  ;;  %v755_v4 = vmul.f32 %v1113_v57, %v380_v61  ;;  %v581_v8 = vmul.f32 %v1089_v58, %v385_v59 }
  0xb1   : > { %880 = vst.msk [vmem:[%s1228_s27 + $0x44] sm:$0x3] %vm862_vm0, %v854_v62  ;;  %879 = vst.msk [vmem:[%s1228_s27 + $0x40] sm:$0x3] %vm862_vm0, %v853_v0  ;;  %v580_v9 = vmul.f32 %v1088_v60, %v380_v61 }
  0xb2   : > { %981 = vst.msk [vmem:[%s1228_s27 + $0x44] sm:$0xc] %vm963_vm1, %v955_v63  ;;  %980 = vst.msk [vmem:[%s1228_s27 + $0x40] sm:$0xc] %vm963_vm1, %v954_v1  ;;  %v806_v10 = vrot.slane %v756_v3, 2  ;;  %v907_v11 = vrot.slane %v756_v3, 6  ;;  %v395_v14 = vpop.permute.xlu1 %394  ;;  %v390_v15 = vpop.permute.xlu0 %389 }
  0xb3   : > { %v805_v12 = vrot.slane %v755_v4, 2  ;;  %v906_v13 = vrot.slane %v755_v4, 6  ;;  %v583_v16 = vmul.f32 %v1091_v2, %v395_v14  ;;  %v758_v17 = vmul.f32 %v1116_v5, %v395_v14 }
  0xb4   : > { %v582_v18 = vmul.f32 %v1090_v6, %v390_v15  ;;  %v757_v19 = vmul.f32 %v1115_v7, %v390_v15  ;;  %v856_v20 = vsub.f32 %v581_v8, %v806_v10  ;;  %v957_v21 = vadd.f32 %v907_v11, %v581_v8 }
  0xb5   : > { %v855_v22 = vsub.f32 %v580_v9, %v805_v12  ;;  %v956_v23 = vadd.f32 %v906_v13, %v580_v9  ;;  %v808_v25 = vrot.slane %v758_v17, 2  ;;  %v909_v26 = vrot.slane %v758_v17, 6 }
  0xb6   : > { %v807_v27 = vrot.slane %v757_v19, 2  ;;  %v908_v28 = vrot.slane %v757_v19, 6  ;;  %882 = vst.msk [vmem:[%s1228_s27 + $0x4c] sm:$0x3] %vm862_vm0, %v856_v20  ;;  %v405_v31 = vpop.permute.xlu1 %404  ;;  %v400_v33 = vpop.permute.xlu0 %399 }
  0xb7   : > { %983 = vst.msk [vmem:[%s1228_s27 + $0x4c] sm:$0xc] %vm963_vm1, %v957_v21  ;;  %982 = vst.msk [vmem:[%s1228_s27 + $0x48] sm:$0xc] %vm963_vm1, %v956_v23  ;;  %v858_v34 = vsub.f32 %v583_v16, %v808_v25  ;;  %v959_v35 = vadd.f32 %v909_v26, %v583_v16  ;;  %v760_v38 = vmul.f32 %v1118_v24, %v405_v31 }
  0xb8   : > { %881 = vst.msk [vmem:[%s1228_s27 + $0x48] sm:$0x3] %vm862_vm0, %v855_v22  ;;  %v857_v36 = vsub.f32 %v582_v18, %v807_v27  ;;  %v958_v37 = vadd.f32 %v908_v28, %v582_v18  ;;  %v759_v39 = vmul.f32 %v1117_v29, %v400_v33  ;;  %v585_v41 = vmul.f32 %v1093_v30, %v405_v31 }
  0xb9   : > { %884 = vst.msk [vmem:[%s1228_s27 + $0x54] sm:$0x3] %vm862_vm0, %v858_v34  ;;  %v584_v42 = vmul.f32 %v1092_v32, %v400_v33  ;;  %v810_v43 = vrot.slane %v760_v38, 2  ;;  %v911_v44 = vrot.slane %v760_v38, 6 }
  0xba   : > { %985 = vst.msk [vmem:[%s1228_s27 + $0x54] sm:$0xc] %vm963_vm1, %v959_v35  ;;  %984 = vst.msk [vmem:[%s1228_s27 + $0x50] sm:$0xc] %vm963_vm1, %v958_v37  ;;  %v809_v45 = vrot.slane %v759_v39, 2  ;;  %v910_v46 = vrot.slane %v759_v39, 6  ;;  %v410_v48 = vpop.permute.xlu0 %409 }
  0xbb   : > { %883 = vst.msk [vmem:[%s1228_s27 + $0x50] sm:$0x3] %vm862_vm0, %v857_v36  ;;  %v761_v49 = vmul.f32 %v1119_v40, %v410_v48  ;;  %v860_v50 = vsub.f32 %v585_v41, %v810_v43  ;;  %v961_v51 = vadd.f32 %v911_v44, %v585_v41  ;;  %v586_v54 = vmul.f32 %v1094_v47, %v410_v48 }
  0xbc   : > { %v859_v52 = vsub.f32 %v584_v42, %v809_v45  ;;  %v960_v53 = vadd.f32 %v910_v46, %v584_v42 }
  0xbd   : > { %v811_v55 = vrot.slane %v761_v49, 2  ;;  %v912_v56 = vrot.slane %v761_v49, 6  ;;  %886 = vst.msk [vmem:[%s1228_s27 + $0x5c] sm:$0x3] %vm862_vm0, %v860_v50 }
  0xbe   : > { %987 = vst.msk [vmem:[%s1228_s27 + $0x5c] sm:$0xc] %vm963_vm1, %v961_v51  ;;  %986 = vst.msk [vmem:[%s1228_s27 + $0x58] sm:$0xc] %vm963_vm1, %v960_v53 }
  0xbf   : > { %885 = vst.msk [vmem:[%s1228_s27 + $0x58] sm:$0x3] %vm862_vm0, %v859_v52  ;;  %v861_v57 = vsub.f32 %v586_v54, %v811_v55  ;;  %v962_v58 = vadd.f32 %v912_v56, %v586_v54 }
  0xc1   : > { %887 = vst.msk [vmem:[%s1228_s27 + $0x60] sm:$0x3] %vm862_vm0, %v861_v57 }
  0xc2   : > { %988 = vst.msk [vmem:[%s1228_s27 + $0x60] sm:$0xc] %vm963_vm1, %v962_v58 }
  0xc3 PF: > { %s13_s12 = sadd.s32 1, %s1139_s12  }
  0xc4   : > { %p10_p4 = scmp.ge.s32.totalorder %s13_s12, 4  }
  0xc6   :  { %12 = sbr.rel (!%p10_p4) target bundleno = 1 (0x1), region = 68 }

// kernel: reverse.3
= control target key start
LH: loop header
LB: loop body
LE: loop exit
PB: predicated region body
PF: predicated region fallthrough
CT: control target
= control target key end

     0   :  { %s632_s0 = inlined_call_operand.vmem [shape: f32[2,16,28,13], index: 0, kind: input, shape index: {}]   ;;  %s633_s1 = inlined_call_operand.vmem [shape: f32[2,16,28,13], index: 1, kind: output, shape index: {}]  }
   0x1   :  { %v208_v0 = vld [vmem:[%s632_s0 + $0xc0] sm:$0xff]  ;;  %v209_v1 = vld [vmem:[%s632_s0 + $0x190] sm:$0xff]  ;;  %v258_v26 = vld [vmem:[%s632_s0 + $0xc8] sm:$0xff] }
   0x2   :  { %v211_v2 = vld [vmem:[%s632_s0 + $0xb0] sm:$0xff]  ;;  %4 = vst [vmem:[%s633_s1] sm:$0xff] %v208_v0  ;;  %210 = vst [vmem:[%s633_s1 + $0xd0] sm:$0xff] %v209_v1  ;;  %v213_v3 = vld [vmem:[%s632_s0 + $0x180] sm:$0xff] }
   0x3   :  { %212 = vst [vmem:[%s633_s1 + $0x10] sm:$0xff] %v211_v2  ;;  %v215_v4 = vld [vmem:[%s632_s0 + $0xa0] sm:$0xff]  ;;  %v217_v5 = vld [vmem:[%s632_s0 + $0x170] sm:$0xff]  ;;  %214 = vst [vmem:[%s633_s1 + $0xe0] sm:$0xff] %v213_v3 }
   0x4   :  { %216 = vst [vmem:[%s633_s1 + $0x20] sm:$0xff] %v215_v4  ;;  %218 = vst [vmem:[%s633_s1 + $0xf0] sm:$0xff] %v217_v5  ;;  %v219_v6 = vld [vmem:[%s632_s0 + $0x90] sm:$0xff]  ;;  %v221_v7 = vld [vmem:[%s632_s0 + $0x160] sm:$0xff] }
   0x5   :  { %v223_v8 = vld [vmem:[%s632_s0 + $0x80] sm:$0xff]  ;;  %220 = vst [vmem:[%s633_s1 + $0x30] sm:$0xff] %v219_v6  ;;  %222 = vst [vmem:[%s633_s1 + $0x100] sm:$0xff] %v221_v7  ;;  %v225_v9 = vld [vmem:[%s632_s0 + $0x150] sm:$0xff] }
   0x6   :  { %224 = vst [vmem:[%s633_s1 + $0x40] sm:$0xff] %v223_v8  ;;  %v227_v10 = vld [vmem:[%s632_s0 + $0x70] sm:$0xff]  ;;  %v229_v11 = vld [vmem:[%s632_s0 + $0x140] sm:$0xff]  ;;  %226 = vst [vmem:[%s633_s1 + $0x110] sm:$0xff] %v225_v9 }
   0x7   :  { %228 = vst [vmem:[%s633_s1 + $0x50] sm:$0xff] %v227_v10  ;;  %230 = vst [vmem:[%s633_s1 + $0x120] sm:$0xff] %v229_v11  ;;  %v231_v12 = vld [vmem:[%s632_s0 + $0x60] sm:$0xff]  ;;  %v233_v13 = vld [vmem:[%s632_s0 + $0x130] sm:$0xff] }
   0x8   :  { %v235_v14 = vld [vmem:[%s632_s0 + $0x50] sm:$0xff]  ;;  %232 = vst [vmem:[%s633_s1 + $0x60] sm:$0xff] %v231_v12  ;;  %234 = vst [vmem:[%s633_s1 + $0x130] sm:$0xff] %v233_v13  ;;  %v237_v15 = vld [vmem:[%s632_s0 + $0x120] sm:$0xff] }
   0x9   :  { %236 = vst [vmem:[%s633_s1 + $0x70] sm:$0xff] %v235_v14  ;;  %v239_v16 = vld [vmem:[%s632_s0 + $0x40] sm:$0xff]  ;;  %v241_v17 = vld [vmem:[%s632_s0 + $0x110] sm:$0xff]  ;;  %238 = vst [vmem:[%s633_s1 + $0x140] sm:$0xff] %v237_v15 }
   0xa   :  { %240 = vst [vmem:[%s633_s1 + $0x80] sm:$0xff] %v239_v16  ;;  %242 = vst [vmem:[%s633_s1 + $0x150] sm:$0xff] %v241_v17  ;;  %v243_v18 = vld [vmem:[%s632_s0 + $0x30] sm:$0xff]  ;;  %v245_v19 = vld [vmem:[%s632_s0 + $0x100] sm:$0xff] }
   0xb   :  { %v247_v20 = vld [vmem:[%s632_s0 + $0x20] sm:$0xff]  ;;  %244 = vst [vmem:[%s633_s1 + $0x90] sm:$0xff] %v243_v18  ;;  %246 = vst [vmem:[%s633_s1 + $0x160] sm:$0xff] %v245_v19  ;;  %v249_v21 = vld [vmem:[%s632_s0 + $0xf0] sm:$0xff] }
   0xc   :  { %248 = vst [vmem:[%s633_s1 + $0xa0] sm:$0xff] %v247_v20  ;;  %v251_v22 = vld [vmem:[%s632_s0 + $0x10] sm:$0xff]  ;;  %v253_v23 = vld [vmem:[%s632_s0 + $0xe0] sm:$0xff]  ;;  %250 = vst [vmem:[%s633_s1 + $0x170] sm:$0xff] %v249_v21 }
   0xd   :  { %252 = vst [vmem:[%s633_s1 + $0xb0] sm:$0xff] %v251_v22  ;;  %254 = vst [vmem:[%s633_s1 + $0x180] sm:$0xff] %v253_v23  ;;  %v97_v24 = vld [vmem:[%s632_s0] sm:$0xff]  ;;  %v256_v25 = vld [vmem:[%s632_s0 + $0xd0] sm:$0xff] }
   0xe   :  { %255 = vst [vmem:[%s633_s1 + $0xc0] sm:$0xff] %v97_v24  ;;  %257 = vst [vmem:[%s633_s1 + $0x190] sm:$0xff] %v256_v25  ;;  %v260_v27 = vld [vmem:[%s632_s0 + $0x198] sm:$0xff]  ;;  %v264_v29 = vld [vmem:[%s632_s0 + $0x188] sm:$0xff] }
   0xf   :  { %259 = vst [vmem:[%s633_s1 + $0x8] sm:$0xff] %v258_v26  ;;  %v262_v28 = vld [vmem:[%s632_s0 + $0xb8] sm:$0xff]  ;;  %261 = vst [vmem:[%s633_s1 + $0xd8] sm:$0xff] %v260_v27  ;;  %v266_v30 = vld [vmem:[%s632_s0 + $0xa8] sm:$0xff] }
  0x10   :  { %263 = vst [vmem:[%s633_s1 + $0x18] sm:$0xff] %v262_v28  ;;  %265 = vst [vmem:[%s633_s1 + $0xe8] sm:$0xff] %v264_v29  ;;  %v268_v31 = vld [vmem:[%s632_s0 + $0x178] sm:$0xff]  ;;  %v272_v33 = vld [vmem:[%s632_s0 + $0x168] sm:$0xff] }
  0x11   :  { %v270_v32 = vld [vmem:[%s632_s0 + $0x98] sm:$0xff]  ;;  %267 = vst [vmem:[%s633_s1 + $0x28] sm:$0xff] %v266_v30  ;;  %269 = vst [vmem:[%s633_s1 + $0xf8] sm:$0xff] %v268_v31  ;;  %v274_v34 = vld [vmem:[%s632_s0 + $0x88] sm:$0xff] }
  0x12   :  { %271 = vst [vmem:[%s633_s1 + $0x38] sm:$0xff] %v270_v32  ;;  %v276_v35 = vld [vmem:[%s632_s0 + $0x158] sm:$0xff]  ;;  %273 = vst [vmem:[%s633_s1 + $0x108] sm:$0xff] %v272_v33  ;;  %v280_v37 = vld [vmem:[%s632_s0 + $0x148] sm:$0xff] }
  0x13   :  { %275 = vst [vmem:[%s633_s1 + $0x48] sm:$0xff] %v274_v34  ;;  %277 = vst [vmem:[%s633_s1 + $0x118] sm:$0xff] %v276_v35  ;;  %v278_v36 = vld [vmem:[%s632_s0 + $0x78] sm:$0xff]  ;;  %v282_v38 = vld [vmem:[%s632_s0 + $0x68] sm:$0xff] }
  0x14   :  { %279 = vst [vmem:[%s633_s1 + $0x58] sm:$0xff] %v278_v36  ;;  %281 = vst [vmem:[%s633_s1 + $0x128] sm:$0xff] %v280_v37  ;;  %v284_v39 = vld [vmem:[%s632_s0 + $0x138] sm:$0xff]  ;;  %v288_v41 = vld [vmem:[%s632_s0 + $0x128] sm:$0xff] }
  0x15   :  { %283 = vst [vmem:[%s633_s1 + $0x68] sm:$0xff] %v282_v38  ;;  %v286_v40 = vld [vmem:[%s632_s0 + $0x58] sm:$0xff]  ;;  %285 = vst [vmem:[%s633_s1 + $0x138] sm:$0xff] %v284_v39  ;;  %v290_v42 = vld [vmem:[%s632_s0 + $0x48] sm:$0xff] }
  0x16   :  { %287 = vst [vmem:[%s633_s1 + $0x78] sm:$0xff] %v286_v40  ;;  %289 = vst [vmem:[%s633_s1 + $0x148] sm:$0xff] %v288_v41  ;;  %v292_v43 = vld [vmem:[%s632_s0 + $0x118] sm:$0xff]  ;;  %v296_v45 = vld [vmem:[%s632_s0 + $0x108] sm:$0xff] }
  0x17   :  { %v294_v44 = vld [vmem:[%s632_s0 + $0x38] sm:$0xff]  ;;  %291 = vst [vmem:[%s633_s1 + $0x88] sm:$0xff] %v290_v42  ;;  %293 = vst [vmem:[%s633_s1 + $0x158] sm:$0xff] %v292_v43  ;;  %v298_v46 = vld [vmem:[%s632_s0 + $0x28] sm:$0xff] }
  0x18   :  { %295 = vst [vmem:[%s633_s1 + $0x98] sm:$0xff] %v294_v44  ;;  %v300_v47 = vld [vmem:[%s632_s0 + $0xf8] sm:$0xff]  ;;  %297 = vst [vmem:[%s633_s1 + $0x168] sm:$0xff] %v296_v45  ;;  %v304_v49 = vld [vmem:[%s632_s0 + $0xe8] sm:$0xff] }
  0x19   :  { %299 = vst [vmem:[%s633_s1 + $0xa8] sm:$0xff] %v298_v46  ;;  %301 = vst [vmem:[%s633_s1 + $0x178] sm:$0xff] %v300_v47  ;;  %v302_v48 = vld [vmem:[%s632_s0 + $0x18] sm:$0xff]  ;;  %v306_v50 = vld [vmem:[%s632_s0 + $0x8] sm:$0xff] }
  0x1a   :  { %303 = vst [vmem:[%s633_s1 + $0xb8] sm:$0xff] %v302_v48  ;;  %305 = vst [vmem:[%s633_s1 + $0x188] sm:$0xff] %v304_v49  ;;  %v308_v51 = vld [vmem:[%s632_s0 + $0xd8] sm:$0xff] }
  0x1b   :  { %307 = vst [vmem:[%s633_s1 + $0xc8] sm:$0xff] %v306_v50  ;;  %309 = vst [vmem:[%s633_s1 + $0x198] sm:$0xff] %v308_v51 }

// kernel: net2d_forward.5
= control target key start
LH: loop header
LB: loop body
LE: loop exit
PB: predicated region body
PF: predicated region fallthrough
CT: control target
= control target key end

     0   :  { %s4837_s12 = smov 0   ;;  %s5551_s0 = inlined_call_operand.vmem [shape: f32[50,4,16], index: 0, kind: input, shape index: {}]   ;;  %s5552_s1 = inlined_call_operand.vmem [shape: f32[50,16,32], index: 1, kind: input, shape index: {}]   ;;  %s5553_s2 = inlined_call_operand.vmem [shape: f32[50,16,32], index: 2, kind: input, shape index: {}]   ;;  %s5554_s3 = inlined_call_operand.vmem [shape: f32[50,4,32], index: 3, kind: output, shape index: {}]  }
   0x1 LB: > { %s4232_s13 = sadd.s32 4294967295, %s4813_s12   ;;  %p4236_p0 = scmp.ge.s32.totalorder %s4813_s12, 1  ;;  %s4813_s12 = sphi %s4837_s12, %s13_s12  }
   0x2   : > { %p162_p1 = scmp.lt.s32.totalorder %s4813_s12, 3 }
   0x4   : > { %p163_p2 = pnand %p4236_p0, %p162_p1 }
   0x5   : > { %s198_s14 = smul.u32 (!%p163_p2), 25, %s4232_s13 }
   0x6   : > { %166 = sbr.rel (%p163_p2) target bundleno = 361 (0x169), region = 32 }
   0x7   : > { %p199_p3 = scmp.lt.s32.totalorder (!%p163_p2), %s198_s14, 49 }
   0xb   : > { %v4815_v0 = vmov 0.0   ;;  %vm4816_vm0 = vmmov 0   ;;  %s5556_s14 = smov (!%p199_p3, %s198_s14), 49  ;;  %vm349_vm1 = vcmask 130048   ;;  %vm4025_vm2 = vcmask 254976  }
   0xc   : > { %4447 = vmatprep.subr.mxu0 %v4815_v0  ;;  %4454 = vmatprep.subr.mxu1 %v4815_v0  ;;  %s4295_s15 = sshll.u32 %s5556_s14, 4  ;;  %s4237_s16 = sshll.u32 %s5556_s14, 2  ;;  %vm4126_vm3 = vcmask 257026  }
   0xd   : > { %4451 = vmatprep.mubr.msk.f32.mxu0 %vm4816_vm0, %v4815_v0  ;;  %4458 = vmatprep.mubr.msk.f32.mxu1 %vm4816_vm0, %v4815_v0  ;;  %s4860_s19 = scalar_lea.vmem %s5552_s1, %s4295_s15  ;;  %s4870_s22 = scalar_lea.vmem %s5551_s0, %s4237_s16 }
   0xe   : > { %v250_v1 = vld [vmem:[%s4860_s19 + $0x8] sm:$0xff]  ;;  %v252_v2 = vld [vmem:[%s4860_s19 + $0x18] sm:$0xff]  ;;  %v249_v3 = vld [vmem:[%s4860_s19] sm:$0xff]  ;;  %s5115_s25 = scalar_lea.vmem %s5553_s2, %s4295_s15  ;;  %s5398_s28 = scalar_lea.vmem %s5554_s3, %s4237_s16 }
   0xf   : > { %4448 = vmatpush3.msra.mxu0 %v250_v1  ;;  %4455 = vmatpush3.msra.mxu1 %v252_v2  ;;  %v251_v4 = vld [vmem:[%s4860_s19 + $0x10] sm:$0xff]  ;;  %v4874_v5 = vld [vmem:[%s4870_s22] sm:$0xf]  ;;  %v4877_v6 = vld [vmem:[%s4870_s22 + $0x4] sm:$0xf] }
  0x10   : > { %4449 = vmatprep.subr.mxu0 %v4815_v0  ;;  %4456 = vmatprep.subr.mxu1 %v4815_v0  ;;  %v254_v7 = vld [vmem:[%s4860_s19 + $0x28] sm:$0xff]  ;;  %v256_v8 = vld [vmem:[%s4860_s19 + $0x38] sm:$0xff]  ;;  %v253_v9 = vld [vmem:[%s4860_s19 + $0x20] sm:$0xff] }
  0x11   : > { %4450 = vmatpush3.msra.mxu0 %v249_v3  ;;  %4457 = vmatpush3.msra.mxu1 %v251_v4  ;;  %v255_v10 = vld [vmem:[%s4860_s19 + $0x30] sm:$0xff]  ;;  %v4894_v11 = vld [vmem:[%s4870_s22 + $0x8] sm:$0xf]  ;;  %v4897_v12 = vld [vmem:[%s4870_s22 + $0xc] sm:$0xf] }
  0x12   : > { %4452 = vmatmul.mubr.msk.f32.vlgmr.msra.gmra.mxu0 %vm349_vm1, %v4874_v5  ;;  %4459 = vmatmul.mubr.msk.f32.vlgmr.msra.gmra.mxu1 %vm349_vm1, %v4877_v6  ;;  %v258_v13 = vld [vmem:[%s4860_s19 + $0x48] sm:$0xff]  ;;  %v260_v14 = vld [vmem:[%s4860_s19 + $0x58] sm:$0xff]  ;;  %v257_v15 = vld [vmem:[%s4860_s19 + $0x40] sm:$0xff] }
  0x13   : > { %4461 = vmatprep.subr.mxu0 %v4815_v0  ;;  %4468 = vmatprep.subr.mxu1 %v4815_v0  ;;  %v259_v16 = vld [vmem:[%s4860_s19 + $0x50] sm:$0xff]  ;;  %v262_v19 = vld [vmem:[%s4860_s19 + $0x68] sm:$0xff]  ;;  %v264_v20 = vld [vmem:[%s4860_s19 + $0x78] sm:$0xff] }
  0x14   : > { %4462 = vmatpush3.msra.mxu0 %v254_v7  ;;  %4469 = vmatpush3.msra.mxu1 %v256_v8  ;;  %v4916_v17 = vld [vmem:[%s4870_s22 + $0x10] sm:$0xf]  ;;  %v4919_v18 = vld [vmem:[%s4870_s22 + $0x14] sm:$0xf]  ;;  %v261_v21 = vld [vmem:[%s4860_s19 + $0x60] sm:$0xff] }
  0x15   : > { %4463 = vmatprep.subr.mxu0 %v4815_v0  ;;  %4470 = vmatprep.subr.mxu1 %v4815_v0  ;;  %v263_v22 = vld [vmem:[%s4860_s19 + $0x70] sm:$0xff]  ;;  %v4938_v23 = vld [vmem:[%s4870_s22 + $0x18] sm:$0xf]  ;;  %v4941_v24 = vld [vmem:[%s4870_s22 + $0x1c] sm:$0xf] }
  0x16   : > { %4464 = vmatpush3.msra.mxu0 %v253_v9  ;;  %4465 = vmatprep.mubr.msk.f32.mxu0 %vm4816_vm0, %v4815_v0  ;;  %v266_v25 = vld [vmem:[%s4860_s19 + $0x88] sm:$0xff]  ;;  %v268_v26 = vld [vmem:[%s4860_s19 + $0x98] sm:$0xff]  ;;  %v265_v27 = vld [vmem:[%s4860_s19 + $0x80] sm:$0xff] }
  0x17   : > { %4471 = vmatpush3.msra.mxu1 %v255_v10  ;;  %4472 = vmatprep.mubr.msk.f32.mxu1 %vm4816_vm0, %v4815_v0  ;;  %v267_v28 = vld [vmem:[%s4860_s19 + $0x90] sm:$0xff]  ;;  %v4960_v29 = vld [vmem:[%s4870_s22 + $0x20] sm:$0xf]  ;;  %v4963_v30 = vld [vmem:[%s4870_s22 + $0x24] sm:$0xf] }
  0x18   : > { %4466 = vmatmul.mubr.msk.f32.vlgmr.msra.gmra.mxu0 %vm349_vm1, %v4894_v11  ;;  %4473 = vmatmul.mubr.msk.f32.vlgmr.msra.gmra.mxu1 %vm349_vm1, %v4897_v12  ;;  %v270_v31 = vld [vmem:[%s4860_s19 + $0xa8] sm:$0xff]  ;;  %v272_v32 = vld [vmem:[%s4860_s19 + $0xb8] sm:$0xff]  ;;  %v269_v33 = vld [vmem:[%s4860_s19 + $0xa0] sm:$0xff] }
  0x19   : > { %4475 = vmatprep.subr.mxu0 %v4815_v0  ;;  %4482 = vmatprep.subr.mxu1 %v4815_v0  ;;  %v271_v34 = vld [vmem:[%s4860_s19 + $0xb0] sm:$0xff]  ;;  %v4982_v35 = vld [vmem:[%s4870_s22 + $0x28] sm:$0xf]  ;;  %v4985_v36 = vld [vmem:[%s4870_s22 + $0x2c] sm:$0xf] }
  0x1a   : > { %4476 = vmatpush3.msra.mxu0 %v258_v13  ;;  %4483 = vmatpush3.msra.mxu1 %v260_v14  ;;  %v274_v37 = vld [vmem:[%s4860_s19 + $0xc8] sm:$0xff]  ;;  %v276_v38 = vld [vmem:[%s4860_s19 + $0xd8] sm:$0xff]  ;;  %v273_v39 = vld [vmem:[%s4860_s19 + $0xc0] sm:$0xff] }
  0x1b   : > { %4477 = vmatprep.subr.mxu0 %v4815_v0  ;;  %4484 = vmatprep.subr.mxu1 %v4815_v0  ;;  %v275_v40 = vld [vmem:[%s4860_s19 + $0xd0] sm:$0xff]  ;;  %v278_v43 = vld [vmem:[%s4860_s19 + $0xe8] sm:$0xff]  ;;  %v280_v44 = vld [vmem:[%s4860_s19 + $0xf8] sm:$0xff] }
  0x1c   : > { %4478 = vmatpush3.msra.mxu0 %v257_v15  ;;  %4479 = vmatprep.mubr.msk.f32.mxu0 %vm4816_vm0, %v4815_v0  ;;  %v5004_v41 = vld [vmem:[%s4870_s22 + $0x30] sm:$0xf]  ;;  %v5007_v42 = vld [vmem:[%s4870_s22 + $0x34] sm:$0xf]  ;;  %v277_v45 = vld [vmem:[%s4860_s19 + $0xe0] sm:$0xff] }
  0x1d   : > { %4485 = vmatpush3.msra.mxu1 %v259_v16  ;;  %4486 = vmatprep.mubr.msk.f32.mxu1 %vm4816_vm0, %v4815_v0  ;;  %v279_v46 = vld [vmem:[%s4860_s19 + $0xf0] sm:$0xff]  ;;  %v5026_v47 = vld [vmem:[%s4870_s22 + $0x38] sm:$0xf]  ;;  %v5029_v48 = vld [vmem:[%s4870_s22 + $0x3c] sm:$0xf] }
  0x1e   : > { %4480 = vmatmul.mubr.msk.f32.vlgmr.msra.gmra.mxu0 %vm349_vm1, %v4916_v17  ;;  %4487 = vmatmul.mubr.msk.f32.vlgmr.msra.gmra.mxu1 %vm349_vm1, %v4919_v18  ;;  %v282_v49 = vld [vmem:[%s4860_s19 + $0x108] sm:$0xff]  ;;  %v284_v50 = vld [vmem:[%s4860_s19 + $0x118] sm:$0xff]  ;;  %v281_v51 = vld [vmem:[%s4860_s19 + $0x100] sm:$0xff] }
  0x1f   : > { %4489 = vmatprep.subr.mxu0 %v4815_v0  ;;  %4496 = vmatprep.subr.mxu1 %v4815_v0  ;;  %v283_v52 = vld [vmem:[%s4860_s19 + $0x110] sm:$0xff]  ;;  %v5048_v53 = vld [vmem:[%s4870_s22 + $0x40] sm:$0xf]  ;;  %v5051_v54 = vld [vmem:[%s4870_s22 + $0x44] sm:$0xf] }
  0x20   : > { %4490 = vmatpush3.msra.mxu0 %v262_v19  ;;  %4497 = vmatpush3.msra.mxu1 %v264_v20  ;;  %v286_v55 = vld [vmem:[%s4860_s19 + $0x128] sm:$0xff]  ;;  %v288_v56 = vld [vmem:[%s4860_s19 + $0x138] sm:$0xff]  ;;  %v285_v57 = vld [vmem:[%s4860_s19 + $0x120] sm:$0xff] }
  0x21   : > { %4491 = vmatprep.subr.mxu0 %v4815_v0  ;;  %4498 = vmatprep.subr.mxu1 %v4815_v0  ;;  %v287_v58 = vld [vmem:[%s4860_s19 + $0x130] sm:$0xff]  ;;  %v5070_v59 = vld [vmem:[%s4870_s22 + $0x48] sm:$0xf]  ;;  %v5073_v60 = vld [vmem:[%s4870_s22 + $0x4c] sm:$0xf] }
  0x22   : > { %4492 = vmatpush3.msra.mxu0 %v261_v21  ;;  %4493 = vmatprep.mubr.msk.f32.mxu0 %vm4816_vm0, %v4815_v0  ;;  %v290_v61 = vld [vmem:[%s4860_s19 + $0x148] sm:$0xff]  ;;  %v292_v62 = vld [vmem:[%s4860_s19 + $0x158] sm:$0xff]  ;;  %v289_v63 = vld [vmem:[%s4860_s19 + $0x140] sm:$0xff] }
  0x23   : > { %4499 = vmatpush3.msra.mxu1 %v263_v22  ;;  %4500 = vmatprep.mubr.msk.f32.mxu1 %vm4816_vm0, %v4815_v0  ;;  %v291_v1 = vld [vmem:[%s4860_s19 + $0x150] sm:$0xff]  ;;  %v294_v4 = vld [vmem:[%s4860_s19 + $0x168] sm:$0xff]  ;;  %v296_v7 = vld [vmem:[%s4860_s19 + $0x178] sm:$0xff] }
  0x24   : > { %4494 = vmatmul.mubr.msk.f32.vlgmr.msra.gmra.mxu0 %vm349_vm1, %v4938_v23  ;;  %4501 = vmatmul.mubr.msk.f32.vlgmr.msra.gmra.mxu1 %vm349_vm1, %v4941_v24  ;;  %v5092_v2 = vld [vmem:[%s4870_s22 + $0x50] sm:$0xf]  ;;  %v5095_v3 = vld [vmem:[%s4870_s22 + $0x54] sm:$0xf]  ;;  %v293_v8 = vld [vmem:[%s4860_s19 + $0x160] sm:$0xff] }
  0x25   : > { %4503 = vmatprep.subr.mxu0 %v4815_v0  ;;  %4510 = vmatprep.subr.mxu1 %v4815_v0  ;;  %v295_v9 = vld [vmem:[%s4860_s19 + $0x170] sm:$0xff]  ;;  %v5121_v10 = vld [vmem:[%s4870_s22 + $0x58] sm:$0xf]  ;;  %v5124_v13 = vld [vmem:[%s4870_s22 + $0x5c] sm:$0xf] }
  0x26   : > { %4504 = vmatpush3.msra.mxu0 %v266_v25  ;;  %4511 = vmatpush3.msra.mxu1 %v268_v26  ;;  %v298_v14 = vld [vmem:[%s4860_s19 + $0x188] sm:$0xff]  ;;  %v297_v16 = vld [vmem:[%s4860_s19 + $0x180] sm:$0xff]  ;;  %v302_v21 = vld [vmem:[%s5115_s25 + $0x18] sm:$0xff] }
  0x27   : > { %4505 = vmatprep.subr.mxu0 %v4815_v0  ;;  %4512 = vmatprep.subr.mxu1 %v4815_v0  ;;  %v300_v15 = vld [vmem:[%s5115_s25 + $0x8] sm:$0xff]  ;;  %v299_v19 = vld [vmem:[%s5115_s25] sm:$0xff]  ;;  %v301_v25 = vld [vmem:[%s5115_s25 + $0x10] sm:$0xff] }
  0x28   : > { %4506 = vmatpush3.msra.mxu0 %v265_v27  ;;  %4507 = vmatprep.mubr.msk.f32.mxu0 %vm4816_vm0, %v4815_v0  ;;  %v5143_v20 = vld [vmem:[%s4870_s22 + $0x60] sm:$0xf]  ;;  %v304_v22 = vld [vmem:[%s5115_s25 + $0x28] sm:$0xff] }
  0x29   : > { %4513 = vmatpush3.msra.mxu1 %v267_v28  ;;  %4514 = vmatprep.mubr.msk.f32.mxu1 %vm4816_vm0, %v4815_v0  ;;  %v303_v26 = vld [vmem:[%s5115_s25 + $0x20] sm:$0xff]  ;;  %v308_v27 = vld [vmem:[%s5115_s25 + $0x48] sm:$0xff]  ;;  %v305_v28 = vld [vmem:[%s5115_s25 + $0x30] sm:$0xff] }
  0x2a   : > { %4508 = vmatmul.mubr.msk.f32.vlgmr.msra.gmra.mxu0 %vm349_vm1, %v4960_v29  ;;  %4515 = vmatmul.mubr.msk.f32.vlgmr.msra.gmra.mxu1 %vm349_vm1, %v4963_v30 }
  0x2b   : > { %4517 = vmatprep.subr.mxu0 %v4815_v0  ;;  %4524 = vmatprep.subr.mxu1 %v4815_v0 }
  0x2c   : > { %4518 = vmatpush3.msra.mxu0 %v270_v31  ;;  %4525 = vmatpush3.msra.mxu1 %v272_v32  ;;  %v307_v31 = vld [vmem:[%s5115_s25 + $0x40] sm:$0xff]  ;;  %v309_v32 = vld [vmem:[%s5115_s25 + $0x50] sm:$0xff] }
  0x2d   : > { %4519 = vmatprep.subr.mxu0 %v4815_v0  ;;  %4526 = vmatprep.subr.mxu1 %v4815_v0 }
  0x2e   : > { %4520 = vmatpush3.msra.mxu0 %v269_v33  ;;  %4521 = vmatprep.mubr.msk.f32.mxu0 %vm4816_vm0, %v4815_v0  ;;  %v311_v33 = vld [vmem:[%s5115_s25 + $0x60] sm:$0xff] }
  0x2f   : > { %4527 = vmatpush3.msra.mxu1 %v271_v34  ;;  %4528 = vmatprep.mubr.msk.f32.mxu1 %vm4816_vm0, %v4815_v0  ;;  %v313_v34 = vld [vmem:[%s5115_s25 + $0x70] sm:$0xff] }
  0x30   : > { %4522 = vmatmul.mubr.msk.f32.vlgmr.msra.gmra.mxu0 %vm349_vm1, %v4982_v35  ;;  %4529 = vmatmul.mubr.msk.f32.vlgmr.msra.gmra.mxu1 %vm349_vm1, %v4985_v36 }
  0x31   : > { %4531 = vmatprep.subr.mxu0 %v4815_v0  ;;  %4538 = vmatprep.subr.mxu1 %v4815_v0 }
  0x32   : > { %4532 = vmatpush3.msra.mxu0 %v274_v37  ;;  %4539 = vmatpush3.msra.mxu1 %v276_v38  ;;  %v315_v37 = vld [vmem:[%s5115_s25 + $0x80] sm:$0xff]  ;;  %v317_v38 = vld [vmem:[%s5115_s25 + $0x90] sm:$0xff] }
  0x33   : > { %4533 = vmatprep.subr.mxu0 %v4815_v0  ;;  %4540 = vmatprep.subr.mxu1 %v4815_v0 }
  0x34   : > { %4534 = vmatpush3.msra.mxu0 %v273_v39  ;;  %4535 = vmatprep.mubr.msk.f32.mxu0 %vm4816_vm0, %v4815_v0  ;;  %v319_v39 = vld [vmem:[%s5115_s25 + $0xa0] sm:$0xff] }
  0x35   : > { %4541 = vmatpush3.msra.mxu1 %v275_v40  ;;  %4542 = vmatprep.mubr.msk.f32.mxu1 %vm4816_vm0, %v4815_v0  ;;  %v321_v40 = vld [vmem:[%s5115_s25 + $0xb0] sm:$0xff] }
  0x36   : > { %4536 = vmatmul.mubr.msk.f32.vlgmr.msra.gmra.mxu0 %vm349_vm1, %v5004_v41  ;;  %4543 = vmatmul.mubr.msk.f32.vlgmr.msra.gmra.mxu1 %vm349_vm1, %v5007_v42 }
  0x37   : > { %4545 = vmatprep.subr.mxu0 %v4815_v0  ;;  %4552 = vmatprep.subr.mxu1 %v4815_v0 }
  0x38   : > { %4546 = vmatpush3.msra.mxu0 %v278_v43  ;;  %4553 = vmatpush3.msra.mxu1 %v280_v44  ;;  %v323_v43 = vld [vmem:[%s5115_s25 + $0xc0] sm:$0xff]  ;;  %v325_v44 = vld [vmem:[%s5115_s25 + $0xd0] sm:$0xff] }
  0x39   : > { %4547 = vmatprep.subr.mxu0 %v4815_v0  ;;  %4554 = vmatprep.subr.mxu1 %v4815_v0 }
  0x3a   : > { %4548 = vmatpush3.msra.mxu0 %v277_v45  ;;  %4549 = vmatprep.mubr.msk.f32.mxu0 %vm4816_vm0, %v4815_v0  ;;  %v327_v45 = vld [vmem:[%s5115_s25 + $0xe0] sm:$0xff] }
  0x3b   : > { %4555 = vmatpush3.msra.mxu1 %v279_v46  ;;  %4556 = vmatprep.mubr.msk.f32.mxu1 %vm4816_vm0, %v4815_v0  ;;  %v329_v46 = vld [vmem:[%s5115_s25 + $0xf0] sm:$0xff] }
  0x3c   : > { %4550 = vmatmul.mubr.msk.f32.vlgmr.msra.gmra.mxu0 %vm349_vm1, %v5026_v47  ;;  %4557 = vmatmul.mubr.msk.f32.vlgmr.msra.gmra.mxu1 %vm349_vm1, %v5029_v48 }
  0x3d   : > { %4559 = vmatprep.subr.mxu0 %v4815_v0  ;;  %4566 = vmatprep.subr.mxu1 %v4815_v0 }
  0x3e   : > { %4560 = vmatpush3.msra.mxu0 %v282_v49  ;;  %4567 = vmatpush3.msra.mxu1 %v284_v50  ;;  %v331_v49 = vld [vmem:[%s5115_s25 + $0x100] sm:$0xff]  ;;  %v333_v50 = vld [vmem:[%s5115_s25 + $0x110] sm:$0xff] }
  0x3f   : > { %4561 = vmatprep.subr.mxu0 %v4815_v0  ;;  %4568 = vmatprep.subr.mxu1 %v4815_v0 }
  0x40   : > { %4562 = vmatpush3.msra.mxu0 %v281_v51  ;;  %4563 = vmatprep.mubr.msk.f32.mxu0 %vm4816_vm0, %v4815_v0  ;;  %v335_v51 = vld [vmem:[%s5115_s25 + $0x120] sm:$0xff] }
  0x41   : > { %4569 = vmatpush3.msra.mxu1 %v283_v52  ;;  %4570 = vmatprep.mubr.msk.f32.mxu1 %vm4816_vm0, %v4815_v0  ;;  %v340_v52 = vld [vmem:[%s5115_s25 + $0x148] sm:$0xff] }
  0x42   : > { %4564 = vmatmul.mubr.msk.f32.vlgmr.msra.gmra.mxu0 %vm349_vm1, %v5048_v53  ;;  %4571 = vmatmul.mubr.msk.f32.vlgmr.msra.gmra.mxu1 %vm349_vm1, %v5051_v54 }
  0x43   : > { %4573 = vmatprep.subr.mxu0 %v4815_v0  ;;  %4580 = vmatprep.subr.mxu1 %v4815_v0 }
  0x44   : > { %4574 = vmatpush3.msra.mxu0 %v286_v55  ;;  %4581 = vmatpush3.msra.mxu1 %v288_v56  ;;  %v339_v55 = vld [vmem:[%s5115_s25 + $0x140] sm:$0xff]  ;;  %v344_v56 = vld [vmem:[%s5115_s25 + $0x168] sm:$0xff] }
  0x45   : > { %4575 = vmatprep.subr.mxu0 %v4815_v0  ;;  %4582 = vmatprep.subr.mxu1 %v4815_v0 }
  0x46   : > { %4576 = vmatpush3.msra.mxu0 %v285_v57  ;;  %4577 = vmatprep.mubr.msk.f32.mxu0 %vm4816_vm0, %v4815_v0  ;;  %v341_v57 = vld [vmem:[%s5115_s25 + $0x150] sm:$0xff] }
  0x47   : > { %4583 = vmatpush3.msra.mxu1 %v287_v58  ;;  %4584 = vmatprep.mubr.msk.f32.mxu1 %vm4816_vm0, %v4815_v0  ;;  %v343_v58 = vld [vmem:[%s5115_s25 + $0x160] sm:$0xff] }
  0x48   : > { %4578 = vmatmul.mubr.msk.f32.vlgmr.msra.gmra.mxu0 %vm349_vm1, %v5070_v59  ;;  %4585 = vmatmul.mubr.msk.f32.vlgmr.msra.gmra.mxu1 %vm349_vm1, %v5073_v60 }
  0x49   : > { %4587 = vmatprep.subr.mxu0 %v4815_v0  ;;  %4594 = vmatprep.subr.mxu1 %v4815_v0 }
  0x4a   : > { %4588 = vmatpush3.msra.mxu0 %v290_v61  ;;  %4595 = vmatpush3.msra.mxu1 %v292_v62  ;;  %v345_v61 = vld [vmem:[%s5115_s25 + $0x170] sm:$0xff]  ;;  %v347_v62 = vld [vmem:[%s5115_s25 + $0x180] sm:$0xff] }
  0x4b   : > { %4589 = vmatprep.subr.mxu0 %v4815_v0  ;;  %4596 = vmatprep.subr.mxu1 %v4815_v0 }
  0x4c   : > { %4590 = vmatpush3.msra.mxu0 %v289_v63  ;;  %4591 = vmatprep.mubr.msk.f32.mxu0 %vm4816_vm0, %v4815_v0 }
  0x4d   : > { %4597 = vmatpush3.msra.mxu1 %v291_v1  ;;  %4598 = vmatprep.mubr.msk.f32.mxu1 %vm4816_vm0, %v4815_v0 }
  0x4e   : > { %4592 = vmatmul.mubr.msk.f32.vlgmr.msra.gmra.mxu0 %vm349_vm1, %v5092_v2  ;;  %4599 = vmatmul.mubr.msk.f32.vlgmr.msra.gmra.mxu1 %vm349_vm1, %v5095_v3 }
  0x4f   : > { %4601 = vmatprep.subr.mxu0 %v4815_v0  ;;  %4608 = vmatprep.subr.mxu1 %v4815_v0 }
  0x50   : > { %4602 = vmatpush3.msra.mxu0 %v294_v4  ;;  %4609 = vmatpush3.msra.mxu1 %v296_v7 }
  0x51   : > { %4603 = vmatprep.subr.mxu0 %v4815_v0  ;;  %4610 = vmatprep.subr.mxu1 %v4815_v0 }
  0x52   : > { %4604 = vmatpush3.msra.mxu0 %v293_v8  ;;  %4605 = vmatprep.mubr.msk.f32.mxu0 %vm4816_vm0, %v4815_v0 }
  0x53   : > { %4611 = vmatpush3.msra.mxu1 %v295_v9  ;;  %4612 = vmatprep.mubr.msk.f32.mxu1 %vm4816_vm0, %v4815_v0 }
  0x54   : > { %4606 = vmatmul.mubr.msk.f32.vlgmr.msra.gmra.mxu0 %vm349_vm1, %v5121_v10  ;;  %4613 = vmatmul.mubr.msk.f32.vlgmr.msra.gmra.mxu1 %vm349_vm1, %v5124_v13 }
  0x55   : > { %4615 = vmatprep.subr.mxu0 %v4815_v0  ;;  %4622 = vmatprep.subr.mxu1 %v4815_v0 }
  0x56   : > { %4616 = vmatpush3.msra.mxu0 %v298_v14  ;;  %4623 = vmatpush3.msra.mxu1 %v300_v15 }
  0x57   : > { %4617 = vmatprep.subr.mxu0 %v4815_v0  ;;  %4624 = vmatprep.subr.mxu1 %v4815_v0 }
  0x58   : > { %4618 = vmatpush3.msra.mxu0 %v297_v16  ;;  %4619 = vmatprep.mubr.msk.f32.mxu0 %vm4816_vm0, %v4815_v0 }
  0x59   : > { %4625 = vmatpush3.msra.mxu1 %v299_v19  ;;  %4626 = vmatprep.mubr.msk.f32.mxu1 %vm4816_vm0, %v4815_v0 }
  0x5a   : > { %4620 = vmatmul.mubr.msk.f32.vlgmr.msra.gmra.mxu0 %vm349_vm1, %v5143_v20  ;;  %4627 = vmatmul.mubr.msk.f32.vlgmr.msra.gmra.mxu1 %vm349_vm1, %v4874_v5  ;;  %v306_v5 = vld [vmem:[%s5115_s25 + $0x38] sm:$0xff] }
  0x5b   : > { %4629 = vmatprep.subr.mxu0 %v4815_v0  ;;  %4636 = vmatprep.subr.mxu1 %v4815_v0 }
  0x5c   : > { %4630 = vmatpush3.msra.mxu0 %v302_v21  ;;  %4637 = vmatpush3.msra.mxu1 %v304_v22 }
  0x5d   : > { %4631 = vmatprep.subr.mxu0 %v4815_v0  ;;  %4638 = vmatprep.subr.mxu1 %v4815_v0 }
  0x5e   : > { %4632 = vmatpush3.msra.mxu0 %v301_v25  ;;  %4633 = vmatprep.mubr.msk.f32.mxu0 %vm4816_vm0, %v4815_v0 }
  0x5f   : > { %4639 = vmatpush3.msra.mxu1 %v303_v26  ;;  %4640 = vmatprep.mubr.msk.f32.mxu1 %vm4816_vm0, %v4815_v0 }
  0x60   : > { %4634 = vmatmul.mubr.msk.f32.vlgmr.msra.gmra.mxu0 %vm349_vm1, %v4877_v6  ;;  %4641 = vmatmul.mubr.msk.f32.vlgmr.msra.gmra.mxu1 %vm349_vm1, %v4894_v11  ;;  %v310_v6 = vld [vmem:[%s5115_s25 + $0x58] sm:$0xff]  ;;  %v312_v11 = vld [vmem:[%s5115_s25 + $0x68] sm:$0xff] }
  0x61   : > { %4643 = vmatprep.subr.mxu0 %v4815_v0  ;;  %4650 = vmatprep.subr.mxu1 %v4815_v0 }
  0x62   : > { %4644 = vmatpush3.msra.mxu0 %v306_v5  ;;  %4651 = vmatpush3.msra.mxu1 %v308_v27 }
  0x63   : > { %4645 = vmatprep.subr.mxu0 %v4815_v0  ;;  %4652 = vmatprep.subr.mxu1 %v4815_v0 }
  0x64   : > { %4646 = vmatpush3.msra.mxu0 %v305_v28  ;;  %4647 = vmatprep.mubr.msk.f32.mxu0 %vm4816_vm0, %v4815_v0 }
  0x65   : > { %4653 = vmatpush3.msra.mxu1 %v307_v31  ;;  %4654 = vmatprep.mubr.msk.f32.mxu1 %vm4816_vm0, %v4815_v0 }
  0x66   : > { %4648 = vmatmul.mubr.msk.f32.vlgmr.msra.gmra.mxu0 %vm349_vm1, %v4897_v12  ;;  %4655 = vmatmul.mubr.msk.f32.vlgmr.msra.gmra.mxu1 %vm349_vm1, %v4916_v17  ;;  %v314_v12 = vld [vmem:[%s5115_s25 + $0x78] sm:$0xff]  ;;  %v316_v17 = vld [vmem:[%s5115_s25 + $0x88] sm:$0xff] }
  0x67   : > { %4657 = vmatprep.subr.mxu0 %v4815_v0  ;;  %4664 = vmatprep.subr.mxu1 %v4815_v0 }
  0x68   : > { %4658 = vmatpush3.msra.mxu0 %v310_v6  ;;  %4665 = vmatpush3.msra.mxu1 %v312_v11 }
  0x69   : > { %4659 = vmatprep.subr.mxu0 %v4815_v0  ;;  %4666 = vmatprep.subr.mxu1 %v4815_v0 }
  0x6a   : > { %4660 = vmatpush3.msra.mxu0 %v309_v32  ;;  %4661 = vmatprep.mubr.msk.f32.mxu0 %vm4816_vm0, %v4815_v0 }
  0x6b   : > { %4667 = vmatpush3.msra.mxu1 %v311_v33  ;;  %4668 = vmatprep.mubr.msk.f32.mxu1 %vm4816_vm0, %v4815_v0 }
  0x6c   : > { %4662 = vmatmul.mubr.msk.f32.vlgmr.msra.gmra.mxu0 %vm349_vm1, %v4919_v18  ;;  %4669 = vmatmul.mubr.msk.f32.vlgmr.msra.gmra.mxu1 %vm349_vm1, %v4938_v23  ;;  %v318_v18 = vld [vmem:[%s5115_s25 + $0x98] sm:$0xff]  ;;  %v320_v23 = vld [vmem:[%s5115_s25 + $0xa8] sm:$0xff] }
  0x6d   : > { %4671 = vmatprep.subr.mxu0 %v4815_v0  ;;  %4678 = vmatprep.subr.mxu1 %v4815_v0 }
  0x6e   : > { %4672 = vmatpush3.msra.mxu0 %v314_v12  ;;  %4679 = vmatpush3.msra.mxu1 %v316_v17 }
  0x6f   : > { %4673 = vmatprep.subr.mxu0 %v4815_v0  ;;  %4680 = vmatprep.subr.mxu1 %v4815_v0 }
  0x70   : > { %4674 = vmatpush3.msra.mxu0 %v313_v34  ;;  %4675 = vmatprep.mubr.msk.f32.mxu0 %vm4816_vm0, %v4815_v0 }
  0x71   : > { %4681 = vmatpush3.msra.mxu1 %v315_v37  ;;  %4682 = vmatprep.mubr.msk.f32.mxu1 %vm4816_vm0, %v4815_v0 }
  0x72   : > { %4676 = vmatmul.mubr.msk.f32.vlgmr.msra.gmra.mxu0 %vm349_vm1, %v4941_v24  ;;  %4683 = vmatmul.mubr.msk.f32.vlgmr.msra.gmra.mxu1 %vm349_vm1, %v4960_v29  ;;  %v322_v24 = vld [vmem:[%s5115_s25 + $0xb8] sm:$0xff]  ;;  %v324_v29 = vld [vmem:[%s5115_s25 + $0xc8] sm:$0xff] }
  0x73   : > { %4685 = vmatprep.subr.mxu0 %v4815_v0  ;;  %4692 = vmatprep.subr.mxu1 %v4815_v0 }
  0x74   : > { %4686 = vmatpush3.msra.mxu0 %v318_v18  ;;  %4693 = vmatpush3.msra.mxu1 %v320_v23 }
  0x75   : > { %4687 = vmatprep.subr.mxu0 %v4815_v0  ;;  %4694 = vmatprep.subr.mxu1 %v4815_v0 }
  0x76   : > { %4688 = vmatpush3.msra.mxu0 %v317_v38  ;;  %4689 = vmatprep.mubr.msk.f32.mxu0 %vm4816_vm0, %v4815_v0 }
  0x77   : > { %4695 = vmatpush3.msra.mxu1 %v319_v39  ;;  %4696 = vmatprep.mubr.msk.f32.mxu1 %vm4816_vm0, %v4815_v0 }
  0x78   : > { %4690 = vmatmul.mubr.msk.f32.vlgmr.msra.gmra.mxu0 %vm349_vm1, %v4963_v30  ;;  %4697 = vmatmul.mubr.msk.f32.vlgmr.msra.gmra.mxu1 %vm349_vm1, %v4982_v35  ;;  %v326_v30 = vld [vmem:[%s5115_s25 + $0xd8] sm:$0xff]  ;;  %v328_v35 = vld [vmem:[%s5115_s25 + $0xe8] sm:$0xff] }
  0x79   : > { %4699 = vmatprep.subr.mxu0 %v4815_v0  ;;  %4706 = vmatprep.subr.mxu1 %v4815_v0 }
  0x7a   : > { %4700 = vmatpush3.msra.mxu0 %v322_v24  ;;  %4707 = vmatpush3.msra.mxu1 %v324_v29 }
  0x7b   : > { %4701 = vmatprep.subr.mxu0 %v4815_v0  ;;  %4708 = vmatprep.subr.mxu1 %v4815_v0 }
  0x7c   : > { %4702 = vmatpush3.msra.mxu0 %v321_v40  ;;  %4703 = vmatprep.mubr.msk.f32.mxu0 %vm4816_vm0, %v4815_v0 }
  0x7d   : > { %4709 = vmatpush3.msra.mxu1 %v323_v43  ;;  %4710 = vmatprep.mubr.msk.f32.mxu1 %vm4816_vm0, %v4815_v0 }
  0x7e   : > { %4704 = vmatmul.mubr.msk.f32.vlgmr.msra.gmra.mxu0 %vm349_vm1, %v4985_v36  ;;  %4711 = vmatmul.mubr.msk.f32.vlgmr.msra.gmra.mxu1 %vm349_vm1, %v5004_v41  ;;  %v330_v36 = vld [vmem:[%s5115_s25 + $0xf8] sm:$0xff]  ;;  %v332_v41 = vld [vmem:[%s5115_s25 + $0x108] sm:$0xff] }
  0x7f   : > { %4713 = vmatprep.subr.mxu0 %v4815_v0  ;;  %4720 = vmatprep.subr.mxu1 %v4815_v0 }
  0x80   : > { %4714 = vmatpush3.msra.mxu0 %v326_v30  ;;  %4721 = vmatpush3.msra.mxu1 %v328_v35 }
  0x81   : > { %4715 = vmatprep.subr.mxu0 %v4815_v0  ;;  %4722 = vmatprep.subr.mxu1 %v4815_v0 }
  0x82   : > { %4716 = vmatpush3.msra.mxu0 %v325_v44  ;;  %4717 = vmatprep.mubr.msk.f32.mxu0 %vm4816_vm0, %v4815_v0 }
  0x83   : > { %4723 = vmatpush3.msra.mxu1 %v327_v45  ;;  %4724 = vmatprep.mubr.msk.f32.mxu1 %vm4816_vm0, %v4815_v0 }
  0x84   : > { %4718 = vmatmul.mubr.msk.f32.vlgmr.msra.gmra.mxu0 %vm349_vm1, %v5007_v42  ;;  %4725 = vmatmul.mubr.msk.f32.vlgmr.msra.gmra.mxu1 %vm349_vm1, %v5026_v47  ;;  %v334_v42 = vld [vmem:[%s5115_s25 + $0x118] sm:$0xff]  ;;  %v336_v47 = vld [vmem:[%s5115_s25 + $0x128] sm:$0xff] }
  0x85   : > { %4727 = vmatprep.subr.mxu0 %v4815_v0  ;;  %4734 = vmatprep.subr.mxu1 %v4815_v0 }
  0x86   : > { %4728 = vmatpush3.msra.mxu0 %v330_v36  ;;  %4735 = vmatpush3.msra.mxu1 %v332_v41 }
  0x87   : > { %4729 = vmatprep.subr.mxu0 %v4815_v0  ;;  %4736 = vmatprep.subr.mxu1 %v4815_v0 }
  0x88   : > { %4730 = vmatpush3.msra.mxu0 %v329_v46  ;;  %4731 = vmatprep.mubr.msk.f32.mxu0 %vm4816_vm0, %v4815_v0 }
  0x89   : > { %4737 = vmatpush3.msra.mxu1 %v331_v49  ;;  %4738 = vmatprep.mubr.msk.f32.mxu1 %vm4816_vm0, %v4815_v0 }
  0x8a   : > { %4732 = vmatmul.mubr.msk.f32.vlgmr.msra.gmra.mxu0 %vm349_vm1, %v5029_v48  ;;  %4739 = vmatmul.mubr.msk.f32.vlgmr.msra.gmra.mxu1 %vm349_vm1, %v5048_v53  ;;  %v338_v48 = vld [vmem:[%s5115_s25 + $0x138] sm:$0xff]  ;;  %v337_v53 = vld [vmem:[%s5115_s25 + $0x130] sm:$0xff] }
  0x8b   : > { %4741 = vmatprep.subr.mxu0 %v4815_v0  ;;  %4748 = vmatprep.subr.mxu1 %v4815_v0 }
  0x8c   : > { %4742 = vmatpush3.msra.mxu0 %v334_v42  ;;  %4749 = vmatpush3.msra.mxu1 %v336_v47 }
  0x8d   : > { %4743 = vmatprep.subr.mxu0 %v4815_v0  ;;  %4750 = vmatprep.subr.mxu1 %v4815_v0 }
  0x8e   : > { %4744 = vmatpush3.msra.mxu0 %v333_v50  ;;  %4745 = vmatprep.mubr.msk.f32.mxu0 %vm4816_vm0, %v4815_v0 }
  0x8f   : > { %4751 = vmatpush3.msra.mxu1 %v335_v51  ;;  %4752 = vmatprep.mubr.msk.f32.mxu1 %vm4816_vm0, %v4815_v0 }
  0x90   : > { %4746 = vmatmul.mubr.msk.f32.vlgmr.msra.gmra.mxu0 %vm349_vm1, %v5051_v54  ;;  %4753 = vmatmul.mubr.msk.f32.vlgmr.msra.gmra.mxu1 %vm349_vm1, %v5070_v59  ;;  %v342_v54 = vld [vmem:[%s5115_s25 + $0x158] sm:$0xff] }
  0x91   : > { %4755 = vmatprep.subr.mxu0 %v4815_v0  ;;  %4762 = vmatprep.subr.mxu1 %v4815_v0  ;;  %v346_v59 = vld [vmem:[%s5115_s25 + $0x178] sm:$0xff] }
  0x92   : > { %4756 = vmatpush3.msra.mxu0 %v338_v48  ;;  %4763 = vmatpush3.msra.mxu1 %v340_v52 }
  0x93   : > { %4757 = vmatprep.subr.mxu0 %v4815_v0  ;;  %4764 = vmatprep.subr.mxu1 %v4815_v0 }
  0x94   : > { %4758 = vmatpush3.msra.mxu0 %v337_v53  ;;  %4759 = vmatprep.mubr.msk.f32.mxu0 %vm4816_vm0, %v4815_v0 }
  0x95   : > { %4765 = vmatpush3.msra.mxu1 %v339_v55  ;;  %4766 = vmatprep.mubr.msk.f32.mxu1 %vm4816_vm0, %v4815_v0 }
  0x96   : > { %4760 = vmatmul.mubr.msk.f32.vlgmr.msra.gmra.mxu0 %vm349_vm1, %v5073_v60  ;;  %4767 = vmatmul.mubr.msk.f32.vlgmr.msra.gmra.mxu1 %vm349_vm1, %v5092_v2  ;;  %v348_v60 = vld [vmem:[%s5115_s25 + $0x188] sm:$0xff] }
  0x97   : > { %4769 = vmatprep.subr.mxu0 %v4815_v0  ;;  %4776 = vmatprep.subr.mxu1 %v4815_v0 }
  0x98   : > { %4770 = vmatpush3.msra.mxu0 %v342_v54  ;;  %4777 = vmatpush3.msra.mxu1 %v344_v56 }
  0x99   : > { %4771 = vmatprep.subr.mxu0 %v4815_v0  ;;  %4778 = vmatprep.subr.mxu1 %v4815_v0 }
  0x9a   : > { %4772 = vmatpush3.msra.mxu0 %v341_v57  ;;  %4773 = vmatprep.mubr.msk.f32.mxu0 %vm4816_vm0, %v4815_v0 }
  0x9b   : > { %4779 = vmatpush3.msra.mxu1 %v343_v58  ;;  %4780 = vmatprep.mubr.msk.f32.mxu1 %vm4816_vm0, %v4815_v0 }
  0x9c   : > { %4774 = vmatmul.mubr.msk.f32.vlgmr.msra.gmra.mxu0 %vm349_vm1, %v5095_v3  ;;  %4781 = vmatmul.mubr.msk.f32.vlgmr.msra.gmra.mxu1 %vm349_vm1, %v5121_v10 }
  0x9d   : > { %4783 = vmatprep.subr.mxu0 %v4815_v0  ;;  %4790 = vmatprep.subr.mxu1 %v4815_v0 }
  0x9e   : > { %4784 = vmatpush3.msra.mxu0 %v346_v59  ;;  %4791 = vmatpush3.msra.mxu1 %v348_v60 }
  0x9f   : > { %4785 = vmatprep.subr.mxu0 %v4815_v0  ;;  %4792 = vmatprep.subr.mxu1 %v4815_v0 }
  0xa0   : > { %4786 = vmatpush3.msra.mxu0 %v345_v61  ;;  %4787 = vmatprep.mubr.msk.f32.mxu0 %vm4816_vm0, %v4815_v0 }
  0xa1   : > { %4793 = vmatpush3.msra.mxu1 %v347_v62  ;;  %4794 = vmatprep.mubr.msk.f32.mxu1 %vm4816_vm0, %v4815_v0 }
  0xa2   : > { %4788 = vmatmul.mubr.msk.f32.vlgmr.msra.gmra.mxu0 %vm349_vm1, %v5124_v13  ;;  %4795 = vmatmul.mubr.msk.f32.vlgmr.msra.gmra.mxu1 %vm349_vm1, %v5143_v20 }
  0xd2   : > { %v419_v63 = vpop.f32.mrf.mxu0  ;;  %v5345_v1 = vpop.f32.mrf.mxu1 }
  0xd4   : > { %v4453_v2 = vpop.f32.mrf.mxu0  ;;  %v4460_v3 = vpop.f32.mrf.mxu1 }
  0xd8   : > { %v5347_v4 = vpop.f32.mrf.mxu0  ;;  %v5349_v7 = vpop.f32.mrf.mxu1 }
  0xda   : > { %v4467_v8 = vpop.f32.mrf.mxu0  ;;  %v4474_v9 = vpop.f32.mrf.mxu1 }
  0xde   : > { %v5351_v10 = vpop.f32.mrf.mxu0  ;;  %v5353_v0 = vpop.f32.mrf.mxu1 }
  0xe0   : > { %v4481_v14 = vpop.f32.mrf.mxu0  ;;  %v4488_v13 = vpop.f32.mrf.mxu1 }
  0xe4   : > { %v5355_v15 = vpop.f32.mrf.mxu0  ;;  %v5357_v16 = vpop.f32.mrf.mxu1 }
  0xe6   : > { %v4495_v19 = vpop.f32.mrf.mxu0  ;;  %v4502_v20 = vpop.f32.mrf.mxu1 }
  0xea   : > { %v5359_v21 = vpop.f32.mrf.mxu0  ;;  %v5361_v22 = vpop.f32.mrf.mxu1 }
  0xec   : > { %v4509_v25 = vpop.f32.mrf.mxu0  ;;  %v4516_v26 = vpop.f32.mrf.mxu1 }
  0xf0   : > { %v5363_v5 = vpop.f32.mrf.mxu0  ;;  %v5365_v27 = vpop.f32.mrf.mxu1 }
  0xf2   : > { %v4523_v28 = vpop.f32.mrf.mxu0  ;;  %v4530_v31 = vpop.f32.mrf.mxu1 }
  0xf6   : > { %v5367_v6 = vpop.f32.mrf.mxu0  ;;  %v5369_v11 = vpop.f32.mrf.mxu1 }
  0xf8   : > { %v4537_v32 = vpop.f32.mrf.mxu0  ;;  %v4544_v33 = vpop.f32.mrf.mxu1 }
  0xfc   : > { %v5371_v12 = vpop.f32.mrf.mxu0  ;;  %v5373_v17 = vpop.f32.mrf.mxu1 }
  0xfe   : > { %v4551_v34 = vpop.f32.mrf.mxu0  ;;  %v4558_v37 = vpop.f32.mrf.mxu1 }
 0x102   : > { %v5375_v18 = vpop.f32.mrf.mxu0  ;;  %v5377_v23 = vpop.f32.mrf.mxu1 }
 0x104   : > { %v4565_v38 = vpop.f32.mrf.mxu0  ;;  %v4572_v39 = vpop.f32.mrf.mxu1 }
 0x108   : > { %v5379_v24 = vpop.f32.mrf.mxu0  ;;  %v5381_v29 = vpop.f32.mrf.mxu1 }
 0x10a   : > { %v4579_v40 = vpop.f32.mrf.mxu0  ;;  %v4586_v43 = vpop.f32.mrf.mxu1 }
 0x10e   : > { %v5383_v30 = vpop.f32.mrf.mxu0  ;;  %v5385_v35 = vpop.f32.mrf.mxu1 }
 0x110   : > { %v4593_v44 = vpop.f32.mrf.mxu0  ;;  %v4600_v45 = vpop.f32.mrf.mxu1 }
 0x114   : > { %v5387_v36 = vpop.f32.mrf.mxu0  ;;  %v5389_v41 = vpop.f32.mrf.mxu1 }
 0x116   : > { %v4607_v46 = vpop.f32.mrf.mxu0  ;;  %v4614_v49 = vpop.f32.mrf.mxu1 }
 0x11a   : > { %v5391_v42 = vpop.f32.mrf.mxu0  ;;  %v2241_v47 = vpop.f32.mrf.mxu1 }
 0x11b   : > { %v3950_v50 = vrot.slane %v2241_v47, 2  ;;  %v4051_v51 = vrot.slane %v2241_v47, 6 }
 0x11c   : > { %v4621_v48 = vpop.f32.mrf.mxu0  ;;  %v4628_v52 = vpop.f32.mrf.mxu1 }
 0x11d   : > { %v4000_v53 = vsub.f32 %v419_v63, %v3950_v50  ;;  %v4101_v55 = vadd.f32 %v4051_v51, %v419_v63 }
 0x11f   : > { %4026 = vst.msk [vmem:[%s5398_s28] sm:$0x3] %vm4025_vm2, %v4000_v53 }
 0x120   : > { %4127 = vst.msk [vmem:[%s5398_s28] sm:$0xc] %vm4126_vm3, %v4101_v55  ;;  %v2311_v54 = vpop.f32.mrf.mxu0  ;;  %v2381_v56 = vpop.f32.mrf.mxu1 }
 0x121   : > { %v3951_v57 = vrot.slane %v2311_v54, 2  ;;  %v4052_v58 = vrot.slane %v2311_v54, 6  ;;  %v3952_v59 = vrot.slane %v2381_v56, 2  ;;  %v4053_v60 = vrot.slane %v2381_v56, 6 }
 0x122   : > { %v4635_v61 = vpop.f32.mrf.mxu0  ;;  %v4642_v62 = vpop.f32.mrf.mxu1 }
 0x123   : > { %v4001_v2 = vsub.f32 %v5345_v1, %v3951_v57  ;;  %v4102_v3 = vadd.f32 %v4052_v58, %v5345_v1  ;;  %v4002_v63 = vsub.f32 %v5347_v4, %v3952_v59  ;;  %v4103_v8 = vadd.f32 %v4053_v60, %v5347_v4 }
 0x125   : > { %4027 = vst.msk [vmem:[%s5398_s28 + $0x4] sm:$0x3] %vm4025_vm2, %v4001_v2  ;;  %4028 = vst.msk [vmem:[%s5398_s28 + $0x8] sm:$0x3] %vm4025_vm2, %v4002_v63 }
 0x126   : > { %4128 = vst.msk [vmem:[%s5398_s28 + $0x4] sm:$0xc] %vm4126_vm3, %v4102_v3  ;;  %4129 = vst.msk [vmem:[%s5398_s28 + $0x8] sm:$0xc] %vm4126_vm3, %v4103_v8  ;;  %v2451_v9 = vpop.f32.mrf.mxu0  ;;  %v2521_v14 = vpop.f32.mrf.mxu1 }
 0x127   : > { %v3953_v13 = vrot.slane %v2451_v9, 2  ;;  %v4054_v1 = vrot.slane %v2451_v9, 6  ;;  %v3954_v19 = vrot.slane %v2521_v14, 2  ;;  %v4055_v20 = vrot.slane %v2521_v14, 6 }
 0x128   : > { %v4649_v25 = vpop.f32.mrf.mxu0  ;;  %v4656_v4 = vpop.f32.mrf.mxu1 }
 0x129   : > { %v4003_v26 = vsub.f32 %v5349_v7, %v3953_v13  ;;  %v4104_v28 = vadd.f32 %v4054_v1, %v5349_v7  ;;  %v4004_v31 = vsub.f32 %v5351_v10, %v3954_v19  ;;  %v4105_v32 = vadd.f32 %v4055_v20, %v5351_v10 }
 0x12b   : > { %4029 = vst.msk [vmem:[%s5398_s28 + $0xc] sm:$0x3] %vm4025_vm2, %v4003_v26  ;;  %4030 = vst.msk [vmem:[%s5398_s28 + $0x10] sm:$0x3] %vm4025_vm2, %v4004_v31 }
 0x12c   : > { %4130 = vst.msk [vmem:[%s5398_s28 + $0xc] sm:$0xc] %vm4126_vm3, %v4104_v28  ;;  %4131 = vst.msk [vmem:[%s5398_s28 + $0x10] sm:$0xc] %vm4126_vm3, %v4105_v32  ;;  %v2591_v33 = vpop.f32.mrf.mxu0  ;;  %v2661_v34 = vpop.f32.mrf.mxu1 }
 0x12d   : > { %v3955_v37 = vrot.slane %v2591_v33, 2  ;;  %v4056_v7 = vrot.slane %v2591_v33, 6  ;;  %v3956_v38 = vrot.slane %v2661_v34, 2  ;;  %v4057_v39 = vrot.slane %v2661_v34, 6 }
 0x12e   : > { %v4663_v40 = vpop.f32.mrf.mxu0  ;;  %v4670_v10 = vpop.f32.mrf.mxu1 }
 0x12f   : > { %v4005_v43 = vsub.f32 %v5353_v0, %v3955_v37  ;;  %v4106_v44 = vadd.f32 %v4056_v7, %v5353_v0  ;;  %v4006_v45 = vsub.f32 %v5355_v15, %v3956_v38  ;;  %v4107_v46 = vadd.f32 %v4057_v39, %v5355_v15 }
 0x131   : > { %4031 = vst.msk [vmem:[%s5398_s28 + $0x14] sm:$0x3] %vm4025_vm2, %v4005_v43  ;;  %4032 = vst.msk [vmem:[%s5398_s28 + $0x18] sm:$0x3] %vm4025_vm2, %v4006_v45 }
 0x132   : > { %4132 = vst.msk [vmem:[%s5398_s28 + $0x14] sm:$0xc] %vm4126_vm3, %v4106_v44  ;;  %4133 = vst.msk [vmem:[%s5398_s28 + $0x18] sm:$0xc] %vm4126_vm3, %v4107_v46  ;;  %v2731_v49 = vpop.f32.mrf.mxu0  ;;  %v2801_v47 = vpop.f32.mrf.mxu1 }
 0x133   : > { %v3957_v50 = vrot.slane %v2731_v49, 2  ;;  %v4058_v0 = vrot.slane %v2731_v49, 6  ;;  %v3958_v51 = vrot.slane %v2801_v47, 2  ;;  %v4059_v48 = vrot.slane %v2801_v47, 6 }
 0x134   : > { %v4677_v52 = vpop.f32.mrf.mxu0  ;;  %v4684_v15 = vpop.f32.mrf.mxu1 }
 0x135   : > { %v4007_v53 = vsub.f32 %v5357_v16, %v3957_v50  ;;  %v4108_v55 = vadd.f32 %v4058_v0, %v5357_v16  ;;  %v4008_v54 = vsub.f32 %v5359_v21, %v3958_v51  ;;  %v4109_v56 = vadd.f32 %v4059_v48, %v5359_v21 }
 0x137   : > { %4033 = vst.msk [vmem:[%s5398_s28 + $0x1c] sm:$0x3] %vm4025_vm2, %v4007_v53  ;;  %4034 = vst.msk [vmem:[%s5398_s28 + $0x20] sm:$0x3] %vm4025_vm2, %v4008_v54 }
 0x138   : > { %4134 = vst.msk [vmem:[%s5398_s28 + $0x1c] sm:$0xc] %vm4126_vm3, %v4108_v55  ;;  %4135 = vst.msk [vmem:[%s5398_s28 + $0x20] sm:$0xc] %vm4126_vm3, %v4109_v56  ;;  %v2871_v57 = vpop.f32.mrf.mxu0  ;;  %v2941_v58 = vpop.f32.mrf.mxu1 }
 0x139   : > { %v3959_v59 = vrot.slane %v2871_v57, 2  ;;  %v4060_v16 = vrot.slane %v2871_v57, 6  ;;  %v3960_v60 = vrot.slane %v2941_v58, 2  ;;  %v4061_v61 = vrot.slane %v2941_v58, 6 }
 0x13a   : > { %v4691_v62 = vpop.f32.mrf.mxu0  ;;  %v4698_v21 = vpop.f32.mrf.mxu1 }
 0x13b   : > { %v4009_v2 = vsub.f32 %v5361_v22, %v3959_v59  ;;  %v4110_v3 = vadd.f32 %v4060_v16, %v5361_v22  ;;  %v4010_v63 = vsub.f32 %v5363_v5, %v3960_v60  ;;  %v4111_v8 = vadd.f32 %v4061_v61, %v5363_v5 }
 0x13d   : > { %4035 = vst.msk [vmem:[%s5398_s28 + $0x24] sm:$0x3] %vm4025_vm2, %v4009_v2  ;;  %4036 = vst.msk [vmem:[%s5398_s28 + $0x28] sm:$0x3] %vm4025_vm2, %v4010_v63 }
 0x13e   : > { %4136 = vst.msk [vmem:[%s5398_s28 + $0x24] sm:$0xc] %vm4126_vm3, %v4110_v3  ;;  %4137 = vst.msk [vmem:[%s5398_s28 + $0x28] sm:$0xc] %vm4126_vm3, %v4111_v8  ;;  %v3011_v9 = vpop.f32.mrf.mxu0  ;;  %v3081_v14 = vpop.f32.mrf.mxu1 }
 0x13f   : > { %v3961_v13 = vrot.slane %v3011_v9, 2  ;;  %v4062_v22 = vrot.slane %v3011_v9, 6  ;;  %v3962_v1 = vrot.slane %v3081_v14, 2  ;;  %v4063_v19 = vrot.slane %v3081_v14, 6 }
 0x140   : > { %v4705_v20 = vpop.f32.mrf.mxu0  ;;  %v4712_v5 = vpop.f32.mrf.mxu1 }
 0x141   : > { %v4011_v25 = vsub.f32 %v5365_v27, %v3961_v13  ;;  %v4112_v4 = vadd.f32 %v4062_v22, %v5365_v27  ;;  %v4012_v26 = vsub.f32 %v5367_v6, %v3962_v1  ;;  %v4113_v28 = vadd.f32 %v4063_v19, %v5367_v6 }
 0x143   : > { %4037 = vst.msk [vmem:[%s5398_s28 + $0x2c] sm:$0x3] %vm4025_vm2, %v4011_v25  ;;  %4038 = vst.msk [vmem:[%s5398_s28 + $0x30] sm:$0x3] %vm4025_vm2, %v4012_v26 }
 0x144   : > { %4138 = vst.msk [vmem:[%s5398_s28 + $0x2c] sm:$0xc] %vm4126_vm3, %v4112_v4  ;;  %4139 = vst.msk [vmem:[%s5398_s28 + $0x30] sm:$0xc] %vm4126_vm3, %v4113_v28  ;;  %v3151_v31 = vpop.f32.mrf.mxu0  ;;  %v3221_v32 = vpop.f32.mrf.mxu1 }
 0x145   : > { %v3963_v33 = vrot.slane %v3151_v31, 2  ;;  %v4064_v27 = vrot.slane %v3151_v31, 6  ;;  %v3964_v34 = vrot.slane %v3221_v32, 2  ;;  %v4065_v37 = vrot.slane %v3221_v32, 6 }
 0x146   : > { %v4719_v7 = vpop.f32.mrf.mxu0  ;;  %v4726_v6 = vpop.f32.mrf.mxu1 }
 0x147   : > { %v4013_v38 = vsub.f32 %v5369_v11, %v3963_v33  ;;  %v4114_v39 = vadd.f32 %v4064_v27, %v5369_v11  ;;  %v4014_v40 = vsub.f32 %v5371_v12, %v3964_v34  ;;  %v4115_v10 = vadd.f32 %v4065_v37, %v5371_v12 }
 0x149   : > { %4039 = vst.msk [vmem:[%s5398_s28 + $0x34] sm:$0x3] %vm4025_vm2, %v4013_v38  ;;  %4040 = vst.msk [vmem:[%s5398_s28 + $0x38] sm:$0x3] %vm4025_vm2, %v4014_v40 }
 0x14a   : > { %4140 = vst.msk [vmem:[%s5398_s28 + $0x34] sm:$0xc] %vm4126_vm3, %v4114_v39  ;;  %4141 = vst.msk [vmem:[%s5398_s28 + $0x38] sm:$0xc] %vm4126_vm3, %v4115_v10  ;;  %v3291_v43 = vpop.f32.mrf.mxu0  ;;  %v3361_v44 = vpop.f32.mrf.mxu1 }
 0x14b   : > { %v3965_v45 = vrot.slane %v3291_v43, 2  ;;  %v4066_v11 = vrot.slane %v3291_v43, 6  ;;  %v3966_v46 = vrot.slane %v3361_v44, 2  ;;  %v4067_v49 = vrot.slane %v3361_v44, 6 }
 0x14c   : > { %v4733_v47 = vpop.f32.mrf.mxu0  ;;  %v4740_v12 = vpop.f32.mrf.mxu1 }
 0x14d   : > { %v4015_v50 = vsub.f32 %v5373_v17, %v3965_v45  ;;  %v4116_v0 = vadd.f32 %v4066_v11, %v5373_v17  ;;  %v4016_v51 = vsub.f32 %v5375_v18, %v3966_v46  ;;  %v4117_v48 = vadd.f32 %v4067_v49, %v5375_v18 }
 0x14f   : > { %4041 = vst.msk [vmem:[%s5398_s28 + $0x3c] sm:$0x3] %vm4025_vm2, %v4015_v50  ;;  %4042 = vst.msk [vmem:[%s5398_s28 + $0x40] sm:$0x3] %vm4025_vm2, %v4016_v51 }
 0x150   : > { %4142 = vst.msk [vmem:[%s5398_s28 + $0x3c] sm:$0xc] %vm4126_vm3, %v4116_v0  ;;  %4143 = vst.msk [vmem:[%s5398_s28 + $0x40] sm:$0xc] %vm4126_vm3, %v4117_v48  ;;  %v3431_v52 = vpop.f32.mrf.mxu0  ;;  %v3501_v15 = vpop.f32.mrf.mxu1 }
 0x151   : > { %v3967_v53 = vrot.slane %v3431_v52, 2  ;;  %v4068_v17 = vrot.slane %v3431_v52, 6  ;;  %v3968_v55 = vrot.slane %v3501_v15, 2  ;;  %v4069_v54 = vrot.slane %v3501_v15, 6 }
 0x152   : > { %v4747_v56 = vpop.f32.mrf.mxu0  ;;  %v4754_v18 = vpop.f32.mrf.mxu1 }
 0x153   : > { %v4017_v57 = vsub.f32 %v5377_v23, %v3967_v53  ;;  %v4118_v58 = vadd.f32 %v4068_v17, %v5377_v23  ;;  %v4018_v59 = vsub.f32 %v5379_v24, %v3968_v55  ;;  %v4119_v16 = vadd.f32 %v4069_v54, %v5379_v24 }
 0x155   : > { %4043 = vst.msk [vmem:[%s5398_s28 + $0x44] sm:$0x3] %vm4025_vm2, %v4017_v57  ;;  %4044 = vst.msk [vmem:[%s5398_s28 + $0x48] sm:$0x3] %vm4025_vm2, %v4018_v59 }
 0x156   : > { %4144 = vst.msk [vmem:[%s5398_s28 + $0x44] sm:$0xc] %vm4126_vm3, %v4118_v58  ;;  %4145 = vst.msk [vmem:[%s5398_s28 + $0x48] sm:$0xc] %vm4126_vm3, %v4119_v16  ;;  %v3571_v60 = vpop.f32.mrf.mxu0  ;;  %v3641_v61 = vpop.f32.mrf.mxu1 }
 0x157   : > { %v3969_v62 = vrot.slane %v3571_v60, 2  ;;  %v4070_v23 = vrot.slane %v3571_v60, 6  ;;  %v3970_v21 = vrot.slane %v3641_v61, 2  ;;  %v4071_v2 = vrot.slane %v3641_v61, 6 }
 0x158   : > { %v4761_v3 = vpop.f32.mrf.mxu0  ;;  %v4768_v24 = vpop.f32.mrf.mxu1 }
 0x159   : > { %v4019_v63 = vsub.f32 %v5381_v29, %v3969_v62  ;;  %v4120_v8 = vadd.f32 %v4070_v23, %v5381_v29  ;;  %v4020_v9 = vsub.f32 %v5383_v30, %v3970_v21  ;;  %v4121_v14 = vadd.f32 %v4071_v2, %v5383_v30 }
 0x15b   : > { %4045 = vst.msk [vmem:[%s5398_s28 + $0x4c] sm:$0x3] %vm4025_vm2, %v4019_v63  ;;  %4046 = vst.msk [vmem:[%s5398_s28 + $0x50] sm:$0x3] %vm4025_vm2, %v4020_v9 }
 0x15c   : > { %4146 = vst.msk [vmem:[%s5398_s28 + $0x4c] sm:$0xc] %vm4126_vm3, %v4120_v8  ;;  %4147 = vst.msk [vmem:[%s5398_s28 + $0x50] sm:$0xc] %vm4126_vm3, %v4121_v14  ;;  %v3711_v13 = vpop.f32.mrf.mxu0  ;;  %v3781_v22 = vpop.f32.mrf.mxu1 }
 0x15d   : > { %v3971_v1 = vrot.slane %v3711_v13, 2  ;;  %v4072_v29 = vrot.slane %v3711_v13, 6  ;;  %v3972_v19 = vrot.slane %v3781_v22, 2  ;;  %v4073_v20 = vrot.slane %v3781_v22, 6 }
 0x15e   : > { %v4775_v5 = vpop.f32.mrf.mxu0  ;;  %v4782_v30 = vpop.f32.mrf.mxu1 }
 0x15f   : > { %v4021_v25 = vsub.f32 %v5385_v35, %v3971_v1  ;;  %v4122_v4 = vadd.f32 %v4072_v29, %v5385_v35  ;;  %v4022_v26 = vsub.f32 %v5387_v36, %v3972_v19  ;;  %v4123_v28 = vadd.f32 %v4073_v20, %v5387_v36 }
 0x161   : > { %4047 = vst.msk [vmem:[%s5398_s28 + $0x54] sm:$0x3] %vm4025_vm2, %v4021_v25  ;;  %4048 = vst.msk [vmem:[%s5398_s28 + $0x58] sm:$0x3] %vm4025_vm2, %v4022_v26 }
 0x162   : > { %4148 = vst.msk [vmem:[%s5398_s28 + $0x54] sm:$0xc] %vm4126_vm3, %v4122_v4  ;;  %4149 = vst.msk [vmem:[%s5398_s28 + $0x58] sm:$0xc] %vm4126_vm3, %v4123_v28  ;;  %v3851_v31 = vpop.f32.mrf.mxu0  ;;  %v3921_v32 = vpop.f32.mrf.mxu1 }
 0x163   : > { %v3973_v33 = vrot.slane %v3851_v31, 2  ;;  %v4074_v35 = vrot.slane %v3851_v31, 6  ;;  %v3974_v27 = vrot.slane %v3921_v32, 2  ;;  %v4075_v34 = vrot.slane %v3921_v32, 6 }
 0x164   : > { %v4789_v37 = vpop.f32.mrf.mxu0  ;;  %v4796_v36 = vpop.f32.mrf.mxu1 }
 0x165   : > { %v4023_v7 = vsub.f32 %v5389_v41, %v3973_v33  ;;  %v4124_v6 = vadd.f32 %v4074_v35, %v5389_v41  ;;  %v4024_v38 = vsub.f32 %v5391_v42, %v3974_v27  ;;  %v4125_v39 = vadd.f32 %v4075_v34, %v5391_v42 }
 0x167   : > { %4049 = vst.msk [vmem:[%s5398_s28 + $0x5c] sm:$0x3] %vm4025_vm2, %v4023_v7  ;;  %4050 = vst.msk [vmem:[%s5398_s28 + $0x60] sm:$0x3] %vm4025_vm2, %v4024_v38 }
 0x168   : > { %4150 = vst.msk [vmem:[%s5398_s28 + $0x5c] sm:$0xc] %vm4126_vm3, %v4124_v6  ;;  %4151 = vst.msk [vmem:[%s5398_s28 + $0x60] sm:$0xc] %vm4126_vm3, %v4125_v39 }
 0x169 PF: > { %s13_s12 = sadd.s32 1, %s4813_s12  }
 0x16a   : > { %p10_p4 = scmp.ge.s32.totalorder %s13_s12, 4  }
 0x16c   :  { %12 = sbr.rel (!%p10_p4) target bundleno = 1 (0x1), region = 68 }

// kernel: reverse.4
= control target key start
LH: loop header
LB: loop body
LE: loop exit
PB: predicated region body
PF: predicated region fallthrough
CT: control target
= control target key end

     0   :  { %s1256_s0 = inlined_call_operand.vmem [shape: f32[2,32,28,13], index: 0, kind: input, shape index: {}]   ;;  %s1257_s1 = inlined_call_operand.vmem [shape: f32[2,32,28,13], index: 1, kind: output, shape index: {}]  }
   0x1   :  { %v416_v0 = vld [vmem:[%s1256_s0 + $0x180] sm:$0xff]  ;;  %v466_v26 = vld [vmem:[%s1256_s0 + $0x188] sm:$0xff]  ;;  %v518_v52 = vld [vmem:[%s1256_s0 + $0x190] sm:$0xff] }
   0x2   :  { %v417_v1 = vld [vmem:[%s1256_s0 + $0x320] sm:$0xff]  ;;  %4 = vst [vmem:[%s1257_s1] sm:$0xff] %v416_v0  ;;  %467 = vst [vmem:[%s1257_s1 + $0x8] sm:$0xff] %v466_v26  ;;  %v468_v27 = vld [vmem:[%s1256_s0 + $0x328] sm:$0xff] }
   0x3   :  { %v419_v2 = vld [vmem:[%s1256_s0 + $0x160] sm:$0xff]  ;;  %418 = vst [vmem:[%s1257_s1 + $0x1a0] sm:$0xff] %v417_v1  ;;  %v470_v28 = vld [vmem:[%s1256_s0 + $0x168] sm:$0xff]  ;;  %469 = vst [vmem:[%s1257_s1 + $0x1a8] sm:$0xff] %v468_v27 }
   0x4   :  { %420 = vst [vmem:[%s1257_s1 + $0x20] sm:$0xff] %v419_v2  ;;  %v421_v3 = vld [vmem:[%s1256_s0 + $0x300] sm:$0xff]  ;;  %v472_v29 = vld [vmem:[%s1256_s0 + $0x308] sm:$0xff]  ;;  %471 = vst [vmem:[%s1257_s1 + $0x28] sm:$0xff] %v470_v28 }
   0x5   :  { %v423_v4 = vld [vmem:[%s1256_s0 + $0x140] sm:$0xff]  ;;  %422 = vst [vmem:[%s1257_s1 + $0x1c0] sm:$0xff] %v421_v3  ;;  %473 = vst [vmem:[%s1257_s1 + $0x1c8] sm:$0xff] %v472_v29  ;;  %v474_v30 = vld [vmem:[%s1256_s0 + $0x148] sm:$0xff] }
   0x6   :  { %v425_v5 = vld [vmem:[%s1256_s0 + $0x2e0] sm:$0xff]  ;;  %424 = vst [vmem:[%s1257_s1 + $0x40] sm:$0xff] %v423_v4  ;;  %v476_v31 = vld [vmem:[%s1256_s0 + $0x2e8] sm:$0xff]  ;;  %475 = vst [vmem:[%s1257_s1 + $0x48] sm:$0xff] %v474_v30 }
   0x7   :  { %426 = vst [vmem:[%s1257_s1 + $0x1e0] sm:$0xff] %v425_v5  ;;  %v427_v6 = vld [vmem:[%s1256_s0 + $0x120] sm:$0xff]  ;;  %v478_v32 = vld [vmem:[%s1256_s0 + $0x128] sm:$0xff]  ;;  %477 = vst [vmem:[%s1257_s1 + $0x1e8] sm:$0xff] %v476_v31 }
   0x8   :  { %v429_v7 = vld [vmem:[%s1256_s0 + $0x2c0] sm:$0xff]  ;;  %428 = vst [vmem:[%s1257_s1 + $0x60] sm:$0xff] %v427_v6  ;;  %479 = vst [vmem:[%s1257_s1 + $0x68] sm:$0xff] %v478_v32  ;;  %v480_v33 = vld [vmem:[%s1256_s0 + $0x2c8] sm:$0xff] }
   0x9   :  { %v431_v8 = vld [vmem:[%s1256_s0 + $0x100] sm:$0xff]  ;;  %430 = vst [vmem:[%s1257_s1 + $0x200] sm:$0xff] %v429_v7  ;;  %v482_v34 = vld [vmem:[%s1256_s0 + $0x108] sm:$0xff]  ;;  %481 = vst [vmem:[%s1257_s1 + $0x208] sm:$0xff] %v480_v33 }
   0xa   :  { %432 = vst [vmem:[%s1257_s1 + $0x80] sm:$0xff] %v431_v8  ;;  %v433_v9 = vld [vmem:[%s1256_s0 + $0x2a0] sm:$0xff]  ;;  %v484_v35 = vld [vmem:[%s1256_s0 + $0x2a8] sm:$0xff]  ;;  %483 = vst [vmem:[%s1257_s1 + $0x88] sm:$0xff] %v482_v34 }
   0xb   :  { %v435_v10 = vld [vmem:[%s1256_s0 + $0xe0] sm:$0xff]  ;;  %434 = vst [vmem:[%s1257_s1 + $0x220] sm:$0xff] %v433_v9  ;;  %485 = vst [vmem:[%s1257_s1 + $0x228] sm:$0xff] %v484_v35  ;;  %v486_v36 = vld [vmem:[%s1256_s0 + $0xe8] sm:$0xff] }
   0xc   :  { %v437_v11 = vld [vmem:[%s1256_s0 + $0x280] sm:$0xff]  ;;  %436 = vst [vmem:[%s1257_s1 + $0xa0] sm:$0xff] %v435_v10  ;;  %v488_v37 = vld [vmem:[%s1256_s0 + $0x288] sm:$0xff]  ;;  %487 = vst [vmem:[%s1257_s1 + $0xa8] sm:$0xff] %v486_v36 }
   0xd   :  { %438 = vst [vmem:[%s1257_s1 + $0x240] sm:$0xff] %v437_v11  ;;  %v439_v12 = vld [vmem:[%s1256_s0 + $0xc0] sm:$0xff]  ;;  %v490_v38 = vld [vmem:[%s1256_s0 + $0xc8] sm:$0xff]  ;;  %489 = vst [vmem:[%s1257_s1 + $0x248] sm:$0xff] %v488_v37 }
   0xe   :  { %v441_v13 = vld [vmem:[%s1256_s0 + $0x260] sm:$0xff]  ;;  %440 = vst [vmem:[%s1257_s1 + $0xc0] sm:$0xff] %v439_v12  ;;  %491 = vst [vmem:[%s1257_s1 + $0xc8] sm:$0xff] %v490_v38  ;;  %v492_v39 = vld [vmem:[%s1256_s0 + $0x268] sm:$0xff] }
   0xf   :  { %v443_v14 = vld [vmem:[%s1256_s0 + $0xa0] sm:$0xff]  ;;  %442 = vst [vmem:[%s1257_s1 + $0x260] sm:$0xff] %v441_v13  ;;  %v494_v40 = vld [vmem:[%s1256_s0 + $0xa8] sm:$0xff]  ;;  %493 = vst [vmem:[%s1257_s1 + $0x268] sm:$0xff] %v492_v39 }
  0x10   :  { %444 = vst [vmem:[%s1257_s1 + $0xe0] sm:$0xff] %v443_v14  ;;  %v445_v15 = vld [vmem:[%s1256_s0 + $0x240] sm:$0xff]  ;;  %v496_v41 = vld [vmem:[%s1256_s0 + $0x248] sm:$0xff]  ;;  %495 = vst [vmem:[%s1257_s1 + $0xe8] sm:$0xff] %v494_v40 }
  0x11   :  { %v447_v16 = vld [vmem:[%s1256_s0 + $0x80] sm:$0xff]  ;;  %446 = vst [vmem:[%s1257_s1 + $0x280] sm:$0xff] %v445_v15  ;;  %497 = vst [vmem:[%s1257_s1 + $0x288] sm:$0xff] %v496_v41  ;;  %v498_v42 = vld [vmem:[%s1256_s0 + $0x88] sm:$0xff] }
  0x12   :  { %v449_v17 = vld [vmem:[%s1256_s0 + $0x220] sm:$0xff]  ;;  %448 = vst [vmem:[%s1257_s1 + $0x100] sm:$0xff] %v447_v16  ;;  %v500_v43 = vld [vmem:[%s1256_s0 + $0x228] sm:$0xff]  ;;  %499 = vst [vmem:[%s1257_s1 + $0x108] sm:$0xff] %v498_v42 }
  0x13   :  { %450 = vst [vmem:[%s1257_s1 + $0x2a0] sm:$0xff] %v449_v17  ;;  %v451_v18 = vld [vmem:[%s1256_s0 + $0x60] sm:$0xff]  ;;  %v502_v44 = vld [vmem:[%s1256_s0 + $0x68] sm:$0xff]  ;;  %501 = vst [vmem:[%s1257_s1 + $0x2a8] sm:$0xff] %v500_v43 }
  0x14   :  { %v453_v19 = vld [vmem:[%s1256_s0 + $0x200] sm:$0xff]  ;;  %452 = vst [vmem:[%s1257_s1 + $0x120] sm:$0xff] %v451_v18  ;;  %503 = vst [vmem:[%s1257_s1 + $0x128] sm:$0xff] %v502_v44  ;;  %v504_v45 = vld [vmem:[%s1256_s0 + $0x208] sm:$0xff] }
  0x15   :  { %v455_v20 = vld [vmem:[%s1256_s0 + $0x40] sm:$0xff]  ;;  %454 = vst [vmem:[%s1257_s1 + $0x2c0] sm:$0xff] %v453_v19  ;;  %v506_v46 = vld [vmem:[%s1256_s0 + $0x48] sm:$0xff]  ;;  %505 = vst [vmem:[%s1257_s1 + $0x2c8] sm:$0xff] %v504_v45 }
  0x16   :  { %456 = vst [vmem:[%s1257_s1 + $0x140] sm:$0xff] %v455_v20  ;;  %v457_v21 = vld [vmem:[%s1256_s0 + $0x1e0] sm:$0xff]  ;;  %v508_v47 = vld [vmem:[%s1256_s0 + $0x1e8] sm:$0xff]  ;;  %507 = vst [vmem:[%s1257_s1 + $0x148] sm:$0xff] %v506_v46 }
  0x17   :  { %v459_v22 = vld [vmem:[%s1256_s0 + $0x20] sm:$0xff]  ;;  %458 = vst [vmem:[%s1257_s1 + $0x2e0] sm:$0xff] %v457_v21  ;;  %509 = vst [vmem:[%s1257_s1 + $0x2e8] sm:$0xff] %v508_v47  ;;  %v510_v48 = vld [vmem:[%s1256_s0 + $0x28] sm:$0xff] }
  0x18   :  { %v461_v23 = vld [vmem:[%s1256_s0 + $0x1c0] sm:$0xff]  ;;  %460 = vst [vmem:[%s1257_s1 + $0x160] sm:$0xff] %v459_v22  ;;  %v512_v49 = vld [vmem:[%s1256_s0 + $0x1c8] sm:$0xff]  ;;  %511 = vst [vmem:[%s1257_s1 + $0x168] sm:$0xff] %v510_v48 }
  0x19   :  { %462 = vst [vmem:[%s1257_s1 + $0x300] sm:$0xff] %v461_v23  ;;  %v97_v24 = vld [vmem:[%s1256_s0] sm:$0xff]  ;;  %v514_v50 = vld [vmem:[%s1256_s0 + $0x8] sm:$0xff]  ;;  %513 = vst [vmem:[%s1257_s1 + $0x308] sm:$0xff] %v512_v49 }
  0x1a   :  { %v464_v25 = vld [vmem:[%s1256_s0 + $0x1a0] sm:$0xff]  ;;  %463 = vst [vmem:[%s1257_s1 + $0x180] sm:$0xff] %v97_v24  ;;  %515 = vst [vmem:[%s1257_s1 + $0x188] sm:$0xff] %v514_v50  ;;  %v516_v51 = vld [vmem:[%s1256_s0 + $0x1a8] sm:$0xff] }
  0x1b   :  { %465 = vst [vmem:[%s1257_s1 + $0x320] sm:$0xff] %v464_v25  ;;  %v520_v53 = vld [vmem:[%s1256_s0 + $0x330] sm:$0xff]  ;;  %517 = vst [vmem:[%s1257_s1 + $0x328] sm:$0xff] %v516_v51  ;;  %v570_v14 = vld [vmem:[%s1256_s0 + $0x198] sm:$0xff] }
  0x1c   :  { %519 = vst [vmem:[%s1257_s1 + $0x10] sm:$0xff] %v518_v52  ;;  %521 = vst [vmem:[%s1257_s1 + $0x1b0] sm:$0xff] %v520_v53  ;;  %v522_v54 = vld [vmem:[%s1256_s0 + $0x170] sm:$0xff]  ;;  %v572_v15 = vld [vmem:[%s1256_s0 + $0x338] sm:$0xff] }
  0x1d   :  { %v524_v55 = vld [vmem:[%s1256_s0 + $0x310] sm:$0xff]  ;;  %523 = vst [vmem:[%s1257_s1 + $0x30] sm:$0xff] %v522_v54  ;;  %v574_v16 = vld [vmem:[%s1256_s0 + $0x178] sm:$0xff]  ;;  %571 = vst [vmem:[%s1257_s1 + $0x18] sm:$0xff] %v570_v14 }
  0x1e   :  { %v526_v56 = vld [vmem:[%s1256_s0 + $0x150] sm:$0xff]  ;;  %525 = vst [vmem:[%s1257_s1 + $0x1d0] sm:$0xff] %v524_v55  ;;  %573 = vst [vmem:[%s1257_s1 + $0x1b8] sm:$0xff] %v572_v15  ;;  %v576_v17 = vld [vmem:[%s1256_s0 + $0x318] sm:$0xff] }
  0x1f   :  { %527 = vst [vmem:[%s1257_s1 + $0x50] sm:$0xff] %v526_v56  ;;  %v528_v57 = vld [vmem:[%s1256_s0 + $0x2f0] sm:$0xff]  ;;  %575 = vst [vmem:[%s1257_s1 + $0x38] sm:$0xff] %v574_v16  ;;  %v578_v18 = vld [vmem:[%s1256_s0 + $0x158] sm:$0xff] }
  0x20   :  { %v530_v58 = vld [vmem:[%s1256_s0 + $0x130] sm:$0xff]  ;;  %529 = vst [vmem:[%s1257_s1 + $0x1f0] sm:$0xff] %v528_v57  ;;  %v580_v19 = vld [vmem:[%s1256_s0 + $0x2f8] sm:$0xff]  ;;  %577 = vst [vmem:[%s1257_s1 + $0x1d8] sm:$0xff] %v576_v17 }
  0x21   :  { %v532_v59 = vld [vmem:[%s1256_s0 + $0x2d0] sm:$0xff]  ;;  %531 = vst [vmem:[%s1257_s1 + $0x70] sm:$0xff] %v530_v58  ;;  %579 = vst [vmem:[%s1257_s1 + $0x58] sm:$0xff] %v578_v18  ;;  %v582_v20 = vld [vmem:[%s1256_s0 + $0x138] sm:$0xff] }
  0x22   :  { %533 = vst [vmem:[%s1257_s1 + $0x210] sm:$0xff] %v532_v59  ;;  %v534_v60 = vld [vmem:[%s1256_s0 + $0x110] sm:$0xff]  ;;  %581 = vst [vmem:[%s1257_s1 + $0x1f8] sm:$0xff] %v580_v19  ;;  %v584_v21 = vld [vmem:[%s1256_s0 + $0x2d8] sm:$0xff] }
  0x23   :  { %v536_v61 = vld [vmem:[%s1256_s0 + $0x2b0] sm:$0xff]  ;;  %535 = vst [vmem:[%s1257_s1 + $0x90] sm:$0xff] %v534_v60  ;;  %v586_v22 = vld [vmem:[%s1256_s0 + $0x118] sm:$0xff]  ;;  %583 = vst [vmem:[%s1257_s1 + $0x78] sm:$0xff] %v582_v20 }
  0x24   :  { %v538_v62 = vld [vmem:[%s1256_s0 + $0xf0] sm:$0xff]  ;;  %537 = vst [vmem:[%s1257_s1 + $0x230] sm:$0xff] %v536_v61  ;;  %585 = vst [vmem:[%s1257_s1 + $0x218] sm:$0xff] %v584_v21  ;;  %v588_v23 = vld [vmem:[%s1256_s0 + $0x2b8] sm:$0xff] }
  0x25   :  { %539 = vst [vmem:[%s1257_s1 + $0xb0] sm:$0xff] %v538_v62  ;;  %v540_v63 = vld [vmem:[%s1256_s0 + $0x290] sm:$0xff]  ;;  %587 = vst [vmem:[%s1257_s1 + $0x98] sm:$0xff] %v586_v22  ;;  %v590_v24 = vld [vmem:[%s1256_s0 + $0xf8] sm:$0xff] }
  0x26   :  { %v542_v0 = vld [vmem:[%s1256_s0 + $0xd0] sm:$0xff]  ;;  %541 = vst [vmem:[%s1257_s1 + $0x250] sm:$0xff] %v540_v63  ;;  %v592_v25 = vld [vmem:[%s1256_s0 + $0x298] sm:$0xff]  ;;  %589 = vst [vmem:[%s1257_s1 + $0x238] sm:$0xff] %v588_v23 }
  0x27   :  { %v544_v1 = vld [vmem:[%s1256_s0 + $0x270] sm:$0xff]  ;;  %543 = vst [vmem:[%s1257_s1 + $0xd0] sm:$0xff] %v542_v0  ;;  %591 = vst [vmem:[%s1257_s1 + $0xb8] sm:$0xff] %v590_v24  ;;  %v594_v26 = vld [vmem:[%s1256_s0 + $0xd8] sm:$0xff] }
  0x28   :  { %545 = vst [vmem:[%s1257_s1 + $0x270] sm:$0xff] %v544_v1  ;;  %v546_v2 = vld [vmem:[%s1256_s0 + $0xb0] sm:$0xff]  ;;  %593 = vst [vmem:[%s1257_s1 + $0x258] sm:$0xff] %v592_v25  ;;  %v596_v27 = vld [vmem:[%s1256_s0 + $0x278] sm:$0xff] }
  0x29   :  { %v548_v3 = vld [vmem:[%s1256_s0 + $0x250] sm:$0xff]  ;;  %547 = vst [vmem:[%s1257_s1 + $0xf0] sm:$0xff] %v546_v2  ;;  %v598_v28 = vld [vmem:[%s1256_s0 + $0xb8] sm:$0xff]  ;;  %595 = vst [vmem:[%s1257_s1 + $0xd8] sm:$0xff] %v594_v26 }
  0x2a   :  { %v550_v4 = vld [vmem:[%s1256_s0 + $0x90] sm:$0xff]  ;;  %549 = vst [vmem:[%s1257_s1 + $0x290] sm:$0xff] %v548_v3  ;;  %597 = vst [vmem:[%s1257_s1 + $0x278] sm:$0xff] %v596_v27  ;;  %v600_v29 = vld [vmem:[%s1256_s0 + $0x258] sm:$0xff] }
  0x2b   :  { %551 = vst [vmem:[%s1257_s1 + $0x110] sm:$0xff] %v550_v4  ;;  %v552_v5 = vld [vmem:[%s1256_s0 + $0x230] sm:$0xff]  ;;  %599 = vst [vmem:[%s1257_s1 + $0xf8] sm:$0xff] %v598_v28  ;;  %v602_v30 = vld [vmem:[%s1256_s0 + $0x98] sm:$0xff] }
  0x2c   :  { %v554_v6 = vld [vmem:[%s1256_s0 + $0x70] sm:$0xff]  ;;  %553 = vst [vmem:[%s1257_s1 + $0x2b0] sm:$0xff] %v552_v5  ;;  %v604_v31 = vld [vmem:[%s1256_s0 + $0x238] sm:$0xff]  ;;  %601 = vst [vmem:[%s1257_s1 + $0x298] sm:$0xff] %v600_v29 }
  0x2d   :  { %v556_v7 = vld [vmem:[%s1256_s0 + $0x210] sm:$0xff]  ;;  %555 = vst [vmem:[%s1257_s1 + $0x130] sm:$0xff] %v554_v6  ;;  %603 = vst [vmem:[%s1257_s1 + $0x118] sm:$0xff] %v602_v30  ;;  %v606_v32 = vld [vmem:[%s1256_s0 + $0x78] sm:$0xff] }
  0x2e   :  { %557 = vst [vmem:[%s1257_s1 + $0x2d0] sm:$0xff] %v556_v7  ;;  %v558_v8 = vld [vmem:[%s1256_s0 + $0x50] sm:$0xff]  ;;  %605 = vst [vmem:[%s1257_s1 + $0x2b8] sm:$0xff] %v604_v31  ;;  %v608_v33 = vld [vmem:[%s1256_s0 + $0x218] sm:$0xff] }
  0x2f   :  { %v560_v9 = vld [vmem:[%s1256_s0 + $0x1f0] sm:$0xff]  ;;  %559 = vst [vmem:[%s1257_s1 + $0x150] sm:$0xff] %v558_v8  ;;  %v610_v34 = vld [vmem:[%s1256_s0 + $0x58] sm:$0xff]  ;;  %607 = vst [vmem:[%s1257_s1 + $0x138] sm:$0xff] %v606_v32 }
  0x30   :  { %v562_v10 = vld [vmem:[%s1256_s0 + $0x30] sm:$0xff]  ;;  %561 = vst [vmem:[%s1257_s1 + $0x2f0] sm:$0xff] %v560_v9  ;;  %609 = vst [vmem:[%s1257_s1 + $0x2d8] sm:$0xff] %v608_v33  ;;  %v612_v35 = vld [vmem:[%s1256_s0 + $0x1f8] sm:$0xff] }
  0x31   :  { %563 = vst [vmem:[%s1257_s1 + $0x170] sm:$0xff] %v562_v10  ;;  %v564_v11 = vld [vmem:[%s1256_s0 + $0x1d0] sm:$0xff]  ;;  %611 = vst [vmem:[%s1257_s1 + $0x158] sm:$0xff] %v610_v34  ;;  %v614_v36 = vld [vmem:[%s1256_s0 + $0x38] sm:$0xff] }
  0x32   :  { %v566_v12 = vld [vmem:[%s1256_s0 + $0x10] sm:$0xff]  ;;  %565 = vst [vmem:[%s1257_s1 + $0x310] sm:$0xff] %v564_v11  ;;  %v616_v37 = vld [vmem:[%s1256_s0 + $0x1d8] sm:$0xff]  ;;  %613 = vst [vmem:[%s1257_s1 + $0x2f8] sm:$0xff] %v612_v35 }
  0x33   :  { %v568_v13 = vld [vmem:[%s1256_s0 + $0x1b0] sm:$0xff]  ;;  %567 = vst [vmem:[%s1257_s1 + $0x190] sm:$0xff] %v566_v12  ;;  %615 = vst [vmem:[%s1257_s1 + $0x178] sm:$0xff] %v614_v36  ;;  %v618_v38 = vld [vmem:[%s1256_s0 + $0x18] sm:$0xff] }
  0x34   :  { %569 = vst [vmem:[%s1257_s1 + $0x330] sm:$0xff] %v568_v13  ;;  %617 = vst [vmem:[%s1257_s1 + $0x318] sm:$0xff] %v616_v37  ;;  %v620_v39 = vld [vmem:[%s1256_s0 + $0x1b8] sm:$0xff] }
  0x35   :  { %619 = vst [vmem:[%s1257_s1 + $0x198] sm:$0xff] %v618_v38  ;;  %621 = vst [vmem:[%s1257_s1 + $0x338] sm:$0xff] %v620_v39 }

// kernel: net2d_forward.6
= control target key start
LH: loop header
LB: loop body
LE: loop exit
PB: predicated region body
PF: predicated region fallthrough
CT: control target
= control target key end

     0   :  { %s5237_s12 = smov 0   ;;  %s6155_s0 = inlined_call_operand.vmem [shape: f32[50,4,32], index: 0, kind: input, shape index: {}]   ;;  %s6156_s1 = inlined_call_operand.vmem [shape: f32[50,32,64], index: 1, kind: input, shape index: {}]   ;;  %s6157_s2 = inlined_call_operand.vmem [shape: f32[50,32,64], index: 2, kind: input, shape index: {}]   ;;  %s6158_s3 = inlined_call_operand.vmem [shape: f32[50,4,64], index: 3, kind: output, shape index: {}]  }
   0x1 LB: > { %s4332_s13 = sadd.s32 4294967295, %s5213_s12   ;;  %p4336_p0 = scmp.ge.s32.totalorder %s5213_s12, 1  ;;  %s5213_s12 = sphi %s5237_s12, %s13_s12  }
   0x2   : > { %p162_p1 = scmp.lt.s32.totalorder %s5213_s12, 3 }
   0x4   : > { %p163_p2 = pnand %p4336_p0, %p162_p1 }
   0x5   : > { %s198_s14 = smul.u32 (!%p163_p2), 25, %s4332_s13 }
   0x6   : > { %166 = sbr.rel (%p163_p2) target bundleno = 462 (0x1ce), region = 32 }
   0x7   : > { %p199_p3 = scmp.lt.s32.totalorder (!%p163_p2), %s198_s14, 49 }
   0xb   : > { %v5215_v0 = vmov 0.0   ;;  %vm5216_vm0 = vmmov 0   ;;  %s6160_s14 = smov (!%p199_p3, %s198_s14), 49  ;;  %vm449_vm1 = vcmask 261120   ;;  %vm4125_vm2 = vcmask 517120  }
   0xc   : > { %4647 = vmatprep.subr.mxu0 %v5215_v0  ;;  %4658 = vmatprep.subr.mxu1 %v5215_v0  ;;  %s4395_s15 = sshll.u32 %s6160_s14, 5  ;;  %s4337_s19 = sshll.u32 %s6160_s14, 2  ;;  %vm4226_vm3 = vcmask 519170  }
   0xd   : > { %4655 = vmatprep.mubr.msk.f32.mxu0 %vm5216_vm0, %v5215_v0  ;;  %4666 = vmatprep.mubr.msk.f32.mxu1 %vm5216_vm0, %v5215_v0  ;;  %s5259_s18 = scalar_lea.vmem %s6156_s1, %s4395_s15  ;;  %s5275_s22 = scalar_lea.vmem %s6155_s0, %s4337_s19 }
   0xe   : > { %v252_v1 = vld [vmem:[%s5259_s18 + $0x18] sm:$0xff]  ;;  %v251_v3 = vld [vmem:[%s5259_s18 + $0x10] sm:$0xff]  ;;  %v250_v5 = vld [vmem:[%s5259_s18 + $0x8] sm:$0xff]  ;;  %s5611_s25 = scalar_lea.vmem %s6157_s2, %s4395_s15  ;;  %s6000_s28 = scalar_lea.vmem %s6158_s3, %s4337_s19 }
   0xf   : > { %v256_v2 = vld [vmem:[%s5259_s18 + $0x38] sm:$0xff]  ;;  %4648 = vmatpush3.msra.mxu0 %v252_v1  ;;  %v255_v4 = vld [vmem:[%s5259_s18 + $0x30] sm:$0xff]  ;;  %v254_v6 = vld [vmem:[%s5259_s18 + $0x28] sm:$0xff] }
  0x10   : > { %4659 = vmatpush3.msra.mxu1 %v256_v2  ;;  %4649 = vmatprep.subr.mxu0 %v5215_v0  ;;  %v249_v7 = vld [vmem:[%s5259_s18] sm:$0xff]  ;;  %v260_v11 = vld [vmem:[%s5259_s18 + $0x58] sm:$0xff]  ;;  %v259_v13 = vld [vmem:[%s5259_s18 + $0x50] sm:$0xff] }
  0x11   : > { %4660 = vmatprep.subr.mxu1 %v5215_v0  ;;  %4650 = vmatpush3.msra.mxu0 %v251_v3  ;;  %v253_v8 = vld [vmem:[%s5259_s18 + $0x20] sm:$0xff]  ;;  %v264_v12 = vld [vmem:[%s5259_s18 + $0x78] sm:$0xff]  ;;  %v263_v14 = vld [vmem:[%s5259_s18 + $0x70] sm:$0xff] }
  0x12   : > { %4661 = vmatpush3.msra.mxu1 %v255_v4  ;;  %4651 = vmatprep.subr.mxu0 %v5215_v0  ;;  %v5282_v9 = vld [vmem:[%s5275_s22] sm:$0xf]  ;;  %v5285_v10 = vld [vmem:[%s5275_s22 + $0x4] sm:$0xf]  ;;  %v258_v15 = vld [vmem:[%s5259_s18 + $0x48] sm:$0xff] }
  0x13   : > { %4662 = vmatprep.subr.mxu1 %v5215_v0  ;;  %4652 = vmatpush3.msra.mxu0 %v250_v5  ;;  %v262_v16 = vld [vmem:[%s5259_s18 + $0x68] sm:$0xff]  ;;  %v257_v17 = vld [vmem:[%s5259_s18 + $0x40] sm:$0xff]  ;;  %v268_v21 = vld [vmem:[%s5259_s18 + $0x98] sm:$0xff] }
  0x14   : > { %4663 = vmatpush3.msra.mxu1 %v254_v6  ;;  %4653 = vmatprep.subr.mxu0 %v5215_v0  ;;  %v261_v18 = vld [vmem:[%s5259_s18 + $0x60] sm:$0xff]  ;;  %v5310_v19 = vld [vmem:[%s5275_s22 + $0x8] sm:$0xf]  ;;  %v5313_v20 = vld [vmem:[%s5275_s22 + $0xc] sm:$0xf] }
  0x15   : > { %4664 = vmatprep.subr.mxu1 %v5215_v0  ;;  %4654 = vmatpush3.msra.mxu0 %v249_v7  ;;  %v272_v22 = vld [vmem:[%s5259_s18 + $0xb8] sm:$0xff]  ;;  %v267_v23 = vld [vmem:[%s5259_s18 + $0x90] sm:$0xff]  ;;  %v266_v25 = vld [vmem:[%s5259_s18 + $0x88] sm:$0xff] }
  0x16   : > { %4665 = vmatpush3.msra.mxu1 %v253_v8  ;;  %4656 = vmatmul.mubr.msk.f32.vlgmr.msra.gmra.mxu0 %vm449_vm1, %v5282_v9  ;;  %v271_v24 = vld [vmem:[%s5259_s18 + $0xb0] sm:$0xff]  ;;  %v270_v26 = vld [vmem:[%s5259_s18 + $0xa8] sm:$0xff]  ;;  %v265_v27 = vld [vmem:[%s5259_s18 + $0x80] sm:$0xff] }
  0x17   : > { %4667 = vmatmul.mubr.msk.f32.vlgmr.msra.gmra.mxu1 %vm449_vm1, %v5285_v10  ;;  %4669 = vmatprep.subr.mxu0 %v5215_v0  ;;  %v269_v28 = vld [vmem:[%s5259_s18 + $0xa0] sm:$0xff]  ;;  %v5340_v29 = vld [vmem:[%s5275_s22 + $0x10] sm:$0xf]  ;;  %v5343_v30 = vld [vmem:[%s5275_s22 + $0x14] sm:$0xf] }
  0x18   : > { %4680 = vmatprep.subr.mxu1 %v5215_v0  ;;  %4670 = vmatpush3.msra.mxu0 %v260_v11  ;;  %v276_v31 = vld [vmem:[%s5259_s18 + $0xd8] sm:$0xff]  ;;  %v275_v33 = vld [vmem:[%s5259_s18 + $0xd0] sm:$0xff]  ;;  %v274_v35 = vld [vmem:[%s5259_s18 + $0xc8] sm:$0xff] }
  0x19   : > { %4681 = vmatpush3.msra.mxu1 %v264_v12  ;;  %4671 = vmatprep.subr.mxu0 %v5215_v0  ;;  %v280_v32 = vld [vmem:[%s5259_s18 + $0xf8] sm:$0xff]  ;;  %v279_v34 = vld [vmem:[%s5259_s18 + $0xf0] sm:$0xff]  ;;  %v278_v36 = vld [vmem:[%s5259_s18 + $0xe8] sm:$0xff] }
  0x1a   : > { %4682 = vmatprep.subr.mxu1 %v5215_v0  ;;  %4672 = vmatpush3.msra.mxu0 %v259_v13  ;;  %v273_v37 = vld [vmem:[%s5259_s18 + $0xc0] sm:$0xff]  ;;  %v5370_v39 = vld [vmem:[%s5275_s22 + $0x18] sm:$0xf]  ;;  %v5373_v40 = vld [vmem:[%s5275_s22 + $0x1c] sm:$0xf] }
  0x1b   : > { %4683 = vmatpush3.msra.mxu1 %v263_v14  ;;  %4673 = vmatprep.subr.mxu0 %v5215_v0  ;;  %v277_v38 = vld [vmem:[%s5259_s18 + $0xe0] sm:$0xff]  ;;  %v284_v41 = vld [vmem:[%s5259_s18 + $0x118] sm:$0xff]  ;;  %v283_v43 = vld [vmem:[%s5259_s18 + $0x110] sm:$0xff] }
  0x1c   : > { %4684 = vmatprep.subr.mxu1 %v5215_v0  ;;  %4674 = vmatpush3.msra.mxu0 %v258_v15  ;;  %v288_v42 = vld [vmem:[%s5259_s18 + $0x138] sm:$0xff]  ;;  %v287_v44 = vld [vmem:[%s5259_s18 + $0x130] sm:$0xff]  ;;  %v282_v45 = vld [vmem:[%s5259_s18 + $0x108] sm:$0xff] }
  0x1d   : > { %4685 = vmatpush3.msra.mxu1 %v262_v16  ;;  %4675 = vmatprep.subr.mxu0 %v5215_v0  ;;  %v286_v46 = vld [vmem:[%s5259_s18 + $0x128] sm:$0xff]  ;;  %v281_v47 = vld [vmem:[%s5259_s18 + $0x100] sm:$0xff]  ;;  %v292_v51 = vld [vmem:[%s5259_s18 + $0x158] sm:$0xff] }
  0x1e   : > { %4686 = vmatprep.subr.mxu1 %v5215_v0  ;;  %4676 = vmatpush3.msra.mxu0 %v257_v17  ;;  %v285_v48 = vld [vmem:[%s5259_s18 + $0x120] sm:$0xff]  ;;  %v296_v52 = vld [vmem:[%s5259_s18 + $0x178] sm:$0xff]  ;;  %v291_v53 = vld [vmem:[%s5259_s18 + $0x150] sm:$0xff] }
  0x1f   : > { %4677 = vmatprep.mubr.msk.f32.mxu0 %vm5216_vm0, %v5215_v0  ;;  %4687 = vmatpush3.msra.mxu1 %v261_v18  ;;  %v5400_v49 = vld [vmem:[%s5275_s22 + $0x20] sm:$0xf]  ;;  %v5403_v50 = vld [vmem:[%s5275_s22 + $0x24] sm:$0xf]  ;;  %v295_v54 = vld [vmem:[%s5259_s18 + $0x170] sm:$0xff] }
  0x20   : > { %4688 = vmatprep.mubr.msk.f32.mxu1 %vm5216_vm0, %v5215_v0  ;;  %4678 = vmatmul.mubr.msk.f32.vlgmr.msra.gmra.mxu0 %vm449_vm1, %v5310_v19  ;;  %v290_v55 = vld [vmem:[%s5259_s18 + $0x148] sm:$0xff]  ;;  %v289_v57 = vld [vmem:[%s5259_s18 + $0x140] sm:$0xff]  ;;  %v300_v61 = vld [vmem:[%s5259_s18 + $0x198] sm:$0xff] }
  0x21   : > { %4689 = vmatmul.mubr.msk.f32.vlgmr.msra.gmra.mxu1 %vm449_vm1, %v5313_v20  ;;  %4691 = vmatprep.subr.mxu0 %v5215_v0  ;;  %v294_v56 = vld [vmem:[%s5259_s18 + $0x168] sm:$0xff]  ;;  %v293_v58 = vld [vmem:[%s5259_s18 + $0x160] sm:$0xff]  ;;  %v304_v62 = vld [vmem:[%s5259_s18 + $0x1b8] sm:$0xff] }
  0x22   : > { %4702 = vmatprep.subr.mxu1 %v5215_v0  ;;  %4692 = vmatpush3.msra.mxu0 %v268_v21  ;;  %v5430_v59 = vld [vmem:[%s5275_s22 + $0x28] sm:$0xf]  ;;  %v5433_v60 = vld [vmem:[%s5275_s22 + $0x2c] sm:$0xf]  ;;  %v299_v63 = vld [vmem:[%s5259_s18 + $0x190] sm:$0xff] }
  0x23   : > { %4703 = vmatpush3.msra.mxu1 %v272_v22  ;;  %4693 = vmatprep.subr.mxu0 %v5215_v0  ;;  %v303_v1 = vld [vmem:[%s5259_s18 + $0x1b0] sm:$0xff]  ;;  %v298_v2 = vld [vmem:[%s5259_s18 + $0x188] sm:$0xff]  ;;  %v297_v4 = vld [vmem:[%s5259_s18 + $0x180] sm:$0xff] }
  0x24   : > { %4704 = vmatprep.subr.mxu1 %v5215_v0  ;;  %4694 = vmatpush3.msra.mxu0 %v267_v23  ;;  %v302_v3 = vld [vmem:[%s5259_s18 + $0x1a8] sm:$0xff]  ;;  %v301_v5 = vld [vmem:[%s5259_s18 + $0x1a0] sm:$0xff]  ;;  %v5460_v6 = vld [vmem:[%s5275_s22 + $0x30] sm:$0xf] }
  0x25   : > { %4705 = vmatpush3.msra.mxu1 %v271_v24  ;;  %4695 = vmatprep.subr.mxu0 %v5215_v0  ;;  %v5463_v7 = vld [vmem:[%s5275_s22 + $0x34] sm:$0xf]  ;;  %v308_v8 = vld [vmem:[%s5259_s18 + $0x1d8] sm:$0xff]  ;;  %v306_v14 = vld [vmem:[%s5259_s18 + $0x1c8] sm:$0xff] }
  0x26   : > { %4706 = vmatprep.subr.mxu1 %v5215_v0  ;;  %4696 = vmatpush3.msra.mxu0 %v266_v25  ;;  %v312_v11 = vld [vmem:[%s5259_s18 + $0x1f8] sm:$0xff]  ;;  %v307_v12 = vld [vmem:[%s5259_s18 + $0x1d0] sm:$0xff]  ;;  %v310_v15 = vld [vmem:[%s5259_s18 + $0x1e8] sm:$0xff] }
  0x27   : > { %4707 = vmatpush3.msra.mxu1 %v270_v26  ;;  %4697 = vmatprep.subr.mxu0 %v5215_v0  ;;  %v311_v13 = vld [vmem:[%s5259_s18 + $0x1f0] sm:$0xff]  ;;  %v305_v16 = vld [vmem:[%s5259_s18 + $0x1c0] sm:$0xff]  ;;  %v5490_v18 = vld [vmem:[%s5275_s22 + $0x38] sm:$0xf] }
  0x28   : > { %4708 = vmatprep.subr.mxu1 %v5215_v0  ;;  %4698 = vmatpush3.msra.mxu0 %v265_v27  ;;  %v309_v17 = vld [vmem:[%s5259_s18 + $0x1e0] sm:$0xff]  ;;  %v5493_v21 = vld [vmem:[%s5275_s22 + $0x3c] sm:$0xf]  ;;  %v315_v24 = vld [vmem:[%s5259_s18 + $0x210] sm:$0xff] }
  0x29   : > { %4699 = vmatprep.mubr.msk.f32.mxu0 %vm5216_vm0, %v5215_v0  ;;  %4709 = vmatpush3.msra.mxu1 %v269_v28  ;;  %v316_v22 = vld [vmem:[%s5259_s18 + $0x218] sm:$0xff]  ;;  %v319_v25 = vld [vmem:[%s5259_s18 + $0x230] sm:$0xff]  ;;  %v314_v26 = vld [vmem:[%s5259_s18 + $0x208] sm:$0xff] }
  0x2a   : > { %4710 = vmatprep.mubr.msk.f32.mxu1 %vm5216_vm0, %v5215_v0  ;;  %4700 = vmatmul.mubr.msk.f32.vlgmr.msra.gmra.mxu0 %vm449_vm1, %v5340_v29  ;;  %v320_v23 = vld [vmem:[%s5259_s18 + $0x238] sm:$0xff]  ;;  %v318_v27 = vld [vmem:[%s5259_s18 + $0x228] sm:$0xff]  ;;  %v313_v28 = vld [vmem:[%s5259_s18 + $0x200] sm:$0xff] }
  0x2b   : > { %4711 = vmatmul.mubr.msk.f32.vlgmr.msra.gmra.mxu1 %vm449_vm1, %v5343_v30  ;;  %4713 = vmatprep.subr.mxu0 %v5215_v0 }
  0x2c   : > { %4724 = vmatprep.subr.mxu1 %v5215_v0  ;;  %4714 = vmatpush3.msra.mxu0 %v276_v31  ;;  %v317_v31 = vld [vmem:[%s5259_s18 + $0x220] sm:$0xff] }
  0x2d   : > { %4725 = vmatpush3.msra.mxu1 %v280_v32  ;;  %4715 = vmatprep.subr.mxu0 %v5215_v0  ;;  %v5520_v32 = vld [vmem:[%s5275_s22 + $0x40] sm:$0xf] }
  0x2e   : > { %4726 = vmatprep.subr.mxu1 %v5215_v0  ;;  %4716 = vmatpush3.msra.mxu0 %v275_v33  ;;  %v5523_v33 = vld [vmem:[%s5275_s22 + $0x44] sm:$0xf] }
  0x2f   : > { %4727 = vmatpush3.msra.mxu1 %v279_v34  ;;  %4717 = vmatprep.subr.mxu0 %v5215_v0  ;;  %v324_v34 = vld [vmem:[%s5259_s18 + $0x258] sm:$0xff] }
  0x30   : > { %4728 = vmatprep.subr.mxu1 %v5215_v0  ;;  %4718 = vmatpush3.msra.mxu0 %v274_v35  ;;  %v328_v35 = vld [vmem:[%s5259_s18 + $0x278] sm:$0xff] }
  0x31   : > { %4729 = vmatpush3.msra.mxu1 %v278_v36  ;;  %4719 = vmatprep.subr.mxu0 %v5215_v0  ;;  %v323_v36 = vld [vmem:[%s5259_s18 + $0x250] sm:$0xff] }
  0x32   : > { %4730 = vmatprep.subr.mxu1 %v5215_v0  ;;  %4720 = vmatpush3.msra.mxu0 %v273_v37  ;;  %v327_v37 = vld [vmem:[%s5259_s18 + $0x270] sm:$0xff] }
  0x33   : > { %4721 = vmatprep.mubr.msk.f32.mxu0 %vm5216_vm0, %v5215_v0  ;;  %4731 = vmatpush3.msra.mxu1 %v277_v38  ;;  %v322_v38 = vld [vmem:[%s5259_s18 + $0x248] sm:$0xff] }
  0x34   : > { %4732 = vmatprep.mubr.msk.f32.mxu1 %vm5216_vm0, %v5215_v0  ;;  %4722 = vmatmul.mubr.msk.f32.vlgmr.msra.gmra.mxu0 %vm449_vm1, %v5370_v39 }
  0x35   : > { %4733 = vmatmul.mubr.msk.f32.vlgmr.msra.gmra.mxu1 %vm449_vm1, %v5373_v40  ;;  %4735 = vmatprep.subr.mxu0 %v5215_v0 }
  0x36   : > { %4746 = vmatprep.subr.mxu1 %v5215_v0  ;;  %4736 = vmatpush3.msra.mxu0 %v284_v41  ;;  %v326_v41 = vld [vmem:[%s5259_s18 + $0x268] sm:$0xff] }
  0x37   : > { %4747 = vmatpush3.msra.mxu1 %v288_v42  ;;  %4737 = vmatprep.subr.mxu0 %v5215_v0  ;;  %v321_v42 = vld [vmem:[%s5259_s18 + $0x240] sm:$0xff] }
  0x38   : > { %4748 = vmatprep.subr.mxu1 %v5215_v0  ;;  %4738 = vmatpush3.msra.mxu0 %v283_v43  ;;  %v325_v43 = vld [vmem:[%s5259_s18 + $0x260] sm:$0xff] }
  0x39   : > { %4749 = vmatpush3.msra.mxu1 %v287_v44  ;;  %4739 = vmatprep.subr.mxu0 %v5215_v0  ;;  %v5550_v44 = vld [vmem:[%s5275_s22 + $0x48] sm:$0xf] }
  0x3a   : > { %4750 = vmatprep.subr.mxu1 %v5215_v0  ;;  %4740 = vmatpush3.msra.mxu0 %v282_v45  ;;  %v5553_v45 = vld [vmem:[%s5275_s22 + $0x4c] sm:$0xf] }
  0x3b   : > { %4751 = vmatpush3.msra.mxu1 %v286_v46  ;;  %4741 = vmatprep.subr.mxu0 %v5215_v0  ;;  %v332_v46 = vld [vmem:[%s5259_s18 + $0x298] sm:$0xff] }
  0x3c   : > { %4752 = vmatprep.subr.mxu1 %v5215_v0  ;;  %4742 = vmatpush3.msra.mxu0 %v281_v47  ;;  %v336_v47 = vld [vmem:[%s5259_s18 + $0x2b8] sm:$0xff] }
  0x3d   : > { %4743 = vmatprep.mubr.msk.f32.mxu0 %vm5216_vm0, %v5215_v0  ;;  %4753 = vmatpush3.msra.mxu1 %v285_v48  ;;  %v331_v48 = vld [vmem:[%s5259_s18 + $0x290] sm:$0xff] }
  0x3e   : > { %4754 = vmatprep.mubr.msk.f32.mxu1 %vm5216_vm0, %v5215_v0  ;;  %4744 = vmatmul.mubr.msk.f32.vlgmr.msra.gmra.mxu0 %vm449_vm1, %v5400_v49 }
  0x3f   : > { %4755 = vmatmul.mubr.msk.f32.vlgmr.msra.gmra.mxu1 %vm449_vm1, %v5403_v50  ;;  %4757 = vmatprep.subr.mxu0 %v5215_v0 }
  0x40   : > { %4768 = vmatprep.subr.mxu1 %v5215_v0  ;;  %4758 = vmatpush3.msra.mxu0 %v292_v51  ;;  %v335_v51 = vld [vmem:[%s5259_s18 + $0x2b0] sm:$0xff] }
  0x41   : > { %4769 = vmatpush3.msra.mxu1 %v296_v52  ;;  %4759 = vmatprep.subr.mxu0 %v5215_v0  ;;  %v330_v52 = vld [vmem:[%s5259_s18 + $0x288] sm:$0xff] }
  0x42   : > { %4770 = vmatprep.subr.mxu1 %v5215_v0  ;;  %4760 = vmatpush3.msra.mxu0 %v291_v53  ;;  %v334_v53 = vld [vmem:[%s5259_s18 + $0x2a8] sm:$0xff] }
  0x43   : > { %4771 = vmatpush3.msra.mxu1 %v295_v54  ;;  %4761 = vmatprep.subr.mxu0 %v5215_v0  ;;  %v329_v54 = vld [vmem:[%s5259_s18 + $0x280] sm:$0xff] }
  0x44   : > { %4772 = vmatprep.subr.mxu1 %v5215_v0  ;;  %4762 = vmatpush3.msra.mxu0 %v290_v55  ;;  %v333_v55 = vld [vmem:[%s5259_s18 + $0x2a0] sm:$0xff] }
  0x45   : > { %4773 = vmatpush3.msra.mxu1 %v294_v56  ;;  %4763 = vmatprep.subr.mxu0 %v5215_v0  ;;  %v5580_v56 = vld [vmem:[%s5275_s22 + $0x50] sm:$0xf] }
  0x46   : > { %4774 = vmatprep.subr.mxu1 %v5215_v0  ;;  %4764 = vmatpush3.msra.mxu0 %v289_v57  ;;  %v5583_v57 = vld [vmem:[%s5275_s22 + $0x54] sm:$0xf] }
  0x47   : > { %4765 = vmatprep.mubr.msk.f32.mxu0 %vm5216_vm0, %v5215_v0  ;;  %4775 = vmatpush3.msra.mxu1 %v293_v58  ;;  %v340_v58 = vld [vmem:[%s5259_s18 + $0x2d8] sm:$0xff] }
  0x48   : > { %4776 = vmatprep.mubr.msk.f32.mxu1 %vm5216_vm0, %v5215_v0  ;;  %4766 = vmatmul.mubr.msk.f32.vlgmr.msra.gmra.mxu0 %vm449_vm1, %v5430_v59 }
  0x49   : > { %4777 = vmatmul.mubr.msk.f32.vlgmr.msra.gmra.mxu1 %vm449_vm1, %v5433_v60  ;;  %4779 = vmatprep.subr.mxu0 %v5215_v0 }
  0x4a   : > { %4790 = vmatprep.subr.mxu1 %v5215_v0  ;;  %4780 = vmatpush3.msra.mxu0 %v300_v61  ;;  %v344_v61 = vld [vmem:[%s5259_s18 + $0x2f8] sm:$0xff] }
  0x4b   : > { %4791 = vmatpush3.msra.mxu1 %v304_v62  ;;  %4781 = vmatprep.subr.mxu0 %v5215_v0  ;;  %v339_v62 = vld [vmem:[%s5259_s18 + $0x2d0] sm:$0xff] }
  0x4c   : > { %4792 = vmatprep.subr.mxu1 %v5215_v0  ;;  %4782 = vmatpush3.msra.mxu0 %v299_v63  ;;  %v343_v63 = vld [vmem:[%s5259_s18 + $0x2f0] sm:$0xff] }
  0x4d   : > { %4793 = vmatpush3.msra.mxu1 %v303_v1  ;;  %4783 = vmatprep.subr.mxu0 %v5215_v0  ;;  %v338_v1 = vld [vmem:[%s5259_s18 + $0x2c8] sm:$0xff] }
  0x4e   : > { %4794 = vmatprep.subr.mxu1 %v5215_v0  ;;  %4784 = vmatpush3.msra.mxu0 %v298_v2  ;;  %v342_v2 = vld [vmem:[%s5259_s18 + $0x2e8] sm:$0xff] }
  0x4f   : > { %4795 = vmatpush3.msra.mxu1 %v302_v3  ;;  %4785 = vmatprep.subr.mxu0 %v5215_v0  ;;  %v337_v3 = vld [vmem:[%s5259_s18 + $0x2c0] sm:$0xff] }
  0x50   : > { %4796 = vmatprep.subr.mxu1 %v5215_v0  ;;  %4786 = vmatpush3.msra.mxu0 %v297_v4  ;;  %v341_v4 = vld [vmem:[%s5259_s18 + $0x2e0] sm:$0xff] }
  0x51   : > { %4787 = vmatprep.mubr.msk.f32.mxu0 %vm5216_vm0, %v5215_v0  ;;  %4797 = vmatpush3.msra.mxu1 %v301_v5  ;;  %v5617_v5 = vld [vmem:[%s5275_s22 + $0x58] sm:$0xf] }
  0x52   : > { %4798 = vmatprep.mubr.msk.f32.mxu1 %vm5216_vm0, %v5215_v0  ;;  %4788 = vmatmul.mubr.msk.f32.vlgmr.msra.gmra.mxu0 %vm449_vm1, %v5460_v6 }
  0x53   : > { %4799 = vmatmul.mubr.msk.f32.vlgmr.msra.gmra.mxu1 %vm449_vm1, %v5463_v7  ;;  %4801 = vmatprep.subr.mxu0 %v5215_v0 }
  0x54   : > { %4812 = vmatprep.subr.mxu1 %v5215_v0  ;;  %4802 = vmatpush3.msra.mxu0 %v308_v8  ;;  %v5620_v8 = vld [vmem:[%s5275_s22 + $0x5c] sm:$0xf] }
  0x55   : > { %4813 = vmatpush3.msra.mxu1 %v312_v11  ;;  %4803 = vmatprep.subr.mxu0 %v5215_v0  ;;  %v348_v11 = vld [vmem:[%s5259_s18 + $0x318] sm:$0xff] }
  0x56   : > { %4814 = vmatprep.subr.mxu1 %v5215_v0  ;;  %4804 = vmatpush3.msra.mxu0 %v307_v12  ;;  %v352_v12 = vld [vmem:[%s5611_s25 + $0x18] sm:$0xff] }
  0x57   : > { %4815 = vmatpush3.msra.mxu1 %v311_v13  ;;  %4805 = vmatprep.subr.mxu0 %v5215_v0  ;;  %v347_v13 = vld [vmem:[%s5259_s18 + $0x310] sm:$0xff] }
  0x58   : > { %4816 = vmatprep.subr.mxu1 %v5215_v0  ;;  %4806 = vmatpush3.msra.mxu0 %v306_v14  ;;  %v351_v14 = vld [vmem:[%s5611_s25 + $0x10] sm:$0xff] }
  0x59   : > { %4817 = vmatpush3.msra.mxu1 %v310_v15  ;;  %4807 = vmatprep.subr.mxu0 %v5215_v0  ;;  %v346_v15 = vld [vmem:[%s5259_s18 + $0x308] sm:$0xff] }
  0x5a   : > { %4818 = vmatprep.subr.mxu1 %v5215_v0  ;;  %4808 = vmatpush3.msra.mxu0 %v305_v16  ;;  %v350_v16 = vld [vmem:[%s5611_s25 + $0x8] sm:$0xff] }
  0x5b   : > { %4809 = vmatprep.mubr.msk.f32.mxu0 %vm5216_vm0, %v5215_v0  ;;  %4819 = vmatpush3.msra.mxu1 %v309_v17  ;;  %v345_v17 = vld [vmem:[%s5259_s18 + $0x300] sm:$0xff] }
  0x5c   : > { %4820 = vmatprep.mubr.msk.f32.mxu1 %vm5216_vm0, %v5215_v0  ;;  %4810 = vmatmul.mubr.msk.f32.vlgmr.msra.gmra.mxu0 %vm449_vm1, %v5490_v18 }
  0x5d   : > { %4821 = vmatmul.mubr.msk.f32.vlgmr.msra.gmra.mxu1 %vm449_vm1, %v5493_v21  ;;  %4823 = vmatprep.subr.mxu0 %v5215_v0 }
  0x5e   : > { %4834 = vmatprep.subr.mxu1 %v5215_v0  ;;  %4824 = vmatpush3.msra.mxu0 %v316_v22  ;;  %v349_v22 = vld [vmem:[%s5611_s25] sm:$0xff] }
  0x5f   : > { %4835 = vmatpush3.msra.mxu1 %v320_v23  ;;  %4825 = vmatprep.subr.mxu0 %v5215_v0  ;;  %v5647_v23 = vld [vmem:[%s5275_s22 + $0x60] sm:$0xf] }
  0x60   : > { %4836 = vmatprep.subr.mxu1 %v5215_v0  ;;  %4826 = vmatpush3.msra.mxu0 %v315_v24  ;;  %v356_v24 = vld [vmem:[%s5611_s25 + $0x38] sm:$0xff] }
  0x61   : > { %4837 = vmatpush3.msra.mxu1 %v319_v25  ;;  %4827 = vmatprep.subr.mxu0 %v5215_v0  ;;  %v360_v25 = vld [vmem:[%s5611_s25 + $0x58] sm:$0xff] }
  0x62   : > { %4838 = vmatprep.subr.mxu1 %v5215_v0  ;;  %4828 = vmatpush3.msra.mxu0 %v314_v26  ;;  %v355_v26 = vld [vmem:[%s5611_s25 + $0x30] sm:$0xff] }
  0x63   : > { %4839 = vmatpush3.msra.mxu1 %v318_v27  ;;  %4829 = vmatprep.subr.mxu0 %v5215_v0  ;;  %v359_v27 = vld [vmem:[%s5611_s25 + $0x50] sm:$0xff] }
  0x64   : > { %4840 = vmatprep.subr.mxu1 %v5215_v0  ;;  %4830 = vmatpush3.msra.mxu0 %v313_v28  ;;  %v354_v28 = vld [vmem:[%s5611_s25 + $0x28] sm:$0xff] }
  0x65   : > { %4831 = vmatprep.mubr.msk.f32.mxu0 %vm5216_vm0, %v5215_v0  ;;  %4841 = vmatpush3.msra.mxu1 %v317_v31  ;;  %v358_v31 = vld [vmem:[%s5611_s25 + $0x48] sm:$0xff] }
  0x66   : > { %4842 = vmatprep.mubr.msk.f32.mxu1 %vm5216_vm0, %v5215_v0  ;;  %4832 = vmatmul.mubr.msk.f32.vlgmr.msra.gmra.mxu0 %vm449_vm1, %v5520_v32 }
  0x67   : > { %4843 = vmatmul.mubr.msk.f32.vlgmr.msra.gmra.mxu1 %vm449_vm1, %v5523_v33  ;;  %4845 = vmatprep.subr.mxu0 %v5215_v0 }
  0x68   : > { %4856 = vmatprep.subr.mxu1 %v5215_v0  ;;  %4846 = vmatpush3.msra.mxu0 %v324_v34  ;;  %v357_v34 = vld [vmem:[%s5611_s25 + $0x40] sm:$0xff] }
  0x69   : > { %4857 = vmatpush3.msra.mxu1 %v328_v35  ;;  %4847 = vmatprep.subr.mxu0 %v5215_v0  ;;  %v364_v35 = vld [vmem:[%s5611_s25 + $0x78] sm:$0xff] }
  0x6a   : > { %4858 = vmatprep.subr.mxu1 %v5215_v0  ;;  %4848 = vmatpush3.msra.mxu0 %v323_v36  ;;  %v368_v36 = vld [vmem:[%s5611_s25 + $0x98] sm:$0xff] }
  0x6b   : > { %4859 = vmatpush3.msra.mxu1 %v327_v37  ;;  %4849 = vmatprep.subr.mxu0 %v5215_v0  ;;  %v363_v37 = vld [vmem:[%s5611_s25 + $0x70] sm:$0xff] }
  0x6c   : > { %4860 = vmatprep.subr.mxu1 %v5215_v0  ;;  %4850 = vmatpush3.msra.mxu0 %v322_v38  ;;  %v367_v38 = vld [vmem:[%s5611_s25 + $0x90] sm:$0xff] }
  0x6d   : > { %4861 = vmatpush3.msra.mxu1 %v326_v41  ;;  %4851 = vmatprep.subr.mxu0 %v5215_v0  ;;  %v362_v41 = vld [vmem:[%s5611_s25 + $0x68] sm:$0xff] }
  0x6e   : > { %4862 = vmatprep.subr.mxu1 %v5215_v0  ;;  %4852 = vmatpush3.msra.mxu0 %v321_v42  ;;  %v365_v42 = vld [vmem:[%s5611_s25 + $0x80] sm:$0xff] }
  0x6f   : > { %4853 = vmatprep.mubr.msk.f32.mxu0 %vm5216_vm0, %v5215_v0  ;;  %4863 = vmatpush3.msra.mxu1 %v325_v43  ;;  %v372_v43 = vld [vmem:[%s5611_s25 + $0xb8] sm:$0xff] }
  0x70   : > { %4864 = vmatprep.mubr.msk.f32.mxu1 %vm5216_vm0, %v5215_v0  ;;  %4854 = vmatmul.mubr.msk.f32.vlgmr.msra.gmra.mxu0 %vm449_vm1, %v5550_v44 }
  0x71   : > { %4865 = vmatmul.mubr.msk.f32.vlgmr.msra.gmra.mxu1 %vm449_vm1, %v5553_v45  ;;  %4867 = vmatprep.subr.mxu0 %v5215_v0 }
  0x72   : > { %4878 = vmatprep.subr.mxu1 %v5215_v0  ;;  %4868 = vmatpush3.msra.mxu0 %v332_v46  ;;  %v376_v46 = vld [vmem:[%s5611_s25 + $0xd8] sm:$0xff] }
  0x73   : > { %4879 = vmatpush3.msra.mxu1 %v336_v47  ;;  %4869 = vmatprep.subr.mxu0 %v5215_v0  ;;  %v371_v47 = vld [vmem:[%s5611_s25 + $0xb0] sm:$0xff] }
  0x74   : > { %4880 = vmatprep.subr.mxu1 %v5215_v0  ;;  %4870 = vmatpush3.msra.mxu0 %v331_v48  ;;  %v375_v48 = vld [vmem:[%s5611_s25 + $0xd0] sm:$0xff] }
  0x75   : > { %4881 = vmatpush3.msra.mxu1 %v335_v51  ;;  %4871 = vmatprep.subr.mxu0 %v5215_v0  ;;  %v370_v51 = vld [vmem:[%s5611_s25 + $0xa8] sm:$0xff] }
  0x76   : > { %4882 = vmatprep.subr.mxu1 %v5215_v0  ;;  %4872 = vmatpush3.msra.mxu0 %v330_v52  ;;  %v373_v52 = vld [vmem:[%s5611_s25 + $0xc0] sm:$0xff] }
  0x77   : > { %4883 = vmatpush3.msra.mxu1 %v334_v53  ;;  %4873 = vmatprep.subr.mxu0 %v5215_v0  ;;  %v380_v53 = vld [vmem:[%s5611_s25 + $0xf8] sm:$0xff] }
  0x78   : > { %4884 = vmatprep.subr.mxu1 %v5215_v0  ;;  %4874 = vmatpush3.msra.mxu0 %v329_v54  ;;  %v384_v54 = vld [vmem:[%s5611_s25 + $0x118] sm:$0xff] }
  0x79   : > { %4875 = vmatprep.mubr.msk.f32.mxu0 %vm5216_vm0, %v5215_v0  ;;  %4885 = vmatpush3.msra.mxu1 %v333_v55  ;;  %v379_v55 = vld [vmem:[%s5611_s25 + $0xf0] sm:$0xff] }
  0x7a   : > { %4886 = vmatprep.mubr.msk.f32.mxu1 %vm5216_vm0, %v5215_v0  ;;  %4876 = vmatmul.mubr.msk.f32.vlgmr.msra.gmra.mxu0 %vm449_vm1, %v5580_v56 }
  0x7b   : > { %4887 = vmatmul.mubr.msk.f32.vlgmr.msra.gmra.mxu1 %vm449_vm1, %v5583_v57  ;;  %4889 = vmatprep.subr.mxu0 %v5215_v0 }
  0x7c   : > { %4900 = vmatprep.subr.mxu1 %v5215_v0  ;;  %4890 = vmatpush3.msra.mxu0 %v340_v58  ;;  %v383_v58 = vld [vmem:[%s5611_s25 + $0x110] sm:$0xff] }
  0x7d   : > { %4901 = vmatpush3.msra.mxu1 %v344_v61  ;;  %4891 = vmatprep.subr.mxu0 %v5215_v0  ;;  %v378_v61 = vld [vmem:[%s5611_s25 + $0xe8] sm:$0xff] }
  0x7e   : > { %4902 = vmatprep.subr.mxu1 %v5215_v0  ;;  %4892 = vmatpush3.msra.mxu0 %v339_v62  ;;  %v381_v62 = vld [vmem:[%s5611_s25 + $0x100] sm:$0xff] }
  0x7f   : > { %4903 = vmatpush3.msra.mxu1 %v343_v63  ;;  %4893 = vmatprep.subr.mxu0 %v5215_v0  ;;  %v388_v63 = vld [vmem:[%s5611_s25 + $0x138] sm:$0xff] }
  0x80   : > { %4904 = vmatprep.subr.mxu1 %v5215_v0  ;;  %4894 = vmatpush3.msra.mxu0 %v338_v1  ;;  %v392_v1 = vld [vmem:[%s5611_s25 + $0x158] sm:$0xff] }
  0x81   : > { %4905 = vmatpush3.msra.mxu1 %v342_v2  ;;  %4895 = vmatprep.subr.mxu0 %v5215_v0  ;;  %v387_v2 = vld [vmem:[%s5611_s25 + $0x130] sm:$0xff] }
  0x82   : > { %4906 = vmatprep.subr.mxu1 %v5215_v0  ;;  %4896 = vmatpush3.msra.mxu0 %v337_v3  ;;  %v391_v3 = vld [vmem:[%s5611_s25 + $0x150] sm:$0xff] }
  0x83   : > { %4897 = vmatprep.mubr.msk.f32.mxu0 %vm5216_vm0, %v5215_v0  ;;  %4907 = vmatpush3.msra.mxu1 %v341_v4  ;;  %v386_v4 = vld [vmem:[%s5611_s25 + $0x128] sm:$0xff] }
  0x84   : > { %4908 = vmatprep.mubr.msk.f32.mxu1 %vm5216_vm0, %v5215_v0  ;;  %4898 = vmatmul.mubr.msk.f32.vlgmr.msra.gmra.mxu0 %vm449_vm1, %v5617_v5 }
  0x85   : > { %4909 = vmatmul.mubr.msk.f32.vlgmr.msra.gmra.mxu1 %vm449_vm1, %v5620_v8  ;;  %4911 = vmatprep.subr.mxu0 %v5215_v0 }
  0x86   : > { %4922 = vmatprep.subr.mxu1 %v5215_v0  ;;  %4912 = vmatpush3.msra.mxu0 %v348_v11  ;;  %v389_v11 = vld [vmem:[%s5611_s25 + $0x140] sm:$0xff] }
  0x87   : > { %4923 = vmatpush3.msra.mxu1 %v352_v12  ;;  %4913 = vmatprep.subr.mxu0 %v5215_v0  ;;  %v396_v12 = vld [vmem:[%s5611_s25 + $0x178] sm:$0xff] }
  0x88   : > { %4924 = vmatprep.subr.mxu1 %v5215_v0  ;;  %4914 = vmatpush3.msra.mxu0 %v347_v13  ;;  %v400_v13 = vld [vmem:[%s5611_s25 + $0x198] sm:$0xff] }
  0x89   : > { %4925 = vmatpush3.msra.mxu1 %v351_v14  ;;  %4915 = vmatprep.subr.mxu0 %v5215_v0  ;;  %v395_v14 = vld [vmem:[%s5611_s25 + $0x170] sm:$0xff] }
  0x8a   : > { %4926 = vmatprep.subr.mxu1 %v5215_v0  ;;  %4916 = vmatpush3.msra.mxu0 %v346_v15  ;;  %v399_v15 = vld [vmem:[%s5611_s25 + $0x190] sm:$0xff] }
  0x8b   : > { %4927 = vmatpush3.msra.mxu1 %v350_v16  ;;  %4917 = vmatprep.subr.mxu0 %v5215_v0  ;;  %v394_v16 = vld [vmem:[%s5611_s25 + $0x168] sm:$0xff] }
  0x8c   : > { %4928 = vmatprep.subr.mxu1 %v5215_v0  ;;  %4918 = vmatpush3.msra.mxu0 %v345_v17  ;;  %v397_v17 = vld [vmem:[%s5611_s25 + $0x180] sm:$0xff] }
  0x8d   : > { %4919 = vmatprep.mubr.msk.f32.mxu0 %vm5216_vm0, %v5215_v0  ;;  %4929 = vmatpush3.msra.mxu1 %v349_v22  ;;  %v404_v22 = vld [vmem:[%s5611_s25 + $0x1b8] sm:$0xff] }
  0x8e   : > { %4930 = vmatprep.mubr.msk.f32.mxu1 %vm5216_vm0, %v5215_v0  ;;  %4920 = vmatmul.mubr.msk.f32.vlgmr.msra.gmra.mxu0 %vm449_vm1, %v5647_v23 }
  0x8f   : > { %4931 = vmatmul.mubr.msk.f32.vlgmr.msra.gmra.mxu1 %vm449_vm1, %v5282_v9  ;;  %4933 = vmatprep.subr.mxu0 %v5215_v0  ;;  %v353_v9 = vld [vmem:[%s5611_s25 + $0x20] sm:$0xff] }
  0x90   : > { %4944 = vmatprep.subr.mxu1 %v5215_v0  ;;  %4934 = vmatpush3.msra.mxu0 %v356_v24  ;;  %v408_v24 = vld [vmem:[%s5611_s25 + $0x1d8] sm:$0xff] }
  0x91   : > { %4945 = vmatpush3.msra.mxu1 %v360_v25  ;;  %4935 = vmatprep.subr.mxu0 %v5215_v0  ;;  %v403_v25 = vld [vmem:[%s5611_s25 + $0x1b0] sm:$0xff] }
  0x92   : > { %4946 = vmatprep.subr.mxu1 %v5215_v0  ;;  %4936 = vmatpush3.msra.mxu0 %v355_v26  ;;  %v407_v26 = vld [vmem:[%s5611_s25 + $0x1d0] sm:$0xff] }
  0x93   : > { %4947 = vmatpush3.msra.mxu1 %v359_v27  ;;  %4937 = vmatprep.subr.mxu0 %v5215_v0  ;;  %v402_v27 = vld [vmem:[%s5611_s25 + $0x1a8] sm:$0xff] }
  0x94   : > { %4948 = vmatprep.subr.mxu1 %v5215_v0  ;;  %4938 = vmatpush3.msra.mxu0 %v354_v28  ;;  %v405_v28 = vld [vmem:[%s5611_s25 + $0x1c0] sm:$0xff] }
  0x95   : > { %4949 = vmatpush3.msra.mxu1 %v358_v31  ;;  %4939 = vmatprep.subr.mxu0 %v5215_v0  ;;  %v412_v31 = vld [vmem:[%s5611_s25 + $0x1f8] sm:$0xff] }
  0x96   : > { %4950 = vmatprep.subr.mxu1 %v5215_v0  ;;  %4940 = vmatpush3.msra.mxu0 %v353_v9  ;;  %v416_v9 = vld [vmem:[%s5611_s25 + $0x218] sm:$0xff] }
  0x97   : > { %4941 = vmatprep.mubr.msk.f32.mxu0 %vm5216_vm0, %v5215_v0  ;;  %4951 = vmatpush3.msra.mxu1 %v357_v34  ;;  %v411_v34 = vld [vmem:[%s5611_s25 + $0x1f0] sm:$0xff] }
  0x98   : > { %4952 = vmatprep.mubr.msk.f32.mxu1 %vm5216_vm0, %v5215_v0  ;;  %4942 = vmatmul.mubr.msk.f32.vlgmr.msra.gmra.mxu0 %vm449_vm1, %v5285_v10  ;;  %v366_v10 = vld [vmem:[%s5611_s25 + $0x88] sm:$0xff] }
  0x99   : > { %4953 = vmatmul.mubr.msk.f32.vlgmr.msra.gmra.mxu1 %vm449_vm1, %v5310_v19  ;;  %4955 = vmatprep.subr.mxu0 %v5215_v0  ;;  %v361_v19 = vld [vmem:[%s5611_s25 + $0x60] sm:$0xff] }
  0x9a   : > { %4966 = vmatprep.subr.mxu1 %v5215_v0  ;;  %4956 = vmatpush3.msra.mxu0 %v364_v35  ;;  %v415_v35 = vld [vmem:[%s5611_s25 + $0x210] sm:$0xff] }
  0x9b   : > { %4967 = vmatpush3.msra.mxu1 %v368_v36  ;;  %4957 = vmatprep.subr.mxu0 %v5215_v0 }
  0x9c   : > { %4968 = vmatprep.subr.mxu1 %v5215_v0  ;;  %4958 = vmatpush3.msra.mxu0 %v363_v37 }
  0x9d   : > { %4969 = vmatpush3.msra.mxu1 %v367_v38  ;;  %4959 = vmatprep.subr.mxu0 %v5215_v0 }
  0x9e   : > { %4970 = vmatprep.subr.mxu1 %v5215_v0  ;;  %4960 = vmatpush3.msra.mxu0 %v362_v41 }
  0x9f   : > { %4971 = vmatpush3.msra.mxu1 %v366_v10  ;;  %4961 = vmatprep.subr.mxu0 %v5215_v0  ;;  %v409_v10 = vld [vmem:[%s5611_s25 + $0x1e0] sm:$0xff] }
  0xa0   : > { %4972 = vmatprep.subr.mxu1 %v5215_v0  ;;  %4962 = vmatpush3.msra.mxu0 %v361_v19  ;;  %v413_v19 = vld [vmem:[%s5611_s25 + $0x200] sm:$0xff] }
  0xa1   : > { %4963 = vmatprep.mubr.msk.f32.mxu0 %vm5216_vm0, %v5215_v0  ;;  %4973 = vmatpush3.msra.mxu1 %v365_v42  ;;  %v420_v42 = vld [vmem:[%s5611_s25 + $0x238] sm:$0xff] }
  0xa2   : > { %4974 = vmatprep.mubr.msk.f32.mxu1 %vm5216_vm0, %v5215_v0  ;;  %4964 = vmatmul.mubr.msk.f32.vlgmr.msra.gmra.mxu0 %vm449_vm1, %v5313_v20  ;;  %v374_v20 = vld [vmem:[%s5611_s25 + $0xc8] sm:$0xff] }
  0xa3   : > { %4975 = vmatmul.mubr.msk.f32.vlgmr.msra.gmra.mxu1 %vm449_vm1, %v5340_v29  ;;  %4977 = vmatprep.subr.mxu0 %v5215_v0  ;;  %v369_v29 = vld [vmem:[%s5611_s25 + $0xa0] sm:$0xff] }
  0xa4   : > { %4988 = vmatprep.subr.mxu1 %v5215_v0  ;;  %4978 = vmatpush3.msra.mxu0 %v372_v43  ;;  %v424_v43 = vld [vmem:[%s5611_s25 + $0x258] sm:$0xff] }
  0xa5   : > { %4989 = vmatpush3.msra.mxu1 %v376_v46  ;;  %4979 = vmatprep.subr.mxu0 %v5215_v0  ;;  %v419_v46 = vld [vmem:[%s5611_s25 + $0x230] sm:$0xff] }
  0xa6   : > { %4990 = vmatprep.subr.mxu1 %v5215_v0  ;;  %4980 = vmatpush3.msra.mxu0 %v371_v47  ;;  %v423_v47 = vld [vmem:[%s5611_s25 + $0x250] sm:$0xff] }
  0xa7   : > { %4991 = vmatpush3.msra.mxu1 %v375_v48  ;;  %4981 = vmatprep.subr.mxu0 %v5215_v0 }
  0xa8   : > { %4992 = vmatprep.subr.mxu1 %v5215_v0  ;;  %4982 = vmatpush3.msra.mxu0 %v370_v51 }
  0xa9   : > { %4993 = vmatpush3.msra.mxu1 %v374_v20  ;;  %4983 = vmatprep.subr.mxu0 %v5215_v0 }
  0xaa   : > { %4994 = vmatprep.subr.mxu1 %v5215_v0  ;;  %4984 = vmatpush3.msra.mxu0 %v369_v29 }
  0xab   : > { %4985 = vmatprep.mubr.msk.f32.mxu0 %vm5216_vm0, %v5215_v0  ;;  %4995 = vmatpush3.msra.mxu1 %v373_v52  ;;  %v417_v52 = vld [vmem:[%s5611_s25 + $0x220] sm:$0xff] }
  0xac   : > { %4996 = vmatprep.mubr.msk.f32.mxu1 %vm5216_vm0, %v5215_v0  ;;  %4986 = vmatmul.mubr.msk.f32.vlgmr.msra.gmra.mxu0 %vm449_vm1, %v5343_v30  ;;  %v382_v30 = vld [vmem:[%s5611_s25 + $0x108] sm:$0xff] }
  0xad   : > { %4997 = vmatmul.mubr.msk.f32.vlgmr.msra.gmra.mxu1 %vm449_vm1, %v5370_v39  ;;  %4999 = vmatprep.subr.mxu0 %v5215_v0  ;;  %v377_v39 = vld [vmem:[%s5611_s25 + $0xe0] sm:$0xff] }
  0xae   : > { %5010 = vmatprep.subr.mxu1 %v5215_v0  ;;  %5000 = vmatpush3.msra.mxu0 %v380_v53  ;;  %v421_v53 = vld [vmem:[%s5611_s25 + $0x240] sm:$0xff] }
  0xaf   : > { %5011 = vmatpush3.msra.mxu1 %v384_v54  ;;  %5001 = vmatprep.subr.mxu0 %v5215_v0  ;;  %v428_v54 = vld [vmem:[%s5611_s25 + $0x278] sm:$0xff] }
  0xb0   : > { %5012 = vmatprep.subr.mxu1 %v5215_v0  ;;  %5002 = vmatpush3.msra.mxu0 %v379_v55  ;;  %v432_v55 = vld [vmem:[%s5611_s25 + $0x298] sm:$0xff] }
  0xb1   : > { %5013 = vmatpush3.msra.mxu1 %v383_v58  ;;  %5003 = vmatprep.subr.mxu0 %v5215_v0  ;;  %v427_v58 = vld [vmem:[%s5611_s25 + $0x270] sm:$0xff] }
  0xb2   : > { %5014 = vmatprep.subr.mxu1 %v5215_v0  ;;  %5004 = vmatpush3.msra.mxu0 %v378_v61  ;;  %v431_v61 = vld [vmem:[%s5611_s25 + $0x290] sm:$0xff] }
  0xb3   : > { %5015 = vmatpush3.msra.mxu1 %v382_v30  ;;  %5005 = vmatprep.subr.mxu0 %v5215_v0 }
  0xb4   : > { %5016 = vmatprep.subr.mxu1 %v5215_v0  ;;  %5006 = vmatpush3.msra.mxu0 %v377_v39 }
  0xb5   : > { %5007 = vmatprep.mubr.msk.f32.mxu0 %vm5216_vm0, %v5215_v0  ;;  %5017 = vmatpush3.msra.mxu1 %v381_v62 }
  0xb6   : > { %5018 = vmatprep.mubr.msk.f32.mxu1 %vm5216_vm0, %v5215_v0  ;;  %5008 = vmatmul.mubr.msk.f32.vlgmr.msra.gmra.mxu0 %vm449_vm1, %v5373_v40  ;;  %v390_v40 = vld [vmem:[%s5611_s25 + $0x148] sm:$0xff] }
  0xb7   : > { %5019 = vmatmul.mubr.msk.f32.vlgmr.msra.gmra.mxu1 %vm449_vm1, %v5400_v49  ;;  %5021 = vmatprep.subr.mxu0 %v5215_v0  ;;  %v385_v49 = vld [vmem:[%s5611_s25 + $0x120] sm:$0xff] }
  0xb8   : > { %5032 = vmatprep.subr.mxu1 %v5215_v0  ;;  %5022 = vmatpush3.msra.mxu0 %v388_v63 }
  0xb9   : > { %5033 = vmatpush3.msra.mxu1 %v392_v1  ;;  %5023 = vmatprep.subr.mxu0 %v5215_v0  ;;  %v425_v1 = vld [vmem:[%s5611_s25 + $0x260] sm:$0xff] }
  0xba   : > { %5034 = vmatprep.subr.mxu1 %v5215_v0  ;;  %5024 = vmatpush3.msra.mxu0 %v387_v2  ;;  %v429_v2 = vld [vmem:[%s5611_s25 + $0x280] sm:$0xff] }
  0xbb   : > { %5035 = vmatpush3.msra.mxu1 %v391_v3  ;;  %5025 = vmatprep.subr.mxu0 %v5215_v0  ;;  %v436_v3 = vld [vmem:[%s5611_s25 + $0x2b8] sm:$0xff] }
  0xbc   : > { %5036 = vmatprep.subr.mxu1 %v5215_v0  ;;  %5026 = vmatpush3.msra.mxu0 %v386_v4  ;;  %v440_v4 = vld [vmem:[%s5611_s25 + $0x2d8] sm:$0xff] }
  0xbd   : > { %5037 = vmatpush3.msra.mxu1 %v390_v40  ;;  %5027 = vmatprep.subr.mxu0 %v5215_v0  ;;  %v435_v40 = vld [vmem:[%s5611_s25 + $0x2b0] sm:$0xff] }
  0xbe   : > { %5038 = vmatprep.subr.mxu1 %v5215_v0  ;;  %5028 = vmatpush3.msra.mxu0 %v385_v49  ;;  %v439_v49 = vld [vmem:[%s5611_s25 + $0x2d0] sm:$0xff] }
  0xbf   : > { %5029 = vmatprep.mubr.msk.f32.mxu0 %vm5216_vm0, %v5215_v0  ;;  %5039 = vmatpush3.msra.mxu1 %v389_v11 }
  0xc0   : > { %5040 = vmatprep.mubr.msk.f32.mxu1 %vm5216_vm0, %v5215_v0  ;;  %5030 = vmatmul.mubr.msk.f32.vlgmr.msra.gmra.mxu0 %vm449_vm1, %v5403_v50  ;;  %v398_v50 = vld [vmem:[%s5611_s25 + $0x188] sm:$0xff] }
  0xc1   : > { %5041 = vmatmul.mubr.msk.f32.vlgmr.msra.gmra.mxu1 %vm449_vm1, %v5430_v59  ;;  %5043 = vmatprep.subr.mxu0 %v5215_v0  ;;  %v393_v59 = vld [vmem:[%s5611_s25 + $0x160] sm:$0xff] }
  0xc2   : > { %5054 = vmatprep.subr.mxu1 %v5215_v0  ;;  %5044 = vmatpush3.msra.mxu0 %v396_v12 }
  0xc3   : > { %5055 = vmatpush3.msra.mxu1 %v400_v13  ;;  %5045 = vmatprep.subr.mxu0 %v5215_v0 }
  0xc4   : > { %5056 = vmatprep.subr.mxu1 %v5215_v0  ;;  %5046 = vmatpush3.msra.mxu0 %v395_v14 }
  0xc5   : > { %5057 = vmatpush3.msra.mxu1 %v399_v15  ;;  %5047 = vmatprep.subr.mxu0 %v5215_v0  ;;  %v433_v15 = vld [vmem:[%s5611_s25 + $0x2a0] sm:$0xff] }
  0xc6   : > { %5058 = vmatprep.subr.mxu1 %v5215_v0  ;;  %5048 = vmatpush3.msra.mxu0 %v394_v16  ;;  %v437_v16 = vld [vmem:[%s5611_s25 + $0x2c0] sm:$0xff] }
  0xc7   : > { %5059 = vmatpush3.msra.mxu1 %v398_v50  ;;  %5049 = vmatprep.subr.mxu0 %v5215_v0  ;;  %v444_v50 = vld [vmem:[%s5611_s25 + $0x2f8] sm:$0xff] }
  0xc8   : > { %5060 = vmatprep.subr.mxu1 %v5215_v0  ;;  %5050 = vmatpush3.msra.mxu0 %v393_v59  ;;  %v448_v59 = vld [vmem:[%s5611_s25 + $0x318] sm:$0xff] }
  0xc9   : > { %5051 = vmatprep.mubr.msk.f32.mxu0 %vm5216_vm0, %v5215_v0  ;;  %5061 = vmatpush3.msra.mxu1 %v397_v17  ;;  %v443_v17 = vld [vmem:[%s5611_s25 + $0x2f0] sm:$0xff] }
  0xca   : > { %5062 = vmatprep.mubr.msk.f32.mxu1 %vm5216_vm0, %v5215_v0  ;;  %5052 = vmatmul.mubr.msk.f32.vlgmr.msra.gmra.mxu0 %vm449_vm1, %v5433_v60  ;;  %v406_v60 = vld [vmem:[%s5611_s25 + $0x1c8] sm:$0xff] }
  0xcb   : > { %5063 = vmatmul.mubr.msk.f32.vlgmr.msra.gmra.mxu1 %vm449_vm1, %v5460_v6  ;;  %5065 = vmatprep.subr.mxu0 %v5215_v0  ;;  %v401_v6 = vld [vmem:[%s5611_s25 + $0x1a0] sm:$0xff] }
  0xcc   : > { %5076 = vmatprep.subr.mxu1 %v5215_v0  ;;  %5066 = vmatpush3.msra.mxu0 %v404_v22  ;;  %v447_v22 = vld [vmem:[%s5611_s25 + $0x310] sm:$0xff] }
  0xcd   : > { %5077 = vmatpush3.msra.mxu1 %v408_v24  ;;  %5067 = vmatprep.subr.mxu0 %v5215_v0 }
  0xce   : > { %5078 = vmatprep.subr.mxu1 %v5215_v0  ;;  %5068 = vmatpush3.msra.mxu0 %v403_v25 }
  0xcf   : > { %5079 = vmatpush3.msra.mxu1 %v407_v26  ;;  %5069 = vmatprep.subr.mxu0 %v5215_v0 }
  0xd0   : > { %5080 = vmatprep.subr.mxu1 %v5215_v0  ;;  %5070 = vmatpush3.msra.mxu0 %v402_v27 }
  0xd1   : > { %5081 = vmatpush3.msra.mxu1 %v406_v60  ;;  %5071 = vmatprep.subr.mxu0 %v5215_v0  ;;  %v441_v60 = vld [vmem:[%s5611_s25 + $0x2e0] sm:$0xff] }
  0xd2   : > { %5082 = vmatprep.subr.mxu1 %v5215_v0  ;;  %5072 = vmatpush3.msra.mxu0 %v401_v6  ;;  %v445_v6 = vld [vmem:[%s5611_s25 + $0x300] sm:$0xff] }
  0xd3   : > { %5073 = vmatprep.mubr.msk.f32.mxu0 %vm5216_vm0, %v5215_v0  ;;  %5083 = vmatpush3.msra.mxu1 %v405_v28 }
  0xd4   : > { %5084 = vmatprep.mubr.msk.f32.mxu1 %vm5216_vm0, %v5215_v0  ;;  %5074 = vmatmul.mubr.msk.f32.vlgmr.msra.gmra.mxu0 %vm449_vm1, %v5463_v7  ;;  %v410_v7 = vld [vmem:[%s5611_s25 + $0x1e8] sm:$0xff] }
  0xd5   : > { %5085 = vmatmul.mubr.msk.f32.vlgmr.msra.gmra.mxu1 %vm449_vm1, %v5490_v18  ;;  %5087 = vmatprep.subr.mxu0 %v5215_v0  ;;  %v414_v18 = vld [vmem:[%s5611_s25 + $0x208] sm:$0xff] }
  0xd6   : > { %5098 = vmatprep.subr.mxu1 %v5215_v0  ;;  %5088 = vmatpush3.msra.mxu0 %v412_v31  ;;  %v5831_v36 = vpop.f32.mrf.mxu0 }
  0xd7   : > { %5099 = vmatpush3.msra.mxu1 %v416_v9  ;;  %v5833_v37 = vpop.f32.mrf.mxu1  ;;  %5089 = vmatprep.subr.mxu0 %v5215_v0 }
  0xd8   : > { %5100 = vmatprep.subr.mxu1 %v5215_v0  ;;  %5090 = vmatpush3.msra.mxu0 %v411_v34  ;;  %v4657_v38 = vpop.f32.mrf.mxu0 }
  0xd9   : > { %5101 = vmatpush3.msra.mxu1 %v415_v35  ;;  %v4668_v41 = vpop.f32.mrf.mxu1  ;;  %5091 = vmatprep.subr.mxu0 %v5215_v0 }
  0xda   : > { %5102 = vmatprep.subr.mxu1 %v5215_v0  ;;  %5092 = vmatpush3.msra.mxu0 %v410_v7 }
  0xdb   : > { %5103 = vmatpush3.msra.mxu1 %v414_v18  ;;  %5093 = vmatprep.subr.mxu0 %v5215_v0 }
  0xdc   : > { %5104 = vmatprep.subr.mxu1 %v5215_v0  ;;  %5094 = vmatpush3.msra.mxu0 %v409_v10 }
  0xdd   : > { %5095 = vmatprep.mubr.msk.f32.mxu0 %vm5216_vm0, %v5215_v0  ;;  %5105 = vmatpush3.msra.mxu1 %v413_v19 }
  0xde   : > { %5106 = vmatprep.mubr.msk.f32.mxu1 %vm5216_vm0, %v5215_v0  ;;  %5096 = vmatmul.mubr.msk.f32.vlgmr.msra.gmra.mxu0 %vm449_vm1, %v5493_v21  ;;  %v418_v21 = vld [vmem:[%s5611_s25 + $0x228] sm:$0xff] }
  0xdf   : > { %5107 = vmatmul.mubr.msk.f32.vlgmr.msra.gmra.mxu1 %vm449_vm1, %v5520_v32  ;;  %5109 = vmatprep.subr.mxu0 %v5215_v0  ;;  %v422_v32 = vld [vmem:[%s5611_s25 + $0x248] sm:$0xff] }
  0xe0   : > { %5120 = vmatprep.subr.mxu1 %v5215_v0  ;;  %5110 = vmatpush3.msra.mxu0 %v420_v42  ;;  %v5859_v48 = vpop.f32.mrf.mxu0 }
  0xe1   : > { %5121 = vmatpush3.msra.mxu1 %v424_v43  ;;  %v5861_v51 = vpop.f32.mrf.mxu1  ;;  %5111 = vmatprep.subr.mxu0 %v5215_v0 }
  0xe2   : > { %5122 = vmatprep.subr.mxu1 %v5215_v0  ;;  %5112 = vmatpush3.msra.mxu0 %v419_v46  ;;  %v4679_v20 = vpop.f32.mrf.mxu0 }
  0xe3   : > { %5123 = vmatpush3.msra.mxu1 %v423_v47  ;;  %v4690_v29 = vpop.f32.mrf.mxu1  ;;  %5113 = vmatprep.subr.mxu0 %v5215_v0 }
  0xe4   : > { %5124 = vmatprep.subr.mxu1 %v5215_v0  ;;  %5114 = vmatpush3.msra.mxu0 %v418_v21 }
  0xe5   : > { %5125 = vmatpush3.msra.mxu1 %v422_v32  ;;  %5115 = vmatprep.subr.mxu0 %v5215_v0 }
  0xe6   : > { %5126 = vmatprep.subr.mxu1 %v5215_v0  ;;  %5116 = vmatpush3.msra.mxu0 %v417_v52 }
  0xe7   : > { %5117 = vmatprep.mubr.msk.f32.mxu0 %vm5216_vm0, %v5215_v0  ;;  %5127 = vmatpush3.msra.mxu1 %v421_v53 }
  0xe8   : > { %5128 = vmatprep.mubr.msk.f32.mxu1 %vm5216_vm0, %v5215_v0  ;;  %5118 = vmatmul.mubr.msk.f32.vlgmr.msra.gmra.mxu0 %vm449_vm1, %v5523_v33  ;;  %v426_v33 = vld [vmem:[%s5611_s25 + $0x268] sm:$0xff] }
  0xe9   : > { %5129 = vmatmul.mubr.msk.f32.vlgmr.msra.gmra.mxu1 %vm449_vm1, %v5550_v44  ;;  %5131 = vmatprep.subr.mxu0 %v5215_v0  ;;  %v430_v44 = vld [vmem:[%s5611_s25 + $0x288] sm:$0xff] }
  0xea   : > { %5142 = vmatprep.subr.mxu1 %v5215_v0  ;;  %5132 = vmatpush3.msra.mxu0 %v428_v54  ;;  %v5887_v30 = vpop.f32.mrf.mxu0 }
  0xeb   : > { %5143 = vmatpush3.msra.mxu1 %v432_v55  ;;  %v5889_v39 = vpop.f32.mrf.mxu1  ;;  %5133 = vmatprep.subr.mxu0 %v5215_v0 }
  0xec   : > { %5144 = vmatprep.subr.mxu1 %v5215_v0  ;;  %5134 = vmatpush3.msra.mxu0 %v427_v58  ;;  %v4701_v62 = vpop.f32.mrf.mxu0 }
  0xed   : > { %5145 = vmatpush3.msra.mxu1 %v431_v61  ;;  %v4712_v63 = vpop.f32.mrf.mxu1  ;;  %5135 = vmatprep.subr.mxu0 %v5215_v0 }
  0xee   : > { %5146 = vmatprep.subr.mxu1 %v5215_v0  ;;  %5136 = vmatpush3.msra.mxu0 %v426_v33 }
  0xef   : > { %5147 = vmatpush3.msra.mxu1 %v430_v44  ;;  %5137 = vmatprep.subr.mxu0 %v5215_v0 }
  0xf0   : > { %5148 = vmatprep.subr.mxu1 %v5215_v0  ;;  %5138 = vmatpush3.msra.mxu0 %v425_v1 }
  0xf1   : > { %5139 = vmatprep.mubr.msk.f32.mxu0 %vm5216_vm0, %v5215_v0  ;;  %5149 = vmatpush3.msra.mxu1 %v429_v2 }
  0xf2   : > { %5150 = vmatprep.mubr.msk.f32.mxu1 %vm5216_vm0, %v5215_v0  ;;  %5140 = vmatmul.mubr.msk.f32.vlgmr.msra.gmra.mxu0 %vm449_vm1, %v5553_v45  ;;  %v434_v45 = vld [vmem:[%s5611_s25 + $0x2a8] sm:$0xff] }
  0xf3   : > { %5151 = vmatmul.mubr.msk.f32.vlgmr.msra.gmra.mxu1 %vm449_vm1, %v5580_v56  ;;  %5153 = vmatprep.subr.mxu0 %v5215_v0  ;;  %v438_v56 = vld [vmem:[%s5611_s25 + $0x2c8] sm:$0xff] }
  0xf4   : > { %5164 = vmatprep.subr.mxu1 %v5215_v0  ;;  %5154 = vmatpush3.msra.mxu0 %v436_v3  ;;  %v5915_v11 = vpop.f32.mrf.mxu0 }
  0xf5   : > { %5165 = vmatpush3.msra.mxu1 %v440_v4  ;;  %v5917_v12 = vpop.f32.mrf.mxu1  ;;  %5155 = vmatprep.subr.mxu0 %v5215_v0 }
  0xf6   : > { %5166 = vmatprep.subr.mxu1 %v5215_v0  ;;  %5156 = vmatpush3.msra.mxu0 %v435_v40  ;;  %v4723_v13 = vpop.f32.mrf.mxu0 }
  0xf7   : > { %5167 = vmatpush3.msra.mxu1 %v439_v49  ;;  %v4734_v14 = vpop.f32.mrf.mxu1  ;;  %5157 = vmatprep.subr.mxu0 %v5215_v0 }
  0xf8   : > { %5168 = vmatprep.subr.mxu1 %v5215_v0  ;;  %5158 = vmatpush3.msra.mxu0 %v434_v45 }
  0xf9   : > { %5169 = vmatpush3.msra.mxu1 %v438_v56  ;;  %5159 = vmatprep.subr.mxu0 %v5215_v0 }
  0xfa   : > { %5170 = vmatprep.subr.mxu1 %v5215_v0  ;;  %5160 = vmatpush3.msra.mxu0 %v433_v15 }
  0xfb   : > { %5161 = vmatprep.mubr.msk.f32.mxu0 %vm5216_vm0, %v5215_v0  ;;  %5171 = vmatpush3.msra.mxu1 %v437_v16 }
  0xfc   : > { %5172 = vmatprep.mubr.msk.f32.mxu1 %vm5216_vm0, %v5215_v0  ;;  %5162 = vmatmul.mubr.msk.f32.vlgmr.msra.gmra.mxu0 %vm449_vm1, %v5583_v57  ;;  %v442_v57 = vld [vmem:[%s5611_s25 + $0x2e8] sm:$0xff] }
  0xfd   : > { %5173 = vmatmul.mubr.msk.f32.vlgmr.msra.gmra.mxu1 %vm449_vm1, %v5617_v5  ;;  %5175 = vmatprep.subr.mxu0 %v5215_v0  ;;  %v446_v5 = vld [vmem:[%s5611_s25 + $0x308] sm:$0xff] }
  0xfe   : > { %5186 = vmatprep.subr.mxu1 %v5215_v0  ;;  %5176 = vmatpush3.msra.mxu0 %v444_v50  ;;  %v5943_v24 = vpop.f32.mrf.mxu0 }
  0xff   : > { %5187 = vmatpush3.msra.mxu1 %v448_v59  ;;  %v5945_v25 = vpop.f32.mrf.mxu1  ;;  %5177 = vmatprep.subr.mxu0 %v5215_v0 }
 0x100   : > { %5188 = vmatprep.subr.mxu1 %v5215_v0  ;;  %5178 = vmatpush3.msra.mxu0 %v443_v17  ;;  %v4745_v26 = vpop.f32.mrf.mxu0 }
 0x101   : > { %5189 = vmatpush3.msra.mxu1 %v447_v22  ;;  %v4756_v27 = vpop.f32.mrf.mxu1  ;;  %5179 = vmatprep.subr.mxu0 %v5215_v0 }
 0x102   : > { %5190 = vmatprep.subr.mxu1 %v5215_v0  ;;  %5180 = vmatpush3.msra.mxu0 %v442_v57 }
 0x103   : > { %5191 = vmatpush3.msra.mxu1 %v446_v5  ;;  %5181 = vmatprep.subr.mxu0 %v5215_v0 }
 0x104   : > { %5192 = vmatprep.subr.mxu1 %v5215_v0  ;;  %5182 = vmatpush3.msra.mxu0 %v441_v60 }
 0x105   : > { %5183 = vmatprep.mubr.msk.f32.mxu0 %vm5216_vm0, %v5215_v0  ;;  %5193 = vmatpush3.msra.mxu1 %v445_v6 }
 0x106   : > { %5194 = vmatprep.mubr.msk.f32.mxu1 %vm5216_vm0, %v5215_v0  ;;  %5184 = vmatmul.mubr.msk.f32.vlgmr.msra.gmra.mxu0 %vm449_vm1, %v5620_v8 }
 0x107   : > { %5195 = vmatmul.mubr.msk.f32.vlgmr.msra.gmra.mxu1 %vm449_vm1, %v5647_v23 }
 0x108   : > { %v5965_v28 = vpop.f32.mrf.mxu0 }
 0x109   : > { %v5967_v31 = vpop.f32.mrf.mxu1 }
 0x10a   : > { %v4767_v9 = vpop.f32.mrf.mxu0 }
 0x10b   : > { %v4778_v34 = vpop.f32.mrf.mxu1 }
 0x112   : > { %v5969_v35 = vpop.f32.mrf.mxu0 }
 0x113   : > { %v5971_v7 = vpop.f32.mrf.mxu1 }
 0x114   : > { %v4789_v18 = vpop.f32.mrf.mxu0 }
 0x115   : > { %v4800_v38 = vpop.f32.mrf.mxu1 }
 0x11c   : > { %v5973_v41 = vpop.f32.mrf.mxu0 }
 0x11d   : > { %v5975_v0 = vpop.f32.mrf.mxu1 }
 0x11e   : > { %v4811_v8 = vpop.f32.mrf.mxu0 }
 0x11f   : > { %v4822_v10 = vpop.f32.mrf.mxu1 }
 0x126   : > { %v5977_v19 = vpop.f32.mrf.mxu0 }
 0x127   : > { %v5979_v23 = vpop.f32.mrf.mxu1 }
 0x128   : > { %v4833_v42 = vpop.f32.mrf.mxu0 }
 0x129   : > { %v4844_v43 = vpop.f32.mrf.mxu1 }
 0x130   : > { %v5981_v46 = vpop.f32.mrf.mxu0 }
 0x131   : > { %v5983_v47 = vpop.f32.mrf.mxu1 }
 0x132   : > { %v4855_v21 = vpop.f32.mrf.mxu0 }
 0x133   : > { %v4866_v32 = vpop.f32.mrf.mxu1 }
 0x13a   : > { %v5985_v20 = vpop.f32.mrf.mxu0 }
 0x13b   : > { %v5987_v29 = vpop.f32.mrf.mxu1 }
 0x13c   : > { %v4877_v52 = vpop.f32.mrf.mxu0 }
 0x13d   : > { %v4888_v53 = vpop.f32.mrf.mxu1 }
 0x144   : > { %v5989_v54 = vpop.f32.mrf.mxu0 }
 0x145   : > { %v5991_v55 = vpop.f32.mrf.mxu1 }
 0x146   : > { %v4899_v58 = vpop.f32.mrf.mxu0 }
 0x147   : > { %v4910_v61 = vpop.f32.mrf.mxu1 }
 0x14e   : > { %v5993_v33 = vpop.f32.mrf.mxu0 }
 0x14f   : > { %v2341_v44 = vpop.f32.mrf.mxu1 }
 0x150   : > { %v4050_v62 = vrot.slane %v2341_v44, 2  ;;  %v4151_v63 = vrot.slane %v2341_v44, 6  ;;  %v4921_v1 = vpop.f32.mrf.mxu0 }
 0x151   : > { %v4932_v2 = vpop.f32.mrf.mxu1 }
 0x152   : > { %v4100_v3 = vsub.f32 %v5831_v36, %v4050_v62  ;;  %v4201_v4 = vadd.f32 %v4151_v63, %v5831_v36 }
 0x154   : > { %4126 = vst.msk [vmem:[%s6000_s28] sm:$0x3] %vm4125_vm2, %v4100_v3 }
 0x155   : > { %4227 = vst.msk [vmem:[%s6000_s28] sm:$0xc] %vm4226_vm3, %v4201_v4 }
 0x158   : > { %v2411_v40 = vpop.f32.mrf.mxu0 }
 0x159   : > { %v2481_v49 = vpop.f32.mrf.mxu1  ;;  %v4051_v45 = vrot.slane %v2411_v40, 2  ;;  %v4152_v56 = vrot.slane %v2411_v40, 6 }
 0x15a   : > { %v4052_v13 = vrot.slane %v2481_v49, 2  ;;  %v4153_v14 = vrot.slane %v2481_v49, 6  ;;  %v4943_v15 = vpop.f32.mrf.mxu0 }
 0x15b   : > { %v4954_v16 = vpop.f32.mrf.mxu1  ;;  %v4101_v50 = vsub.f32 %v5833_v37, %v4051_v45  ;;  %v4202_v59 = vadd.f32 %v4152_v56, %v5833_v37 }
 0x15c   : > { %v4102_v36 = vsub.f32 %v5859_v48, %v4052_v13  ;;  %v4203_v17 = vadd.f32 %v4153_v14, %v5859_v48 }
 0x15d   : > { %4127 = vst.msk [vmem:[%s6000_s28 + $0x4] sm:$0x3] %vm4125_vm2, %v4101_v50 }
 0x15e   : > { %4228 = vst.msk [vmem:[%s6000_s28 + $0x4] sm:$0xc] %vm4226_vm3, %v4202_v59  ;;  %4229 = vst.msk [vmem:[%s6000_s28 + $0x8] sm:$0xc] %vm4226_vm3, %v4203_v17 }
 0x15f   : > { %4128 = vst.msk [vmem:[%s6000_s28 + $0x8] sm:$0x3] %vm4125_vm2, %v4102_v36 }
 0x162   : > { %v2551_v22 = vpop.f32.mrf.mxu0 }
 0x163   : > { %v2621_v57 = vpop.f32.mrf.mxu1  ;;  %v4053_v5 = vrot.slane %v2551_v22, 2  ;;  %v4154_v37 = vrot.slane %v2551_v22, 6 }
 0x164   : > { %v4054_v26 = vrot.slane %v2621_v57, 2  ;;  %v4155_v27 = vrot.slane %v2621_v57, 6  ;;  %v4965_v60 = vpop.f32.mrf.mxu0 }
 0x165   : > { %v4976_v48 = vpop.f32.mrf.mxu1  ;;  %v4103_v6 = vsub.f32 %v5861_v51, %v4053_v5  ;;  %v4204_v9 = vadd.f32 %v4154_v37, %v5861_v51 }
 0x166   : > { %v4104_v34 = vsub.f32 %v5887_v30, %v4054_v26  ;;  %v4205_v18 = vadd.f32 %v4155_v27, %v5887_v30 }
 0x167   : > { %4129 = vst.msk [vmem:[%s6000_s28 + $0xc] sm:$0x3] %vm4125_vm2, %v4103_v6 }
 0x168   : > { %4230 = vst.msk [vmem:[%s6000_s28 + $0xc] sm:$0xc] %vm4226_vm3, %v4204_v9  ;;  %4231 = vst.msk [vmem:[%s6000_s28 + $0x10] sm:$0xc] %vm4226_vm3, %v4205_v18 }
 0x169   : > { %4130 = vst.msk [vmem:[%s6000_s28 + $0x10] sm:$0x3] %vm4125_vm2, %v4104_v34 }
 0x16c   : > { %v2691_v38 = vpop.f32.mrf.mxu0 }
 0x16d   : > { %v2761_v8 = vpop.f32.mrf.mxu1  ;;  %v4055_v10 = vrot.slane %v2691_v38, 2  ;;  %v4156_v51 = vrot.slane %v2691_v38, 6 }
 0x16e   : > { %v4056_v42 = vrot.slane %v2761_v8, 2  ;;  %v4157_v43 = vrot.slane %v2761_v8, 6  ;;  %v4987_v21 = vpop.f32.mrf.mxu0 }
 0x16f   : > { %v4998_v30 = vpop.f32.mrf.mxu1  ;;  %v4105_v32 = vsub.f32 %v5889_v39, %v4055_v10  ;;  %v4206_v52 = vadd.f32 %v4156_v51, %v5889_v39 }
 0x170   : > { %v4106_v53 = vsub.f32 %v5915_v11, %v4056_v42  ;;  %v4207_v58 = vadd.f32 %v4157_v43, %v5915_v11 }
 0x171   : > { %4131 = vst.msk [vmem:[%s6000_s28 + $0x14] sm:$0x3] %vm4125_vm2, %v4105_v32 }
 0x172   : > { %4232 = vst.msk [vmem:[%s6000_s28 + $0x14] sm:$0xc] %vm4226_vm3, %v4206_v52  ;;  %4233 = vst.msk [vmem:[%s6000_s28 + $0x18] sm:$0xc] %vm4226_vm3, %v4207_v58 }
 0x173   : > { %4132 = vst.msk [vmem:[%s6000_s28 + $0x18] sm:$0x3] %vm4125_vm2, %v4106_v53 }
 0x176   : > { %v2831_v61 = vpop.f32.mrf.mxu0 }
 0x177   : > { %v2901_v44 = vpop.f32.mrf.mxu1  ;;  %v4057_v62 = vrot.slane %v2831_v61, 2  ;;  %v4158_v39 = vrot.slane %v2831_v61, 6 }
 0x178   : > { %v4058_v63 = vrot.slane %v2901_v44, 2  ;;  %v4159_v1 = vrot.slane %v2901_v44, 6  ;;  %v5009_v2 = vpop.f32.mrf.mxu0 }
 0x179   : > { %v5020_v11 = vpop.f32.mrf.mxu1  ;;  %v4107_v3 = vsub.f32 %v5917_v12, %v4057_v62  ;;  %v4208_v4 = vadd.f32 %v4158_v39, %v5917_v12 }
 0x17a   : > { %v4108_v40 = vsub.f32 %v5943_v24, %v4058_v63  ;;  %v4209_v49 = vadd.f32 %v4159_v1, %v5943_v24 }
 0x17b   : > { %4133 = vst.msk [vmem:[%s6000_s28 + $0x1c] sm:$0x3] %vm4125_vm2, %v4107_v3 }
 0x17c   : > { %4234 = vst.msk [vmem:[%s6000_s28 + $0x1c] sm:$0xc] %vm4226_vm3, %v4208_v4  ;;  %4235 = vst.msk [vmem:[%s6000_s28 + $0x20] sm:$0xc] %vm4226_vm3, %v4209_v49 }
 0x17d   : > { %4134 = vst.msk [vmem:[%s6000_s28 + $0x20] sm:$0x3] %vm4125_vm2, %v4108_v40 }
 0x180   : > { %v2971_v45 = vpop.f32.mrf.mxu0 }
 0x181   : > { %v3041_v56 = vpop.f32.mrf.mxu1  ;;  %v4059_v13 = vrot.slane %v2971_v45, 2  ;;  %v4160_v12 = vrot.slane %v2971_v45, 6 }
 0x182   : > { %v4060_v14 = vrot.slane %v3041_v56, 2  ;;  %v4161_v15 = vrot.slane %v3041_v56, 6  ;;  %v5031_v16 = vpop.f32.mrf.mxu0 }
 0x183   : > { %v5042_v24 = vpop.f32.mrf.mxu1  ;;  %v4109_v50 = vsub.f32 %v5945_v25, %v4059_v13  ;;  %v4210_v59 = vadd.f32 %v4160_v12, %v5945_v25 }
 0x184   : > { %v4110_v36 = vsub.f32 %v5965_v28, %v4060_v14  ;;  %v4211_v17 = vadd.f32 %v4161_v15, %v5965_v28 }
 0x185   : > { %4135 = vst.msk [vmem:[%s6000_s28 + $0x24] sm:$0x3] %vm4125_vm2, %v4109_v50 }
 0x186   : > { %4236 = vst.msk [vmem:[%s6000_s28 + $0x24] sm:$0xc] %vm4226_vm3, %v4210_v59  ;;  %4237 = vst.msk [vmem:[%s6000_s28 + $0x28] sm:$0xc] %vm4226_vm3, %v4211_v17 }
 0x187   : > { %4136 = vst.msk [vmem:[%s6000_s28 + $0x28] sm:$0x3] %vm4125_vm2, %v4110_v36 }
 0x18a   : > { %v3111_v22 = vpop.f32.mrf.mxu0 }
 0x18b   : > { %v3181_v57 = vpop.f32.mrf.mxu1  ;;  %v4061_v5 = vrot.slane %v3111_v22, 2  ;;  %v4162_v25 = vrot.slane %v3111_v22, 6 }
 0x18c   : > { %v4062_v37 = vrot.slane %v3181_v57, 2  ;;  %v4163_v26 = vrot.slane %v3181_v57, 6  ;;  %v5053_v27 = vpop.f32.mrf.mxu0 }
 0x18d   : > { %v5064_v28 = vpop.f32.mrf.mxu1  ;;  %v4111_v60 = vsub.f32 %v5967_v31, %v4061_v5  ;;  %v4212_v48 = vadd.f32 %v4162_v25, %v5967_v31 }
 0x18e   : > { %v4112_v6 = vsub.f32 %v5969_v35, %v4062_v37  ;;  %v4213_v9 = vadd.f32 %v4163_v26, %v5969_v35 }
 0x18f   : > { %4137 = vst.msk [vmem:[%s6000_s28 + $0x2c] sm:$0x3] %vm4125_vm2, %v4111_v60 }
 0x190   : > { %4238 = vst.msk [vmem:[%s6000_s28 + $0x2c] sm:$0xc] %vm4226_vm3, %v4212_v48  ;;  %4239 = vst.msk [vmem:[%s6000_s28 + $0x30] sm:$0xc] %vm4226_vm3, %v4213_v9 }
 0x191   : > { %4138 = vst.msk [vmem:[%s6000_s28 + $0x30] sm:$0x3] %vm4125_vm2, %v4112_v6 }
 0x194   : > { %v3251_v34 = vpop.f32.mrf.mxu0 }
 0x195   : > { %v3321_v18 = vpop.f32.mrf.mxu1  ;;  %v4063_v38 = vrot.slane %v3251_v34, 2  ;;  %v4164_v31 = vrot.slane %v3251_v34, 6 }
 0x196   : > { %v4064_v8 = vrot.slane %v3321_v18, 2  ;;  %v4165_v10 = vrot.slane %v3321_v18, 6  ;;  %v5075_v51 = vpop.f32.mrf.mxu0 }
 0x197   : > { %v5086_v35 = vpop.f32.mrf.mxu1  ;;  %v4113_v42 = vsub.f32 %v5971_v7, %v4063_v38  ;;  %v4214_v43 = vadd.f32 %v4164_v31, %v5971_v7 }
 0x198   : > { %v4114_v21 = vsub.f32 %v5973_v41, %v4064_v8  ;;  %v4215_v30 = vadd.f32 %v4165_v10, %v5973_v41 }
 0x199   : > { %4139 = vst.msk [vmem:[%s6000_s28 + $0x34] sm:$0x3] %vm4125_vm2, %v4113_v42 }
 0x19a   : > { %4240 = vst.msk [vmem:[%s6000_s28 + $0x34] sm:$0xc] %vm4226_vm3, %v4214_v43  ;;  %4241 = vst.msk [vmem:[%s6000_s28 + $0x38] sm:$0xc] %vm4226_vm3, %v4215_v30 }
 0x19b   : > { %4140 = vst.msk [vmem:[%s6000_s28 + $0x38] sm:$0x3] %vm4125_vm2, %v4114_v21 }
 0x19e   : > { %v3391_v32 = vpop.f32.mrf.mxu0 }
 0x19f   : > { %v3461_v52 = vpop.f32.mrf.mxu1  ;;  %v4065_v53 = vrot.slane %v3391_v32, 2  ;;  %v4166_v7 = vrot.slane %v3391_v32, 6 }
 0x1a0   : > { %v4066_v58 = vrot.slane %v3461_v52, 2  ;;  %v4167_v61 = vrot.slane %v3461_v52, 6  ;;  %v5097_v44 = vpop.f32.mrf.mxu0 }
 0x1a1   : > { %v5108_v41 = vpop.f32.mrf.mxu1  ;;  %v4115_v62 = vsub.f32 %v5975_v0, %v4065_v53  ;;  %v4216_v39 = vadd.f32 %v4166_v7, %v5975_v0 }
 0x1a2   : > { %v4116_v63 = vsub.f32 %v5977_v19, %v4066_v58  ;;  %v4217_v1 = vadd.f32 %v4167_v61, %v5977_v19 }
 0x1a3   : > { %4141 = vst.msk [vmem:[%s6000_s28 + $0x3c] sm:$0x3] %vm4125_vm2, %v4115_v62 }
 0x1a4   : > { %4242 = vst.msk [vmem:[%s6000_s28 + $0x3c] sm:$0xc] %vm4226_vm3, %v4216_v39  ;;  %4243 = vst.msk [vmem:[%s6000_s28 + $0x40] sm:$0xc] %vm4226_vm3, %v4217_v1 }
 0x1a5   : > { %4142 = vst.msk [vmem:[%s6000_s28 + $0x40] sm:$0x3] %vm4125_vm2, %v4116_v63 }
 0x1a8   : > { %v3531_v2 = vpop.f32.mrf.mxu0 }
 0x1a9   : > { %v3601_v11 = vpop.f32.mrf.mxu1  ;;  %v4067_v3 = vrot.slane %v3531_v2, 2  ;;  %v4168_v0 = vrot.slane %v3531_v2, 6 }
 0x1aa   : > { %v4068_v4 = vrot.slane %v3601_v11, 2  ;;  %v4169_v40 = vrot.slane %v3601_v11, 6  ;;  %v5119_v49 = vpop.f32.mrf.mxu0 }
 0x1ab   : > { %v5130_v19 = vpop.f32.mrf.mxu1  ;;  %v4117_v45 = vsub.f32 %v5979_v23, %v4067_v3  ;;  %v4218_v56 = vadd.f32 %v4168_v0, %v5979_v23 }
 0x1ac   : > { %v4118_v13 = vsub.f32 %v5981_v46, %v4068_v4  ;;  %v4219_v12 = vadd.f32 %v4169_v40, %v5981_v46 }
 0x1ad   : > { %4143 = vst.msk [vmem:[%s6000_s28 + $0x44] sm:$0x3] %vm4125_vm2, %v4117_v45 }
 0x1ae   : > { %4244 = vst.msk [vmem:[%s6000_s28 + $0x44] sm:$0xc] %vm4226_vm3, %v4218_v56  ;;  %4245 = vst.msk [vmem:[%s6000_s28 + $0x48] sm:$0xc] %vm4226_vm3, %v4219_v12 }
 0x1af   : > { %4144 = vst.msk [vmem:[%s6000_s28 + $0x48] sm:$0x3] %vm4125_vm2, %v4118_v13 }
 0x1b2   : > { %v3671_v14 = vpop.f32.mrf.mxu0 }
 0x1b3   : > { %v3741_v15 = vpop.f32.mrf.mxu1  ;;  %v4069_v16 = vrot.slane %v3671_v14, 2  ;;  %v4170_v23 = vrot.slane %v3671_v14, 6 }
 0x1b4   : > { %v4070_v24 = vrot.slane %v3741_v15, 2  ;;  %v4171_v50 = vrot.slane %v3741_v15, 6  ;;  %v5141_v59 = vpop.f32.mrf.mxu0 }
 0x1b5   : > { %v5152_v46 = vpop.f32.mrf.mxu1  ;;  %v4119_v36 = vsub.f32 %v5983_v47, %v4069_v16  ;;  %v4220_v17 = vadd.f32 %v4170_v23, %v5983_v47 }
 0x1b6   : > { %v4120_v22 = vsub.f32 %v5985_v20, %v4070_v24  ;;  %v4221_v57 = vadd.f32 %v4171_v50, %v5985_v20 }
 0x1b7   : > { %4145 = vst.msk [vmem:[%s6000_s28 + $0x4c] sm:$0x3] %vm4125_vm2, %v4119_v36 }
 0x1b8   : > { %4246 = vst.msk [vmem:[%s6000_s28 + $0x4c] sm:$0xc] %vm4226_vm3, %v4220_v17  ;;  %4247 = vst.msk [vmem:[%s6000_s28 + $0x50] sm:$0xc] %vm4226_vm3, %v4221_v57 }
 0x1b9   : > { %4146 = vst.msk [vmem:[%s6000_s28 + $0x50] sm:$0x3] %vm4125_vm2, %v4120_v22 }
 0x1bc   : > { %v3811_v5 = vpop.f32.mrf.mxu0 }
 0x1bd   : > { %v3881_v25 = vpop.f32.mrf.mxu1  ;;  %v4071_v37 = vrot.slane %v3811_v5, 2  ;;  %v4172_v47 = vrot.slane %v3811_v5, 6 }
 0x1be   : > { %v4072_v26 = vrot.slane %v3881_v25, 2  ;;  %v4173_v27 = vrot.slane %v3881_v25, 6  ;;  %v5163_v28 = vpop.f32.mrf.mxu0 }
 0x1bf   : > { %v5174_v20 = vpop.f32.mrf.mxu1  ;;  %v4121_v60 = vsub.f32 %v5987_v29, %v4071_v37  ;;  %v4222_v48 = vadd.f32 %v4172_v47, %v5987_v29 }
 0x1c0   : > { %v4122_v6 = vsub.f32 %v5989_v54, %v4072_v26  ;;  %v4223_v9 = vadd.f32 %v4173_v27, %v5989_v54 }
 0x1c1   : > { %4147 = vst.msk [vmem:[%s6000_s28 + $0x54] sm:$0x3] %vm4125_vm2, %v4121_v60 }
 0x1c2   : > { %4248 = vst.msk [vmem:[%s6000_s28 + $0x54] sm:$0xc] %vm4226_vm3, %v4222_v48  ;;  %4249 = vst.msk [vmem:[%s6000_s28 + $0x58] sm:$0xc] %vm4226_vm3, %v4223_v9 }
 0x1c3   : > { %4148 = vst.msk [vmem:[%s6000_s28 + $0x58] sm:$0x3] %vm4125_vm2, %v4122_v6 }
 0x1c6   : > { %v3951_v34 = vpop.f32.mrf.mxu0 }
 0x1c7   : > { %v4021_v18 = vpop.f32.mrf.mxu1  ;;  %v4073_v38 = vrot.slane %v3951_v34, 2  ;;  %v4174_v29 = vrot.slane %v3951_v34, 6 }
 0x1c8   : > { %v4074_v31 = vrot.slane %v4021_v18, 2  ;;  %v4175_v8 = vrot.slane %v4021_v18, 6  ;;  %v5185_v10 = vpop.f32.mrf.mxu0 }
 0x1c9   : > { %v5196_v54 = vpop.f32.mrf.mxu1  ;;  %v4123_v51 = vsub.f32 %v5991_v55, %v4073_v38  ;;  %v4224_v35 = vadd.f32 %v4174_v29, %v5991_v55 }
 0x1ca   : > { %v4124_v42 = vsub.f32 %v5993_v33, %v4074_v31  ;;  %v4225_v43 = vadd.f32 %v4175_v8, %v5993_v33 }
 0x1cb   : > { %4149 = vst.msk [vmem:[%s6000_s28 + $0x5c] sm:$0x3] %vm4125_vm2, %v4123_v51 }
 0x1cc   : > { %4250 = vst.msk [vmem:[%s6000_s28 + $0x5c] sm:$0xc] %vm4226_vm3, %v4224_v35  ;;  %4251 = vst.msk [vmem:[%s6000_s28 + $0x60] sm:$0xc] %vm4226_vm3, %v4225_v43 }
 0x1cd   : > { %4150 = vst.msk [vmem:[%s6000_s28 + $0x60] sm:$0x3] %vm4125_vm2, %v4124_v42 }
 0x1ce PF: > { %s13_s12 = sadd.s32 1, %s5213_s12  }
 0x1cf   : > { %p10_p4 = scmp.ge.s32.totalorder %s13_s12, 4  }
 0x1d1   :  { %12 = sbr.rel (!%p10_p4) target bundleno = 1 (0x1), region = 68 }

// kernel: reverse.5
= control target key start
LH: loop header
LB: loop body
LE: loop exit
PB: predicated region body
PF: predicated region fallthrough
CT: control target
= control target key end

     0   :  { %s1256_s0 = inlined_call_operand.vmem [shape: f32[2,64,28,13], index: 0, kind: input, shape index: {}]   ;;  %s1257_s1 = inlined_call_operand.vmem [shape: f32[2,64,28,13], index: 1, kind: output, shape index: {}]  }
   0x1   :  { %v416_v0 = vld [vmem:[%s1256_s0 + $0x180] sm:$0xff]  ;;  %v466_v26 = vld [vmem:[%s1256_s0 + $0x188] sm:$0xff]  ;;  %v518_v52 = vld [vmem:[%s1256_s0 + $0x190] sm:$0xff] }
   0x2   :  { %v417_v1 = vld [vmem:[%s1256_s0 + $0x320] sm:$0xff]  ;;  %4 = vst [vmem:[%s1257_s1] sm:$0xff] %v416_v0  ;;  %467 = vst [vmem:[%s1257_s1 + $0x8] sm:$0xff] %v466_v26  ;;  %v468_v27 = vld [vmem:[%s1256_s0 + $0x328] sm:$0xff] }
   0x3   :  { %v419_v2 = vld [vmem:[%s1256_s0 + $0x160] sm:$0xff]  ;;  %418 = vst [vmem:[%s1257_s1 + $0x1a0] sm:$0xff] %v417_v1  ;;  %v470_v28 = vld [vmem:[%s1256_s0 + $0x168] sm:$0xff]  ;;  %469 = vst [vmem:[%s1257_s1 + $0x1a8] sm:$0xff] %v468_v27 }
   0x4   :  { %420 = vst [vmem:[%s1257_s1 + $0x20] sm:$0xff] %v419_v2  ;;  %v421_v3 = vld [vmem:[%s1256_s0 + $0x300] sm:$0xff]  ;;  %v472_v29 = vld [vmem:[%s1256_s0 + $0x308] sm:$0xff]  ;;  %471 = vst [vmem:[%s1257_s1 + $0x28] sm:$0xff] %v470_v28 }
   0x5   :  { %v423_v4 = vld [vmem:[%s1256_s0 + $0x140] sm:$0xff]  ;;  %422 = vst [vmem:[%s1257_s1 + $0x1c0] sm:$0xff] %v421_v3  ;;  %473 = vst [vmem:[%s1257_s1 + $0x1c8] sm:$0xff] %v472_v29  ;;  %v474_v30 = vld [vmem:[%s1256_s0 + $0x148] sm:$0xff] }
   0x6   :  { %v425_v5 = vld [vmem:[%s1256_s0 + $0x2e0] sm:$0xff]  ;;  %424 = vst [vmem:[%s1257_s1 + $0x40] sm:$0xff] %v423_v4  ;;  %v476_v31 = vld [vmem:[%s1256_s0 + $0x2e8] sm:$0xff]  ;;  %475 = vst [vmem:[%s1257_s1 + $0x48] sm:$0xff] %v474_v30 }
   0x7   :  { %426 = vst [vmem:[%s1257_s1 + $0x1e0] sm:$0xff] %v425_v5  ;;  %v427_v6 = vld [vmem:[%s1256_s0 + $0x120] sm:$0xff]  ;;  %v478_v32 = vld [vmem:[%s1256_s0 + $0x128] sm:$0xff]  ;;  %477 = vst [vmem:[%s1257_s1 + $0x1e8] sm:$0xff] %v476_v31 }
   0x8   :  { %v429_v7 = vld [vmem:[%s1256_s0 + $0x2c0] sm:$0xff]  ;;  %428 = vst [vmem:[%s1257_s1 + $0x60] sm:$0xff] %v427_v6  ;;  %479 = vst [vmem:[%s1257_s1 + $0x68] sm:$0xff] %v478_v32  ;;  %v480_v33 = vld [vmem:[%s1256_s0 + $0x2c8] sm:$0xff] }
   0x9   :  { %v431_v8 = vld [vmem:[%s1256_s0 + $0x100] sm:$0xff]  ;;  %430 = vst [vmem:[%s1257_s1 + $0x200] sm:$0xff] %v429_v7  ;;  %v482_v34 = vld [vmem:[%s1256_s0 + $0x108] sm:$0xff]  ;;  %481 = vst [vmem:[%s1257_s1 + $0x208] sm:$0xff] %v480_v33 }
   0xa   :  { %432 = vst [vmem:[%s1257_s1 + $0x80] sm:$0xff] %v431_v8  ;;  %v433_v9 = vld [vmem:[%s1256_s0 + $0x2a0] sm:$0xff]  ;;  %v484_v35 = vld [vmem:[%s1256_s0 + $0x2a8] sm:$0xff]  ;;  %483 = vst [vmem:[%s1257_s1 + $0x88] sm:$0xff] %v482_v34 }
   0xb   :  { %v435_v10 = vld [vmem:[%s1256_s0 + $0xe0] sm:$0xff]  ;;  %434 = vst [vmem:[%s1257_s1 + $0x220] sm:$0xff] %v433_v9  ;;  %485 = vst [vmem:[%s1257_s1 + $0x228] sm:$0xff] %v484_v35  ;;  %v486_v36 = vld [vmem:[%s1256_s0 + $0xe8] sm:$0xff] }
   0xc   :  { %v437_v11 = vld [vmem:[%s1256_s0 + $0x280] sm:$0xff]  ;;  %436 = vst [vmem:[%s1257_s1 + $0xa0] sm:$0xff] %v435_v10  ;;  %v488_v37 = vld [vmem:[%s1256_s0 + $0x288] sm:$0xff]  ;;  %487 = vst [vmem:[%s1257_s1 + $0xa8] sm:$0xff] %v486_v36 }
   0xd   :  { %438 = vst [vmem:[%s1257_s1 + $0x240] sm:$0xff] %v437_v11  ;;  %v439_v12 = vld [vmem:[%s1256_s0 + $0xc0] sm:$0xff]  ;;  %v490_v38 = vld [vmem:[%s1256_s0 + $0xc8] sm:$0xff]  ;;  %489 = vst [vmem:[%s1257_s1 + $0x248] sm:$0xff] %v488_v37 }
   0xe   :  { %v441_v13 = vld [vmem:[%s1256_s0 + $0x260] sm:$0xff]  ;;  %440 = vst [vmem:[%s1257_s1 + $0xc0] sm:$0xff] %v439_v12  ;;  %491 = vst [vmem:[%s1257_s1 + $0xc8] sm:$0xff] %v490_v38  ;;  %v492_v39 = vld [vmem:[%s1256_s0 + $0x268] sm:$0xff] }
   0xf   :  { %v443_v14 = vld [vmem:[%s1256_s0 + $0xa0] sm:$0xff]  ;;  %442 = vst [vmem:[%s1257_s1 + $0x260] sm:$0xff] %v441_v13  ;;  %v494_v40 = vld [vmem:[%s1256_s0 + $0xa8] sm:$0xff]  ;;  %493 = vst [vmem:[%s1257_s1 + $0x268] sm:$0xff] %v492_v39 }
  0x10   :  { %444 = vst [vmem:[%s1257_s1 + $0xe0] sm:$0xff] %v443_v14  ;;  %v445_v15 = vld [vmem:[%s1256_s0 + $0x240] sm:$0xff]  ;;  %v496_v41 = vld [vmem:[%s1256_s0 + $0x248] sm:$0xff]  ;;  %495 = vst [vmem:[%s1257_s1 + $0xe8] sm:$0xff] %v494_v40 }
  0x11   :  { %v447_v16 = vld [vmem:[%s1256_s0 + $0x80] sm:$0xff]  ;;  %446 = vst [vmem:[%s1257_s1 + $0x280] sm:$0xff] %v445_v15  ;;  %497 = vst [vmem:[%s1257_s1 + $0x288] sm:$0xff] %v496_v41  ;;  %v498_v42 = vld [vmem:[%s1256_s0 + $0x88] sm:$0xff] }
  0x12   :  { %v449_v17 = vld [vmem:[%s1256_s0 + $0x220] sm:$0xff]  ;;  %448 = vst [vmem:[%s1257_s1 + $0x100] sm:$0xff] %v447_v16  ;;  %v500_v43 = vld [vmem:[%s1256_s0 + $0x228] sm:$0xff]  ;;  %499 = vst [vmem:[%s1257_s1 + $0x108] sm:$0xff] %v498_v42 }
  0x13   :  { %450 = vst [vmem:[%s1257_s1 + $0x2a0] sm:$0xff] %v449_v17  ;;  %v451_v18 = vld [vmem:[%s1256_s0 + $0x60] sm:$0xff]  ;;  %v502_v44 = vld [vmem:[%s1256_s0 + $0x68] sm:$0xff]  ;;  %501 = vst [vmem:[%s1257_s1 + $0x2a8] sm:$0xff] %v500_v43 }
  0x14   :  { %v453_v19 = vld [vmem:[%s1256_s0 + $0x200] sm:$0xff]  ;;  %452 = vst [vmem:[%s1257_s1 + $0x120] sm:$0xff] %v451_v18  ;;  %503 = vst [vmem:[%s1257_s1 + $0x128] sm:$0xff] %v502_v44  ;;  %v504_v45 = vld [vmem:[%s1256_s0 + $0x208] sm:$0xff] }
  0x15   :  { %v455_v20 = vld [vmem:[%s1256_s0 + $0x40] sm:$0xff]  ;;  %454 = vst [vmem:[%s1257_s1 + $0x2c0] sm:$0xff] %v453_v19  ;;  %v506_v46 = vld [vmem:[%s1256_s0 + $0x48] sm:$0xff]  ;;  %505 = vst [vmem:[%s1257_s1 + $0x2c8] sm:$0xff] %v504_v45 }
  0x16   :  { %456 = vst [vmem:[%s1257_s1 + $0x140] sm:$0xff] %v455_v20  ;;  %v457_v21 = vld [vmem:[%s1256_s0 + $0x1e0] sm:$0xff]  ;;  %v508_v47 = vld [vmem:[%s1256_s0 + $0x1e8] sm:$0xff]  ;;  %507 = vst [vmem:[%s1257_s1 + $0x148] sm:$0xff] %v506_v46 }
  0x17   :  { %v459_v22 = vld [vmem:[%s1256_s0 + $0x20] sm:$0xff]  ;;  %458 = vst [vmem:[%s1257_s1 + $0x2e0] sm:$0xff] %v457_v21  ;;  %509 = vst [vmem:[%s1257_s1 + $0x2e8] sm:$0xff] %v508_v47  ;;  %v510_v48 = vld [vmem:[%s1256_s0 + $0x28] sm:$0xff] }
  0x18   :  { %v461_v23 = vld [vmem:[%s1256_s0 + $0x1c0] sm:$0xff]  ;;  %460 = vst [vmem:[%s1257_s1 + $0x160] sm:$0xff] %v459_v22  ;;  %v512_v49 = vld [vmem:[%s1256_s0 + $0x1c8] sm:$0xff]  ;;  %511 = vst [vmem:[%s1257_s1 + $0x168] sm:$0xff] %v510_v48 }
  0x19   :  { %462 = vst [vmem:[%s1257_s1 + $0x300] sm:$0xff] %v461_v23  ;;  %v97_v24 = vld [vmem:[%s1256_s0] sm:$0xff]  ;;  %v514_v50 = vld [vmem:[%s1256_s0 + $0x8] sm:$0xff]  ;;  %513 = vst [vmem:[%s1257_s1 + $0x308] sm:$0xff] %v512_v49 }
  0x1a   :  { %v464_v25 = vld [vmem:[%s1256_s0 + $0x1a0] sm:$0xff]  ;;  %463 = vst [vmem:[%s1257_s1 + $0x180] sm:$0xff] %v97_v24  ;;  %515 = vst [vmem:[%s1257_s1 + $0x188] sm:$0xff] %v514_v50  ;;  %v516_v51 = vld [vmem:[%s1256_s0 + $0x1a8] sm:$0xff] }
  0x1b   :  { %465 = vst [vmem:[%s1257_s1 + $0x320] sm:$0xff] %v464_v25  ;;  %v520_v53 = vld [vmem:[%s1256_s0 + $0x330] sm:$0xff]  ;;  %517 = vst [vmem:[%s1257_s1 + $0x328] sm:$0xff] %v516_v51  ;;  %v570_v14 = vld [vmem:[%s1256_s0 + $0x198] sm:$0xff] }
  0x1c   :  { %519 = vst [vmem:[%s1257_s1 + $0x10] sm:$0xff] %v518_v52  ;;  %521 = vst [vmem:[%s1257_s1 + $0x1b0] sm:$0xff] %v520_v53  ;;  %v522_v54 = vld [vmem:[%s1256_s0 + $0x170] sm:$0xff]  ;;  %v572_v15 = vld [vmem:[%s1256_s0 + $0x338] sm:$0xff] }
  0x1d   :  { %v524_v55 = vld [vmem:[%s1256_s0 + $0x310] sm:$0xff]  ;;  %523 = vst [vmem:[%s1257_s1 + $0x30] sm:$0xff] %v522_v54  ;;  %v574_v16 = vld [vmem:[%s1256_s0 + $0x178] sm:$0xff]  ;;  %571 = vst [vmem:[%s1257_s1 + $0x18] sm:$0xff] %v570_v14 }
  0x1e   :  { %v526_v56 = vld [vmem:[%s1256_s0 + $0x150] sm:$0xff]  ;;  %525 = vst [vmem:[%s1257_s1 + $0x1d0] sm:$0xff] %v524_v55  ;;  %573 = vst [vmem:[%s1257_s1 + $0x1b8] sm:$0xff] %v572_v15  ;;  %v576_v17 = vld [vmem:[%s1256_s0 + $0x318] sm:$0xff] }
  0x1f   :  { %527 = vst [vmem:[%s1257_s1 + $0x50] sm:$0xff] %v526_v56  ;;  %v528_v57 = vld [vmem:[%s1256_s0 + $0x2f0] sm:$0xff]  ;;  %575 = vst [vmem:[%s1257_s1 + $0x38] sm:$0xff] %v574_v16  ;;  %v578_v18 = vld [vmem:[%s1256_s0 + $0x158] sm:$0xff] }
  0x20   :  { %v530_v58 = vld [vmem:[%s1256_s0 + $0x130] sm:$0xff]  ;;  %529 = vst [vmem:[%s1257_s1 + $0x1f0] sm:$0xff] %v528_v57  ;;  %v580_v19 = vld [vmem:[%s1256_s0 + $0x2f8] sm:$0xff]  ;;  %577 = vst [vmem:[%s1257_s1 + $0x1d8] sm:$0xff] %v576_v17 }
  0x21   :  { %v532_v59 = vld [vmem:[%s1256_s0 + $0x2d0] sm:$0xff]  ;;  %531 = vst [vmem:[%s1257_s1 + $0x70] sm:$0xff] %v530_v58  ;;  %579 = vst [vmem:[%s1257_s1 + $0x58] sm:$0xff] %v578_v18  ;;  %v582_v20 = vld [vmem:[%s1256_s0 + $0x138] sm:$0xff] }
  0x22   :  { %533 = vst [vmem:[%s1257_s1 + $0x210] sm:$0xff] %v532_v59  ;;  %v534_v60 = vld [vmem:[%s1256_s0 + $0x110] sm:$0xff]  ;;  %581 = vst [vmem:[%s1257_s1 + $0x1f8] sm:$0xff] %v580_v19  ;;  %v584_v21 = vld [vmem:[%s1256_s0 + $0x2d8] sm:$0xff] }
  0x23   :  { %v536_v61 = vld [vmem:[%s1256_s0 + $0x2b0] sm:$0xff]  ;;  %535 = vst [vmem:[%s1257_s1 + $0x90] sm:$0xff] %v534_v60  ;;  %v586_v22 = vld [vmem:[%s1256_s0 + $0x118] sm:$0xff]  ;;  %583 = vst [vmem:[%s1257_s1 + $0x78] sm:$0xff] %v582_v20 }
  0x24   :  { %v538_v62 = vld [vmem:[%s1256_s0 + $0xf0] sm:$0xff]  ;;  %537 = vst [vmem:[%s1257_s1 + $0x230] sm:$0xff] %v536_v61  ;;  %585 = vst [vmem:[%s1257_s1 + $0x218] sm:$0xff] %v584_v21  ;;  %v588_v23 = vld [vmem:[%s1256_s0 + $0x2b8] sm:$0xff] }
  0x25   :  { %539 = vst [vmem:[%s1257_s1 + $0xb0] sm:$0xff] %v538_v62  ;;  %v540_v63 = vld [vmem:[%s1256_s0 + $0x290] sm:$0xff]  ;;  %587 = vst [vmem:[%s1257_s1 + $0x98] sm:$0xff] %v586_v22  ;;  %v590_v24 = vld [vmem:[%s1256_s0 + $0xf8] sm:$0xff] }
  0x26   :  { %v542_v0 = vld [vmem:[%s1256_s0 + $0xd0] sm:$0xff]  ;;  %541 = vst [vmem:[%s1257_s1 + $0x250] sm:$0xff] %v540_v63  ;;  %v592_v25 = vld [vmem:[%s1256_s0 + $0x298] sm:$0xff]  ;;  %589 = vst [vmem:[%s1257_s1 + $0x238] sm:$0xff] %v588_v23 }
  0x27   :  { %v544_v1 = vld [vmem:[%s1256_s0 + $0x270] sm:$0xff]  ;;  %543 = vst [vmem:[%s1257_s1 + $0xd0] sm:$0xff] %v542_v0  ;;  %591 = vst [vmem:[%s1257_s1 + $0xb8] sm:$0xff] %v590_v24  ;;  %v594_v26 = vld [vmem:[%s1256_s0 + $0xd8] sm:$0xff] }
  0x28   :  { %545 = vst [vmem:[%s1257_s1 + $0x270] sm:$0xff] %v544_v1  ;;  %v546_v2 = vld [vmem:[%s1256_s0 + $0xb0] sm:$0xff]  ;;  %593 = vst [vmem:[%s1257_s1 + $0x258] sm:$0xff] %v592_v25  ;;  %v596_v27 = vld [vmem:[%s1256_s0 + $0x278] sm:$0xff] }
  0x29   :  { %v548_v3 = vld [vmem:[%s1256_s0 + $0x250] sm:$0xff]  ;;  %547 = vst [vmem:[%s1257_s1 + $0xf0] sm:$0xff] %v546_v2  ;;  %v598_v28 = vld [vmem:[%s1256_s0 + $0xb8] sm:$0xff]  ;;  %595 = vst [vmem:[%s1257_s1 + $0xd8] sm:$0xff] %v594_v26 }
  0x2a   :  { %v550_v4 = vld [vmem:[%s1256_s0 + $0x90] sm:$0xff]  ;;  %549 = vst [vmem:[%s1257_s1 + $0x290] sm:$0xff] %v548_v3  ;;  %597 = vst [vmem:[%s1257_s1 + $0x278] sm:$0xff] %v596_v27  ;;  %v600_v29 = vld [vmem:[%s1256_s0 + $0x258] sm:$0xff] }
  0x2b   :  { %551 = vst [vmem:[%s1257_s1 + $0x110] sm:$0xff] %v550_v4  ;;  %v552_v5 = vld [vmem:[%s1256_s0 + $0x230] sm:$0xff]  ;;  %599 = vst [vmem:[%s1257_s1 + $0xf8] sm:$0xff] %v598_v28  ;;  %v602_v30 = vld [vmem:[%s1256_s0 + $0x98] sm:$0xff] }
  0x2c   :  { %v554_v6 = vld [vmem:[%s1256_s0 + $0x70] sm:$0xff]  ;;  %553 = vst [vmem:[%s1257_s1 + $0x2b0] sm:$0xff] %v552_v5  ;;  %v604_v31 = vld [vmem:[%s1256_s0 + $0x238] sm:$0xff]  ;;  %601 = vst [vmem:[%s1257_s1 + $0x298] sm:$0xff] %v600_v29 }
  0x2d   :  { %v556_v7 = vld [vmem:[%s1256_s0 + $0x210] sm:$0xff]  ;;  %555 = vst [vmem:[%s1257_s1 + $0x130] sm:$0xff] %v554_v6  ;;  %603 = vst [vmem:[%s1257_s1 + $0x118] sm:$0xff] %v602_v30  ;;  %v606_v32 = vld [vmem:[%s1256_s0 + $0x78] sm:$0xff] }
  0x2e   :  { %557 = vst [vmem:[%s1257_s1 + $0x2d0] sm:$0xff] %v556_v7  ;;  %v558_v8 = vld [vmem:[%s1256_s0 + $0x50] sm:$0xff]  ;;  %605 = vst [vmem:[%s1257_s1 + $0x2b8] sm:$0xff] %v604_v31  ;;  %v608_v33 = vld [vmem:[%s1256_s0 + $0x218] sm:$0xff] }
  0x2f   :  { %v560_v9 = vld [vmem:[%s1256_s0 + $0x1f0] sm:$0xff]  ;;  %559 = vst [vmem:[%s1257_s1 + $0x150] sm:$0xff] %v558_v8  ;;  %v610_v34 = vld [vmem:[%s1256_s0 + $0x58] sm:$0xff]  ;;  %607 = vst [vmem:[%s1257_s1 + $0x138] sm:$0xff] %v606_v32 }
  0x30   :  { %v562_v10 = vld [vmem:[%s1256_s0 + $0x30] sm:$0xff]  ;;  %561 = vst [vmem:[%s1257_s1 + $0x2f0] sm:$0xff] %v560_v9  ;;  %609 = vst [vmem:[%s1257_s1 + $0x2d8] sm:$0xff] %v608_v33  ;;  %v612_v35 = vld [vmem:[%s1256_s0 + $0x1f8] sm:$0xff] }
  0x31   :  { %563 = vst [vmem:[%s1257_s1 + $0x170] sm:$0xff] %v562_v10  ;;  %v564_v11 = vld [vmem:[%s1256_s0 + $0x1d0] sm:$0xff]  ;;  %611 = vst [vmem:[%s1257_s1 + $0x158] sm:$0xff] %v610_v34  ;;  %v614_v36 = vld [vmem:[%s1256_s0 + $0x38] sm:$0xff] }
  0x32   :  { %v566_v12 = vld [vmem:[%s1256_s0 + $0x10] sm:$0xff]  ;;  %565 = vst [vmem:[%s1257_s1 + $0x310] sm:$0xff] %v564_v11  ;;  %v616_v37 = vld [vmem:[%s1256_s0 + $0x1d8] sm:$0xff]  ;;  %613 = vst [vmem:[%s1257_s1 + $0x2f8] sm:$0xff] %v612_v35 }
  0x33   :  { %v568_v13 = vld [vmem:[%s1256_s0 + $0x1b0] sm:$0xff]  ;;  %567 = vst [vmem:[%s1257_s1 + $0x190] sm:$0xff] %v566_v12  ;;  %615 = vst [vmem:[%s1257_s1 + $0x178] sm:$0xff] %v614_v36  ;;  %v618_v38 = vld [vmem:[%s1256_s0 + $0x18] sm:$0xff] }
  0x34   :  { %569 = vst [vmem:[%s1257_s1 + $0x330] sm:$0xff] %v568_v13  ;;  %617 = vst [vmem:[%s1257_s1 + $0x318] sm:$0xff] %v616_v37  ;;  %v620_v39 = vld [vmem:[%s1256_s0 + $0x1b8] sm:$0xff] }
  0x35   :  { %619 = vst [vmem:[%s1257_s1 + $0x198] sm:$0xff] %v618_v38  ;;  %621 = vst [vmem:[%s1257_s1 + $0x338] sm:$0xff] %v620_v39 }

// kernel: net2d_forward.7
= control target key start
LH: loop header
LB: loop body
LE: loop exit
PB: predicated region body
PF: predicated region fallthrough
CT: control target
= control target key end

     0   :  { %v1633_v27 = vlaneseq  ;;  %v11988_v35 = vmov 1966171168   ;;  %s14730_s0 = inlined_call_operand.vmem [shape: bf16[2,12544], index: 0, kind: input, shape index: {}]   ;;  %s14731_s1 = inlined_call_operand.vmem [shape: bf16[12544,120], index: 1, kind: input, shape index: {}]   ;;  %s14732_s2 = inlined_call_operand.vmem [shape: f32[1,120], index: 2, kind: input, shape index: {}]   ;;  %s14733_s3 = inlined_call_operand.vmem [shape: f32[120,84], index: 3, kind: input, shape index: {}]   ;;  %s14734_s4 = inlined_call_operand.vmem [shape: f32[1,84], index: 4, kind: input, shape index: {}]   ;;  %s14735_s5 = inlined_call_operand.vmem [shape: f32[84,10], index: 5, kind: input, shape index: {}]   ;;  %s14736_s6 = inlined_call_operand.vmem [shape: f32[1,10], index: 6, kind: input, shape index: {}]   ;;  %s14737_s7 = inlined_call_operand.hbm [shape: f32[2,10], index: 7, kind: output, shape index: {}]  }
   0x1   :  { %v11170_v0 = vld [vmem:[%s14731_s1 + $0x78] sm:$0xff]   ;;  %v11174_v4 = vld [vmem:[%s14731_s1 + $0x70] sm:$0xff]   ;;  %v11178_v8 = vld [vmem:[%s14731_s1 + $0x68] sm:$0xff]   ;;  %v1631_v36 = vunpack.c.l.s4 %v11988_v35 }
   0x2   :  { %v11171_v1 = vld [vmem:[%s14731_s1 + $0x38] sm:$0xff]   ;;  %10002 = vmatprep.subr.bf16.mxu0 %v11170_v0  ;;  %v11175_v5 = vld [vmem:[%s14731_s1 + $0x30] sm:$0xff]   ;;  %v11179_v9 = vld [vmem:[%s14731_s1 + $0x28] sm:$0xff]   ;;  %v1634_v32 = vshrl.u32 %v1633_v27, 7 }
   0x3   :  { %v11172_v2 = vld [vmem:[%s14731_s1 + $0xf8] sm:$0xff]   ;;  %10003 = vmatpush3.bf16.msra.mxu0 %v11171_v1  ;;  %v11176_v6 = vld [vmem:[%s14731_s1 + $0xf0] sm:$0xff]   ;;  %v11180_v10 = vld [vmem:[%s14731_s1 + $0xe8] sm:$0xff]   ;;  %v1632_v39 = vunpack.c.0.s8 %v1631_v36 }
   0x4   :  { %v11173_v3 = vld [vmem:[%s14731_s1 + $0xb8] sm:$0xff]   ;;  %10024 = vmatprep.subr.bf16.mxu1 %v11172_v2  ;;  %10004 = vmatprep.subr.bf16.mxu0 %v11174_v4  ;;  %v11177_v7 = vld [vmem:[%s14731_s1 + $0xb0] sm:$0xff]   ;;  %v11181_v11 = vld [vmem:[%s14731_s1 + $0xa8] sm:$0xff]  }
   0x5   :  { %10025 = vmatpush3.bf16.msra.mxu1 %v11173_v3  ;;  %v11182_v12 = vld [vmem:[%s14731_s1 + $0x60] sm:$0xff]   ;;  %v11186_v16 = vld [vmem:[%s14731_s1 + $0x58] sm:$0xff]   ;;  %v11190_v20 = vld [vmem:[%s14731_s1 + $0x50] sm:$0xff]   ;;  %v12137_v41 = vsub.s32 %v1632_v39, %v1634_v32 }
   0x6   :  { %10026 = vmatprep.subr.bf16.mxu1 %v11176_v6  ;;  %v11183_v13 = vld [vmem:[%s14731_s1 + $0x20] sm:$0xff]   ;;  %v11187_v17 = vld [vmem:[%s14731_s1 + $0x18] sm:$0xff]   ;;  %v11191_v21 = vld [vmem:[%s14731_s1 + $0x10] sm:$0xff]  }
   0x7   :  { %10005 = vmatpush3.bf16.msra.mxu0 %v11175_v5  ;;  %v11184_v14 = vld [vmem:[%s14731_s1 + $0xe0] sm:$0xff]   ;;  %v11188_v18 = vld [vmem:[%s14731_s1 + $0xd8] sm:$0xff]   ;;  %v11192_v22 = vld [vmem:[%s14731_s1 + $0xd0] sm:$0xff]  }
   0x8   :  { %10006 = vmatprep.subr.bf16.mxu0 %v11178_v8  ;;  %v11185_v15 = vld [vmem:[%s14731_s1 + $0xa0] sm:$0xff]   ;;  %v11189_v19 = vld [vmem:[%s14731_s1 + $0x98] sm:$0xff]   ;;  %v11193_v23 = vld [vmem:[%s14731_s1 + $0x90] sm:$0xff]  }
   0x9   :  { %10027 = vmatpush3.bf16.msra.mxu1 %v11177_v7  ;;  %v11194_v24 = vld [vmem:[%s14731_s1 + $0x48] sm:$0xff]   ;;  %v11198_v29 = vld [vmem:[%s14731_s1 + $0x40] sm:$0xff]   ;;  %v11203_v37 = vld [vmem:[%s14731_s1 + $0x178] sm:$0xff]  }
   0xa   :  { %10028 = vmatprep.subr.bf16.mxu1 %v11180_v10  ;;  %v11195_v25 = vld [vmem:[%s14731_s1 + $0x8] sm:$0xff]   ;;  %v11199_v30 = vld [vmem:[%s14731_s1] sm:$0xff]   ;;  %v11205_v40 = vld [vmem:[%s14731_s1 + $0x1f8] sm:$0xff]  }
   0xb   :  { %10007 = vmatpush3.bf16.msra.mxu0 %v11179_v9  ;;  %v11196_v26 = vld [vmem:[%s14731_s1 + $0xc8] sm:$0xff]   ;;  %v11200_v31 = vld [vmem:[%s14731_s1 + $0xc0] sm:$0xff]   ;;  %v11204_v47 = vld [vmem:[%s14731_s1 + $0x138] sm:$0xff]  }
   0xc   :  { %10008 = vmatprep.subr.bf16.mxu0 %v11182_v12  ;;  %v11197_v28 = vld [vmem:[%s14731_s1 + $0x88] sm:$0xff]   ;;  %v28_v33 = vld [vmem:[%s14730_s0] sm:$0xff]  ;;  %v11206_v49 = vld [vmem:[%s14731_s1 + $0x1b8] sm:$0xff]  }
   0xd   :  { %10029 = vmatpush3.bf16.msra.mxu1 %v11181_v11  ;;  %v11202_v34 = vld [vmem:[%s14731_s1 + $0x80] sm:$0xff]   ;;  %v1629_v38 = vcombine.high %v28_v33, %v28_v33  ;;  %v1636_v42 = vrot.slane %v28_v33, %v12137_v41  ;;  %v11207_v52 = vld [vmem:[%s14731_s1 + $0x170] sm:$0xff]   ;;  %v11211_v58 = vld [vmem:[%s14731_s1 + $0x168] sm:$0xff]  }
   0xe   :  { %10030 = vmatprep.subr.bf16.mxu1 %v11184_v14  ;;  %v11208_v54 = vld [vmem:[%s14731_s1 + $0x130] sm:$0xff]   ;;  %v11212_v59 = vld [vmem:[%s14731_s1 + $0x128] sm:$0xff]   ;;  %v11215_v62 = vld [vmem:[%s14731_s1 + $0x160] sm:$0xff]  }
   0xf   :  { %10009 = vmatpush3.bf16.msra.mxu0 %v11183_v13  ;;  %v12141_v43 = vrot.slane %v1629_v38, %v12137_v41  ;;  %v1644_v44 = vcombine.high %v1636_v42, %v1636_v42  ;;  %v1652_v45 = vrot.slane %v1636_v42, %v12137_v41  ;;  %v11209_v55 = vld [vmem:[%s14731_s1 + $0x1f0] sm:$0xff]   ;;  %v11213_v60 = vld [vmem:[%s14731_s1 + $0x1e8] sm:$0xff]   ;;  %v11216_v63 = vld [vmem:[%s14731_s1 + $0x120] sm:$0xff]  }
  0x10   :  { %10010 = vmatprep.subr.bf16.mxu0 %v11186_v16  ;;  %v11210_v57 = vld [vmem:[%s14731_s1 + $0x1b0] sm:$0xff]   ;;  %v11214_v61 = vld [vmem:[%s14731_s1 + $0x1a8] sm:$0xff]   ;;  %v11217_v0 = vld [vmem:[%s14731_s1 + $0x1e0] sm:$0xff]  }
  0x11   :  { %10031 = vmatpush3.bf16.msra.mxu1 %v11185_v15  ;;  %v1645_v46 = vcombine.high %v12141_v43, %v12141_v43  ;;  %v1666_v48 = vrot.slane %v1644_v44, %v12137_v41  ;;  %v1674_v51 = vcombine.high %v1652_v45, %v1652_v45  ;;  %v11218_v1 = vld [vmem:[%s14731_s1 + $0x1a0] sm:$0xff]   ;;  %v11219_v2 = vld [vmem:[%s14731_s1 + $0x158] sm:$0xff]   ;;  %v11223_v6 = vld [vmem:[%s14731_s1 + $0x150] sm:$0xff]  }
  0x12   :  { %10032 = vmatprep.subr.bf16.mxu1 %v11188_v18  ;;  %v11220_v3 = vld [vmem:[%s14731_s1 + $0x118] sm:$0xff]   ;;  %v11224_v7 = vld [vmem:[%s14731_s1 + $0x110] sm:$0xff]   ;;  %v11227_v10 = vld [vmem:[%s14731_s1 + $0x148] sm:$0xff]   ;;  %v1659_v18 = vrot.slane %v12141_v43, %v12137_v41 }
  0x13   :  { %10011 = vmatpush3.bf16.msra.mxu0 %v11187_v17  ;;  %v1673_v50 = vrot.slane %v1645_v46, %v12137_v41  ;;  %7073 = vmatprep.mubr.bf16.mxu0 %v1666_v48  ;;  %v1676_v53 = vcombine.high %v1666_v48, %v1666_v48  ;;  %v11221_v4 = vld [vmem:[%s14731_s1 + $0x1d8] sm:$0xff]   ;;  %v11225_v8 = vld [vmem:[%s14731_s1 + $0x1d0] sm:$0xff]   ;;  %v11228_v11 = vld [vmem:[%s14731_s1 + $0x108] sm:$0xff]  }
  0x14   :  { %10012 = vmatprep.subr.bf16.mxu0 %v11190_v20  ;;  %v11222_v5 = vld [vmem:[%s14731_s1 + $0x198] sm:$0xff]   ;;  %v11226_v9 = vld [vmem:[%s14731_s1 + $0x190] sm:$0xff]   ;;  %v11229_v12 = vld [vmem:[%s14731_s1 + $0x1c8] sm:$0xff]  }
  0x15   :  { %10033 = vmatpush3.bf16.msra.mxu1 %v11189_v19  ;;  %v1677_v56 = vcombine.high %v1673_v50, %v1673_v50  ;;  %7113 = vmatprep.mubr.bf16.mxu1 %v1676_v53  ;;  %v11230_v13 = vld [vmem:[%s14731_s1 + $0x188] sm:$0xff]   ;;  %v11231_v14 = vld [vmem:[%s14731_s1 + $0x140] sm:$0xff]   ;;  %v11235_v19 = vld [vmem:[%s14731_s1 + $0x278] sm:$0xff]  }
  0x16   :  { %10034 = vmatprep.subr.bf16.mxu1 %v11192_v22  ;;  %v11232_v15 = vld [vmem:[%s14731_s1 + $0x100] sm:$0xff]   ;;  %v11236_v20 = vld [vmem:[%s14731_s1 + $0x238] sm:$0xff]   ;;  %v11242_v27 = vld [vmem:[%s14731_s1 + $0x2b0] sm:$0xff]  }
  0x17   :  { %10013 = vmatpush3.bf16.msra.mxu0 %v11191_v21  ;;  %v11233_v16 = vld [vmem:[%s14731_s1 + $0x1c0] sm:$0xff]   ;;  %v11237_v21 = vld [vmem:[%s14731_s1 + $0x2f8] sm:$0xff]   ;;  %v11256_v42 = vld [vmem:[%s14731_s1 + $0x210] sm:$0xff]  }
  0x18   :  { %10014 = vmatprep.subr.bf16.mxu0 %v11194_v24  ;;  %v11234_v17 = vld [vmem:[%s14731_s1 + $0x180] sm:$0xff]   ;;  %v11238_v22 = vld [vmem:[%s14731_s1 + $0x2b8] sm:$0xff]   ;;  %v11239_v24 = vld [vmem:[%s14731_s1 + $0x270] sm:$0xff]  }
  0x19   :  { %10035 = vmatpush3.bf16.msra.mxu1 %v11193_v23  ;;  %v1675_v23 = vcombine.high %v1659_v18, %v1659_v18  ;;  %v11247_v32 = vld [vmem:[%s14731_s1 + $0x260] sm:$0xff]   ;;  %v11251_v36 = vld [vmem:[%s14731_s1 + $0x258] sm:$0xff]   ;;  %v11257_v43 = vld [vmem:[%s14731_s1 + $0x2d0] sm:$0xff]  }
  0x1a   :  { %10036 = vmatprep.subr.bf16.mxu1 %v11196_v26  ;;  %v11241_v26 = vld [vmem:[%s14731_s1 + $0x2f0] sm:$0xff]   ;;  %v11248_v33 = vld [vmem:[%s14731_s1 + $0x220] sm:$0xff]   ;;  %v11253_v38 = vld [vmem:[%s14731_s1 + $0x2d8] sm:$0xff]  }
  0x1b   :  { %10015 = vmatpush3.bf16.msra.mxu0 %v11195_v25  ;;  %v11240_v25 = vld [vmem:[%s14731_s1 + $0x230] sm:$0xff]   ;;  %v11250_v35 = vld [vmem:[%s14731_s1 + $0x2a0] sm:$0xff]   ;;  %v11254_v39 = vld [vmem:[%s14731_s1 + $0x298] sm:$0xff]  }
  0x1c   :  { %10016 = vmatprep.subr.bf16.mxu0 %v11198_v29  ;;  %v11244_v29 = vld [vmem:[%s14731_s1 + $0x228] sm:$0xff]   ;;  %v11258_v44 = vld [vmem:[%s14731_s1 + $0x290] sm:$0xff]  }
  0x1d   :  { %10037 = vmatpush3.bf16.msra.mxu1 %v11197_v28  ;;  %v11243_v28 = vld [vmem:[%s14731_s1 + $0x268] sm:$0xff]  }
  0x1e   :  { %10038 = vmatprep.subr.bf16.mxu1 %v11200_v31  ;;  %v11246_v31 = vld [vmem:[%s14731_s1 + $0x2a8] sm:$0xff]  }
  0x1f   :  { %10017 = vmatpush3.bf16.msra.mxu0 %v11199_v30  ;;  %v11245_v30 = vld [vmem:[%s14731_s1 + $0x2e8] sm:$0xff]  }
  0x20   :  { %10046 = vmatprep.subr.bf16.mxu0 %v11203_v37  ;;  %v11252_v37 = vld [vmem:[%s14731_s1 + $0x218] sm:$0xff]   ;;  %v29_v46 = vld [vmem:[%s14730_s0 + $0x8] sm:$0xff] }
  0x21   :  { %10039 = vmatpush3.bf16.msra.mxu1 %v11202_v34  ;;  %v11249_v34 = vld [vmem:[%s14731_s1 + $0x2e0] sm:$0xff]   ;;  %v1685_v48 = vrot.slane %v29_v46, %v12137_v41 }
  0x22   :  { %10068 = vmatprep.subr.bf16.mxu1 %v11205_v40  ;;  %7074 = vmatmul.mubr.bf16.vlgmr.msra.gmra.mxu0 %v1652_v45  ;;  %v11255_v40 = vld [vmem:[%s14731_s1 + $0x250] sm:$0xff]   ;;  %v11259_v45 = vld [vmem:[%s14731_s1 + $0x248] sm:$0xff]  }
  0x23   :  { %10047 = vmatpush3.bf16.msra.mxu0 %v11204_v47  ;;  %7153 = vmatprep.mubr.bf16.mxu0 %v1673_v50  ;;  %v11260_v47 = vld [vmem:[%s14731_s1 + $0x208] sm:$0xff]  }
  0x24   :  { %7114 = vmatmul.mubr.bf16.vlgmr.msra.gmra.mxu1 %v1674_v51  ;;  %10048 = vmatprep.subr.bf16.mxu0 %v11207_v52  ;;  %v11261_v50 = vld [vmem:[%s14731_s1 + $0x2c8] sm:$0xff]   ;;  %v1693_v52 = vcombine.high %v1685_v48, %v1685_v48 }
  0x25   :  { %10069 = vmatpush3.bf16.msra.mxu1 %v11206_v49  ;;  %7193 = vmatprep.mubr.bf16.mxu1 %v1677_v56  ;;  %v1678_v49 = vcombine.high %v29_v46, %v29_v46  ;;  %v11262_v51 = vld [vmem:[%s14731_s1 + $0x288] sm:$0xff]  }
  0x26   :  { %10070 = vmatprep.subr.bf16.mxu1 %v11209_v55  ;;  %v11264_v55 = vld [vmem:[%s14731_s1 + $0x200] sm:$0xff]   ;;  %v1715_v56 = vrot.slane %v1693_v52, %v12137_v41  ;;  %v11310_v46 = vld [vmem:[%s14731_s1 + $0x4e8] sm:$0xff]   ;;  %v11316_v52 = vld [vmem:[%s14731_s1 + $0x458] sm:$0xff]  }
  0x27   :  { %10049 = vmatpush3.bf16.msra.mxu0 %v11208_v54  ;;  %v12329_v53 = vrot.slane %v1678_v49, %v12137_v41  ;;  %v11263_v54 = vld [vmem:[%s14731_s1 + $0x240] sm:$0xff]  }
  0x28   :  { %10050 = vmatprep.subr.bf16.mxu0 %v11211_v58  ;;  %v11265_v58 = vld [vmem:[%s14731_s1 + $0x2c0] sm:$0xff]  }
  0x29   :  { %10071 = vmatpush3.bf16.msra.mxu1 %v11210_v57  ;;  %v1694_v57 = vcombine.high %v12329_v53, %v12329_v53  ;;  %v11313_v49 = vld [vmem:[%s14731_s1 + $0x420] sm:$0xff]  }
  0x2a   :  { %10072 = vmatprep.subr.bf16.mxu1 %v11213_v60  ;;  %v1725_v60 = vcombine.high %v1715_v56, %v1715_v56 }
  0x2b   :  { %10051 = vmatpush3.bf16.msra.mxu0 %v11212_v59  ;;  %v11266_v59 = vld [vmem:[%s14731_s1 + $0x280] sm:$0xff]  }
  0x2c   :  { %10052 = vmatprep.subr.bf16.mxu0 %v11215_v62  ;;  %v11267_v62 = vld [vmem:[%s14731_s1 + $0x378] sm:$0xff]  }
  0x2d   :  { %10073 = vmatpush3.bf16.msra.mxu1 %v11214_v61  ;;  %v1701_v61 = vrot.slane %v1685_v48, %v12137_v41  ;;  %v11312_v48 = vld [vmem:[%s14731_s1 + $0x460] sm:$0xff]  }
  0x2e   :  { %10074 = vmatprep.subr.bf16.mxu1 %v11217_v0  ;;  %v1722_v0 = vrot.slane %v1694_v57, %v12137_v41  ;;  %v11321_v57 = vld [vmem:[%s14731_s1 + $0x410] sm:$0xff]  }
  0x2f   :  { %10053 = vmatpush3.bf16.msra.mxu0 %v11216_v63  ;;  %v11268_v63 = vld [vmem:[%s14731_s1 + $0x338] sm:$0xff]  }
  0x30   :  { %10054 = vmatprep.subr.bf16.mxu0 %v11219_v2  ;;  %v11270_v2 = vld [vmem:[%s14731_s1 + $0x3b8] sm:$0xff]  }
  0x31   :  { %10075 = vmatpush3.bf16.msra.mxu1 %v11218_v1  ;;  %v11269_v1 = vld [vmem:[%s14731_s1 + $0x3f8] sm:$0xff]  }
  0x32   :  { %10076 = vmatprep.subr.bf16.mxu1 %v11221_v4  ;;  %v11271_v4 = vld [vmem:[%s14731_s1 + $0x370] sm:$0xff]  }
  0x33   :  { %10055 = vmatpush3.bf16.msra.mxu0 %v11220_v3  ;;  %v1723_v3 = vcombine.high %v1701_v61, %v1701_v61 }
  0x34   :  { %10056 = vmatprep.subr.bf16.mxu0 %v11223_v6  ;;  %v1726_v6 = vcombine.high %v1722_v0, %v1722_v0 }
  0x35   :  { %10077 = vmatpush3.bf16.msra.mxu1 %v11222_v5  ;;  %v11272_v5 = vld [vmem:[%s14731_s1 + $0x330] sm:$0xff]  }
  0x36   :  { %10078 = vmatprep.subr.bf16.mxu1 %v11225_v8  ;;  %v11274_v8 = vld [vmem:[%s14731_s1 + $0x3b0] sm:$0xff]  }
  0x37   :  { %10057 = vmatpush3.bf16.msra.mxu0 %v11224_v7  ;;  %v11273_v7 = vld [vmem:[%s14731_s1 + $0x3f0] sm:$0xff]  }
  0x38   :  { %10058 = vmatprep.subr.bf16.mxu0 %v11227_v10  ;;  %v11276_v10 = vld [vmem:[%s14731_s1 + $0x328] sm:$0xff]  }
  0x39   :  { %10079 = vmatpush3.bf16.msra.mxu1 %v11226_v9  ;;  %v11275_v9 = vld [vmem:[%s14731_s1 + $0x368] sm:$0xff]  }
  0x3a   :  { %10080 = vmatprep.subr.bf16.mxu1 %v11229_v12  ;;  %v11278_v12 = vld [vmem:[%s14731_s1 + $0x3a8] sm:$0xff]  }
  0x3b   :  { %10059 = vmatpush3.bf16.msra.mxu0 %v11228_v11  ;;  %v11277_v11 = vld [vmem:[%s14731_s1 + $0x3e8] sm:$0xff]  }
  0x3c   :  { %10060 = vmatprep.subr.bf16.mxu0 %v11231_v14  ;;  %v11280_v14 = vld [vmem:[%s14731_s1 + $0x320] sm:$0xff]  }
  0x3d   :  { %10081 = vmatpush3.bf16.msra.mxu1 %v11230_v13  ;;  %v11279_v13 = vld [vmem:[%s14731_s1 + $0x360] sm:$0xff]  }
  0x3e   :  { %10082 = vmatprep.subr.bf16.mxu1 %v11233_v16  ;;  %v11282_v16 = vld [vmem:[%s14731_s1 + $0x3a0] sm:$0xff]  }
  0x3f   :  { %10061 = vmatpush3.bf16.msra.mxu0 %v11232_v15  ;;  %v11281_v15 = vld [vmem:[%s14731_s1 + $0x3e0] sm:$0xff]  }
  0x40   :  { %10090 = vmatprep.subr.bf16.mxu0 %v11235_v19  ;;  %v11285_v19 = vld [vmem:[%s14731_s1 + $0x3d8] sm:$0xff]  }
  0x41   :  { %10083 = vmatpush3.bf16.msra.mxu1 %v11234_v17  ;;  %v11283_v17 = vld [vmem:[%s14731_s1 + $0x358] sm:$0xff]  }
  0x42   :  { %7154 = vmatmul.mubr.bf16.vlgmr.msra.gmra.mxu0 %v1659_v18  ;;  %10112 = vmatprep.subr.bf16.mxu1 %v11237_v21  ;;  %v11284_v18 = vld [vmem:[%s14731_s1 + $0x318] sm:$0xff]   ;;  %v11287_v21 = vld [vmem:[%s14731_s1 + $0x350] sm:$0xff]  }
  0x43   :  { %10091 = vmatpush3.bf16.msra.mxu0 %v11236_v20  ;;  %7233 = vmatprep.mubr.bf16.mxu0 %v1715_v56  ;;  %v11286_v20 = vld [vmem:[%s14731_s1 + $0x398] sm:$0xff]   ;;  %v11320_v56 = vld [vmem:[%s14731_s1 + $0x450] sm:$0xff]  }
  0x44   :  { %7194 = vmatmul.mubr.bf16.vlgmr.msra.gmra.mxu1 %v1675_v23  ;;  %10092 = vmatprep.subr.bf16.mxu0 %v11239_v24  ;;  %v11289_v23 = vld [vmem:[%s14731_s1 + $0x3d0] sm:$0xff]  }
  0x45   :  { %10113 = vmatpush3.bf16.msra.mxu1 %v11238_v22  ;;  %7273 = vmatprep.mubr.bf16.mxu1 %v1725_v60  ;;  %v11288_v22 = vld [vmem:[%s14731_s1 + $0x310] sm:$0xff]   ;;  %v11324_v60 = vld [vmem:[%s14731_s1 + $0x448] sm:$0xff]  }
  0x46   :  { %10114 = vmatprep.subr.bf16.mxu1 %v11241_v26  ;;  %v11290_v24 = vld [vmem:[%s14731_s1 + $0x390] sm:$0xff]   ;;  %v11292_v26 = vld [vmem:[%s14731_s1 + $0x308] sm:$0xff]  }
  0x47   :  { %10093 = vmatpush3.bf16.msra.mxu0 %v11240_v25  ;;  %v11291_v25 = vld [vmem:[%s14731_s1 + $0x348] sm:$0xff]  }
  0x48   :  { %10094 = vmatprep.subr.bf16.mxu0 %v11243_v28  ;;  %v11294_v28 = vld [vmem:[%s14731_s1 + $0x388] sm:$0xff]  }
  0x49   :  { %10115 = vmatpush3.bf16.msra.mxu1 %v11242_v27  ;;  %v11293_v27 = vld [vmem:[%s14731_s1 + $0x3c8] sm:$0xff]  }
  0x4a   :  { %10116 = vmatprep.subr.bf16.mxu1 %v11245_v30  ;;  %v11296_v30 = vld [vmem:[%s14731_s1 + $0x300] sm:$0xff]  }
  0x4b   :  { %10095 = vmatpush3.bf16.msra.mxu0 %v11244_v29  ;;  %v11295_v29 = vld [vmem:[%s14731_s1 + $0x340] sm:$0xff]  }
  0x4c   :  { %10096 = vmatprep.subr.bf16.mxu0 %v11247_v32  ;;  %v11299_v32 = vld [vmem:[%s14731_s1 + $0x380] sm:$0xff]  }
  0x4d   :  { %10117 = vmatpush3.bf16.msra.mxu1 %v11246_v31  ;;  %v11297_v31 = vld [vmem:[%s14731_s1 + $0x3c0] sm:$0xff]  }
  0x4e   :  { %10118 = vmatprep.subr.bf16.mxu1 %v11249_v34  ;;  %v11300_v34 = vld [vmem:[%s14731_s1 + $0x478] sm:$0xff]  }
  0x4f   :  { %10097 = vmatpush3.bf16.msra.mxu0 %v11248_v33  ;;  %v1708_v33 = vrot.slane %v12329_v53, %v12137_v41  ;;  %v11317_v53 = vld [vmem:[%s14731_s1 + $0x418] sm:$0xff]  }
  0x50   :  { %10098 = vmatprep.subr.bf16.mxu0 %v11251_v36  ;;  %v11302_v36 = vld [vmem:[%s14731_s1 + $0x4f8] sm:$0xff]  }
  0x51   :  { %10119 = vmatpush3.bf16.msra.mxu1 %v11250_v35  ;;  %v11301_v35 = vld [vmem:[%s14731_s1 + $0x438] sm:$0xff]  }
  0x52   :  { %10120 = vmatprep.subr.bf16.mxu1 %v11253_v38  ;;  %v1724_v38 = vcombine.high %v1708_v33, %v1708_v33 }
  0x53   :  { %10099 = vmatpush3.bf16.msra.mxu0 %v11252_v37  ;;  %v11303_v37 = vld [vmem:[%s14731_s1 + $0x4b8] sm:$0xff]  }
  0x54   :  { %10100 = vmatprep.subr.bf16.mxu0 %v11255_v40  ;;  %v11305_v40 = vld [vmem:[%s14731_s1 + $0x430] sm:$0xff]  }
  0x55   :  { %10121 = vmatpush3.bf16.msra.mxu1 %v11254_v39  ;;  %v11304_v39 = vld [vmem:[%s14731_s1 + $0x470] sm:$0xff]  }
  0x56   :  { %10122 = vmatprep.subr.bf16.mxu1 %v11257_v43  ;;  %v11307_v43 = vld [vmem:[%s14731_s1 + $0x4b0] sm:$0xff]  }
  0x57   :  { %10101 = vmatpush3.bf16.msra.mxu0 %v11256_v42  ;;  %v11306_v42 = vld [vmem:[%s14731_s1 + $0x4f0] sm:$0xff]  }
  0x58   :  { %10102 = vmatprep.subr.bf16.mxu0 %v11259_v45  ;;  %v11309_v45 = vld [vmem:[%s14731_s1 + $0x428] sm:$0xff]  }
  0x59   :  { %10123 = vmatpush3.bf16.msra.mxu1 %v11258_v44  ;;  %v11308_v44 = vld [vmem:[%s14731_s1 + $0x468] sm:$0xff]  }
  0x5a   :  { %10124 = vmatprep.subr.bf16.mxu1 %v11261_v50  ;;  %v11314_v50 = vld [vmem:[%s14731_s1 + $0x4e0] sm:$0xff]  }
  0x5b   :  { %10103 = vmatpush3.bf16.msra.mxu0 %v11260_v47  ;;  %v11311_v47 = vld [vmem:[%s14731_s1 + $0x4a8] sm:$0xff]  }
  0x5c   :  { %10104 = vmatprep.subr.bf16.mxu0 %v11263_v54  ;;  %v11318_v54 = vld [vmem:[%s14731_s1 + $0x4d8] sm:$0xff]  }
  0x5d   :  { %10125 = vmatpush3.bf16.msra.mxu1 %v11262_v51  ;;  %v11315_v51 = vld [vmem:[%s14731_s1 + $0x4a0] sm:$0xff]  }
  0x5e   :  { %10126 = vmatprep.subr.bf16.mxu1 %v11265_v58  ;;  %v11322_v58 = vld [vmem:[%s14731_s1 + $0x4d0] sm:$0xff]  }
  0x5f   :  { %10105 = vmatpush3.bf16.msra.mxu0 %v11264_v55  ;;  %v11319_v55 = vld [vmem:[%s14731_s1 + $0x498] sm:$0xff]  }
  0x60   :  { %10134 = vmatprep.subr.bf16.mxu0 %v11267_v62  ;;  %v11325_v62 = vld [vmem:[%s14731_s1 + $0x408] sm:$0xff]  }
  0x61   :  { %10127 = vmatpush3.bf16.msra.mxu1 %v11266_v59  ;;  %v11323_v59 = vld [vmem:[%s14731_s1 + $0x490] sm:$0xff]  }
  0x62   :  { %7234 = vmatmul.mubr.bf16.vlgmr.msra.gmra.mxu0 %v1701_v61  ;;  %10156 = vmatprep.subr.bf16.mxu1 %v11269_v1  ;;  %v30_v61 = vld [vmem:[%s14730_s0 + $0x10] sm:$0xff]  ;;  %v11326_v1 = vld [vmem:[%s14731_s1 + $0x4c8] sm:$0xff]  }
  0x63   :  { %10135 = vmatpush3.bf16.msra.mxu0 %v11268_v63  ;;  %7313 = vmatprep.mubr.bf16.mxu0 %v1722_v0  ;;  %v1734_v63 = vrot.slane %v30_v61, %v12137_v41  ;;  %v1727_v0 = vcombine.high %v30_v61, %v30_v61  ;;  %v11375_v61 = vld [vmem:[%s14731_s1 + $0x6e8] sm:$0xff]  }
  0x64   :  { %7274 = vmatmul.mubr.bf16.vlgmr.msra.gmra.mxu1 %v1723_v3  ;;  %10136 = vmatprep.subr.bf16.mxu0 %v11271_v4 }
  0x65   :  { %10157 = vmatpush3.bf16.msra.mxu1 %v11270_v2  ;;  %7353 = vmatprep.mubr.bf16.mxu1 %v1726_v6  ;;  %v11327_v2 = vld [vmem:[%s14731_s1 + $0x488] sm:$0xff]   ;;  %v1742_v3 = vcombine.high %v1734_v63, %v1734_v63  ;;  %v12535_v4 = vrot.slane %v1727_v0, %v12137_v41  ;;  %v11329_v6 = vld [vmem:[%s14731_s1 + $0x400] sm:$0xff]  }
  0x66   :  { %10158 = vmatprep.subr.bf16.mxu1 %v11273_v7  ;;  %v11378_v0 = vld [vmem:[%s14731_s1 + $0x620] sm:$0xff]  }
  0x67   :  { %10137 = vmatpush3.bf16.msra.mxu0 %v11272_v5  ;;  %v11328_v5 = vld [vmem:[%s14731_s1 + $0x440] sm:$0xff]   ;;  %v1764_v7 = vrot.slane %v1742_v3, %v12137_v41  ;;  %v11381_v3 = vld [vmem:[%s14731_s1 + $0x658] sm:$0xff]  }
  0x68   :  { %10138 = vmatprep.subr.bf16.mxu0 %v11275_v9  ;;  %v11330_v9 = vld [vmem:[%s14731_s1 + $0x4c0] sm:$0xff]  }
  0x69   :  { %10159 = vmatpush3.bf16.msra.mxu1 %v11274_v8  ;;  %v1743_v8 = vcombine.high %v12535_v4, %v12535_v4 }
  0x6a   :  { %10160 = vmatprep.subr.bf16.mxu1 %v11277_v11  ;;  %v1774_v11 = vcombine.high %v1764_v7, %v1764_v7 }
  0x6b   :  { %10139 = vmatpush3.bf16.msra.mxu0 %v11276_v10  ;;  %v11331_v10 = vld [vmem:[%s14731_s1 + $0x480] sm:$0xff]  }
  0x6c   :  { %10140 = vmatprep.subr.bf16.mxu0 %v11279_v13  ;;  %v11332_v13 = vld [vmem:[%s14731_s1 + $0x578] sm:$0xff]  }
  0x6d   :  { %10161 = vmatpush3.bf16.msra.mxu1 %v11278_v12  ;;  %v1750_v12 = vrot.slane %v1734_v63, %v12137_v41  ;;  %v11377_v63 = vld [vmem:[%s14731_s1 + $0x660] sm:$0xff]  }
  0x6e   :  { %10162 = vmatprep.subr.bf16.mxu1 %v11281_v15  ;;  %v1771_v15 = vrot.slane %v1743_v8, %v12137_v41  ;;  %v11386_v8 = vld [vmem:[%s14731_s1 + $0x610] sm:$0xff]  }
  0x6f   :  { %10141 = vmatpush3.bf16.msra.mxu0 %v11280_v14  ;;  %v11333_v14 = vld [vmem:[%s14731_s1 + $0x538] sm:$0xff]  }
  0x70   :  { %10142 = vmatprep.subr.bf16.mxu0 %v11283_v17  ;;  %v11335_v17 = vld [vmem:[%s14731_s1 + $0x5b8] sm:$0xff]  }
  0x71   :  { %10163 = vmatpush3.bf16.msra.mxu1 %v11282_v16  ;;  %v11334_v16 = vld [vmem:[%s14731_s1 + $0x5f8] sm:$0xff]  }
  0x72   :  { %10164 = vmatprep.subr.bf16.mxu1 %v11285_v19  ;;  %v11336_v19 = vld [vmem:[%s14731_s1 + $0x570] sm:$0xff]  }
  0x73   :  { %10143 = vmatpush3.bf16.msra.mxu0 %v11284_v18  ;;  %v1772_v18 = vcombine.high %v1750_v12, %v1750_v12 }
  0x74   :  { %10144 = vmatprep.subr.bf16.mxu0 %v11287_v21  ;;  %v1775_v21 = vcombine.high %v1771_v15, %v1771_v15 }
  0x75   :  { %10165 = vmatpush3.bf16.msra.mxu1 %v11286_v20  ;;  %v11337_v20 = vld [vmem:[%s14731_s1 + $0x530] sm:$0xff]  }
  0x76   :  { %10166 = vmatprep.subr.bf16.mxu1 %v11289_v23  ;;  %v11339_v23 = vld [vmem:[%s14731_s1 + $0x5b0] sm:$0xff]  }
  0x77   :  { %10145 = vmatpush3.bf16.msra.mxu0 %v11288_v22  ;;  %v11338_v22 = vld [vmem:[%s14731_s1 + $0x5f0] sm:$0xff]  }
  0x78   :  { %10146 = vmatprep.subr.bf16.mxu0 %v11291_v25  ;;  %v11341_v25 = vld [vmem:[%s14731_s1 + $0x528] sm:$0xff]  }
  0x79   :  { %10167 = vmatpush3.bf16.msra.mxu1 %v11290_v24  ;;  %v11340_v24 = vld [vmem:[%s14731_s1 + $0x568] sm:$0xff]  }
  0x7a   :  { %10168 = vmatprep.subr.bf16.mxu1 %v11293_v27  ;;  %v11343_v27 = vld [vmem:[%s14731_s1 + $0x5a8] sm:$0xff]  }
  0x7b   :  { %10147 = vmatpush3.bf16.msra.mxu0 %v11292_v26  ;;  %v11342_v26 = vld [vmem:[%s14731_s1 + $0x5e8] sm:$0xff]  }
  0x7c   :  { %10148 = vmatprep.subr.bf16.mxu0 %v11295_v29  ;;  %v11345_v29 = vld [vmem:[%s14731_s1 + $0x520] sm:$0xff]  }
  0x7d   :  { %10169 = vmatpush3.bf16.msra.mxu1 %v11294_v28  ;;  %v11344_v28 = vld [vmem:[%s14731_s1 + $0x560] sm:$0xff]  }
  0x7e   :  { %10170 = vmatprep.subr.bf16.mxu1 %v11297_v31  ;;  %v11347_v31 = vld [vmem:[%s14731_s1 + $0x5a0] sm:$0xff]  }
  0x7f   :  { %10149 = vmatpush3.bf16.msra.mxu0 %v11296_v30  ;;  %v11346_v30 = vld [vmem:[%s14731_s1 + $0x5e0] sm:$0xff]  }
  0x80   :  { %10178 = vmatprep.subr.bf16.mxu0 %v11300_v34  ;;  %v11350_v34 = vld [vmem:[%s14731_s1 + $0x5d8] sm:$0xff]  }
  0x81   :  { %10171 = vmatpush3.bf16.msra.mxu1 %v11299_v32  ;;  %v11348_v32 = vld [vmem:[%s14731_s1 + $0x558] sm:$0xff]  }
  0x82   :  { %7314 = vmatmul.mubr.bf16.vlgmr.msra.gmra.mxu0 %v1708_v33  ;;  %10200 = vmatprep.subr.bf16.mxu1 %v11302_v36  ;;  %v11349_v33 = vld [vmem:[%s14731_s1 + $0x518] sm:$0xff]   ;;  %v11352_v36 = vld [vmem:[%s14731_s1 + $0x550] sm:$0xff]  }
  0x83   :  { %10179 = vmatpush3.bf16.msra.mxu0 %v11301_v35  ;;  %7393 = vmatprep.mubr.bf16.mxu0 %v1764_v7  ;;  %v11351_v35 = vld [vmem:[%s14731_s1 + $0x598] sm:$0xff]   ;;  %v11385_v7 = vld [vmem:[%s14731_s1 + $0x650] sm:$0xff]  }
  0x84   :  { %7354 = vmatmul.mubr.bf16.vlgmr.msra.gmra.mxu1 %v1724_v38  ;;  %10180 = vmatprep.subr.bf16.mxu0 %v11304_v39  ;;  %v11354_v38 = vld [vmem:[%s14731_s1 + $0x5d0] sm:$0xff]  }
  0x85   :  { %10201 = vmatpush3.bf16.msra.mxu1 %v11303_v37  ;;  %7433 = vmatprep.mubr.bf16.mxu1 %v1774_v11  ;;  %v11353_v37 = vld [vmem:[%s14731_s1 + $0x510] sm:$0xff]   ;;  %v11389_v11 = vld [vmem:[%s14731_s1 + $0x648] sm:$0xff]  }
  0x86   :  { %10202 = vmatprep.subr.bf16.mxu1 %v11306_v42  ;;  %v11355_v39 = vld [vmem:[%s14731_s1 + $0x590] sm:$0xff]   ;;  %v11357_v42 = vld [vmem:[%s14731_s1 + $0x508] sm:$0xff]  }
  0x87   :  { %10181 = vmatpush3.bf16.msra.mxu0 %v11305_v40  ;;  %v11356_v40 = vld [vmem:[%s14731_s1 + $0x548] sm:$0xff]  }
  0x88   :  { %10182 = vmatprep.subr.bf16.mxu0 %v11308_v44  ;;  %v11359_v44 = vld [vmem:[%s14731_s1 + $0x588] sm:$0xff]  }
  0x89   :  { %10203 = vmatpush3.bf16.msra.mxu1 %v11307_v43  ;;  %v11358_v43 = vld [vmem:[%s14731_s1 + $0x5c8] sm:$0xff]  }
  0x8a   :  { %10204 = vmatprep.subr.bf16.mxu1 %v11310_v46  ;;  %v11361_v46 = vld [vmem:[%s14731_s1 + $0x500] sm:$0xff]  }
  0x8b   :  { %10183 = vmatpush3.bf16.msra.mxu0 %v11309_v45  ;;  %v11360_v45 = vld [vmem:[%s14731_s1 + $0x540] sm:$0xff]  }
  0x8c   :  { %10184 = vmatprep.subr.bf16.mxu0 %v11312_v48  ;;  %v11364_v48 = vld [vmem:[%s14731_s1 + $0x580] sm:$0xff]  }
  0x8d   :  { %10205 = vmatpush3.bf16.msra.mxu1 %v11311_v47  ;;  %v11362_v47 = vld [vmem:[%s14731_s1 + $0x5c0] sm:$0xff]  }
  0x8e   :  { %10206 = vmatprep.subr.bf16.mxu1 %v11314_v50  ;;  %v11365_v50 = vld [vmem:[%s14731_s1 + $0x678] sm:$0xff]  }
  0x8f   :  { %10185 = vmatpush3.bf16.msra.mxu0 %v11313_v49  ;;  %v1757_v49 = vrot.slane %v12535_v4, %v12137_v41  ;;  %v11382_v4 = vld [vmem:[%s14731_s1 + $0x618] sm:$0xff]  }
  0x90   :  { %10186 = vmatprep.subr.bf16.mxu0 %v11316_v52  ;;  %v11367_v52 = vld [vmem:[%s14731_s1 + $0x6f8] sm:$0xff]  }
  0x91   :  { %10207 = vmatpush3.bf16.msra.mxu1 %v11315_v51  ;;  %v11366_v51 = vld [vmem:[%s14731_s1 + $0x638] sm:$0xff]  }
  0x92   :  { %10208 = vmatprep.subr.bf16.mxu1 %v11318_v54  ;;  %v1773_v54 = vcombine.high %v1757_v49, %v1757_v49 }
  0x93   :  { %10187 = vmatpush3.bf16.msra.mxu0 %v11317_v53  ;;  %v11368_v53 = vld [vmem:[%s14731_s1 + $0x6b8] sm:$0xff]  }
  0x94   :  { %10188 = vmatprep.subr.bf16.mxu0 %v11320_v56  ;;  %v11370_v56 = vld [vmem:[%s14731_s1 + $0x630] sm:$0xff]  }
  0x95   :  { %10209 = vmatpush3.bf16.msra.mxu1 %v11319_v55  ;;  %v11369_v55 = vld [vmem:[%s14731_s1 + $0x670] sm:$0xff]  }
  0x96   :  { %10210 = vmatprep.subr.bf16.mxu1 %v11322_v58  ;;  %v11372_v58 = vld [vmem:[%s14731_s1 + $0x6b0] sm:$0xff]  }
  0x97   :  { %10189 = vmatpush3.bf16.msra.mxu0 %v11321_v57  ;;  %v11371_v57 = vld [vmem:[%s14731_s1 + $0x6f0] sm:$0xff]  }
  0x98   :  { %10190 = vmatprep.subr.bf16.mxu0 %v11324_v60  ;;  %v11374_v60 = vld [vmem:[%s14731_s1 + $0x628] sm:$0xff]  }
  0x99   :  { %10211 = vmatpush3.bf16.msra.mxu1 %v11323_v59  ;;  %v11373_v59 = vld [vmem:[%s14731_s1 + $0x668] sm:$0xff]  }
  0x9a   :  { %10212 = vmatprep.subr.bf16.mxu1 %v11326_v1  ;;  %v11379_v1 = vld [vmem:[%s14731_s1 + $0x6e0] sm:$0xff]  }
  0x9b   :  { %10191 = vmatpush3.bf16.msra.mxu0 %v11325_v62  ;;  %v11376_v62 = vld [vmem:[%s14731_s1 + $0x6a8] sm:$0xff]  }
  0x9c   :  { %10192 = vmatprep.subr.bf16.mxu0 %v11328_v5  ;;  %v11383_v5 = vld [vmem:[%s14731_s1 + $0x6d8] sm:$0xff]  }
  0x9d   :  { %10213 = vmatpush3.bf16.msra.mxu1 %v11327_v2  ;;  %v11380_v2 = vld [vmem:[%s14731_s1 + $0x6a0] sm:$0xff]  }
  0x9e   :  { %10214 = vmatprep.subr.bf16.mxu1 %v11330_v9  ;;  %v11387_v9 = vld [vmem:[%s14731_s1 + $0x6d0] sm:$0xff]  }
  0x9f   :  { %10193 = vmatpush3.bf16.msra.mxu0 %v11329_v6  ;;  %v11384_v6 = vld [vmem:[%s14731_s1 + $0x698] sm:$0xff]  }
  0xa0   :  { %10222 = vmatprep.subr.bf16.mxu0 %v11332_v13  ;;  %v11391_v13 = vld [vmem:[%s14731_s1 + $0x6c8] sm:$0xff]  }
  0xa1   :  { %10215 = vmatpush3.bf16.msra.mxu1 %v11331_v10  ;;  %v11388_v10 = vld [vmem:[%s14731_s1 + $0x690] sm:$0xff]  }
  0xa2   :  { %7394 = vmatmul.mubr.bf16.vlgmr.msra.gmra.mxu0 %v1750_v12  ;;  %10244 = vmatprep.subr.bf16.mxu1 %v11334_v16  ;;  %v31_v12 = vld [vmem:[%s14730_s0 + $0x18] sm:$0xff]  ;;  %v11390_v16 = vld [vmem:[%s14731_s1 + $0x608] sm:$0xff]  }
  0xa3   :  { %10223 = vmatpush3.bf16.msra.mxu0 %v11333_v14  ;;  %7473 = vmatprep.mubr.bf16.mxu0 %v1771_v15  ;;  %v1783_v14 = vrot.slane %v31_v12, %v12137_v41  ;;  %v1776_v15 = vcombine.high %v31_v12, %v31_v12  ;;  %v11429_v12 = vld [vmem:[%s14731_s1 + $0x780] sm:$0xff]  }
  0xa4   :  { %7434 = vmatmul.mubr.bf16.vlgmr.msra.gmra.mxu1 %v1772_v18  ;;  %10224 = vmatprep.subr.bf16.mxu0 %v11336_v19  ;;  %v11393_v18 = vld [vmem:[%s14731_s1 + $0x640] sm:$0xff]  }
  0xa5   :  { %10245 = vmatpush3.bf16.msra.mxu1 %v11335_v17  ;;  %7513 = vmatprep.mubr.bf16.mxu1 %v1775_v21  ;;  %v11392_v17 = vld [vmem:[%s14731_s1 + $0x688] sm:$0xff]   ;;  %v1791_v19 = vcombine.high %v1783_v14, %v1783_v14  ;;  %v11394_v21 = vld [vmem:[%s14731_s1 + $0x600] sm:$0xff]  }
  0xa6   :  { %10246 = vmatprep.subr.bf16.mxu1 %v11338_v22  ;;  %v11395_v22 = vld [vmem:[%s14731_s1 + $0x6c0] sm:$0xff]  }
  0xa7   :  { %10225 = vmatpush3.bf16.msra.mxu0 %v11337_v20  ;;  %v12744_v20 = vrot.slane %v1776_v15, %v12137_v41  ;;  %v11431_v15 = vld [vmem:[%s14731_s1 + $0x838] sm:$0xff]  }
  0xa8   :  { %10226 = vmatprep.subr.bf16.mxu0 %v11340_v24 }
  0xa9   :  { %10247 = vmatpush3.bf16.msra.mxu1 %v11339_v23  ;;  %v1813_v23 = vrot.slane %v1791_v19, %v12137_v41  ;;  %v1792_v24 = vcombine.high %v12744_v20, %v12744_v20  ;;  %v11434_v19 = vld [vmem:[%s14731_s1 + $0x870] sm:$0xff]  }
  0xaa   :  { %10248 = vmatprep.subr.bf16.mxu1 %v11342_v26  ;;  %v1799_v26 = vrot.slane %v1783_v14, %v12137_v41  ;;  %v11430_v14 = vld [vmem:[%s14731_s1 + $0x878] sm:$0xff]  }
  0xab   :  { %10227 = vmatpush3.bf16.msra.mxu0 %v11341_v25  ;;  %v11396_v25 = vld [vmem:[%s14731_s1 + $0x680] sm:$0xff]  }
  0xac   :  { %10228 = vmatprep.subr.bf16.mxu0 %v11344_v28  ;;  %v1823_v28 = vcombine.high %v1813_v23, %v1813_v23 }
  0xad   :  { %10249 = vmatpush3.bf16.msra.mxu1 %v11343_v27  ;;  %v11397_v27 = vld [vmem:[%s14731_s1 + $0x778] sm:$0xff]  }
  0xae   :  { %10250 = vmatprep.subr.bf16.mxu1 %v11346_v30  ;;  %v1820_v30 = vrot.slane %v1792_v24, %v12137_v41 }
  0xaf   :  { %10229 = vmatpush3.bf16.msra.mxu0 %v11345_v29  ;;  %v11398_v29 = vld [vmem:[%s14731_s1 + $0x738] sm:$0xff]  }
  0xb0   :  { %10230 = vmatprep.subr.bf16.mxu0 %v11348_v32  ;;  %v11400_v32 = vld [vmem:[%s14731_s1 + $0x7b8] sm:$0xff]  }
  0xb1   :  { %10251 = vmatpush3.bf16.msra.mxu1 %v11347_v31  ;;  %v11399_v31 = vld [vmem:[%s14731_s1 + $0x7f8] sm:$0xff]  }
  0xb2   :  { %10252 = vmatprep.subr.bf16.mxu1 %v11350_v34  ;;  %v11401_v34 = vld [vmem:[%s14731_s1 + $0x770] sm:$0xff]  }
  0xb3   :  { %10231 = vmatpush3.bf16.msra.mxu0 %v11349_v33  ;;  %v1821_v33 = vcombine.high %v1799_v26, %v1799_v26 }
  0xb4   :  { %10232 = vmatprep.subr.bf16.mxu0 %v11352_v36  ;;  %v1824_v36 = vcombine.high %v1820_v30, %v1820_v30 }
  0xb5   :  { %10253 = vmatpush3.bf16.msra.mxu1 %v11351_v35  ;;  %v11402_v35 = vld [vmem:[%s14731_s1 + $0x730] sm:$0xff]  }
  0xb6   :  { %10254 = vmatprep.subr.bf16.mxu1 %v11354_v38  ;;  %v9211_v38 = vld [vmem:[%s14732_s2] ss:$0 sm:$0xff] }
  0xb7   :  { %10233 = vmatpush3.bf16.msra.mxu0 %v11353_v37 }
  0xb8   :  { %10234 = vmatprep.subr.bf16.mxu0 %v11356_v40  ;;  %v11404_v40 = vld [vmem:[%s14731_s1 + $0x7b0] sm:$0xff]  }
  0xb9   :  { %10255 = vmatpush3.bf16.msra.mxu1 %v11355_v39  ;;  %v11403_v39 = vld [vmem:[%s14731_s1 + $0x7f0] sm:$0xff]  }
  0xba   :  { %10256 = vmatprep.subr.bf16.mxu1 %v11358_v43 }
  0xbb   :  { %10235 = vmatpush3.bf16.msra.mxu0 %v11357_v42 }
  0xbc   :  { %10236 = vmatprep.subr.bf16.mxu0 %v11360_v45 }
  0xbd   :  { %10257 = vmatpush3.bf16.msra.mxu1 %v11359_v44  ;;  %v11405_v44 = vld [vmem:[%s14731_s1 + $0x768] sm:$0xff]  }
  0xbe   :  { %10258 = vmatprep.subr.bf16.mxu1 %v11362_v47 }
  0xbf   :  { %10237 = vmatpush3.bf16.msra.mxu0 %v11361_v46  ;;  %v11406_v46 = vld [vmem:[%s14731_s1 + $0x728] sm:$0xff]  }
  0xc0   :  { %10266 = vmatprep.subr.bf16.mxu0 %v11365_v50 }
  0xc1   :  { %10259 = vmatpush3.bf16.msra.mxu1 %v11364_v48 }
  0xc2   :  { %7474 = vmatmul.mubr.bf16.vlgmr.msra.gmra.mxu0 %v1757_v49  ;;  %10288 = vmatprep.subr.bf16.mxu1 %v11367_v52  ;;  %v11407_v49 = vld [vmem:[%s14731_s1 + $0x7e8] sm:$0xff]  }
  0xc3   :  { %10267 = vmatpush3.bf16.msra.mxu0 %v11366_v51  ;;  %7553 = vmatprep.mubr.bf16.mxu0 %v1813_v23  ;;  %v11408_v52 = vld [vmem:[%s14731_s1 + $0x7a8] sm:$0xff]   ;;  %v11437_v23 = vld [vmem:[%s14731_s1 + $0x8b0] sm:$0xff]  }
  0xc4   :  { %7514 = vmatmul.mubr.bf16.vlgmr.msra.gmra.mxu1 %v1773_v54  ;;  %10268 = vmatprep.subr.bf16.mxu0 %v11369_v55  ;;  %v11409_v54 = vld [vmem:[%s14731_s1 + $0x760] sm:$0xff]  }
  0xc5   :  { %10289 = vmatpush3.bf16.msra.mxu1 %v11368_v53  ;;  %7593 = vmatprep.mubr.bf16.mxu1 %v1823_v28  ;;  %v11439_v28 = vld [vmem:[%s14731_s1 + $0x828] sm:$0xff]  }
  0xc6   :  { %10290 = vmatprep.subr.bf16.mxu1 %v11371_v57  ;;  %v11410_v57 = vld [vmem:[%s14731_s1 + $0x720] sm:$0xff]  }
  0xc7   :  { %10269 = vmatpush3.bf16.msra.mxu0 %v11370_v56 }
  0xc8   :  { %10270 = vmatprep.subr.bf16.mxu0 %v11373_v59 }
  0xc9   :  { %10291 = vmatpush3.bf16.msra.mxu1 %v11372_v58  ;;  %v11411_v58 = vld [vmem:[%s14731_s1 + $0x7e0] sm:$0xff]  }
  0xca   :  { %10292 = vmatprep.subr.bf16.mxu1 %v11375_v61  ;;  %v11413_v61 = vld [vmem:[%s14731_s1 + $0x758] sm:$0xff]  }
  0xcb   :  { %10271 = vmatpush3.bf16.msra.mxu0 %v11374_v60  ;;  %v11412_v60 = vld [vmem:[%s14731_s1 + $0x7a0] sm:$0xff]  }
  0xcc   :  { %10272 = vmatprep.subr.bf16.mxu0 %v11377_v63  ;;  %v11415_v63 = vld [vmem:[%s14731_s1 + $0x7d8] sm:$0xff]  }
  0xcd   :  { %10293 = vmatpush3.bf16.msra.mxu1 %v11376_v62  ;;  %v11414_v62 = vld [vmem:[%s14731_s1 + $0x718] sm:$0xff]  }
  0xce   :  { %10294 = vmatprep.subr.bf16.mxu1 %v11379_v1  ;;  %v11417_v1 = vld [vmem:[%s14731_s1 + $0x750] sm:$0xff]  }
  0xcf   :  { %10273 = vmatpush3.bf16.msra.mxu0 %v11378_v0  ;;  %v11416_v0 = vld [vmem:[%s14731_s1 + $0x798] sm:$0xff]  }
  0xd0   :  { %10274 = vmatprep.subr.bf16.mxu0 %v11381_v3  ;;  %v11419_v3 = vld [vmem:[%s14731_s1 + $0x7d0] sm:$0xff]  }
  0xd1   :  { %10295 = vmatpush3.bf16.msra.mxu1 %v11380_v2  ;;  %v11418_v2 = vld [vmem:[%s14731_s1 + $0x710] sm:$0xff]  }
  0xd2   :  { %10296 = vmatprep.subr.bf16.mxu1 %v11383_v5  ;;  %v11421_v5 = vld [vmem:[%s14731_s1 + $0x748] sm:$0xff]  }
  0xd3   :  { %10275 = vmatpush3.bf16.msra.mxu0 %v11382_v4  ;;  %v11420_v4 = vld [vmem:[%s14731_s1 + $0x790] sm:$0xff]  }
  0xd4   :  { %10276 = vmatprep.subr.bf16.mxu0 %v11385_v7  ;;  %v11423_v7 = vld [vmem:[%s14731_s1 + $0x7c8] sm:$0xff]  }
  0xd5   :  { %10297 = vmatpush3.bf16.msra.mxu1 %v11384_v6  ;;  %v11422_v6 = vld [vmem:[%s14731_s1 + $0x708] sm:$0xff]  }
  0xd6   :  { %10298 = vmatprep.subr.bf16.mxu1 %v11387_v9  ;;  %v11425_v9 = vld [vmem:[%s14731_s1 + $0x740] sm:$0xff]  }
  0xd7   :  { %10277 = vmatpush3.bf16.msra.mxu0 %v11386_v8  ;;  %v11424_v8 = vld [vmem:[%s14731_s1 + $0x788] sm:$0xff]  }
  0xd8   :  { %10278 = vmatprep.subr.bf16.mxu0 %v11389_v11  ;;  %v11427_v11 = vld [vmem:[%s14731_s1 + $0x7c0] sm:$0xff]  }
  0xd9   :  { %10299 = vmatpush3.bf16.msra.mxu1 %v11388_v10  ;;  %v11426_v10 = vld [vmem:[%s14731_s1 + $0x700] sm:$0xff]  }
  0xda   :  { %10300 = vmatprep.subr.bf16.mxu1 %v11391_v13  ;;  %v1806_v13 = vrot.slane %v12744_v20, %v12137_v41  ;;  %v11435_v20 = vld [vmem:[%s14731_s1 + $0x830] sm:$0xff]  }
  0xdb   :  { %10279 = vmatpush3.bf16.msra.mxu0 %v11390_v16  ;;  %v11432_v16 = vld [vmem:[%s14731_s1 + $0x8f8] sm:$0xff]  }
  0xdc   :  { %10280 = vmatprep.subr.bf16.mxu0 %v11393_v18  ;;  %v1822_v18 = vcombine.high %v1806_v13, %v1806_v13 }
  0xdd   :  { %10301 = vmatpush3.bf16.msra.mxu1 %v11392_v17  ;;  %v11433_v17 = vld [vmem:[%s14731_s1 + $0x8b8] sm:$0xff]  }
  0xde   :  { %10302 = vmatprep.subr.bf16.mxu1 %v11395_v22  ;;  %v11436_v22 = vld [vmem:[%s14731_s1 + $0x8f0] sm:$0xff]  }
  0xdf   :  { %10281 = vmatpush3.bf16.msra.mxu0 %v11394_v21 }
  0xe0   :  { %10310 = vmatprep.subr.bf16.mxu0 %v11397_v27 }
  0xe1   :  { %10303 = vmatpush3.bf16.msra.mxu1 %v11396_v25 }
  0xe2   :  { %v10018_v37 = vpop.f32.mrf.mxu0  ;;  %7554 = vmatmul.mubr.bf16.vlgmr.msra.gmra.mxu0 %v1799_v26  ;;  %10332 = vmatprep.subr.bf16.mxu1 %v11399_v31  ;;  %v11438_v26 = vld [vmem:[%s14731_s1 + $0x868] sm:$0xff]  }
  0xe3   :  { %10311 = vmatpush3.bf16.msra.mxu0 %v11398_v29  ;;  %7633 = vmatprep.mubr.bf16.mxu0 %v1820_v30  ;;  %v11440_v31 = vld [vmem:[%s14731_s1 + $0x8e8] sm:$0xff]  }
  0xe4   :  { %v10019_v42 = vpop.f32.mrf.mxu0  ;;  %v10040_v43 = vpop.f32.mrf.mxu1  ;;  %7594 = vmatmul.mubr.bf16.vlgmr.msra.gmra.mxu1 %v1821_v33  ;;  %10312 = vmatprep.subr.bf16.mxu0 %v11401_v34  ;;  %v11441_v34 = vld [vmem:[%s14731_s1 + $0x8a8] sm:$0xff]  }
  0xe5   :  { %v10020_v45 = vadd.f32 %v10019_v42, %v10018_v37  ;;  %10333 = vmatpush3.bf16.msra.mxu1 %v11400_v32  ;;  %7673 = vmatprep.mubr.bf16.mxu1 %v1824_v36  ;;  %v11442_v36 = vld [vmem:[%s14731_s1 + $0x860] sm:$0xff]  }
  0xe6   :  { %v10021_v47 = vpop.f32.mrf.mxu0  ;;  %v10041_v48 = vpop.f32.mrf.mxu1  ;;  %10334 = vmatprep.subr.bf16.mxu1 %v11403_v39  ;;  %v11443_v39 = vld [vmem:[%s14731_s1 + $0x820] sm:$0xff]  }
  0xe7   :  { %v7076_v50 = vadd.f32 %v10020_v45, %v9211_v38  ;;  %v10042_v51 = vadd.f32 %v10041_v48, %v10040_v43  ;;  %10313 = vmatpush3.bf16.msra.mxu0 %v11402_v35  ;;  %v11445_v43 = vld [vmem:[%s14731_s1 + $0x8a0] sm:$0xff]   ;;  %v11447_v45 = vld [vmem:[%s14731_s1 + $0x818] sm:$0xff]   ;;  %v11450_v48 = vld [vmem:[%s14731_s1 + $0x850] sm:$0xff]  }
  0xe8   :  { %v10022_v53 = vpop.f32.mrf.mxu0  ;;  %10314 = vmatprep.subr.bf16.mxu0 %v11405_v44  ;;  %v10043_v55 = vpop.f32.mrf.mxu1  ;;  %v11446_v44 = vld [vmem:[%s14731_s1 + $0x858] sm:$0xff]  }
  0xe9   :  { %v12802_v56 = vadd.f32 %v10042_v51, %v7076_v50  ;;  %10335 = vmatpush3.bf16.msra.mxu1 %v11404_v40  ;;  %v11444_v40 = vld [vmem:[%s14731_s1 + $0x8e0] sm:$0xff]   ;;  %v11449_v47 = vld [vmem:[%s14731_s1 + $0x898] sm:$0xff]   ;;  %v11452_v50 = vld [vmem:[%s14731_s1 + $0x8d0] sm:$0xff]  }
  0xea   :  { %10336 = vmatprep.subr.bf16.mxu1 %v11407_v49  ;;  %v10044_v59 = vpop.f32.mrf.mxu1  ;;  %v11451_v49 = vld [vmem:[%s14731_s1 + $0x810] sm:$0xff]   ;;  %v11455_v53 = vld [vmem:[%s14731_s1 + $0x808] sm:$0xff]  }
  0xeb   :  { %10315 = vmatpush3.bf16.msra.mxu0 %v11406_v46  ;;  %v11448_v46 = vld [vmem:[%s14731_s1 + $0x8d8] sm:$0xff]   ;;  %v11453_v51 = vld [vmem:[%s14731_s1 + $0x890] sm:$0xff]   ;;  %v11456_v55 = vld [vmem:[%s14731_s1 + $0x8c8] sm:$0xff]  }
  0xec   :  { %10316 = vmatprep.subr.bf16.mxu0 %v11409_v54  ;;  %v32_v54 = vld [vmem:[%s14730_s0 + $0x20] sm:$0xff] }
  0xed   :  { %10337 = vmatpush3.bf16.msra.mxu1 %v11408_v52  ;;  %v11454_v52 = vld [vmem:[%s14731_s1 + $0x848] sm:$0xff]   ;;  %v11458_v59 = vld [vmem:[%s14731_s1 + $0x840] sm:$0xff]  }
  0xee   :  { %10338 = vmatprep.subr.bf16.mxu1 %v11411_v58  ;;  %v11457_v58 = vld [vmem:[%s14731_s1 + $0x888] sm:$0xff]  }
  0xef   :  { %10317 = vmatpush3.bf16.msra.mxu0 %v11410_v57  ;;  %v1825_v57 = vcombine.high %v32_v54, %v32_v54 }
  0xf0   :  { %10318 = vmatprep.subr.bf16.mxu0 %v11413_v61 }
  0xf1   :  { %10339 = vmatpush3.bf16.msra.mxu1 %v11412_v60  ;;  %v12958_v61 = vrot.slane %v1825_v57, %v12137_v41  ;;  %v11498_v57 = vld [vmem:[%s14731_s1 + $0xab8] sm:$0xff]  }
  0xf2   :  { %10340 = vmatprep.subr.bf16.mxu1 %v11415_v63  ;;  %v11460_v63 = vld [vmem:[%s14731_s1 + $0x8c0] sm:$0xff]  }
  0xf3   :  { %10319 = vmatpush3.bf16.msra.mxu0 %v11414_v62  ;;  %v11459_v62 = vld [vmem:[%s14731_s1 + $0x800] sm:$0xff]  }
  0xf4   :  { %10320 = vmatprep.subr.bf16.mxu0 %v11417_v1  ;;  %v1841_v1 = vcombine.high %v12958_v61, %v12958_v61 }
  0xf5   :  { %10341 = vmatpush3.bf16.msra.mxu1 %v11416_v0 }
  0xf6   :  { %10342 = vmatprep.subr.bf16.mxu1 %v11419_v3 }
  0xf7   :  { %10321 = vmatpush3.bf16.msra.mxu0 %v11418_v2  ;;  %v11461_v2 = vld [vmem:[%s14731_s1 + $0x880] sm:$0xff]  }
  0xf8   :  { %10322 = vmatprep.subr.bf16.mxu0 %v11421_v5 }
  0xf9   :  { %10343 = vmatpush3.bf16.msra.mxu1 %v11420_v4  ;;  %v11462_v4 = vld [vmem:[%s14731_s1 + $0x978] sm:$0xff]  }
  0xfa   :  { %10344 = vmatprep.subr.bf16.mxu1 %v11423_v7  ;;  %v1869_v7 = vrot.slane %v1841_v1, %v12137_v41 }
  0xfb   :  { %10323 = vmatpush3.bf16.msra.mxu0 %v11422_v6  ;;  %v11463_v6 = vld [vmem:[%s14731_s1 + $0x938] sm:$0xff]  }
  0xfc   :  { %10324 = vmatprep.subr.bf16.mxu0 %v11425_v9  ;;  %v11465_v9 = vld [vmem:[%s14731_s1 + $0x9b8] sm:$0xff]  }
  0xfd   :  { %10345 = vmatpush3.bf16.msra.mxu1 %v11424_v8  ;;  %v11464_v8 = vld [vmem:[%s14731_s1 + $0x9f8] sm:$0xff]  }
  0xfe   :  { %10346 = vmatprep.subr.bf16.mxu1 %v11427_v11  ;;  %v11466_v11 = vld [vmem:[%s14731_s1 + $0x970] sm:$0xff]  }
  0xff   :  { %10325 = vmatpush3.bf16.msra.mxu0 %v11426_v10 }
 0x100   :  { %10354 = vmatprep.subr.bf16.mxu0 %v11430_v14 }
 0x101   :  { %10347 = vmatpush3.bf16.msra.mxu1 %v11429_v12  ;;  %v11467_v12 = vld [vmem:[%s14731_s1 + $0x930] sm:$0xff]  }
 0x102   :  { %v10062_v21 = vpop.f32.mrf.mxu0  ;;  %7634 = vmatmul.mubr.bf16.vlgmr.msra.gmra.mxu0 %v1806_v13  ;;  %10376 = vmatprep.subr.bf16.mxu1 %v11432_v16  ;;  %v1873_v13 = vcombine.high %v1869_v7, %v1869_v7  ;;  %v11469_v16 = vld [vmem:[%s14731_s1 + $0x9b0] sm:$0xff]  }
 0x103   :  { %10355 = vmatpush3.bf16.msra.mxu0 %v11431_v15  ;;  %v11468_v15 = vld [vmem:[%s14731_s1 + $0x9f0] sm:$0xff]  }
 0x104   :  { %v10063_v24 = vpop.f32.mrf.mxu0  ;;  %v10084_v25 = vpop.f32.mrf.mxu1  ;;  %7674 = vmatmul.mubr.bf16.vlgmr.msra.gmra.mxu1 %v1822_v18  ;;  %10356 = vmatprep.subr.bf16.mxu0 %v11434_v19  ;;  %v11470_v19 = vld [vmem:[%s14731_s1 + $0x968] sm:$0xff]  }
 0x105   :  { %v10064_v27 = vadd.f32 %v10063_v24, %v10062_v21  ;;  %10377 = vmatpush3.bf16.msra.mxu1 %v11433_v17  ;;  %v11471_v21 = vld [vmem:[%s14731_s1 + $0x928] sm:$0xff]  }
 0x106   :  { %v10065_v29 = vpop.f32.mrf.mxu0  ;;  %v10085_v30 = vpop.f32.mrf.mxu1  ;;  %10378 = vmatprep.subr.bf16.mxu1 %v11436_v22  ;;  %v11472_v24 = vld [vmem:[%s14731_s1 + $0x9e8] sm:$0xff]  }
 0x107   :  { %v7156_v32 = vadd.f32 %v10064_v27, %v12802_v56  ;;  %v10086_v33 = vadd.f32 %v10085_v30, %v10084_v25  ;;  %10357 = vmatpush3.bf16.msra.mxu0 %v11435_v20  ;;  %v1832_v56 = vrot.slane %v32_v54, %v12137_v41  ;;  %v11473_v27 = vld [vmem:[%s14731_s1 + $0x9a8] sm:$0xff]   ;;  %v11474_v29 = vld [vmem:[%s14731_s1 + $0x960] sm:$0xff]   ;;  %v11495_v54 = vld [vmem:[%s14731_s1 + $0xa78] sm:$0xff]  }
 0x108   :  { %v10066_v35 = vpop.f32.mrf.mxu0  ;;  %10358 = vmatprep.subr.bf16.mxu0 %v11438_v26  ;;  %v10087_v37 = vpop.f32.mrf.mxu1 }
 0x109   :  { %v12903_v38 = vadd.f32 %v10086_v33, %v7156_v32  ;;  %10379 = vmatpush3.bf16.msra.mxu1 %v11437_v23  ;;  %v1840_v60 = vcombine.high %v1832_v56, %v1832_v56  ;;  %v1848_v3 = vrot.slane %v1832_v56, %v12137_v41  ;;  %v11475_v32 = vld [vmem:[%s14731_s1 + $0x920] sm:$0xff]   ;;  %v11479_v37 = vld [vmem:[%s14731_s1 + $0x918] sm:$0xff]  }
 0x10a   :  { %10380 = vmatprep.subr.bf16.mxu1 %v11440_v31  ;;  %v10088_v42 = vpop.f32.mrf.mxu1  ;;  %v11476_v33 = vld [vmem:[%s14731_s1 + $0x9e0] sm:$0xff]   ;;  %v11497_v56 = vld [vmem:[%s14731_s1 + $0xaf8] sm:$0xff]  }
 0x10b   :  { %10359 = vmatpush3.bf16.msra.mxu0 %v11439_v28  ;;  %v1862_v0 = vrot.slane %v1840_v60, %v12137_v41  ;;  %v1870_v10 = vcombine.high %v1848_v3, %v1848_v3  ;;  %v11477_v35 = vld [vmem:[%s14731_s1 + $0x9a0] sm:$0xff]   ;;  %v11483_v42 = vld [vmem:[%s14731_s1 + $0x910] sm:$0xff]  }
 0x10c   :  { %10360 = vmatprep.subr.bf16.mxu0 %v11442_v36  ;;  %v11478_v36 = vld [vmem:[%s14731_s1 + $0x958] sm:$0xff]   ;;  %v11500_v60 = vld [vmem:[%s14731_s1 + $0xa30] sm:$0xff]  }
 0x10d   :  { %10381 = vmatpush3.bf16.msra.mxu1 %v11441_v34  ;;  %7713 = vmatprep.mubr.bf16.mxu0 %v1862_v0  ;;  %v1872_v5 = vcombine.high %v1862_v0, %v1862_v0 }
 0x10e   :  { %10382 = vmatprep.subr.bf16.mxu1 %v11444_v40  ;;  %v11482_v40 = vld [vmem:[%s14731_s1 + $0x950] sm:$0xff]  }
 0x10f   :  { %10361 = vmatpush3.bf16.msra.mxu0 %v11443_v39  ;;  %7753 = vmatprep.mubr.bf16.mxu1 %v1872_v5  ;;  %v11481_v39 = vld [vmem:[%s14731_s1 + $0x998] sm:$0xff]  }
 0x110   :  { %10362 = vmatprep.subr.bf16.mxu0 %v11446_v44  ;;  %v11485_v44 = vld [vmem:[%s14731_s1 + $0x990] sm:$0xff]  }
 0x111   :  { %10383 = vmatpush3.bf16.msra.mxu1 %v11445_v43  ;;  %v11484_v43 = vld [vmem:[%s14731_s1 + $0x9d0] sm:$0xff]  }
 0x112   :  { %10384 = vmatprep.subr.bf16.mxu1 %v11448_v46  ;;  %v11487_v46 = vld [vmem:[%s14731_s1 + $0x908] sm:$0xff]  }
 0x113   :  { %10363 = vmatpush3.bf16.msra.mxu0 %v11447_v45  ;;  %v11486_v45 = vld [vmem:[%s14731_s1 + $0x948] sm:$0xff]  }
 0x114   :  { %10364 = vmatprep.subr.bf16.mxu0 %v11450_v48  ;;  %v11489_v48 = vld [vmem:[%s14731_s1 + $0x988] sm:$0xff]  }
 0x115   :  { %10385 = vmatpush3.bf16.msra.mxu1 %v11449_v47  ;;  %v11488_v47 = vld [vmem:[%s14731_s1 + $0x9c8] sm:$0xff]  }
 0x116   :  { %10386 = vmatprep.subr.bf16.mxu1 %v11452_v50  ;;  %v11491_v50 = vld [vmem:[%s14731_s1 + $0x900] sm:$0xff]  }
 0x117   :  { %10365 = vmatpush3.bf16.msra.mxu0 %v11451_v49  ;;  %v11490_v49 = vld [vmem:[%s14731_s1 + $0x940] sm:$0xff]  }
 0x118   :  { %10366 = vmatprep.subr.bf16.mxu0 %v11454_v52  ;;  %v11494_v52 = vld [vmem:[%s14731_s1 + $0x980] sm:$0xff]  }
 0x119   :  { %10387 = vmatpush3.bf16.msra.mxu1 %v11453_v51  ;;  %v11492_v51 = vld [vmem:[%s14731_s1 + $0x9c0] sm:$0xff]  }
 0x11a   :  { %10388 = vmatprep.subr.bf16.mxu1 %v11456_v55  ;;  %v11496_v55 = vld [vmem:[%s14731_s1 + $0xa38] sm:$0xff]  }
 0x11b   :  { %10367 = vmatpush3.bf16.msra.mxu0 %v11455_v53  ;;  %v1855_v53 = vrot.slane %v12958_v61, %v12137_v41 }
 0x11c   :  { %10368 = vmatprep.subr.bf16.mxu0 %v11458_v59  ;;  %v11499_v59 = vld [vmem:[%s14731_s1 + $0xa70] sm:$0xff]  }
 0x11d   :  { %10389 = vmatpush3.bf16.msra.mxu1 %v11457_v58  ;;  %v1871_v58 = vcombine.high %v1855_v53, %v1855_v53 }
 0x11e   :  { %10390 = vmatprep.subr.bf16.mxu1 %v11460_v63  ;;  %v11502_v63 = vld [vmem:[%s14731_s1 + $0xab0] sm:$0xff]  }
 0x11f   :  { %10369 = vmatpush3.bf16.msra.mxu0 %v11459_v62  ;;  %v11501_v62 = vld [vmem:[%s14731_s1 + $0xaf0] sm:$0xff]  }
 0x120   :  { %10398 = vmatprep.subr.bf16.mxu0 %v11462_v4  ;;  %v11504_v4 = vld [vmem:[%s14731_s1 + $0xa28] sm:$0xff]  }
 0x121   :  { %10391 = vmatpush3.bf16.msra.mxu1 %v11461_v2  ;;  %v11503_v2 = vld [vmem:[%s14731_s1 + $0xa68] sm:$0xff]  }
 0x122   :  { %v10106_v14 = vpop.f32.mrf.mxu0  ;;  %7714 = vmatmul.mubr.bf16.vlgmr.msra.gmra.mxu0 %v1848_v3  ;;  %10420 = vmatprep.subr.bf16.mxu1 %v11464_v8 }
 0x123   :  { %10399 = vmatpush3.bf16.msra.mxu0 %v11463_v6  ;;  %7793 = vmatprep.mubr.bf16.mxu0 %v1869_v7  ;;  %v11505_v7 = vld [vmem:[%s14731_s1 + $0xae8] sm:$0xff]  }
 0x124   :  { %v10107_v17 = vpop.f32.mrf.mxu0  ;;  %v10128_v18 = vpop.f32.mrf.mxu1  ;;  %7754 = vmatmul.mubr.bf16.vlgmr.msra.gmra.mxu1 %v1870_v10  ;;  %10400 = vmatprep.subr.bf16.mxu0 %v11466_v11  ;;  %v11506_v10 = vld [vmem:[%s14731_s1 + $0xaa8] sm:$0xff]  }
 0x125   :  { %v10108_v20 = vadd.f32 %v10107_v17, %v10106_v14  ;;  %10421 = vmatpush3.bf16.msra.mxu1 %v11465_v9  ;;  %7833 = vmatprep.mubr.bf16.mxu1 %v1873_v13 }
 0x126   :  { %v10109_v22 = vpop.f32.mrf.mxu0  ;;  %v10129_v23 = vpop.f32.mrf.mxu1  ;;  %10422 = vmatprep.subr.bf16.mxu1 %v11468_v15  ;;  %v11508_v15 = vld [vmem:[%s14731_s1 + $0xa20] sm:$0xff]  }
 0x127   :  { %v7236_v25 = vadd.f32 %v10108_v20, %v12903_v38  ;;  %v10130_v26 = vadd.f32 %v10129_v23, %v10128_v18  ;;  %10401 = vmatpush3.bf16.msra.mxu0 %v11467_v12  ;;  %v11480_v38 = vld [vmem:[%s14731_s1 + $0x9d8] sm:$0xff]   ;;  %v11507_v12 = vld [vmem:[%s14731_s1 + $0xa60] sm:$0xff]   ;;  %v11515_v23 = vld [vmem:[%s14731_s1 + $0xa50] sm:$0xff]  }
 0x128   :  { %v10110_v28 = vpop.f32.mrf.mxu0  ;;  %10402 = vmatprep.subr.bf16.mxu0 %v11470_v19  ;;  %v10131_v30 = vpop.f32.mrf.mxu1  ;;  %v11510_v18 = vld [vmem:[%s14731_s1 + $0xaa0] sm:$0xff]   ;;  %v11511_v19 = vld [vmem:[%s14731_s1 + $0xa58] sm:$0xff]  }
 0x129   :  { %v13014_v31 = vadd.f32 %v10130_v26, %v7236_v25  ;;  %10423 = vmatpush3.bf16.msra.mxu1 %v11469_v16  ;;  %v11509_v16 = vld [vmem:[%s14731_s1 + $0xae0] sm:$0xff]   ;;  %v11512_v20 = vld [vmem:[%s14731_s1 + $0xa18] sm:$0xff]   ;;  %v11517_v25 = vld [vmem:[%s14731_s1 + $0xad0] sm:$0xff]  }
 0x12a   :  { %10424 = vmatprep.subr.bf16.mxu1 %v11472_v24  ;;  %v10132_v34 = vpop.f32.mrf.mxu1  ;;  %v11514_v22 = vld [vmem:[%s14731_s1 + $0xa98] sm:$0xff]   ;;  %v11516_v24 = vld [vmem:[%s14731_s1 + $0xa10] sm:$0xff]   ;;  %v11520_v28 = vld [vmem:[%s14731_s1 + $0xa08] sm:$0xff]  }
 0x12b   :  { %10403 = vmatpush3.bf16.msra.mxu0 %v11471_v21  ;;  %v11513_v21 = vld [vmem:[%s14731_s1 + $0xad8] sm:$0xff]   ;;  %v11518_v26 = vld [vmem:[%s14731_s1 + $0xa90] sm:$0xff]   ;;  %v33_v30 = vld [vmem:[%s14730_s0 + $0x28] sm:$0xff] }
 0x12c   :  { %10404 = vmatprep.subr.bf16.mxu0 %v11474_v29  ;;  %v11521_v29 = vld [vmem:[%s14731_s1 + $0xac8] sm:$0xff]   ;;  %v11523_v34 = vld [vmem:[%s14731_s1 + $0xa40] sm:$0xff]  }
 0x12d   :  { %10425 = vmatpush3.bf16.msra.mxu1 %v11473_v27  ;;  %v11519_v27 = vld [vmem:[%s14731_s1 + $0xa48] sm:$0xff]  }
 0x12e   :  { %10426 = vmatprep.subr.bf16.mxu1 %v11476_v33  ;;  %v1874_v33 = vcombine.high %v33_v30, %v33_v30 }
 0x12f   :  { %10405 = vmatpush3.bf16.msra.mxu0 %v11475_v32  ;;  %v1881_v32 = vrot.slane %v33_v30, %v12137_v41  ;;  %v11561_v30 = vld [vmem:[%s14731_s1 + $0xc38] sm:$0xff]  }
 0x130   :  { %10406 = vmatprep.subr.bf16.mxu0 %v11478_v36 }
 0x131   :  { %10427 = vmatpush3.bf16.msra.mxu1 %v11477_v35  ;;  %v11524_v35 = vld [vmem:[%s14731_s1 + $0xa00] sm:$0xff]   ;;  %v1889_v36 = vcombine.high %v1881_v32, %v1881_v32 }
 0x132   :  { %10428 = vmatprep.subr.bf16.mxu1 %v11480_v38  ;;  %v11525_v38 = vld [vmem:[%s14731_s1 + $0xac0] sm:$0xff]  }
 0x133   :  { %10407 = vmatpush3.bf16.msra.mxu0 %v11479_v37  ;;  %v13173_v37 = vrot.slane %v1874_v33, %v12137_v41 }
 0x134   :  { %10408 = vmatprep.subr.bf16.mxu0 %v11482_v40  ;;  %v11526_v40 = vld [vmem:[%s14731_s1 + $0xa80] sm:$0xff]  }
 0x135   :  { %10429 = vmatpush3.bf16.msra.mxu1 %v11481_v39  ;;  %v1911_v39 = vrot.slane %v1889_v36, %v12137_v41 }
 0x136   :  { %10430 = vmatprep.subr.bf16.mxu1 %v11484_v43  ;;  %v1897_v43 = vrot.slane %v1881_v32, %v12137_v41  ;;  %v11563_v32 = vld [vmem:[%s14731_s1 + $0xcb8] sm:$0xff]  }
 0x137   :  { %10409 = vmatpush3.bf16.msra.mxu0 %v11483_v42  ;;  %v1890_v42 = vcombine.high %v13173_v37, %v13173_v37 }
 0x138   :  { %10410 = vmatprep.subr.bf16.mxu0 %v11486_v45  ;;  %v1921_v45 = vcombine.high %v1911_v39, %v1911_v39 }
 0x139   :  { %10431 = vmatpush3.bf16.msra.mxu1 %v11485_v44  ;;  %v11527_v44 = vld [vmem:[%s14731_s1 + $0xb78] sm:$0xff]  }
 0x13a   :  { %10432 = vmatprep.subr.bf16.mxu1 %v11488_v47  ;;  %v1918_v47 = vrot.slane %v1890_v42, %v12137_v41  ;;  %v11568_v42 = vld [vmem:[%s14731_s1 + $0xc68] sm:$0xff]  }
 0x13b   :  { %10411 = vmatpush3.bf16.msra.mxu0 %v11487_v46  ;;  %v11528_v46 = vld [vmem:[%s14731_s1 + $0xb38] sm:$0xff]  }
 0x13c   :  { %10412 = vmatprep.subr.bf16.mxu0 %v11490_v49  ;;  %v11530_v49 = vld [vmem:[%s14731_s1 + $0xbb8] sm:$0xff]  }
 0x13d   :  { %10433 = vmatpush3.bf16.msra.mxu1 %v11489_v48  ;;  %v11529_v48 = vld [vmem:[%s14731_s1 + $0xbf8] sm:$0xff]  }
 0x13e   :  { %10434 = vmatprep.subr.bf16.mxu1 %v11492_v51  ;;  %v11531_v51 = vld [vmem:[%s14731_s1 + $0xb70] sm:$0xff]  }
 0x13f   :  { %10413 = vmatpush3.bf16.msra.mxu0 %v11491_v50  ;;  %v1919_v50 = vcombine.high %v1897_v43, %v1897_v43 }
 0x140   :  { %10442 = vmatprep.subr.bf16.mxu0 %v11495_v54 }
 0x141   :  { %10435 = vmatpush3.bf16.msra.mxu1 %v11494_v52  ;;  %v11532_v52 = vld [vmem:[%s14731_s1 + $0xb30] sm:$0xff]  }
 0x142   :  { %v10150_v61 = vpop.f32.mrf.mxu0  ;;  %7794 = vmatmul.mubr.bf16.vlgmr.msra.gmra.mxu0 %v1855_v53  ;;  %10464 = vmatprep.subr.bf16.mxu1 %v11497_v56  ;;  %v1922_v53 = vcombine.high %v1918_v47, %v1918_v47  ;;  %v11534_v56 = vld [vmem:[%s14731_s1 + $0xbb0] sm:$0xff]  }
 0x143   :  { %10443 = vmatpush3.bf16.msra.mxu0 %v11496_v55  ;;  %7873 = vmatprep.mubr.bf16.mxu0 %v1911_v39  ;;  %v11533_v55 = vld [vmem:[%s14731_s1 + $0xbf0] sm:$0xff]  }
 0x144   :  { %v10151_v0 = vpop.f32.mrf.mxu0  ;;  %v10172_v1 = vpop.f32.mrf.mxu1  ;;  %7834 = vmatmul.mubr.bf16.vlgmr.msra.gmra.mxu1 %v1871_v58  ;;  %10444 = vmatprep.subr.bf16.mxu0 %v11499_v59  ;;  %v11535_v59 = vld [vmem:[%s14731_s1 + $0xb68] sm:$0xff]  }
 0x145   :  { %v10152_v3 = vadd.f32 %v10151_v0, %v10150_v61  ;;  %10465 = vmatpush3.bf16.msra.mxu1 %v11498_v57  ;;  %7913 = vmatprep.mubr.bf16.mxu1 %v1921_v45  ;;  %v11536_v61 = vld [vmem:[%s14731_s1 + $0xb28] sm:$0xff]  }
 0x146   :  { %v10153_v5 = vpop.f32.mrf.mxu0  ;;  %v10173_v6 = vpop.f32.mrf.mxu1  ;;  %10466 = vmatprep.subr.bf16.mxu1 %v11501_v62  ;;  %v11537_v0 = vld [vmem:[%s14731_s1 + $0xbe8] sm:$0xff]  }
 0x147   :  { %v7316_v8 = vadd.f32 %v10152_v3, %v13014_v31  ;;  %v10174_v9 = vadd.f32 %v10173_v6, %v10172_v1  ;;  %10445 = vmatpush3.bf16.msra.mxu0 %v11500_v60  ;;  %v11522_v31 = vld [vmem:[%s14731_s1 + $0xa88] sm:$0xff]   ;;  %v11539_v5 = vld [vmem:[%s14731_s1 + $0xb60] sm:$0xff]  }
 0x148   :  { %v10154_v11 = vpop.f32.mrf.mxu0  ;;  %10446 = vmatprep.subr.bf16.mxu0 %v11503_v2  ;;  %v10175_v13 = vpop.f32.mrf.mxu1  ;;  %v11538_v3 = vld [vmem:[%s14731_s1 + $0xba8] sm:$0xff]  }
 0x149   :  { %v13115_v14 = vadd.f32 %v10174_v9, %v7316_v8  ;;  %10467 = vmatpush3.bf16.msra.mxu1 %v11502_v63  ;;  %v11540_v8 = vld [vmem:[%s14731_s1 + $0xb20] sm:$0xff]   ;;  %v11544_v13 = vld [vmem:[%s14731_s1 + $0xb18] sm:$0xff]  }
 0x14a   :  { %10468 = vmatprep.subr.bf16.mxu1 %v11505_v7  ;;  %v10176_v17 = vpop.f32.mrf.mxu1  ;;  %v11541_v9 = vld [vmem:[%s14731_s1 + $0xbe0] sm:$0xff]  }
 0x14b   :  { %10447 = vmatpush3.bf16.msra.mxu0 %v11504_v4  ;;  %v11542_v11 = vld [vmem:[%s14731_s1 + $0xba0] sm:$0xff]   ;;  %v11548_v17 = vld [vmem:[%s14731_s1 + $0xb10] sm:$0xff]  }
 0x14c   :  { %10448 = vmatprep.subr.bf16.mxu0 %v11507_v12  ;;  %v11543_v12 = vld [vmem:[%s14731_s1 + $0xb58] sm:$0xff]  }
 0x14d   :  { %10469 = vmatpush3.bf16.msra.mxu1 %v11506_v10 }
 0x14e   :  { %10470 = vmatprep.subr.bf16.mxu1 %v11509_v16  ;;  %v11547_v16 = vld [vmem:[%s14731_s1 + $0xb50] sm:$0xff]  }
 0x14f   :  { %10449 = vmatpush3.bf16.msra.mxu0 %v11508_v15  ;;  %v11546_v15 = vld [vmem:[%s14731_s1 + $0xb98] sm:$0xff]  }
 0x150   :  { %10450 = vmatprep.subr.bf16.mxu0 %v11511_v19  ;;  %v11550_v19 = vld [vmem:[%s14731_s1 + $0xb90] sm:$0xff]  }
 0x151   :  { %10471 = vmatpush3.bf16.msra.mxu1 %v11510_v18  ;;  %v11549_v18 = vld [vmem:[%s14731_s1 + $0xbd0] sm:$0xff]  }
 0x152   :  { %10472 = vmatprep.subr.bf16.mxu1 %v11513_v21  ;;  %v11552_v21 = vld [vmem:[%s14731_s1 + $0xb08] sm:$0xff]  }
 0x153   :  { %10451 = vmatpush3.bf16.msra.mxu0 %v11512_v20  ;;  %v11551_v20 = vld [vmem:[%s14731_s1 + $0xb48] sm:$0xff]  }
 0x154   :  { %10452 = vmatprep.subr.bf16.mxu0 %v11515_v23  ;;  %v11554_v23 = vld [vmem:[%s14731_s1 + $0xb88] sm:$0xff]  }
 0x155   :  { %10473 = vmatpush3.bf16.msra.mxu1 %v11514_v22  ;;  %v11553_v22 = vld [vmem:[%s14731_s1 + $0xbc8] sm:$0xff]  }
 0x156   :  { %10474 = vmatprep.subr.bf16.mxu1 %v11517_v25  ;;  %v11556_v25 = vld [vmem:[%s14731_s1 + $0xb00] sm:$0xff]  }
 0x157   :  { %10453 = vmatpush3.bf16.msra.mxu0 %v11516_v24  ;;  %v11555_v24 = vld [vmem:[%s14731_s1 + $0xb40] sm:$0xff]  }
 0x158   :  { %10454 = vmatprep.subr.bf16.mxu0 %v11519_v27  ;;  %v11559_v27 = vld [vmem:[%s14731_s1 + $0xb80] sm:$0xff]  }
 0x159   :  { %10475 = vmatpush3.bf16.msra.mxu1 %v11518_v26  ;;  %v11557_v26 = vld [vmem:[%s14731_s1 + $0xbc0] sm:$0xff]  }
 0x15a   :  { %10476 = vmatprep.subr.bf16.mxu1 %v11521_v29  ;;  %v11560_v29 = vld [vmem:[%s14731_s1 + $0xc78] sm:$0xff]  }
 0x15b   :  { %10455 = vmatpush3.bf16.msra.mxu0 %v11520_v28  ;;  %v1904_v28 = vrot.slane %v13173_v37, %v12137_v41  ;;  %v11566_v37 = vld [vmem:[%s14731_s1 + $0xcf0] sm:$0xff]  }
 0x15c   :  { %10456 = vmatprep.subr.bf16.mxu0 %v11523_v34  ;;  %v11564_v34 = vld [vmem:[%s14731_s1 + $0xc70] sm:$0xff]  }
 0x15d   :  { %10477 = vmatpush3.bf16.msra.mxu1 %v11522_v31  ;;  %v11562_v31 = vld [vmem:[%s14731_s1 + $0xcf8] sm:$0xff]   ;;  %v1920_v33 = vcombine.high %v1904_v28, %v1904_v28 }
 0x15e   :  { %10478 = vmatprep.subr.bf16.mxu1 %v11525_v38  ;;  %v11567_v38 = vld [vmem:[%s14731_s1 + $0xcb0] sm:$0xff]  }
 0x15f   :  { %10457 = vmatpush3.bf16.msra.mxu0 %v11524_v35  ;;  %v11565_v35 = vld [vmem:[%s14731_s1 + $0xc30] sm:$0xff]  }
 0x160   :  { %10486 = vmatprep.subr.bf16.mxu0 %v11527_v44  ;;  %v11569_v44 = vld [vmem:[%s14731_s1 + $0xc28] sm:$0xff]  }
 0x161   :  { %10479 = vmatpush3.bf16.msra.mxu1 %v11526_v40 }
 0x162   :  { %v10194_v54 = vpop.f32.mrf.mxu0  ;;  %7874 = vmatmul.mubr.bf16.vlgmr.msra.gmra.mxu0 %v1897_v43  ;;  %10508 = vmatprep.subr.bf16.mxu1 %v11529_v48 }
 0x163   :  { %10487 = vmatpush3.bf16.msra.mxu0 %v11528_v46  ;;  %7953 = vmatprep.mubr.bf16.mxu0 %v1918_v47  ;;  %v11570_v47 = vld [vmem:[%s14731_s1 + $0xce8] sm:$0xff]  }
 0x164   :  { %v10195_v57 = vpop.f32.mrf.mxu0  ;;  %v10216_v58 = vpop.f32.mrf.mxu1  ;;  %7914 = vmatmul.mubr.bf16.vlgmr.msra.gmra.mxu1 %v1919_v50  ;;  %10488 = vmatprep.subr.bf16.mxu0 %v11531_v51  ;;  %v11571_v50 = vld [vmem:[%s14731_s1 + $0xca8] sm:$0xff]  }
 0x165   :  { %v10196_v60 = vadd.f32 %v10195_v57, %v10194_v54  ;;  %10509 = vmatpush3.bf16.msra.mxu1 %v11530_v49  ;;  %7993 = vmatprep.mubr.bf16.mxu1 %v1922_v53 }
 0x166   :  { %v10197_v62 = vpop.f32.mrf.mxu0  ;;  %v10217_v63 = vpop.f32.mrf.mxu1  ;;  %10510 = vmatprep.subr.bf16.mxu1 %v11533_v55  ;;  %v11573_v55 = vld [vmem:[%s14731_s1 + $0xc20] sm:$0xff]  }
 0x167   :  { %v7396_v1 = vadd.f32 %v10196_v60, %v13115_v14  ;;  %v10218_v2 = vadd.f32 %v10217_v63, %v10216_v58  ;;  %10489 = vmatpush3.bf16.msra.mxu0 %v11532_v52  ;;  %v11545_v14 = vld [vmem:[%s14731_s1 + $0xbd8] sm:$0xff]   ;;  %v11572_v52 = vld [vmem:[%s14731_s1 + $0xc60] sm:$0xff]   ;;  %v11580_v63 = vld [vmem:[%s14731_s1 + $0xc50] sm:$0xff]  }
 0x168   :  { %v10198_v4 = vpop.f32.mrf.mxu0  ;;  %10490 = vmatprep.subr.bf16.mxu0 %v11535_v59  ;;  %v10219_v6 = vpop.f32.mrf.mxu1  ;;  %v11575_v58 = vld [vmem:[%s14731_s1 + $0xca0] sm:$0xff]   ;;  %v11576_v59 = vld [vmem:[%s14731_s1 + $0xc58] sm:$0xff]  }
 0x169   :  { %v13226_v7 = vadd.f32 %v10218_v2, %v7396_v1  ;;  %10511 = vmatpush3.bf16.msra.mxu1 %v11534_v56  ;;  %v11574_v56 = vld [vmem:[%s14731_s1 + $0xce0] sm:$0xff]   ;;  %v11577_v60 = vld [vmem:[%s14731_s1 + $0xc18] sm:$0xff]   ;;  %v11582_v1 = vld [vmem:[%s14731_s1 + $0xcd0] sm:$0xff]  }
 0x16a   :  { %10512 = vmatprep.subr.bf16.mxu1 %v11537_v0  ;;  %v10220_v10 = vpop.f32.mrf.mxu1  ;;  %v11579_v62 = vld [vmem:[%s14731_s1 + $0xc98] sm:$0xff]   ;;  %v11581_v0 = vld [vmem:[%s14731_s1 + $0xc10] sm:$0xff]   ;;  %v11585_v4 = vld [vmem:[%s14731_s1 + $0xc08] sm:$0xff]  }
 0x16b   :  { %10491 = vmatpush3.bf16.msra.mxu0 %v11536_v61  ;;  %v11578_v61 = vld [vmem:[%s14731_s1 + $0xcd8] sm:$0xff]   ;;  %v11583_v2 = vld [vmem:[%s14731_s1 + $0xc90] sm:$0xff]   ;;  %v11588_v10 = vld [vmem:[%s14731_s1 + $0xc40] sm:$0xff]  }
 0x16c   :  { %10492 = vmatprep.subr.bf16.mxu0 %v11539_v5  ;;  %v11586_v5 = vld [vmem:[%s14731_s1 + $0xcc8] sm:$0xff]   ;;  %v34_v6 = vld [vmem:[%s14730_s0 + $0x30] sm:$0xff] }
 0x16d   :  { %10513 = vmatpush3.bf16.msra.mxu1 %v11538_v3  ;;  %v11584_v3 = vld [vmem:[%s14731_s1 + $0xc48] sm:$0xff]  }
 0x16e   :  { %10514 = vmatprep.subr.bf16.mxu1 %v11541_v9  ;;  %v1923_v9 = vcombine.high %v34_v6, %v34_v6 }
 0x16f   :  { %10493 = vmatpush3.bf16.msra.mxu0 %v11540_v8  ;;  %v1930_v8 = vrot.slane %v34_v6, %v12137_v41  ;;  %v11626_v6 = vld [vmem:[%s14731_s1 + $0xe38] sm:$0xff]  }
 0x170   :  { %10494 = vmatprep.subr.bf16.mxu0 %v11543_v12 }
 0x171   :  { %10515 = vmatpush3.bf16.msra.mxu1 %v11542_v11  ;;  %v11589_v11 = vld [vmem:[%s14731_s1 + $0xc00] sm:$0xff]   ;;  %v1938_v12 = vcombine.high %v1930_v8, %v1930_v8 }
 0x172   :  { %10516 = vmatprep.subr.bf16.mxu1 %v11545_v14  ;;  %v11590_v14 = vld [vmem:[%s14731_s1 + $0xcc0] sm:$0xff]  }
 0x173   :  { %10495 = vmatpush3.bf16.msra.mxu0 %v11544_v13  ;;  %v13385_v13 = vrot.slane %v1923_v9, %v12137_v41 }
 0x174   :  { %10496 = vmatprep.subr.bf16.mxu0 %v11547_v16  ;;  %v11591_v16 = vld [vmem:[%s14731_s1 + $0xc80] sm:$0xff]  }
 0x175   :  { %10517 = vmatpush3.bf16.msra.mxu1 %v11546_v15  ;;  %v1960_v15 = vrot.slane %v1938_v12, %v12137_v41 }
 0x176   :  { %10518 = vmatprep.subr.bf16.mxu1 %v11549_v18  ;;  %v1946_v18 = vrot.slane %v1930_v8, %v12137_v41  ;;  %v11628_v8 = vld [vmem:[%s14731_s1 + $0xeb8] sm:$0xff]  }
 0x177   :  { %10497 = vmatpush3.bf16.msra.mxu0 %v11548_v17  ;;  %v1939_v17 = vcombine.high %v13385_v13, %v13385_v13 }
 0x178   :  { %10498 = vmatprep.subr.bf16.mxu0 %v11551_v20  ;;  %v1970_v20 = vcombine.high %v1960_v15, %v1960_v15 }
 0x179   :  { %10519 = vmatpush3.bf16.msra.mxu1 %v11550_v19  ;;  %v11592_v19 = vld [vmem:[%s14731_s1 + $0xd78] sm:$0xff]  }
 0x17a   :  { %10520 = vmatprep.subr.bf16.mxu1 %v11553_v22  ;;  %v1967_v22 = vrot.slane %v1939_v17, %v12137_v41  ;;  %v11633_v17 = vld [vmem:[%s14731_s1 + $0xe68] sm:$0xff]  }
 0x17b   :  { %10499 = vmatpush3.bf16.msra.mxu0 %v11552_v21  ;;  %v11593_v21 = vld [vmem:[%s14731_s1 + $0xd38] sm:$0xff]  }
 0x17c   :  { %10500 = vmatprep.subr.bf16.mxu0 %v11555_v24  ;;  %v11595_v24 = vld [vmem:[%s14731_s1 + $0xdb8] sm:$0xff]  }
 0x17d   :  { %10521 = vmatpush3.bf16.msra.mxu1 %v11554_v23  ;;  %v11594_v23 = vld [vmem:[%s14731_s1 + $0xdf8] sm:$0xff]  }
 0x17e   :  { %10522 = vmatprep.subr.bf16.mxu1 %v11557_v26  ;;  %v11596_v26 = vld [vmem:[%s14731_s1 + $0xd70] sm:$0xff]  }
 0x17f   :  { %10501 = vmatpush3.bf16.msra.mxu0 %v11556_v25  ;;  %v1968_v25 = vcombine.high %v1946_v18, %v1946_v18 }
 0x180   :  { %10530 = vmatprep.subr.bf16.mxu0 %v11560_v29 }
 0x181   :  { %10523 = vmatpush3.bf16.msra.mxu1 %v11559_v27  ;;  %v11597_v27 = vld [vmem:[%s14731_s1 + $0xd30] sm:$0xff]  }
 0x182   :  { %v10238_v36 = vpop.f32.mrf.mxu0  ;;  %7954 = vmatmul.mubr.bf16.vlgmr.msra.gmra.mxu0 %v1904_v28  ;;  %10552 = vmatprep.subr.bf16.mxu1 %v11562_v31  ;;  %v1971_v28 = vcombine.high %v1967_v22, %v1967_v22  ;;  %v11599_v31 = vld [vmem:[%s14731_s1 + $0xdb0] sm:$0xff]  }
 0x183   :  { %10531 = vmatpush3.bf16.msra.mxu0 %v11561_v30  ;;  %8033 = vmatprep.mubr.bf16.mxu0 %v1960_v15  ;;  %v11598_v30 = vld [vmem:[%s14731_s1 + $0xdf0] sm:$0xff]  }
 0x184   :  { %v10239_v39 = vpop.f32.mrf.mxu0  ;;  %v10260_v40 = vpop.f32.mrf.mxu1  ;;  %7994 = vmatmul.mubr.bf16.vlgmr.msra.gmra.mxu1 %v1920_v33  ;;  %10532 = vmatprep.subr.bf16.mxu0 %v11564_v34  ;;  %v11600_v34 = vld [vmem:[%s14731_s1 + $0xd68] sm:$0xff]  }
 0x185   :  { %v10240_v43 = vadd.f32 %v10239_v39, %v10238_v36  ;;  %10553 = vmatpush3.bf16.msra.mxu1 %v11563_v32  ;;  %8073 = vmatprep.mubr.bf16.mxu1 %v1970_v20  ;;  %v11601_v36 = vld [vmem:[%s14731_s1 + $0xd28] sm:$0xff]  }
 0x186   :  { %v10241_v45 = vpop.f32.mrf.mxu0  ;;  %v10261_v46 = vpop.f32.mrf.mxu1  ;;  %10554 = vmatprep.subr.bf16.mxu1 %v11566_v37  ;;  %v11602_v39 = vld [vmem:[%s14731_s1 + $0xde8] sm:$0xff]  }
 0x187   :  { %v7476_v48 = vadd.f32 %v10240_v43, %v13226_v7  ;;  %v10262_v49 = vadd.f32 %v10261_v46, %v10260_v40  ;;  %10533 = vmatpush3.bf16.msra.mxu0 %v11565_v35  ;;  %v11587_v7 = vld [vmem:[%s14731_s1 + $0xc88] sm:$0xff]   ;;  %v11604_v45 = vld [vmem:[%s14731_s1 + $0xd60] sm:$0xff]  }
 0x188   :  { %v10242_v51 = vpop.f32.mrf.mxu0  ;;  %10534 = vmatprep.subr.bf16.mxu0 %v11568_v42  ;;  %v10263_v53 = vpop.f32.mrf.mxu1  ;;  %v11603_v43 = vld [vmem:[%s14731_s1 + $0xda8] sm:$0xff]  }
 0x189   :  { %v13327_v54 = vadd.f32 %v10262_v49, %v7476_v48  ;;  %10555 = vmatpush3.bf16.msra.mxu1 %v11567_v38  ;;  %v11605_v48 = vld [vmem:[%s14731_s1 + $0xd20] sm:$0xff]   ;;  %v11609_v53 = vld [vmem:[%s14731_s1 + $0xd18] sm:$0xff]  }
 0x18a   :  { %10556 = vmatprep.subr.bf16.mxu1 %v11570_v47  ;;  %v10264_v57 = vpop.f32.mrf.mxu1  ;;  %v11606_v49 = vld [vmem:[%s14731_s1 + $0xde0] sm:$0xff]  }
 0x18b   :  { %10535 = vmatpush3.bf16.msra.mxu0 %v11569_v44  ;;  %v11607_v51 = vld [vmem:[%s14731_s1 + $0xda0] sm:$0xff]   ;;  %v11613_v57 = vld [vmem:[%s14731_s1 + $0xd10] sm:$0xff]  }
 0x18c   :  { %10536 = vmatprep.subr.bf16.mxu0 %v11572_v52  ;;  %v11608_v52 = vld [vmem:[%s14731_s1 + $0xd58] sm:$0xff]  }
 0x18d   :  { %10557 = vmatpush3.bf16.msra.mxu1 %v11571_v50 }
 0x18e   :  { %10558 = vmatprep.subr.bf16.mxu1 %v11574_v56  ;;  %v11612_v56 = vld [vmem:[%s14731_s1 + $0xd50] sm:$0xff]  }
 0x18f   :  { %10537 = vmatpush3.bf16.msra.mxu0 %v11573_v55  ;;  %v11611_v55 = vld [vmem:[%s14731_s1 + $0xd98] sm:$0xff]  }
 0x190   :  { %10538 = vmatprep.subr.bf16.mxu0 %v11576_v59  ;;  %v11615_v59 = vld [vmem:[%s14731_s1 + $0xd90] sm:$0xff]  }
 0x191   :  { %10559 = vmatpush3.bf16.msra.mxu1 %v11575_v58  ;;  %v11614_v58 = vld [vmem:[%s14731_s1 + $0xdd0] sm:$0xff]  }
 0x192   :  { %10560 = vmatprep.subr.bf16.mxu1 %v11578_v61  ;;  %v11617_v61 = vld [vmem:[%s14731_s1 + $0xd08] sm:$0xff]  }
 0x193   :  { %10539 = vmatpush3.bf16.msra.mxu0 %v11577_v60  ;;  %v11616_v60 = vld [vmem:[%s14731_s1 + $0xd48] sm:$0xff]  }
 0x194   :  { %10540 = vmatprep.subr.bf16.mxu0 %v11580_v63  ;;  %v11619_v63 = vld [vmem:[%s14731_s1 + $0xd88] sm:$0xff]  }
 0x195   :  { %10561 = vmatpush3.bf16.msra.mxu1 %v11579_v62  ;;  %v11618_v62 = vld [vmem:[%s14731_s1 + $0xdc8] sm:$0xff]  }
 0x196   :  { %10562 = vmatprep.subr.bf16.mxu1 %v11582_v1  ;;  %v11621_v1 = vld [vmem:[%s14731_s1 + $0xd00] sm:$0xff]  }
 0x197   :  { %10541 = vmatpush3.bf16.msra.mxu0 %v11581_v0  ;;  %v11620_v0 = vld [vmem:[%s14731_s1 + $0xd40] sm:$0xff]  }
 0x198   :  { %10542 = vmatprep.subr.bf16.mxu0 %v11584_v3  ;;  %v11624_v3 = vld [vmem:[%s14731_s1 + $0xd80] sm:$0xff]  }
 0x199   :  { %10563 = vmatpush3.bf16.msra.mxu1 %v11583_v2  ;;  %v11622_v2 = vld [vmem:[%s14731_s1 + $0xdc0] sm:$0xff]  }
 0x19a   :  { %10564 = vmatprep.subr.bf16.mxu1 %v11586_v5  ;;  %v11625_v5 = vld [vmem:[%s14731_s1 + $0xe78] sm:$0xff]  }
 0x19b   :  { %10543 = vmatpush3.bf16.msra.mxu0 %v11585_v4  ;;  %v1953_v4 = vrot.slane %v13385_v13, %v12137_v41  ;;  %v11631_v13 = vld [vmem:[%s14731_s1 + $0xef0] sm:$0xff]  }
 0x19c   :  { %10544 = vmatprep.subr.bf16.mxu0 %v11588_v10  ;;  %v11629_v10 = vld [vmem:[%s14731_s1 + $0xe70] sm:$0xff]  }
 0x19d   :  { %10565 = vmatpush3.bf16.msra.mxu1 %v11587_v7  ;;  %v11627_v7 = vld [vmem:[%s14731_s1 + $0xef8] sm:$0xff]   ;;  %v1969_v9 = vcombine.high %v1953_v4, %v1953_v4 }
 0x19e   :  { %10566 = vmatprep.subr.bf16.mxu1 %v11590_v14  ;;  %v11632_v14 = vld [vmem:[%s14731_s1 + $0xeb0] sm:$0xff]  }
 0x19f   :  { %10545 = vmatpush3.bf16.msra.mxu0 %v11589_v11  ;;  %v11630_v11 = vld [vmem:[%s14731_s1 + $0xe30] sm:$0xff]  }
 0x1a0   :  { %10574 = vmatprep.subr.bf16.mxu0 %v11592_v19  ;;  %v11634_v19 = vld [vmem:[%s14731_s1 + $0xe28] sm:$0xff]  }
 0x1a1   :  { %10567 = vmatpush3.bf16.msra.mxu1 %v11591_v16 }
 0x1a2   :  { %v10282_v29 = vpop.f32.mrf.mxu0  ;;  %8034 = vmatmul.mubr.bf16.vlgmr.msra.gmra.mxu0 %v1946_v18  ;;  %10596 = vmatprep.subr.bf16.mxu1 %v11594_v23 }
 0x1a3   :  { %10575 = vmatpush3.bf16.msra.mxu0 %v11593_v21  ;;  %8113 = vmatprep.mubr.bf16.mxu0 %v1967_v22  ;;  %v11635_v22 = vld [vmem:[%s14731_s1 + $0xee8] sm:$0xff]  }
 0x1a4   :  { %v10283_v32 = vpop.f32.mrf.mxu0  ;;  %v10304_v33 = vpop.f32.mrf.mxu1  ;;  %8074 = vmatmul.mubr.bf16.vlgmr.msra.gmra.mxu1 %v1968_v25  ;;  %10576 = vmatprep.subr.bf16.mxu0 %v11596_v26  ;;  %v11636_v25 = vld [vmem:[%s14731_s1 + $0xea8] sm:$0xff]  }
 0x1a5   :  { %v10284_v35 = vadd.f32 %v10283_v32, %v10282_v29  ;;  %10597 = vmatpush3.bf16.msra.mxu1 %v11595_v24  ;;  %8153 = vmatprep.mubr.bf16.mxu1 %v1971_v28 }
 0x1a6   :  { %v10285_v37 = vpop.f32.mrf.mxu0  ;;  %v10305_v38 = vpop.f32.mrf.mxu1  ;;  %10598 = vmatprep.subr.bf16.mxu1 %v11598_v30  ;;  %v11638_v30 = vld [vmem:[%s14731_s1 + $0xe20] sm:$0xff]  }
 0x1a7   :  { %v7556_v40 = vadd.f32 %v10284_v35, %v13327_v54  ;;  %v10306_v42 = vadd.f32 %v10305_v38, %v10304_v33  ;;  %10577 = vmatpush3.bf16.msra.mxu0 %v11597_v27  ;;  %v11610_v54 = vld [vmem:[%s14731_s1 + $0xdd8] sm:$0xff]   ;;  %v11637_v27 = vld [vmem:[%s14731_s1 + $0xe60] sm:$0xff]   ;;  %v11645_v38 = vld [vmem:[%s14731_s1 + $0xe50] sm:$0xff]  }
 0x1a8   :  { %v10286_v44 = vpop.f32.mrf.mxu0  ;;  %10578 = vmatprep.subr.bf16.mxu0 %v11600_v34  ;;  %v10307_v46 = vpop.f32.mrf.mxu1  ;;  %v11640_v33 = vld [vmem:[%s14731_s1 + $0xea0] sm:$0xff]   ;;  %v11641_v34 = vld [vmem:[%s14731_s1 + $0xe58] sm:$0xff]  }
 0x1a9   :  { %v13438_v47 = vadd.f32 %v10306_v42, %v7556_v40  ;;  %10599 = vmatpush3.bf16.msra.mxu1 %v11599_v31  ;;  %v11639_v31 = vld [vmem:[%s14731_s1 + $0xee0] sm:$0xff]   ;;  %v11642_v35 = vld [vmem:[%s14731_s1 + $0xe18] sm:$0xff]   ;;  %v11647_v40 = vld [vmem:[%s14731_s1 + $0xed0] sm:$0xff]  }
 0x1aa   :  { %10600 = vmatprep.subr.bf16.mxu1 %v11602_v39  ;;  %v10308_v50 = vpop.f32.mrf.mxu1  ;;  %v11644_v37 = vld [vmem:[%s14731_s1 + $0xe98] sm:$0xff]   ;;  %v11646_v39 = vld [vmem:[%s14731_s1 + $0xe10] sm:$0xff]   ;;  %v11650_v44 = vld [vmem:[%s14731_s1 + $0xe08] sm:$0xff]  }
 0x1ab   :  { %10579 = vmatpush3.bf16.msra.mxu0 %v11601_v36  ;;  %v11643_v36 = vld [vmem:[%s14731_s1 + $0xed8] sm:$0xff]   ;;  %v11648_v42 = vld [vmem:[%s14731_s1 + $0xe90] sm:$0xff]   ;;  %v11653_v50 = vld [vmem:[%s14731_s1 + $0xe40] sm:$0xff]  }
 0x1ac   :  { %10580 = vmatprep.subr.bf16.mxu0 %v11604_v45  ;;  %v11651_v45 = vld [vmem:[%s14731_s1 + $0xec8] sm:$0xff]   ;;  %v35_v46 = vld [vmem:[%s14730_s0 + $0x38] sm:$0xff] }
 0x1ad   :  { %10601 = vmatpush3.bf16.msra.mxu1 %v11603_v43  ;;  %v11649_v43 = vld [vmem:[%s14731_s1 + $0xe48] sm:$0xff]  }
 0x1ae   :  { %10602 = vmatprep.subr.bf16.mxu1 %v11606_v49  ;;  %v1972_v49 = vcombine.high %v35_v46, %v35_v46 }
 0x1af   :  { %10581 = vmatpush3.bf16.msra.mxu0 %v11605_v48  ;;  %v1979_v48 = vrot.slane %v35_v46, %v12137_v41  ;;  %v11691_v46 = vld [vmem:[%s14731_s1 + $0x1038] sm:$0xff]  }
 0x1b0   :  { %10582 = vmatprep.subr.bf16.mxu0 %v11608_v52 }
 0x1b1   :  { %10603 = vmatpush3.bf16.msra.mxu1 %v11607_v51  ;;  %v11654_v51 = vld [vmem:[%s14731_s1 + $0xe00] sm:$0xff]   ;;  %v1987_v52 = vcombine.high %v1979_v48, %v1979_v48 }
 0x1b2   :  { %10604 = vmatprep.subr.bf16.mxu1 %v11610_v54  ;;  %v11655_v54 = vld [vmem:[%s14731_s1 + $0xec0] sm:$0xff]  }
 0x1b3   :  { %10583 = vmatpush3.bf16.msra.mxu0 %v11609_v53  ;;  %v13597_v53 = vrot.slane %v1972_v49, %v12137_v41 }
 0x1b4   :  { %10584 = vmatprep.subr.bf16.mxu0 %v11612_v56  ;;  %v11656_v56 = vld [vmem:[%s14731_s1 + $0xe80] sm:$0xff]  }
 0x1b5   :  { %10605 = vmatpush3.bf16.msra.mxu1 %v11611_v55  ;;  %v2009_v55 = vrot.slane %v1987_v52, %v12137_v41 }
 0x1b6   :  { %10606 = vmatprep.subr.bf16.mxu1 %v11614_v58  ;;  %v1995_v58 = vrot.slane %v1979_v48, %v12137_v41  ;;  %v11693_v48 = vld [vmem:[%s14731_s1 + $0x10b8] sm:$0xff]  }
 0x1b7   :  { %10585 = vmatpush3.bf16.msra.mxu0 %v11613_v57  ;;  %v1988_v57 = vcombine.high %v13597_v53, %v13597_v53 }
 0x1b8   :  { %10586 = vmatprep.subr.bf16.mxu0 %v11616_v60  ;;  %v2019_v60 = vcombine.high %v2009_v55, %v2009_v55 }
 0x1b9   :  { %10607 = vmatpush3.bf16.msra.mxu1 %v11615_v59  ;;  %v11657_v59 = vld [vmem:[%s14731_s1 + $0xf78] sm:$0xff]  }
 0x1ba   :  { %10608 = vmatprep.subr.bf16.mxu1 %v11618_v62  ;;  %v2016_v62 = vrot.slane %v1988_v57, %v12137_v41  ;;  %v11698_v57 = vld [vmem:[%s14731_s1 + $0x1068] sm:$0xff]  }
 0x1bb   :  { %10587 = vmatpush3.bf16.msra.mxu0 %v11617_v61  ;;  %v11658_v61 = vld [vmem:[%s14731_s1 + $0xf38] sm:$0xff]  }
 0x1bc   :  { %10588 = vmatprep.subr.bf16.mxu0 %v11620_v0  ;;  %v11660_v0 = vld [vmem:[%s14731_s1 + $0xfb8] sm:$0xff]  }
 0x1bd   :  { %10609 = vmatpush3.bf16.msra.mxu1 %v11619_v63  ;;  %v11659_v63 = vld [vmem:[%s14731_s1 + $0xff8] sm:$0xff]  }
 0x1be   :  { %10610 = vmatprep.subr.bf16.mxu1 %v11622_v2  ;;  %v11661_v2 = vld [vmem:[%s14731_s1 + $0xf70] sm:$0xff]  }
 0x1bf   :  { %10589 = vmatpush3.bf16.msra.mxu0 %v11621_v1  ;;  %v2017_v1 = vcombine.high %v1995_v58, %v1995_v58 }
 0x1c0   :  { %10618 = vmatprep.subr.bf16.mxu0 %v11625_v5 }
 0x1c1   :  { %10611 = vmatpush3.bf16.msra.mxu1 %v11624_v3  ;;  %v11662_v3 = vld [vmem:[%s14731_s1 + $0xf30] sm:$0xff]  }
 0x1c2   :  { %v10326_v12 = vpop.f32.mrf.mxu0  ;;  %8114 = vmatmul.mubr.bf16.vlgmr.msra.gmra.mxu0 %v1953_v4  ;;  %10640 = vmatprep.subr.bf16.mxu1 %v11627_v7  ;;  %v2020_v4 = vcombine.high %v2016_v62, %v2016_v62  ;;  %v11664_v7 = vld [vmem:[%s14731_s1 + $0xfb0] sm:$0xff]  }
 0x1c3   :  { %10619 = vmatpush3.bf16.msra.mxu0 %v11626_v6  ;;  %8193 = vmatprep.mubr.bf16.mxu0 %v2009_v55  ;;  %v11663_v6 = vld [vmem:[%s14731_s1 + $0xff0] sm:$0xff]  }
 0x1c4   :  { %v10327_v15 = vpop.f32.mrf.mxu0  ;;  %v10348_v16 = vpop.f32.mrf.mxu1  ;;  %8154 = vmatmul.mubr.bf16.vlgmr.msra.gmra.mxu1 %v1969_v9  ;;  %10620 = vmatprep.subr.bf16.mxu0 %v11629_v10  ;;  %v11665_v10 = vld [vmem:[%s14731_s1 + $0xf68] sm:$0xff]  }
 0x1c5   :  { %v10328_v18 = vadd.f32 %v10327_v15, %v10326_v12  ;;  %10641 = vmatpush3.bf16.msra.mxu1 %v11628_v8  ;;  %8233 = vmatprep.mubr.bf16.mxu1 %v2019_v60  ;;  %v11666_v12 = vld [vmem:[%s14731_s1 + $0xf28] sm:$0xff]  }
 0x1c6   :  { %v10329_v20 = vpop.f32.mrf.mxu0  ;;  %v10349_v21 = vpop.f32.mrf.mxu1  ;;  %10642 = vmatprep.subr.bf16.mxu1 %v11631_v13  ;;  %v11667_v15 = vld [vmem:[%s14731_s1 + $0xfe8] sm:$0xff]  }
 0x1c7   :  { %v7636_v23 = vadd.f32 %v10328_v18, %v13438_v47  ;;  %v10350_v24 = vadd.f32 %v10349_v21, %v10348_v16  ;;  %10621 = vmatpush3.bf16.msra.mxu0 %v11630_v11  ;;  %v11652_v47 = vld [vmem:[%s14731_s1 + $0xe88] sm:$0xff]   ;;  %v11669_v20 = vld [vmem:[%s14731_s1 + $0xf60] sm:$0xff]  }
 0x1c8   :  { %v10330_v26 = vpop.f32.mrf.mxu0  ;;  %10622 = vmatprep.subr.bf16.mxu0 %v11633_v17  ;;  %v10351_v28 = vpop.f32.mrf.mxu1  ;;  %v11668_v18 = vld [vmem:[%s14731_s1 + $0xfa8] sm:$0xff]  }
 0x1c9   :  { %v13539_v29 = vadd.f32 %v10350_v24, %v7636_v23  ;;  %10643 = vmatpush3.bf16.msra.mxu1 %v11632_v14  ;;  %v11670_v23 = vld [vmem:[%s14731_s1 + $0xf20] sm:$0xff]   ;;  %v11674_v28 = vld [vmem:[%s14731_s1 + $0xf18] sm:$0xff]  }
 0x1ca   :  { %10644 = vmatprep.subr.bf16.mxu1 %v11635_v22  ;;  %v10352_v32 = vpop.f32.mrf.mxu1  ;;  %v11671_v24 = vld [vmem:[%s14731_s1 + $0xfe0] sm:$0xff]  }
 0x1cb   :  { %10623 = vmatpush3.bf16.msra.mxu0 %v11634_v19  ;;  %v11672_v26 = vld [vmem:[%s14731_s1 + $0xfa0] sm:$0xff]   ;;  %v11678_v32 = vld [vmem:[%s14731_s1 + $0xf10] sm:$0xff]  }
 0x1cc   :  { %10624 = vmatprep.subr.bf16.mxu0 %v11637_v27  ;;  %v11673_v27 = vld [vmem:[%s14731_s1 + $0xf58] sm:$0xff]  }
 0x1cd   :  { %10645 = vmatpush3.bf16.msra.mxu1 %v11636_v25 }
 0x1ce   :  { %10646 = vmatprep.subr.bf16.mxu1 %v11639_v31  ;;  %v11677_v31 = vld [vmem:[%s14731_s1 + $0xf50] sm:$0xff]  }
 0x1cf   :  { %10625 = vmatpush3.bf16.msra.mxu0 %v11638_v30  ;;  %v11676_v30 = vld [vmem:[%s14731_s1 + $0xf98] sm:$0xff]  }
 0x1d0   :  { %10626 = vmatprep.subr.bf16.mxu0 %v11641_v34  ;;  %v11680_v34 = vld [vmem:[%s14731_s1 + $0xf90] sm:$0xff]  }
 0x1d1   :  { %10647 = vmatpush3.bf16.msra.mxu1 %v11640_v33  ;;  %v11679_v33 = vld [vmem:[%s14731_s1 + $0xfd0] sm:$0xff]  }
 0x1d2   :  { %10648 = vmatprep.subr.bf16.mxu1 %v11643_v36  ;;  %v11682_v36 = vld [vmem:[%s14731_s1 + $0xf08] sm:$0xff]  }
 0x1d3   :  { %10627 = vmatpush3.bf16.msra.mxu0 %v11642_v35  ;;  %v11681_v35 = vld [vmem:[%s14731_s1 + $0xf48] sm:$0xff]  }
 0x1d4   :  { %10628 = vmatprep.subr.bf16.mxu0 %v11645_v38  ;;  %v11684_v38 = vld [vmem:[%s14731_s1 + $0xf88] sm:$0xff]  }
 0x1d5   :  { %10649 = vmatpush3.bf16.msra.mxu1 %v11644_v37  ;;  %v11683_v37 = vld [vmem:[%s14731_s1 + $0xfc8] sm:$0xff]  }
 0x1d6   :  { %10650 = vmatprep.subr.bf16.mxu1 %v11647_v40  ;;  %v11686_v40 = vld [vmem:[%s14731_s1 + $0xf00] sm:$0xff]  }
 0x1d7   :  { %10629 = vmatpush3.bf16.msra.mxu0 %v11646_v39  ;;  %v11685_v39 = vld [vmem:[%s14731_s1 + $0xf40] sm:$0xff]  }
 0x1d8   :  { %10630 = vmatprep.subr.bf16.mxu0 %v11649_v43  ;;  %v11689_v43 = vld [vmem:[%s14731_s1 + $0xf80] sm:$0xff]  }
 0x1d9   :  { %10651 = vmatpush3.bf16.msra.mxu1 %v11648_v42  ;;  %v11687_v42 = vld [vmem:[%s14731_s1 + $0xfc0] sm:$0xff]  }
 0x1da   :  { %10652 = vmatprep.subr.bf16.mxu1 %v11651_v45  ;;  %v11690_v45 = vld [vmem:[%s14731_s1 + $0x1078] sm:$0xff]  }
 0x1db   :  { %10631 = vmatpush3.bf16.msra.mxu0 %v11650_v44  ;;  %v2002_v44 = vrot.slane %v13597_v53, %v12137_v41  ;;  %v11696_v53 = vld [vmem:[%s14731_s1 + $0x10f0] sm:$0xff]  }
 0x1dc   :  { %10632 = vmatprep.subr.bf16.mxu0 %v11653_v50  ;;  %v11694_v50 = vld [vmem:[%s14731_s1 + $0x1070] sm:$0xff]  }
 0x1dd   :  { %10653 = vmatpush3.bf16.msra.mxu1 %v11652_v47  ;;  %v11692_v47 = vld [vmem:[%s14731_s1 + $0x10f8] sm:$0xff]   ;;  %v2018_v49 = vcombine.high %v2002_v44, %v2002_v44 }
 0x1de   :  { %10654 = vmatprep.subr.bf16.mxu1 %v11655_v54  ;;  %v11697_v54 = vld [vmem:[%s14731_s1 + $0x10b0] sm:$0xff]  }
 0x1df   :  { %10633 = vmatpush3.bf16.msra.mxu0 %v11654_v51  ;;  %v11695_v51 = vld [vmem:[%s14731_s1 + $0x1030] sm:$0xff]  }
 0x1e0   :  { %10662 = vmatprep.subr.bf16.mxu0 %v11657_v59  ;;  %v11699_v59 = vld [vmem:[%s14731_s1 + $0x1028] sm:$0xff]  }
 0x1e1   :  { %10655 = vmatpush3.bf16.msra.mxu1 %v11656_v56 }
 0x1e2   :  { %v10370_v5 = vpop.f32.mrf.mxu0  ;;  %8194 = vmatmul.mubr.bf16.vlgmr.msra.gmra.mxu0 %v1995_v58  ;;  %10684 = vmatprep.subr.bf16.mxu1 %v11659_v63 }
 0x1e3   :  { %10663 = vmatpush3.bf16.msra.mxu0 %v11658_v61  ;;  %8273 = vmatprep.mubr.bf16.mxu0 %v2016_v62  ;;  %v11700_v62 = vld [vmem:[%s14731_s1 + $0x10e8] sm:$0xff]  }
 0x1e4   :  { %v10371_v8 = vpop.f32.mrf.mxu0  ;;  %v10392_v9 = vpop.f32.mrf.mxu1  ;;  %8234 = vmatmul.mubr.bf16.vlgmr.msra.gmra.mxu1 %v2017_v1  ;;  %10664 = vmatprep.subr.bf16.mxu0 %v11661_v2  ;;  %v11701_v1 = vld [vmem:[%s14731_s1 + $0x10a8] sm:$0xff]  }
 0x1e5   :  { %v10372_v11 = vadd.f32 %v10371_v8, %v10370_v5  ;;  %10685 = vmatpush3.bf16.msra.mxu1 %v11660_v0  ;;  %8313 = vmatprep.mubr.bf16.mxu1 %v2020_v4 }
 0x1e6   :  { %v10373_v13 = vpop.f32.mrf.mxu0  ;;  %v10393_v14 = vpop.f32.mrf.mxu1  ;;  %10686 = vmatprep.subr.bf16.mxu1 %v11663_v6  ;;  %v11703_v6 = vld [vmem:[%s14731_s1 + $0x1020] sm:$0xff]  }
 0x1e7   :  { %v7716_v16 = vadd.f32 %v10372_v11, %v13539_v29  ;;  %v10394_v17 = vadd.f32 %v10393_v14, %v10392_v9  ;;  %10665 = vmatpush3.bf16.msra.mxu0 %v11662_v3  ;;  %v11675_v29 = vld [vmem:[%s14731_s1 + $0xfd8] sm:$0xff]   ;;  %v11702_v3 = vld [vmem:[%s14731_s1 + $0x1060] sm:$0xff]   ;;  %v11710_v14 = vld [vmem:[%s14731_s1 + $0x1050] sm:$0xff]  }
 0x1e8   :  { %v10374_v19 = vpop.f32.mrf.mxu0  ;;  %10666 = vmatprep.subr.bf16.mxu0 %v11665_v10  ;;  %v10395_v21 = vpop.f32.mrf.mxu1  ;;  %v11705_v9 = vld [vmem:[%s14731_s1 + $0x10a0] sm:$0xff]   ;;  %v11706_v10 = vld [vmem:[%s14731_s1 + $0x1058] sm:$0xff]  }
 0x1e9   :  { %v13650_v22 = vadd.f32 %v10394_v17, %v7716_v16  ;;  %10687 = vmatpush3.bf16.msra.mxu1 %v11664_v7  ;;  %v11704_v7 = vld [vmem:[%s14731_s1 + $0x10e0] sm:$0xff]   ;;  %v11707_v11 = vld [vmem:[%s14731_s1 + $0x1018] sm:$0xff]   ;;  %v11712_v16 = vld [vmem:[%s14731_s1 + $0x10d0] sm:$0xff]  }
 0x1ea   :  { %10688 = vmatprep.subr.bf16.mxu1 %v11667_v15  ;;  %v10396_v25 = vpop.f32.mrf.mxu1  ;;  %v11709_v13 = vld [vmem:[%s14731_s1 + $0x1098] sm:$0xff]   ;;  %v11711_v15 = vld [vmem:[%s14731_s1 + $0x1010] sm:$0xff]   ;;  %v11715_v19 = vld [vmem:[%s14731_s1 + $0x1008] sm:$0xff]  }
 0x1eb   :  { %10667 = vmatpush3.bf16.msra.mxu0 %v11666_v12  ;;  %v11708_v12 = vld [vmem:[%s14731_s1 + $0x10d8] sm:$0xff]   ;;  %v11713_v17 = vld [vmem:[%s14731_s1 + $0x1090] sm:$0xff]   ;;  %v11717_v21 = vld [vmem:[%s14731_s1 + $0x1088] sm:$0xff]  }
 0x1ec   :  { %10668 = vmatprep.subr.bf16.mxu0 %v11669_v20  ;;  %v11716_v20 = vld [vmem:[%s14731_s1 + $0x10c8] sm:$0xff]  }
 0x1ed   :  { %10689 = vmatpush3.bf16.msra.mxu1 %v11668_v18  ;;  %v11714_v18 = vld [vmem:[%s14731_s1 + $0x1048] sm:$0xff]  }
 0x1ee   :  { %10690 = vmatprep.subr.bf16.mxu1 %v11671_v24 }
 0x1ef   :  { %10669 = vmatpush3.bf16.msra.mxu0 %v11670_v23  ;;  %v11718_v23 = vld [vmem:[%s14731_s1 + $0x1040] sm:$0xff]  }
 0x1f0   :  { %10670 = vmatprep.subr.bf16.mxu0 %v11673_v27  ;;  %v11720_v27 = vld [vmem:[%s14731_s1 + $0x10c0] sm:$0xff]  }
 0x1f1   :  { %10691 = vmatpush3.bf16.msra.mxu1 %v11672_v26  ;;  %v11719_v26 = vld [vmem:[%s14731_s1 + $0x1000] sm:$0xff]  }
 0x1f2   :  { %10692 = vmatprep.subr.bf16.mxu1 %v11675_v29 }
 0x1f3   :  { %10671 = vmatpush3.bf16.msra.mxu0 %v11674_v28 }
 0x1f4   :  { %10672 = vmatprep.subr.bf16.mxu0 %v11677_v31 }
 0x1f5   :  { %10693 = vmatpush3.bf16.msra.mxu1 %v11676_v30  ;;  %v11721_v30 = vld [vmem:[%s14731_s1 + $0x1080] sm:$0xff]  }
 0x1f6   :  { %10694 = vmatprep.subr.bf16.mxu1 %v11679_v33  ;;  %v11722_v33 = vld [vmem:[%s14731_s1 + $0x1178] sm:$0xff]  }
 0x1f7   :  { %10673 = vmatpush3.bf16.msra.mxu0 %v11678_v32 }
 0x1f8   :  { %10674 = vmatprep.subr.bf16.mxu0 %v11681_v35  ;;  %v11723_v35 = vld [vmem:[%s14731_s1 + $0x1138] sm:$0xff]  }
 0x1f9   :  { %10695 = vmatpush3.bf16.msra.mxu1 %v11680_v34 }
 0x1fa   :  { %10696 = vmatprep.subr.bf16.mxu1 %v11683_v37  ;;  %v11724_v37 = vld [vmem:[%s14731_s1 + $0x11f8] sm:$0xff]  }
 0x1fb   :  { %10675 = vmatpush3.bf16.msra.mxu0 %v11682_v36 }
 0x1fc   :  { %10676 = vmatprep.subr.bf16.mxu0 %v11685_v39  ;;  %v11725_v39 = vld [vmem:[%s14731_s1 + $0x11b8] sm:$0xff]  }
 0x1fd   :  { %10697 = vmatpush3.bf16.msra.mxu1 %v11684_v38 }
 0x1fe   :  { %10698 = vmatprep.subr.bf16.mxu1 %v11687_v42  ;;  %v11726_v42 = vld [vmem:[%s14731_s1 + $0x1170] sm:$0xff]  }
 0x1ff   :  { %10677 = vmatpush3.bf16.msra.mxu0 %v11686_v40 }
 0x200   :  { %10706 = vmatprep.subr.bf16.mxu0 %v11690_v45 }
 0x201   :  { %10699 = vmatpush3.bf16.msra.mxu1 %v11689_v43  ;;  %v11727_v43 = vld [vmem:[%s14731_s1 + $0x1130] sm:$0xff]  }
 0x202   :  { %v10414_v52 = vpop.f32.mrf.mxu0  ;;  %8274 = vmatmul.mubr.bf16.vlgmr.msra.gmra.mxu0 %v2002_v44  ;;  %10728 = vmatprep.subr.bf16.mxu1 %v11692_v47  ;;  %v11729_v47 = vld [vmem:[%s14731_s1 + $0x11b0] sm:$0xff]  }
 0x203   :  { %10707 = vmatpush3.bf16.msra.mxu0 %v11691_v46  ;;  %v11728_v46 = vld [vmem:[%s14731_s1 + $0x11f0] sm:$0xff]  }
 0x204   :  { %v10415_v55 = vpop.f32.mrf.mxu0  ;;  %v10436_v56 = vpop.f32.mrf.mxu1  ;;  %8314 = vmatmul.mubr.bf16.vlgmr.msra.gmra.mxu1 %v2018_v49  ;;  %10708 = vmatprep.subr.bf16.mxu0 %v11694_v50  ;;  %v11730_v50 = vld [vmem:[%s14731_s1 + $0x1168] sm:$0xff]  }
 0x205   :  { %v10416_v58 = vadd.f32 %v10415_v55, %v10414_v52  ;;  %10729 = vmatpush3.bf16.msra.mxu1 %v11693_v48  ;;  %v11731_v52 = vld [vmem:[%s14731_s1 + $0x1128] sm:$0xff]  }
 0x206   :  { %v10417_v60 = vpop.f32.mrf.mxu0  ;;  %v10437_v61 = vpop.f32.mrf.mxu1  ;;  %10730 = vmatprep.subr.bf16.mxu1 %v11696_v53  ;;  %v11732_v55 = vld [vmem:[%s14731_s1 + $0x11e8] sm:$0xff]  }
 0x207   :  { %v7796_v63 = vadd.f32 %v10416_v58, %v13650_v22  ;;  %v10438_v0 = vadd.f32 %v10437_v61, %v10436_v56  ;;  %10709 = vmatpush3.bf16.msra.mxu0 %v11695_v51  ;;  %v36_v22 = vld [vmem:[%s14730_s0 + $0x40] sm:$0xff]  ;;  %v11733_v58 = vld [vmem:[%s14731_s1 + $0x11a8] sm:$0xff]  }
 0x208   :  { %v10418_v2 = vpop.f32.mrf.mxu0  ;;  %10710 = vmatprep.subr.bf16.mxu0 %v11698_v57  ;;  %v10439_v4 = vpop.f32.mrf.mxu1  ;;  %v2028_v24 = vrot.slane %v36_v22, %v12137_v41  ;;  %v2021_v25 = vcombine.high %v36_v22, %v36_v22  ;;  %v11734_v60 = vld [vmem:[%s14731_s1 + $0x1160] sm:$0xff]   ;;  %v11757_v22 = vld [vmem:[%s14731_s1 + $0x12f8] sm:$0xff]  }
 0x209   :  { %v13751_v5 = vadd.f32 %v10438_v0, %v7796_v63  ;;  %10731 = vmatpush3.bf16.msra.mxu1 %v11697_v54  ;;  %v11735_v63 = vld [vmem:[%s14731_s1 + $0x1120] sm:$0xff]   ;;  %v11739_v4 = vld [vmem:[%s14731_s1 + $0x1118] sm:$0xff]  }
 0x20a   :  { %10732 = vmatprep.subr.bf16.mxu1 %v11700_v62  ;;  %v10440_v8 = vpop.f32.mrf.mxu1  ;;  %v2036_v28 = vcombine.high %v2028_v24, %v2028_v24  ;;  %v13812_v29 = vrot.slane %v2021_v25, %v12137_v41  ;;  %v2044_v32 = vrot.slane %v2028_v24, %v12137_v41  ;;  %v11736_v0 = vld [vmem:[%s14731_s1 + $0x11e0] sm:$0xff]   ;;  %v11759_v25 = vld [vmem:[%s14731_s1 + $0x1270] sm:$0xff]  }
 0x20b   :  { %10711 = vmatpush3.bf16.msra.mxu0 %v11699_v59  ;;  %v11737_v2 = vld [vmem:[%s14731_s1 + $0x11a0] sm:$0xff]   ;;  %v11743_v8 = vld [vmem:[%s14731_s1 + $0x1110] sm:$0xff]  }
 0x20c   :  { %10712 = vmatprep.subr.bf16.mxu0 %v11702_v3  ;;  %v2058_v31 = vrot.slane %v2036_v28, %v12137_v41  ;;  %v2037_v34 = vcombine.high %v13812_v29, %v13812_v29  ;;  %v2066_v40 = vcombine.high %v2044_v32, %v2044_v32  ;;  %v11738_v3 = vld [vmem:[%s14731_s1 + $0x1158] sm:$0xff]   ;;  %v11761_v28 = vld [vmem:[%s14731_s1 + $0x12f0] sm:$0xff]  }
 0x20d   :  { %10733 = vmatpush3.bf16.msra.mxu1 %v11701_v1 }
 0x20e   :  { %10734 = vmatprep.subr.bf16.mxu1 %v11704_v7  ;;  %8353 = vmatprep.mubr.bf16.mxu0 %v2058_v31  ;;  %v2068_v36 = vcombine.high %v2058_v31, %v2058_v31  ;;  %v2065_v38 = vrot.slane %v2037_v34, %v12137_v41  ;;  %v11742_v7 = vld [vmem:[%s14731_s1 + $0x1150] sm:$0xff]   ;;  %v11764_v34 = vld [vmem:[%s14731_s1 + $0x1228] sm:$0xff]  }
 0x20f   :  { %10713 = vmatpush3.bf16.msra.mxu0 %v11703_v6  ;;  %v11741_v6 = vld [vmem:[%s14731_s1 + $0x1198] sm:$0xff]  }
 0x210   :  { %10714 = vmatprep.subr.bf16.mxu0 %v11706_v10  ;;  %8393 = vmatprep.mubr.bf16.mxu1 %v2068_v36  ;;  %v2069_v44 = vcombine.high %v2065_v38, %v2065_v38  ;;  %v11745_v10 = vld [vmem:[%s14731_s1 + $0x1190] sm:$0xff]  }
 0x211   :  { %10735 = vmatpush3.bf16.msra.mxu1 %v11705_v9  ;;  %v11744_v9 = vld [vmem:[%s14731_s1 + $0x11d0] sm:$0xff]  }
 0x212   :  { %10736 = vmatprep.subr.bf16.mxu1 %v11708_v12  ;;  %v11747_v12 = vld [vmem:[%s14731_s1 + $0x1108] sm:$0xff]  }
 0x213   :  { %10715 = vmatpush3.bf16.msra.mxu0 %v11707_v11  ;;  %v11746_v11 = vld [vmem:[%s14731_s1 + $0x1148] sm:$0xff]  }
 0x214   :  { %10716 = vmatprep.subr.bf16.mxu0 %v11710_v14  ;;  %v11749_v14 = vld [vmem:[%s14731_s1 + $0x1188] sm:$0xff]  }
 0x215   :  { %10737 = vmatpush3.bf16.msra.mxu1 %v11709_v13  ;;  %v11748_v13 = vld [vmem:[%s14731_s1 + $0x11c8] sm:$0xff]  }
 0x216   :  { %10738 = vmatprep.subr.bf16.mxu1 %v11712_v16  ;;  %v11751_v16 = vld [vmem:[%s14731_s1 + $0x1100] sm:$0xff]  }
 0x217   :  { %10717 = vmatpush3.bf16.msra.mxu0 %v11711_v15  ;;  %v11750_v15 = vld [vmem:[%s14731_s1 + $0x1140] sm:$0xff]  }
 0x218   :  { %10718 = vmatprep.subr.bf16.mxu0 %v11714_v18  ;;  %v11754_v18 = vld [vmem:[%s14731_s1 + $0x1180] sm:$0xff]  }
 0x219   :  { %10739 = vmatpush3.bf16.msra.mxu1 %v11713_v17  ;;  %v11752_v17 = vld [vmem:[%s14731_s1 + $0x11c0] sm:$0xff]  }
 0x21a   :  { %10740 = vmatprep.subr.bf16.mxu1 %v11716_v20  ;;  %v11755_v20 = vld [vmem:[%s14731_s1 + $0x1278] sm:$0xff]  }
 0x21b   :  { %10719 = vmatpush3.bf16.msra.mxu0 %v11715_v19  ;;  %v2051_v19 = vrot.slane %v13812_v29, %v12137_v41  ;;  %v11762_v29 = vld [vmem:[%s14731_s1 + $0x12b0] sm:$0xff]  }
 0x21c   :  { %10720 = vmatprep.subr.bf16.mxu0 %v11718_v23  ;;  %v11758_v23 = vld [vmem:[%s14731_s1 + $0x12b8] sm:$0xff]  }
 0x21d   :  { %10741 = vmatpush3.bf16.msra.mxu1 %v11717_v21  ;;  %v11756_v21 = vld [vmem:[%s14731_s1 + $0x1238] sm:$0xff]   ;;  %v2067_v24 = vcombine.high %v2051_v19, %v2051_v19 }
 0x21e   :  { %10742 = vmatprep.subr.bf16.mxu1 %v11720_v27 }
 0x21f   :  { %10721 = vmatpush3.bf16.msra.mxu0 %v11719_v26  ;;  %v11760_v26 = vld [vmem:[%s14731_s1 + $0x1230] sm:$0xff]  }
 0x220   :  { %10750 = vmatprep.subr.bf16.mxu0 %v11722_v33 }
 0x221   :  { %10743 = vmatpush3.bf16.msra.mxu1 %v11721_v30 }
 0x222   :  { %v10458_v45 = vpop.f32.mrf.mxu0  ;;  %8354 = vmatmul.mubr.bf16.vlgmr.msra.gmra.mxu0 %v2044_v32  ;;  %10772 = vmatprep.subr.bf16.mxu1 %v11724_v37  ;;  %v11763_v32 = vld [vmem:[%s14731_s1 + $0x1268] sm:$0xff]  }
 0x223   :  { %10751 = vmatpush3.bf16.msra.mxu0 %v11723_v35  ;;  %8433 = vmatprep.mubr.bf16.mxu0 %v2065_v38  ;;  %v11765_v37 = vld [vmem:[%s14731_s1 + $0x12e8] sm:$0xff]  }
 0x224   :  { %v10459_v48 = vpop.f32.mrf.mxu0  ;;  %v10480_v49 = vpop.f32.mrf.mxu1  ;;  %8394 = vmatmul.mubr.bf16.vlgmr.msra.gmra.mxu1 %v2066_v40  ;;  %10752 = vmatprep.subr.bf16.mxu0 %v11726_v42  ;;  %v11766_v40 = vld [vmem:[%s14731_s1 + $0x12a8] sm:$0xff]  }
 0x225   :  { %v10460_v51 = vadd.f32 %v10459_v48, %v10458_v45  ;;  %10773 = vmatpush3.bf16.msra.mxu1 %v11725_v39  ;;  %8473 = vmatprep.mubr.bf16.mxu1 %v2069_v44 }
 0x226   :  { %v10461_v53 = vpop.f32.mrf.mxu0  ;;  %v10481_v54 = vpop.f32.mrf.mxu1  ;;  %10774 = vmatprep.subr.bf16.mxu1 %v11728_v46  ;;  %v11768_v46 = vld [vmem:[%s14731_s1 + $0x1220] sm:$0xff]  }
 0x227   :  { %v7876_v56 = vadd.f32 %v10460_v51, %v13751_v5  ;;  %v10482_v57 = vadd.f32 %v10481_v54, %v10480_v49  ;;  %10753 = vmatpush3.bf16.msra.mxu0 %v11727_v43  ;;  %v11740_v5 = vld [vmem:[%s14731_s1 + $0x11d8] sm:$0xff]   ;;  %v11767_v43 = vld [vmem:[%s14731_s1 + $0x1260] sm:$0xff]   ;;  %v11775_v54 = vld [vmem:[%s14731_s1 + $0x1250] sm:$0xff]  }
 0x228   :  { %v10462_v59 = vpop.f32.mrf.mxu0  ;;  %10754 = vmatprep.subr.bf16.mxu0 %v11730_v50  ;;  %v10483_v61 = vpop.f32.mrf.mxu1  ;;  %v11770_v49 = vld [vmem:[%s14731_s1 + $0x12a0] sm:$0xff]   ;;  %v11771_v50 = vld [vmem:[%s14731_s1 + $0x1258] sm:$0xff]  }
 0x229   :  { %v13862_v62 = vadd.f32 %v10482_v57, %v7876_v56  ;;  %10775 = vmatpush3.bf16.msra.mxu1 %v11729_v47  ;;  %v11769_v47 = vld [vmem:[%s14731_s1 + $0x12e0] sm:$0xff]   ;;  %v11772_v51 = vld [vmem:[%s14731_s1 + $0x1218] sm:$0xff]   ;;  %v11777_v56 = vld [vmem:[%s14731_s1 + $0x12d0] sm:$0xff]  }
 0x22a   :  { %10776 = vmatprep.subr.bf16.mxu1 %v11732_v55  ;;  %v10484_v1 = vpop.f32.mrf.mxu1  ;;  %v11774_v53 = vld [vmem:[%s14731_s1 + $0x1298] sm:$0xff]   ;;  %v11776_v55 = vld [vmem:[%s14731_s1 + $0x1210] sm:$0xff]   ;;  %v11780_v59 = vld [vmem:[%s14731_s1 + $0x1208] sm:$0xff]  }
 0x22b   :  { %10755 = vmatpush3.bf16.msra.mxu0 %v11731_v52  ;;  %v11773_v52 = vld [vmem:[%s14731_s1 + $0x12d8] sm:$0xff]   ;;  %v11778_v57 = vld [vmem:[%s14731_s1 + $0x1290] sm:$0xff]   ;;  %v11782_v61 = vld [vmem:[%s14731_s1 + $0x1288] sm:$0xff]  }
 0x22c   :  { %10756 = vmatprep.subr.bf16.mxu0 %v11734_v60  ;;  %v11781_v60 = vld [vmem:[%s14731_s1 + $0x12c8] sm:$0xff]  }
 0x22d   :  { %10777 = vmatpush3.bf16.msra.mxu1 %v11733_v58  ;;  %v11779_v58 = vld [vmem:[%s14731_s1 + $0x1248] sm:$0xff]  }
 0x22e   :  { %10778 = vmatprep.subr.bf16.mxu1 %v11736_v0 }
 0x22f   :  { %10757 = vmatpush3.bf16.msra.mxu0 %v11735_v63  ;;  %v11783_v63 = vld [vmem:[%s14731_s1 + $0x1240] sm:$0xff]  }
 0x230   :  { %10758 = vmatprep.subr.bf16.mxu0 %v11738_v3  ;;  %v11785_v3 = vld [vmem:[%s14731_s1 + $0x12c0] sm:$0xff]  }
 0x231   :  { %10779 = vmatpush3.bf16.msra.mxu1 %v11737_v2  ;;  %v11784_v2 = vld [vmem:[%s14731_s1 + $0x1200] sm:$0xff]  }
 0x232   :  { %10780 = vmatprep.subr.bf16.mxu1 %v11740_v5 }
 0x233   :  { %10759 = vmatpush3.bf16.msra.mxu0 %v11739_v4 }
 0x234   :  { %10760 = vmatprep.subr.bf16.mxu0 %v11742_v7 }
 0x235   :  { %10781 = vmatpush3.bf16.msra.mxu1 %v11741_v6  ;;  %v11786_v6 = vld [vmem:[%s14731_s1 + $0x1280] sm:$0xff]  }
 0x236   :  { %10782 = vmatprep.subr.bf16.mxu1 %v11744_v9  ;;  %v11787_v9 = vld [vmem:[%s14731_s1 + $0x1378] sm:$0xff]  }
 0x237   :  { %10761 = vmatpush3.bf16.msra.mxu0 %v11743_v8 }
 0x238   :  { %10762 = vmatprep.subr.bf16.mxu0 %v11746_v11  ;;  %v11788_v11 = vld [vmem:[%s14731_s1 + $0x1338] sm:$0xff]  }
 0x239   :  { %10783 = vmatpush3.bf16.msra.mxu1 %v11745_v10 }
 0x23a   :  { %10784 = vmatprep.subr.bf16.mxu1 %v11748_v13  ;;  %v11789_v13 = vld [vmem:[%s14731_s1 + $0x13f8] sm:$0xff]  }
 0x23b   :  { %10763 = vmatpush3.bf16.msra.mxu0 %v11747_v12 }
 0x23c   :  { %10764 = vmatprep.subr.bf16.mxu0 %v11750_v15  ;;  %v11790_v15 = vld [vmem:[%s14731_s1 + $0x13b8] sm:$0xff]  }
 0x23d   :  { %10785 = vmatpush3.bf16.msra.mxu1 %v11749_v14 }
 0x23e   :  { %10786 = vmatprep.subr.bf16.mxu1 %v11752_v17  ;;  %v11791_v17 = vld [vmem:[%s14731_s1 + $0x1370] sm:$0xff]  }
 0x23f   :  { %10765 = vmatpush3.bf16.msra.mxu0 %v11751_v16 }
 0x240   :  { %10794 = vmatprep.subr.bf16.mxu0 %v11755_v20 }
 0x241   :  { %10787 = vmatpush3.bf16.msra.mxu1 %v11754_v18  ;;  %v11792_v18 = vld [vmem:[%s14731_s1 + $0x1330] sm:$0xff]  }
 0x242   :  { %v10502_v27 = vpop.f32.mrf.mxu0  ;;  %8434 = vmatmul.mubr.bf16.vlgmr.msra.gmra.mxu0 %v2051_v19  ;;  %10816 = vmatprep.subr.bf16.mxu1 %v11757_v22  ;;  %v11794_v22 = vld [vmem:[%s14731_s1 + $0x13b0] sm:$0xff]  }
 0x243   :  { %10795 = vmatpush3.bf16.msra.mxu0 %v11756_v21  ;;  %v11793_v21 = vld [vmem:[%s14731_s1 + $0x13f0] sm:$0xff]  }
 0x244   :  { %v10503_v30 = vpop.f32.mrf.mxu0  ;;  %v10524_v31 = vpop.f32.mrf.mxu1  ;;  %8474 = vmatmul.mubr.bf16.vlgmr.msra.gmra.mxu1 %v2067_v24  ;;  %10796 = vmatprep.subr.bf16.mxu0 %v11759_v25  ;;  %v11795_v25 = vld [vmem:[%s14731_s1 + $0x1368] sm:$0xff]  }
 0x245   :  { %v10504_v33 = vadd.f32 %v10503_v30, %v10502_v27  ;;  %10817 = vmatpush3.bf16.msra.mxu1 %v11758_v23  ;;  %v11796_v27 = vld [vmem:[%s14731_s1 + $0x1328] sm:$0xff]  }
 0x246   :  { %v10505_v35 = vpop.f32.mrf.mxu0  ;;  %v10525_v36 = vpop.f32.mrf.mxu1  ;;  %10818 = vmatprep.subr.bf16.mxu1 %v11761_v28  ;;  %v11797_v30 = vld [vmem:[%s14731_s1 + $0x13e8] sm:$0xff]  }
 0x247   :  { %v7956_v38 = vadd.f32 %v10504_v33, %v13862_v62  ;;  %v10526_v39 = vadd.f32 %v10525_v36, %v10524_v31  ;;  %10797 = vmatpush3.bf16.msra.mxu0 %v11760_v26  ;;  %v37_v62 = vld [vmem:[%s14730_s0 + $0x48] sm:$0xff]  ;;  %v11799_v35 = vld [vmem:[%s14731_s1 + $0x1360] sm:$0xff]  }
 0x248   :  { %v10506_v42 = vpop.f32.mrf.mxu0  ;;  %10798 = vmatprep.subr.bf16.mxu0 %v11763_v32  ;;  %v10527_v44 = vpop.f32.mrf.mxu1  ;;  %v2077_v0 = vrot.slane %v37_v62, %v12137_v41  ;;  %v2070_v1 = vcombine.high %v37_v62, %v37_v62  ;;  %v11798_v33 = vld [vmem:[%s14731_s1 + $0x13a8] sm:$0xff]   ;;  %v11822_v62 = vld [vmem:[%s14731_s1 + $0x14f8] sm:$0xff]  }
 0x249   :  { %v13963_v45 = vadd.f32 %v10526_v39, %v7956_v38  ;;  %10819 = vmatpush3.bf16.msra.mxu1 %v11762_v29  ;;  %v11800_v38 = vld [vmem:[%s14731_s1 + $0x1320] sm:$0xff]   ;;  %v11804_v44 = vld [vmem:[%s14731_s1 + $0x1318] sm:$0xff]  }
 0x24a   :  { %10820 = vmatprep.subr.bf16.mxu1 %v11765_v37  ;;  %v10528_v48 = vpop.f32.mrf.mxu1  ;;  %v2085_v4 = vcombine.high %v2077_v0, %v2077_v0  ;;  %v14024_v5 = vrot.slane %v2070_v1, %v12137_v41  ;;  %v2093_v8 = vrot.slane %v2077_v0, %v12137_v41  ;;  %v11801_v39 = vld [vmem:[%s14731_s1 + $0x13e0] sm:$0xff]   ;;  %v11824_v1 = vld [vmem:[%s14731_s1 + $0x1470] sm:$0xff]  }
 0x24b   :  { %10799 = vmatpush3.bf16.msra.mxu0 %v11764_v34  ;;  %v11802_v42 = vld [vmem:[%s14731_s1 + $0x13a0] sm:$0xff]   ;;  %v11808_v48 = vld [vmem:[%s14731_s1 + $0x1310] sm:$0xff]  }
 0x24c   :  { %10800 = vmatprep.subr.bf16.mxu0 %v11767_v43  ;;  %v2107_v7 = vrot.slane %v2085_v4, %v12137_v41  ;;  %v2086_v10 = vcombine.high %v14024_v5, %v14024_v5  ;;  %v2115_v16 = vcombine.high %v2093_v8, %v2093_v8  ;;  %v11803_v43 = vld [vmem:[%s14731_s1 + $0x1358] sm:$0xff]   ;;  %v11826_v4 = vld [vmem:[%s14731_s1 + $0x14f0] sm:$0xff]  }
 0x24d   :  { %10821 = vmatpush3.bf16.msra.mxu1 %v11766_v40 }
 0x24e   :  { %10822 = vmatprep.subr.bf16.mxu1 %v11769_v47  ;;  %8513 = vmatprep.mubr.bf16.mxu0 %v2107_v7  ;;  %v2117_v12 = vcombine.high %v2107_v7, %v2107_v7  ;;  %v2114_v14 = vrot.slane %v2086_v10, %v12137_v41  ;;  %v11807_v47 = vld [vmem:[%s14731_s1 + $0x1350] sm:$0xff]   ;;  %v11829_v10 = vld [vmem:[%s14731_s1 + $0x1428] sm:$0xff]  }
 0x24f   :  { %10801 = vmatpush3.bf16.msra.mxu0 %v11768_v46  ;;  %v11806_v46 = vld [vmem:[%s14731_s1 + $0x1398] sm:$0xff]  }
 0x250   :  { %10802 = vmatprep.subr.bf16.mxu0 %v11771_v50  ;;  %8553 = vmatprep.mubr.bf16.mxu1 %v2117_v12  ;;  %v2118_v19 = vcombine.high %v2114_v14, %v2114_v14  ;;  %v11810_v50 = vld [vmem:[%s14731_s1 + $0x1390] sm:$0xff]  }
 0x251   :  { %10823 = vmatpush3.bf16.msra.mxu1 %v11770_v49  ;;  %v11809_v49 = vld [vmem:[%s14731_s1 + $0x13d0] sm:$0xff]  }
 0x252   :  { %10824 = vmatprep.subr.bf16.mxu1 %v11773_v52  ;;  %v11812_v52 = vld [vmem:[%s14731_s1 + $0x1308] sm:$0xff]  }
 0x253   :  { %10803 = vmatpush3.bf16.msra.mxu0 %v11772_v51  ;;  %v11811_v51 = vld [vmem:[%s14731_s1 + $0x1348] sm:$0xff]  }
 0x254   :  { %10804 = vmatprep.subr.bf16.mxu0 %v11775_v54  ;;  %v11814_v54 = vld [vmem:[%s14731_s1 + $0x1388] sm:$0xff]  }
 0x255   :  { %10825 = vmatpush3.bf16.msra.mxu1 %v11774_v53  ;;  %v11813_v53 = vld [vmem:[%s14731_s1 + $0x13c8] sm:$0xff]  }
 0x256   :  { %10826 = vmatprep.subr.bf16.mxu1 %v11777_v56  ;;  %v11816_v56 = vld [vmem:[%s14731_s1 + $0x1300] sm:$0xff]  }
 0x257   :  { %10805 = vmatpush3.bf16.msra.mxu0 %v11776_v55  ;;  %v11815_v55 = vld [vmem:[%s14731_s1 + $0x1340] sm:$0xff]  }
 0x258   :  { %10806 = vmatprep.subr.bf16.mxu0 %v11779_v58  ;;  %v11819_v58 = vld [vmem:[%s14731_s1 + $0x1380] sm:$0xff]  }
 0x259   :  { %10827 = vmatpush3.bf16.msra.mxu1 %v11778_v57  ;;  %v11817_v57 = vld [vmem:[%s14731_s1 + $0x13c0] sm:$0xff]  }
 0x25a   :  { %10828 = vmatprep.subr.bf16.mxu1 %v11781_v60  ;;  %v11820_v60 = vld [vmem:[%s14731_s1 + $0x1478] sm:$0xff]  }
 0x25b   :  { %10807 = vmatpush3.bf16.msra.mxu0 %v11780_v59  ;;  %v2100_v59 = vrot.slane %v14024_v5, %v12137_v41  ;;  %v11827_v5 = vld [vmem:[%s14731_s1 + $0x14b0] sm:$0xff]  }
 0x25c   :  { %10808 = vmatprep.subr.bf16.mxu0 %v11783_v63  ;;  %v11823_v63 = vld [vmem:[%s14731_s1 + $0x14b8] sm:$0xff]  }
 0x25d   :  { %10829 = vmatpush3.bf16.msra.mxu1 %v11782_v61  ;;  %v11821_v61 = vld [vmem:[%s14731_s1 + $0x1438] sm:$0xff]   ;;  %v2116_v0 = vcombine.high %v2100_v59, %v2100_v59 }
 0x25e   :  { %10830 = vmatprep.subr.bf16.mxu1 %v11785_v3 }
 0x25f   :  { %10809 = vmatpush3.bf16.msra.mxu0 %v11784_v2  ;;  %v11825_v2 = vld [vmem:[%s14731_s1 + $0x1430] sm:$0xff]  }
 0x260   :  { %10838 = vmatprep.subr.bf16.mxu0 %v11787_v9 }
 0x261   :  { %10831 = vmatpush3.bf16.msra.mxu1 %v11786_v6 }
 0x262   :  { %v10546_v20 = vpop.f32.mrf.mxu0  ;;  %8514 = vmatmul.mubr.bf16.vlgmr.msra.gmra.mxu0 %v2093_v8  ;;  %10860 = vmatprep.subr.bf16.mxu1 %v11789_v13  ;;  %v11828_v8 = vld [vmem:[%s14731_s1 + $0x1468] sm:$0xff]  }
 0x263   :  { %10839 = vmatpush3.bf16.msra.mxu0 %v11788_v11  ;;  %8593 = vmatprep.mubr.bf16.mxu0 %v2114_v14  ;;  %v11830_v13 = vld [vmem:[%s14731_s1 + $0x14e8] sm:$0xff]  }
 0x264   :  { %v10547_v23 = vpop.f32.mrf.mxu0  ;;  %v10568_v24 = vpop.f32.mrf.mxu1  ;;  %8554 = vmatmul.mubr.bf16.vlgmr.msra.gmra.mxu1 %v2115_v16  ;;  %10840 = vmatprep.subr.bf16.mxu0 %v11791_v17  ;;  %v11831_v16 = vld [vmem:[%s14731_s1 + $0x14a8] sm:$0xff]  }
 0x265   :  { %v10548_v26 = vadd.f32 %v10547_v23, %v10546_v20  ;;  %10861 = vmatpush3.bf16.msra.mxu1 %v11790_v15  ;;  %8633 = vmatprep.mubr.bf16.mxu1 %v2118_v19 }
 0x266   :  { %v10549_v28 = vpop.f32.mrf.mxu0  ;;  %v10569_v29 = vpop.f32.mrf.mxu1  ;;  %10862 = vmatprep.subr.bf16.mxu1 %v11793_v21  ;;  %v11833_v21 = vld [vmem:[%s14731_s1 + $0x1420] sm:$0xff]  }
 0x267   :  { %v8036_v31 = vadd.f32 %v10548_v26, %v13963_v45  ;;  %v10570_v32 = vadd.f32 %v10569_v29, %v10568_v24  ;;  %10841 = vmatpush3.bf16.msra.mxu0 %v11792_v18  ;;  %v11805_v45 = vld [vmem:[%s14731_s1 + $0x13d8] sm:$0xff]   ;;  %v11832_v18 = vld [vmem:[%s14731_s1 + $0x1460] sm:$0xff]   ;;  %v11840_v29 = vld [vmem:[%s14731_s1 + $0x1450] sm:$0xff]  }
 0x268   :  { %v10550_v34 = vpop.f32.mrf.mxu0  ;;  %10842 = vmatprep.subr.bf16.mxu0 %v11795_v25  ;;  %v10571_v36 = vpop.f32.mrf.mxu1  ;;  %v11835_v24 = vld [vmem:[%s14731_s1 + $0x14a0] sm:$0xff]   ;;  %v11836_v25 = vld [vmem:[%s14731_s1 + $0x1458] sm:$0xff]  }
 0x269   :  { %v14074_v37 = vadd.f32 %v10570_v32, %v8036_v31  ;;  %10863 = vmatpush3.bf16.msra.mxu1 %v11794_v22  ;;  %v11834_v22 = vld [vmem:[%s14731_s1 + $0x14e0] sm:$0xff]   ;;  %v11837_v26 = vld [vmem:[%s14731_s1 + $0x1418] sm:$0xff]   ;;  %v11842_v31 = vld [vmem:[%s14731_s1 + $0x14d0] sm:$0xff]  }
 0x26a   :  { %10864 = vmatprep.subr.bf16.mxu1 %v11797_v30  ;;  %v10572_v40 = vpop.f32.mrf.mxu1  ;;  %v11839_v28 = vld [vmem:[%s14731_s1 + $0x1498] sm:$0xff]   ;;  %v11841_v30 = vld [vmem:[%s14731_s1 + $0x1410] sm:$0xff]   ;;  %v11845_v34 = vld [vmem:[%s14731_s1 + $0x1408] sm:$0xff]  }
 0x26b   :  { %10843 = vmatpush3.bf16.msra.mxu0 %v11796_v27  ;;  %v11838_v27 = vld [vmem:[%s14731_s1 + $0x14d8] sm:$0xff]   ;;  %v11843_v32 = vld [vmem:[%s14731_s1 + $0x1490] sm:$0xff]   ;;  %v11847_v36 = vld [vmem:[%s14731_s1 + $0x1488] sm:$0xff]  }
 0x26c   :  { %10844 = vmatprep.subr.bf16.mxu0 %v11799_v35  ;;  %v11846_v35 = vld [vmem:[%s14731_s1 + $0x14c8] sm:$0xff]  }
 0x26d   :  { %10865 = vmatpush3.bf16.msra.mxu1 %v11798_v33  ;;  %v11844_v33 = vld [vmem:[%s14731_s1 + $0x1448] sm:$0xff]  }
 0x26e   :  { %10866 = vmatprep.subr.bf16.mxu1 %v11801_v39 }
 0x26f   :  { %10845 = vmatpush3.bf16.msra.mxu0 %v11800_v38  ;;  %v11848_v38 = vld [vmem:[%s14731_s1 + $0x1440] sm:$0xff]  }
 0x270   :  { %10846 = vmatprep.subr.bf16.mxu0 %v11803_v43  ;;  %v11850_v43 = vld [vmem:[%s14731_s1 + $0x14c0] sm:$0xff]  }
 0x271   :  { %10867 = vmatpush3.bf16.msra.mxu1 %v11802_v42  ;;  %v11849_v42 = vld [vmem:[%s14731_s1 + $0x1400] sm:$0xff]  }
 0x272   :  { %10868 = vmatprep.subr.bf16.mxu1 %v11805_v45 }
 0x273   :  { %10847 = vmatpush3.bf16.msra.mxu0 %v11804_v44 }
 0x274   :  { %10848 = vmatprep.subr.bf16.mxu0 %v11807_v47 }
 0x275   :  { %10869 = vmatpush3.bf16.msra.mxu1 %v11806_v46  ;;  %v11851_v46 = vld [vmem:[%s14731_s1 + $0x1480] sm:$0xff]  }
 0x276   :  { %10870 = vmatprep.subr.bf16.mxu1 %v11809_v49  ;;  %v11852_v49 = vld [vmem:[%s14731_s1 + $0x1578] sm:$0xff]  }
 0x277   :  { %10849 = vmatpush3.bf16.msra.mxu0 %v11808_v48 }
 0x278   :  { %10850 = vmatprep.subr.bf16.mxu0 %v11811_v51  ;;  %v11853_v51 = vld [vmem:[%s14731_s1 + $0x1538] sm:$0xff]  }
 0x279   :  { %10871 = vmatpush3.bf16.msra.mxu1 %v11810_v50 }
 0x27a   :  { %10872 = vmatprep.subr.bf16.mxu1 %v11813_v53  ;;  %v11854_v53 = vld [vmem:[%s14731_s1 + $0x15f8] sm:$0xff]  }
 0x27b   :  { %10851 = vmatpush3.bf16.msra.mxu0 %v11812_v52 }
 0x27c   :  { %10852 = vmatprep.subr.bf16.mxu0 %v11815_v55  ;;  %v11855_v55 = vld [vmem:[%s14731_s1 + $0x15b8] sm:$0xff]  }
 0x27d   :  { %10873 = vmatpush3.bf16.msra.mxu1 %v11814_v54 }
 0x27e   :  { %10874 = vmatprep.subr.bf16.mxu1 %v11817_v57  ;;  %v11856_v57 = vld [vmem:[%s14731_s1 + $0x1570] sm:$0xff]  }
 0x27f   :  { %10853 = vmatpush3.bf16.msra.mxu0 %v11816_v56 }
 0x280   :  { %10882 = vmatprep.subr.bf16.mxu0 %v11820_v60 }
 0x281   :  { %10875 = vmatpush3.bf16.msra.mxu1 %v11819_v58  ;;  %v11857_v58 = vld [vmem:[%s14731_s1 + $0x1530] sm:$0xff]  }
 0x282   :  { %v10590_v3 = vpop.f32.mrf.mxu0  ;;  %8594 = vmatmul.mubr.bf16.vlgmr.msra.gmra.mxu0 %v2100_v59  ;;  %10904 = vmatprep.subr.bf16.mxu1 %v11822_v62  ;;  %v11859_v62 = vld [vmem:[%s14731_s1 + $0x15b0] sm:$0xff]  }
 0x283   :  { %10883 = vmatpush3.bf16.msra.mxu0 %v11821_v61  ;;  %v11858_v61 = vld [vmem:[%s14731_s1 + $0x15f0] sm:$0xff]  }
 0x284   :  { %v10591_v6 = vpop.f32.mrf.mxu0  ;;  %v10612_v7 = vpop.f32.mrf.mxu1  ;;  %8634 = vmatmul.mubr.bf16.vlgmr.msra.gmra.mxu1 %v2116_v0  ;;  %10884 = vmatprep.subr.bf16.mxu0 %v11824_v1  ;;  %v11860_v1 = vld [vmem:[%s14731_s1 + $0x1568] sm:$0xff]  }
 0x285   :  { %v10592_v9 = vadd.f32 %v10591_v6, %v10590_v3  ;;  %10905 = vmatpush3.bf16.msra.mxu1 %v11823_v63  ;;  %v11861_v3 = vld [vmem:[%s14731_s1 + $0x1528] sm:$0xff]  }
 0x286   :  { %v10593_v11 = vpop.f32.mrf.mxu0  ;;  %v10613_v12 = vpop.f32.mrf.mxu1  ;;  %10906 = vmatprep.subr.bf16.mxu1 %v11826_v4  ;;  %v11862_v6 = vld [vmem:[%s14731_s1 + $0x15e8] sm:$0xff]  }
 0x287   :  { %v8116_v14 = vadd.f32 %v10592_v9, %v14074_v37  ;;  %v10614_v15 = vadd.f32 %v10613_v12, %v10612_v7  ;;  %10885 = vmatpush3.bf16.msra.mxu0 %v11825_v2  ;;  %v38_v37 = vld [vmem:[%s14730_s0 + $0x50] sm:$0xff]  ;;  %v11863_v9 = vld [vmem:[%s14731_s1 + $0x15a8] sm:$0xff]   ;;  %v11864_v11 = vld [vmem:[%s14731_s1 + $0x1560] sm:$0xff]  }
 0x288   :  { %v10594_v17 = vpop.f32.mrf.mxu0  ;;  %10886 = vmatprep.subr.bf16.mxu0 %v11828_v8  ;;  %v10615_v19 = vpop.f32.mrf.mxu1  ;;  %v2126_v39 = vrot.slane %v38_v37, %v12137_v41  ;;  %v2119_v40 = vcombine.high %v38_v37, %v38_v37  ;;  %v11887_v37 = vld [vmem:[%s14731_s1 + $0x16f8] sm:$0xff]  }
 0x289   :  { %v14175_v20 = vadd.f32 %v10614_v15, %v8116_v14  ;;  %10907 = vmatpush3.bf16.msra.mxu1 %v11827_v5  ;;  %v11865_v14 = vld [vmem:[%s14731_s1 + $0x1520] sm:$0xff]   ;;  %v11869_v19 = vld [vmem:[%s14731_s1 + $0x1518] sm:$0xff]  }
 0x28a   :  { %10908 = vmatprep.subr.bf16.mxu1 %v11830_v13  ;;  %v10616_v23 = vpop.f32.mrf.mxu1  ;;  %v2134_v44 = vcombine.high %v2126_v39, %v2126_v39  ;;  %v14236_v45 = vrot.slane %v2119_v40, %v12137_v41  ;;  %v2142_v48 = vrot.slane %v2126_v39, %v12137_v41  ;;  %v11866_v15 = vld [vmem:[%s14731_s1 + $0x15e0] sm:$0xff]   ;;  %v11889_v40 = vld [vmem:[%s14731_s1 + $0x1670] sm:$0xff]  }
 0x28b   :  { %10887 = vmatpush3.bf16.msra.mxu0 %v11829_v10  ;;  %v11867_v17 = vld [vmem:[%s14731_s1 + $0x15a0] sm:$0xff]   ;;  %v11873_v23 = vld [vmem:[%s14731_s1 + $0x1510] sm:$0xff]  }
 0x28c   :  { %10888 = vmatprep.subr.bf16.mxu0 %v11832_v18  ;;  %v2156_v47 = vrot.slane %v2134_v44, %v12137_v41  ;;  %v2135_v50 = vcombine.high %v14236_v45, %v14236_v45  ;;  %v2164_v56 = vcombine.high %v2142_v48, %v2142_v48  ;;  %v11868_v18 = vld [vmem:[%s14731_s1 + $0x1558] sm:$0xff]   ;;  %v11891_v44 = vld [vmem:[%s14731_s1 + $0x16f0] sm:$0xff]  }
 0x28d   :  { %10909 = vmatpush3.bf16.msra.mxu1 %v11831_v16 }
 0x28e   :  { %10910 = vmatprep.subr.bf16.mxu1 %v11834_v22  ;;  %8673 = vmatprep.mubr.bf16.mxu0 %v2156_v47  ;;  %v2166_v52 = vcombine.high %v2156_v47, %v2156_v47  ;;  %v2163_v54 = vrot.slane %v2135_v50, %v12137_v41  ;;  %v11872_v22 = vld [vmem:[%s14731_s1 + $0x1550] sm:$0xff]   ;;  %v11894_v50 = vld [vmem:[%s14731_s1 + $0x1628] sm:$0xff]  }
 0x28f   :  { %10889 = vmatpush3.bf16.msra.mxu0 %v11833_v21  ;;  %v11871_v21 = vld [vmem:[%s14731_s1 + $0x1598] sm:$0xff]  }
 0x290   :  { %10890 = vmatprep.subr.bf16.mxu0 %v11836_v25  ;;  %8713 = vmatprep.mubr.bf16.mxu1 %v2166_v52  ;;  %v2167_v59 = vcombine.high %v2163_v54, %v2163_v54  ;;  %v11875_v25 = vld [vmem:[%s14731_s1 + $0x1590] sm:$0xff]  }
 0x291   :  { %10911 = vmatpush3.bf16.msra.mxu1 %v11835_v24  ;;  %v11874_v24 = vld [vmem:[%s14731_s1 + $0x15d0] sm:$0xff]  }
 0x292   :  { %10912 = vmatprep.subr.bf16.mxu1 %v11838_v27  ;;  %v11877_v27 = vld [vmem:[%s14731_s1 + $0x1508] sm:$0xff]  }
 0x293   :  { %10891 = vmatpush3.bf16.msra.mxu0 %v11837_v26  ;;  %v11876_v26 = vld [vmem:[%s14731_s1 + $0x1548] sm:$0xff]  }
 0x294   :  { %10892 = vmatprep.subr.bf16.mxu0 %v11840_v29  ;;  %v11879_v29 = vld [vmem:[%s14731_s1 + $0x1588] sm:$0xff]  }
 0x295   :  { %10913 = vmatpush3.bf16.msra.mxu1 %v11839_v28  ;;  %v11878_v28 = vld [vmem:[%s14731_s1 + $0x15c8] sm:$0xff]  }
 0x296   :  { %10914 = vmatprep.subr.bf16.mxu1 %v11842_v31  ;;  %v11881_v31 = vld [vmem:[%s14731_s1 + $0x1500] sm:$0xff]  }
 0x297   :  { %10893 = vmatpush3.bf16.msra.mxu0 %v11841_v30  ;;  %v11880_v30 = vld [vmem:[%s14731_s1 + $0x1540] sm:$0xff]  }
 0x298   :  { %10894 = vmatprep.subr.bf16.mxu0 %v11844_v33  ;;  %v11884_v33 = vld [vmem:[%s14731_s1 + $0x1580] sm:$0xff]  }
 0x299   :  { %10915 = vmatpush3.bf16.msra.mxu1 %v11843_v32  ;;  %v11882_v32 = vld [vmem:[%s14731_s1 + $0x15c0] sm:$0xff]  }
 0x29a   :  { %10916 = vmatprep.subr.bf16.mxu1 %v11846_v35  ;;  %v11885_v35 = vld [vmem:[%s14731_s1 + $0x1678] sm:$0xff]  }
 0x29b   :  { %10895 = vmatpush3.bf16.msra.mxu0 %v11845_v34  ;;  %v2149_v34 = vrot.slane %v14236_v45, %v12137_v41  ;;  %v11892_v45 = vld [vmem:[%s14731_s1 + $0x16b0] sm:$0xff]  }
 0x29c   :  { %10896 = vmatprep.subr.bf16.mxu0 %v11848_v38  ;;  %v11888_v38 = vld [vmem:[%s14731_s1 + $0x16b8] sm:$0xff]  }
 0x29d   :  { %10917 = vmatpush3.bf16.msra.mxu1 %v11847_v36  ;;  %v11886_v36 = vld [vmem:[%s14731_s1 + $0x1638] sm:$0xff]   ;;  %v2165_v39 = vcombine.high %v2149_v34, %v2149_v34 }
 0x29e   :  { %10918 = vmatprep.subr.bf16.mxu1 %v11850_v43 }
 0x29f   :  { %10897 = vmatpush3.bf16.msra.mxu0 %v11849_v42  ;;  %v11890_v42 = vld [vmem:[%s14731_s1 + $0x1630] sm:$0xff]  }
 0x2a0   :  { %10926 = vmatprep.subr.bf16.mxu0 %v11852_v49 }
 0x2a1   :  { %10919 = vmatpush3.bf16.msra.mxu1 %v11851_v46 }
 0x2a2   :  { %v10634_v60 = vpop.f32.mrf.mxu0  ;;  %8674 = vmatmul.mubr.bf16.vlgmr.msra.gmra.mxu0 %v2142_v48  ;;  %10948 = vmatprep.subr.bf16.mxu1 %v11854_v53  ;;  %v11893_v48 = vld [vmem:[%s14731_s1 + $0x1668] sm:$0xff]  }
 0x2a3   :  { %10927 = vmatpush3.bf16.msra.mxu0 %v11853_v51  ;;  %8753 = vmatprep.mubr.bf16.mxu0 %v2163_v54  ;;  %v11895_v53 = vld [vmem:[%s14731_s1 + $0x16e8] sm:$0xff]  }
 0x2a4   :  { %v10635_v63 = vpop.f32.mrf.mxu0  ;;  %v10656_v0 = vpop.f32.mrf.mxu1  ;;  %8714 = vmatmul.mubr.bf16.vlgmr.msra.gmra.mxu1 %v2164_v56  ;;  %10928 = vmatprep.subr.bf16.mxu0 %v11856_v57  ;;  %v11896_v56 = vld [vmem:[%s14731_s1 + $0x16a8] sm:$0xff]  }
 0x2a5   :  { %v10636_v2 = vadd.f32 %v10635_v63, %v10634_v60  ;;  %10949 = vmatpush3.bf16.msra.mxu1 %v11855_v55  ;;  %8793 = vmatprep.mubr.bf16.mxu1 %v2167_v59 }
 0x2a6   :  { %v10637_v4 = vpop.f32.mrf.mxu0  ;;  %v10657_v5 = vpop.f32.mrf.mxu1  ;;  %10950 = vmatprep.subr.bf16.mxu1 %v11858_v61  ;;  %v11898_v61 = vld [vmem:[%s14731_s1 + $0x1620] sm:$0xff]  }
 0x2a7   :  { %v8196_v7 = vadd.f32 %v10636_v2, %v14175_v20  ;;  %v10658_v8 = vadd.f32 %v10657_v5, %v10656_v0  ;;  %10929 = vmatpush3.bf16.msra.mxu0 %v11857_v58  ;;  %v11870_v20 = vld [vmem:[%s14731_s1 + $0x15d8] sm:$0xff]   ;;  %v11897_v58 = vld [vmem:[%s14731_s1 + $0x1660] sm:$0xff]   ;;  %v11905_v5 = vld [vmem:[%s14731_s1 + $0x1650] sm:$0xff]  }
 0x2a8   :  { %v10638_v10 = vpop.f32.mrf.mxu0  ;;  %10930 = vmatprep.subr.bf16.mxu0 %v11860_v1  ;;  %v10659_v12 = vpop.f32.mrf.mxu1  ;;  %v11900_v0 = vld [vmem:[%s14731_s1 + $0x16a0] sm:$0xff]   ;;  %v11901_v1 = vld [vmem:[%s14731_s1 + $0x1658] sm:$0xff]  }
 0x2a9   :  { %v14286_v13 = vadd.f32 %v10658_v8, %v8196_v7  ;;  %10951 = vmatpush3.bf16.msra.mxu1 %v11859_v62  ;;  %v11899_v62 = vld [vmem:[%s14731_s1 + $0x16e0] sm:$0xff]   ;;  %v11902_v2 = vld [vmem:[%s14731_s1 + $0x1618] sm:$0xff]   ;;  %v11907_v7 = vld [vmem:[%s14731_s1 + $0x16d0] sm:$0xff]  }
 0x2aa   :  { %10952 = vmatprep.subr.bf16.mxu1 %v11862_v6  ;;  %v10660_v16 = vpop.f32.mrf.mxu1  ;;  %v11904_v4 = vld [vmem:[%s14731_s1 + $0x1698] sm:$0xff]   ;;  %v11906_v6 = vld [vmem:[%s14731_s1 + $0x1610] sm:$0xff]   ;;  %v11910_v10 = vld [vmem:[%s14731_s1 + $0x1608] sm:$0xff]  }
 0x2ab   :  { %10931 = vmatpush3.bf16.msra.mxu0 %v11861_v3  ;;  %v11903_v3 = vld [vmem:[%s14731_s1 + $0x16d8] sm:$0xff]   ;;  %v11908_v8 = vld [vmem:[%s14731_s1 + $0x1690] sm:$0xff]   ;;  %v11913_v12 = vld [vmem:[%s14731_s1 + $0x1640] sm:$0xff]  }
 0x2ac   :  { %10932 = vmatprep.subr.bf16.mxu0 %v11864_v11  ;;  %v11911_v11 = vld [vmem:[%s14731_s1 + $0x16c8] sm:$0xff]  }
 0x2ad   :  { %10953 = vmatpush3.bf16.msra.mxu1 %v11863_v9  ;;  %v11909_v9 = vld [vmem:[%s14731_s1 + $0x1648] sm:$0xff]  }
 0x2ae   :  { %10954 = vmatprep.subr.bf16.mxu1 %v11866_v15 }
 0x2af   :  { %10933 = vmatpush3.bf16.msra.mxu0 %v11865_v14  ;;  %v11912_v14 = vld [vmem:[%s14731_s1 + $0x1688] sm:$0xff]  }
 0x2b0   :  { %10934 = vmatprep.subr.bf16.mxu0 %v11868_v18  ;;  %v11914_v18 = vld [vmem:[%s14731_s1 + $0x1600] sm:$0xff]  }
 0x2b1   :  { %10955 = vmatpush3.bf16.msra.mxu1 %v11867_v17  ;;  %v11915_v17 = vld [vmem:[%s14731_s1 + $0x16c0] sm:$0xff]  }
 0x2b2   :  { %10956 = vmatprep.subr.bf16.mxu1 %v11870_v20 }
 0x2b3   :  { %10935 = vmatpush3.bf16.msra.mxu0 %v11869_v19 }
 0x2b4   :  { %10936 = vmatprep.subr.bf16.mxu0 %v11872_v22  ;;  %v11917_v22 = vld [vmem:[%s14731_s1 + $0x1778] sm:$0xff]  }
 0x2b5   :  { %10957 = vmatpush3.bf16.msra.mxu1 %v11871_v21 }
 0x2b6   :  { %10958 = vmatprep.subr.bf16.mxu1 %v11874_v24  ;;  %v11916_v24 = vld [vmem:[%s14731_s1 + $0x1680] sm:$0xff]  }
 0x2b7   :  { %10937 = vmatpush3.bf16.msra.mxu0 %v11873_v23 }
 0x2b8   :  { %10938 = vmatprep.subr.bf16.mxu0 %v11876_v26  ;;  %v11919_v26 = vld [vmem:[%s14731_s1 + $0x17f8] sm:$0xff]  }
 0x2b9   :  { %10959 = vmatpush3.bf16.msra.mxu1 %v11875_v25 }
 0x2ba   :  { %10960 = vmatprep.subr.bf16.mxu1 %v11878_v28  ;;  %v11918_v28 = vld [vmem:[%s14731_s1 + $0x1738] sm:$0xff]  }
 0x2bb   :  { %10939 = vmatpush3.bf16.msra.mxu0 %v11877_v27 }
 0x2bc   :  { %10940 = vmatprep.subr.bf16.mxu0 %v11880_v30 }
 0x2bd   :  { %10961 = vmatpush3.bf16.msra.mxu1 %v11879_v29 }
 0x2be   :  { %10962 = vmatprep.subr.bf16.mxu1 %v11882_v32  ;;  %v11920_v32 = vld [vmem:[%s14731_s1 + $0x17b8] sm:$0xff]  }
 0x2bf   :  { %10941 = vmatpush3.bf16.msra.mxu0 %v11881_v31  ;;  %v11921_v31 = vld [vmem:[%s14731_s1 + $0x1770] sm:$0xff]  }
 0x2c0   :  { %10970 = vmatprep.subr.bf16.mxu0 %v11885_v35  ;;  %v11923_v35 = vld [vmem:[%s14731_s1 + $0x17f0] sm:$0xff]  }
 0x2c1   :  { %10963 = vmatpush3.bf16.msra.mxu1 %v11884_v33 }
 0x2c2   :  { %v10678_v43 = vpop.f32.mrf.mxu0  ;;  %8754 = vmatmul.mubr.bf16.vlgmr.msra.gmra.mxu0 %v2149_v34  ;;  %10992 = vmatprep.subr.bf16.mxu1 %v11887_v37 }
 0x2c3   :  { %10971 = vmatpush3.bf16.msra.mxu0 %v11886_v36  ;;  %v11922_v36 = vld [vmem:[%s14731_s1 + $0x1730] sm:$0xff]  }
 0x2c4   :  { %v10679_v46 = vpop.f32.mrf.mxu0  ;;  %v10700_v47 = vpop.f32.mrf.mxu1  ;;  %8794 = vmatmul.mubr.bf16.vlgmr.msra.gmra.mxu1 %v2165_v39  ;;  %10972 = vmatprep.subr.bf16.mxu0 %v11889_v40  ;;  %v11925_v39 = vld [vmem:[%s14731_s1 + $0x1768] sm:$0xff]  }
 0x2c5   :  { %v10680_v49 = vadd.f32 %v10679_v46, %v10678_v43  ;;  %10993 = vmatpush3.bf16.msra.mxu1 %v11888_v38 }
 0x2c6   :  { %v10681_v51 = vpop.f32.mrf.mxu0  ;;  %v10701_v52 = vpop.f32.mrf.mxu1  ;;  %10994 = vmatprep.subr.bf16.mxu1 %v11891_v44 }
 0x2c7   :  { %v8276_v54 = vadd.f32 %v10680_v49, %v14286_v13  ;;  %v10702_v55 = vadd.f32 %v10701_v52, %v10700_v47  ;;  %10973 = vmatpush3.bf16.msra.mxu0 %v11890_v42  ;;  %v39_v13 = vld [vmem:[%s14730_s0 + $0x58] sm:$0xff]  ;;  %v11924_v42 = vld [vmem:[%s14731_s1 + $0x17b0] sm:$0xff]  }
 0x2c8   :  { %v10682_v57 = vpop.f32.mrf.mxu0  ;;  %10974 = vmatprep.subr.bf16.mxu0 %v11893_v48  ;;  %v10703_v59 = vpop.f32.mrf.mxu1  ;;  %v2175_v15 = vrot.slane %v39_v13, %v12137_v41  ;;  %v2168_v16 = vcombine.high %v39_v13, %v39_v13  ;;  %v11926_v48 = vld [vmem:[%s14731_s1 + $0x1728] sm:$0xff]  }
 0x2c9   :  { %v14387_v60 = vadd.f32 %v10702_v55, %v8276_v54  ;;  %10995 = vmatpush3.bf16.msra.mxu1 %v11892_v45  ;;  %v11927_v45 = vld [vmem:[%s14731_s1 + $0x17e8] sm:$0xff]   ;;  %v11931_v54 = vld [vmem:[%s14731_s1 + $0x17e0] sm:$0xff]   ;;  %v11933_v57 = vld [vmem:[%s14731_s1 + $0x1758] sm:$0xff]  }
 0x2ca   :  { %10996 = vmatprep.subr.bf16.mxu1 %v11895_v53  ;;  %v10704_v63 = vpop.f32.mrf.mxu1  ;;  %v2183_v19 = vcombine.high %v2175_v15, %v2175_v15  ;;  %v14448_v20 = vrot.slane %v2168_v16, %v12137_v41  ;;  %v2191_v21 = vrot.slane %v2175_v15, %v12137_v41  ;;  %v11928_v53 = vld [vmem:[%s14731_s1 + $0x17a8] sm:$0xff]   ;;  %v11935_v59 = vld [vmem:[%s14731_s1 + $0x17d8] sm:$0xff]   ;;  %v11953_v16 = vld [vmem:[%s14731_s1 + $0x1830] sm:$0xff]  }
 0x2cb   :  { %10975 = vmatpush3.bf16.msra.mxu0 %v11894_v50  ;;  %v11929_v50 = vld [vmem:[%s14731_s1 + $0x1760] sm:$0xff]   ;;  %v11939_v63 = vld [vmem:[%s14731_s1 + $0x17d0] sm:$0xff]  }
 0x2cc   :  { %10976 = vmatprep.subr.bf16.mxu0 %v11897_v58  ;;  %v2205_v23 = vrot.slane %v2183_v19, %v12137_v41  ;;  %v2184_v25 = vcombine.high %v14448_v20, %v14448_v20  ;;  %v2213_v30 = vcombine.high %v2191_v21, %v2191_v21  ;;  %v11932_v58 = vld [vmem:[%s14731_s1 + $0x17a0] sm:$0xff]   ;;  %v11954_v19 = vld [vmem:[%s14731_s1 + $0x1868] sm:$0xff]  }
 0x2cd   :  { %10997 = vmatpush3.bf16.msra.mxu1 %v11896_v56  ;;  %v11930_v56 = vld [vmem:[%s14731_s1 + $0x1720] sm:$0xff]  }
 0x2ce   :  { %10998 = vmatprep.subr.bf16.mxu1 %v11899_v62  ;;  %8833 = vmatprep.mubr.bf16.mxu0 %v2205_v23  ;;  %v2215_v27 = vcombine.high %v2205_v23, %v2205_v23  ;;  %v2212_v29 = vrot.slane %v2184_v25, %v12137_v41  ;;  %v11936_v62 = vld [vmem:[%s14731_s1 + $0x1798] sm:$0xff]   ;;  %v11955_v25 = vld [vmem:[%s14731_s1 + $0x1828] sm:$0xff]  }
 0x2cf   :  { %10977 = vmatpush3.bf16.msra.mxu0 %v11898_v61  ;;  %v11937_v61 = vld [vmem:[%s14731_s1 + $0x1750] sm:$0xff]  }
 0x2d0   :  { %10978 = vmatprep.subr.bf16.mxu0 %v11901_v1  ;;  %8873 = vmatprep.mubr.bf16.mxu1 %v2215_v27  ;;  %v2216_v33 = vcombine.high %v2212_v29, %v2212_v29  ;;  %v11941_v1 = vld [vmem:[%s14731_s1 + $0x1748] sm:$0xff]   ;;  %v11956_v27 = vld [vmem:[%s14731_s1 + $0x1860] sm:$0xff]  }
 0x2d1   :  { %10999 = vmatpush3.bf16.msra.mxu1 %v11900_v0  ;;  %v11938_v0 = vld [vmem:[%s14731_s1 + $0x1710] sm:$0xff]  }
 0x2d2   :  { %11000 = vmatprep.subr.bf16.mxu1 %v11903_v3  ;;  %v11943_v3 = vld [vmem:[%s14731_s1 + $0x17c8] sm:$0xff]  }
 0x2d3   :  { %10979 = vmatpush3.bf16.msra.mxu0 %v11902_v2  ;;  %v11940_v2 = vld [vmem:[%s14731_s1 + $0x1790] sm:$0xff]  }
 0x2d4   :  { %10980 = vmatprep.subr.bf16.mxu0 %v11905_v5  ;;  %v11945_v5 = vld [vmem:[%s14731_s1 + $0x1740] sm:$0xff]  }
 0x2d5   :  { %11001 = vmatpush3.bf16.msra.mxu1 %v11904_v4  ;;  %v11942_v4 = vld [vmem:[%s14731_s1 + $0x1708] sm:$0xff]  }
 0x2d6   :  { %11002 = vmatprep.subr.bf16.mxu1 %v11907_v7  ;;  %v11947_v7 = vld [vmem:[%s14731_s1 + $0x17c0] sm:$0xff]  }
 0x2d7   :  { %10981 = vmatpush3.bf16.msra.mxu0 %v11906_v6  ;;  %v11944_v6 = vld [vmem:[%s14731_s1 + $0x1788] sm:$0xff]  }
 0x2d8   :  { %10982 = vmatprep.subr.bf16.mxu0 %v11909_v9  ;;  %v2198_v9 = vrot.slane %v14448_v20, %v12137_v41 }
 0x2d9   :  { %11003 = vmatpush3.bf16.msra.mxu1 %v11908_v8  ;;  %v11946_v8 = vld [vmem:[%s14731_s1 + $0x1700] sm:$0xff]  }
 0x2da   :  { %11004 = vmatprep.subr.bf16.mxu1 %v11911_v11  ;;  %v11949_v11 = vld [vmem:[%s14731_s1 + $0x1780] sm:$0xff]   ;;  %v2214_v13 = vcombine.high %v2198_v9, %v2198_v9 }
 0x2db   :  { %10983 = vmatpush3.bf16.msra.mxu0 %v11910_v10  ;;  %v11950_v10 = vld [vmem:[%s14731_s1 + $0x1878] sm:$0xff]  }
 0x2dc   :  { %10984 = vmatprep.subr.bf16.mxu0 %v11913_v12  ;;  %v11951_v12 = vld [vmem:[%s14731_s1 + $0x1838] sm:$0xff]  }
 0x2dd   :  { %11005 = vmatpush3.bf16.msra.mxu1 %v11912_v14  ;;  %v11952_v14 = vld [vmem:[%s14731_s1 + $0x1870] sm:$0xff]  }
 0x2de   :  { %11006 = vmatprep.subr.bf16.mxu1 %v11915_v17 }
 0x2df   :  { %10985 = vmatpush3.bf16.msra.mxu0 %v11914_v18 }
 0x2e0   :  { %11014 = vmatprep.subr.bf16.mxu0 %v11917_v22 }
 0x2e1   :  { %11007 = vmatpush3.bf16.msra.mxu1 %v11916_v24 }
 0x2e2   :  { %v10722_v34 = vpop.f32.mrf.mxu0  ;;  %8834 = vmatmul.mubr.bf16.vlgmr.msra.gmra.mxu0 %v2191_v21  ;;  %11036 = vmatprep.subr.bf16.mxu1 %v11919_v26 }
 0x2e3   :  { %11015 = vmatpush3.bf16.msra.mxu0 %v11918_v28  ;;  %8913 = vmatprep.mubr.bf16.mxu0 %v2212_v29 }
 0x2e4   :  { %v10723_v37 = vpop.f32.mrf.mxu0  ;;  %v10744_v38 = vpop.f32.mrf.mxu1  ;;  %8874 = vmatmul.mubr.bf16.vlgmr.msra.gmra.mxu1 %v2213_v30  ;;  %11016 = vmatprep.subr.bf16.mxu0 %v11921_v31  ;;  %v9212_v30 = vld.sshfl [vmem:[%s14730_s0 + $0x60] sm:$0x11 pattern:$0x75316420] }
 0x2e5   :  { %v10724_v40 = vadd.f32 %v10723_v37, %v10722_v34  ;;  %11037 = vmatpush3.bf16.msra.mxu1 %v11920_v32  ;;  %8953 = vmatprep.mubr.bf16.mxu1 %v2216_v33  ;;  %v2224_v32 = vcombine.high %v9212_v30, %v9212_v30 }
 0x2e6   :  { %v10725_v43 = vpop.f32.mrf.mxu0  ;;  %v10745_v44 = vpop.f32.mrf.mxu1  ;;  %11038 = vmatprep.subr.bf16.mxu1 %v11923_v35 }
 0x2e7   :  { %v8356_v46 = vadd.f32 %v10724_v40, %v14387_v60  ;;  %v10746_v47 = vadd.f32 %v10745_v44, %v10744_v38  ;;  %11017 = vmatpush3.bf16.msra.mxu0 %v11922_v36  ;;  %v11934_v60 = vld [vmem:[%s14731_s1 + $0x1718] sm:$0xff]  }
 0x2e8   :  { %v10726_v49 = vpop.f32.mrf.mxu0  ;;  %11018 = vmatprep.subr.bf16.mxu0 %v11925_v39  ;;  %v10747_v51 = vpop.f32.mrf.mxu1 }
 0x2e9   :  { %v14495_v52 = vadd.f32 %v10746_v47, %v8356_v46  ;;  %11039 = vmatpush3.bf16.msra.mxu1 %v11924_v42 }
 0x2ea   :  { %11040 = vmatprep.subr.bf16.mxu1 %v11927_v45  ;;  %v10748_v55 = vpop.f32.mrf.mxu1 }
 0x2eb   :  { %11019 = vmatpush3.bf16.msra.mxu0 %v11926_v48 }
 0x2ec   :  { %11020 = vmatprep.subr.bf16.mxu0 %v11929_v50 }
 0x2ed   :  { %11041 = vmatpush3.bf16.msra.mxu1 %v11928_v53 }
 0x2ee   :  { %11042 = vmatprep.subr.bf16.mxu1 %v11931_v54 }
 0x2ef   :  { %11021 = vmatpush3.bf16.msra.mxu0 %v11930_v56 }
 0x2f0   :  { %11022 = vmatprep.subr.bf16.mxu0 %v11933_v57 }
 0x2f1   :  { %11043 = vmatpush3.bf16.msra.mxu1 %v11932_v58 }
 0x2f2   :  { %11044 = vmatprep.subr.bf16.mxu1 %v11935_v59 }
 0x2f3   :  { %11023 = vmatpush3.bf16.msra.mxu0 %v11934_v60 }
 0x2f4   :  { %11024 = vmatprep.subr.bf16.mxu0 %v11937_v61 }
 0x2f5   :  { %11045 = vmatpush3.bf16.msra.mxu1 %v11936_v62 }
 0x2f6   :  { %11046 = vmatprep.subr.bf16.mxu1 %v11939_v63 }
 0x2f7   :  { %11025 = vmatpush3.bf16.msra.mxu0 %v11938_v0 }
 0x2f8   :  { %11026 = vmatprep.subr.bf16.mxu0 %v11941_v1 }
 0x2f9   :  { %11047 = vmatpush3.bf16.msra.mxu1 %v11940_v2 }
 0x2fa   :  { %11048 = vmatprep.subr.bf16.mxu1 %v11943_v3 }
 0x2fb   :  { %11027 = vmatpush3.bf16.msra.mxu0 %v11942_v4 }
 0x2fc   :  { %11028 = vmatprep.subr.bf16.mxu0 %v11945_v5 }
 0x2fd   :  { %11049 = vmatpush3.bf16.msra.mxu1 %v11944_v6 }
 0x2fe   :  { %11050 = vmatprep.subr.bf16.mxu1 %v11947_v7 }
 0x2ff   :  { %11029 = vmatpush3.bf16.msra.mxu0 %v11946_v8 }
 0x300   :  { %11058 = vmatprep.subr.bf16.mxu0 %v11950_v10 }
 0x301   :  { %11051 = vmatpush3.bf16.msra.mxu1 %v11949_v11 }
 0x302   :  { %v10766_v15 = vpop.f32.mrf.mxu0  ;;  %8914 = vmatmul.mubr.bf16.vlgmr.msra.gmra.mxu0 %v2198_v9 }
 0x303   :  { %11059 = vmatpush3.bf16.msra.mxu0 %v11951_v12 }
 0x304   :  { %v10767_v17 = vpop.f32.mrf.mxu0  ;;  %v10788_v18 = vpop.f32.mrf.mxu1  ;;  %8954 = vmatmul.mubr.bf16.vlgmr.msra.gmra.mxu1 %v2214_v13  ;;  %11060 = vmatprep.subr.bf16.mxu0 %v11952_v14 }
 0x305   :  { %v10768_v20 = vadd.f32 %v10767_v17, %v10766_v15 }
 0x306   :  { %v10769_v21 = vpop.f32.mrf.mxu0  ;;  %v10789_v22 = vpop.f32.mrf.mxu1 }
 0x307   :  { %v8436_v23 = vadd.f32 %v10768_v20, %v14495_v52  ;;  %v10790_v24 = vadd.f32 %v10789_v22, %v10788_v18  ;;  %11061 = vmatpush3.bf16.msra.mxu0 %v11953_v16 }
 0x308   :  { %v10770_v26 = vpop.f32.mrf.mxu0  ;;  %11062 = vmatprep.subr.bf16.mxu0 %v11954_v19  ;;  %v10791_v28 = vpop.f32.mrf.mxu1 }
 0x309   :  { %v8476_v29 = vadd.f32 %v10790_v24, %v8436_v23 }
 0x30a   :  { %v10792_v31 = vpop.f32.mrf.mxu1 }
 0x30b   :  { %12 = vsyncpa [#allocation3], 0  ;;  %11063 = vmatpush3.bf16.msra.mxu0 %v11955_v25  ;;  %v11957_v33 = vld [vmem:[%s14731_s1 + $0x1820] sm:$0xff]   ;;  %v11958_v34 = vld [vmem:[%s14731_s1 + $0x1858] sm:$0xff]   ;;  %v2238_v35 = vrot.slane %v2224_v32, %v12137_v41  ;;  %v2231_v44 = vrot.slane %v9212_v30, %v12137_v41  ;;  %v11989_v5 = vmov 0.0   ;;  %vm11990_vm0 = vmmov 0  }
 0x30c   :  { %11064 = vmatprep.subr.bf16.mxu0 %v11956_v27  ;;  %v11959_v36 = vld [vmem:[%s14731_s1 + $0x1818] sm:$0xff]   ;;  %v11960_v37 = vld [vmem:[%s14731_s1 + $0x1850] sm:$0xff]   ;;  %v11962_v39 = vld [vmem:[%s14731_s1 + $0x1848] sm:$0xff]   ;;  %11108 = vmatprep.subr.mxu1 %v11989_v5  ;;  %vm9024_vm1 = vcmask 982016   ;;  %vm9121_vm2 = vcmask 1043456   ;;  %vm9117_vm3 = vcmask 687104  }
 0x30d   :  { %8993 = vmatprep.mubr.bf16.mxu0 %v2238_v35  ;;  %v11961_v38 = vld [vmem:[%s14731_s1 + $0x1810] sm:$0xff]   ;;  %v11963_v40 = vld [vmem:[%s14731_s1 + $0x1808] sm:$0xff]   ;;  %v11964_v42 = vld [vmem:[%s14731_s1 + $0x1840] sm:$0xff]   ;;  %11138 = vmatprep.mubr.msk.f32.mxu1 %vm11990_vm0, %v11989_v5  ;;  %s11991_s10 = smov [#allocation2]   ;;  %vm9195_vm4 = vcmask 74752  }
 0x30e   :  { %v11965_v43 = vld [vmem:[%s14731_s1 + $0x1800] sm:$0xff]   ;;  %v9016_v3 = vld [vmem:[%s14733_s3 + $0x70] sm:$0xff]  ;;  %v9015_v6 = vld [vmem:[%s14733_s3 + $0x68] sm:$0xff] }
 0x30f   :  { %11065 = vmatpush3.bf16.msra.mxu0 %v11957_v33  ;;  %11109 = vmatpush3.msra.mxu1 %v9016_v3  ;;  %v9014_v7 = vld [vmem:[%s14733_s3 + $0x60] sm:$0xff]  ;;  %v9013_v8 = vld [vmem:[%s14733_s3 + $0x58] sm:$0xff]  ;;  %v9012_v9 = vld [vmem:[%s14733_s3 + $0x50] sm:$0xff] }
 0x310   :  { %11066 = vmatprep.subr.bf16.mxu0 %v11958_v34  ;;  %11110 = vmatprep.subr.mxu1 %v11989_v5  ;;  %v9011_v10 = vld [vmem:[%s14733_s3 + $0x48] sm:$0xff]  ;;  %v9010_v11 = vld [vmem:[%s14733_s3 + $0x40] sm:$0xff]  ;;  %v9009_v12 = vld [vmem:[%s14733_s3 + $0x38] sm:$0xff] }
 0x311   :  { %11111 = vmatpush3.msra.mxu1 %v9015_v6  ;;  %v9008_v13 = vld [vmem:[%s14733_s3 + $0x30] sm:$0xff]  ;;  %v9007_v14 = vld [vmem:[%s14733_s3 + $0x28] sm:$0xff]  ;;  %v9006_v15 = vld [vmem:[%s14733_s3 + $0x20] sm:$0xff] }
 0x312   :  { %11112 = vmatprep.subr.mxu1 %v11989_v5  ;;  %v9005_v17 = vld [vmem:[%s14733_s3 + $0x18] sm:$0xff]  ;;  %v9004_v21 = vld [vmem:[%s14733_s3 + $0x10] sm:$0xff]  ;;  %v9003_v26 = vld [vmem:[%s14733_s3 + $0x8] sm:$0xff] }
 0x313   :  { %11067 = vmatpush3.bf16.msra.mxu0 %v11959_v36  ;;  %11113 = vmatpush3.msra.mxu1 %v9014_v7  ;;  %v9002_v30 = vld [vmem:[%s14733_s3] sm:$0xff]  ;;  %s9203_s3 = sshll.u32 %s11991_s10, 4  ;;  %s9204_s3 = int_to_ptr.vmem [resolvable:$true] %s9203_s3 }
 0x314   :  { %11068 = vmatprep.subr.bf16.mxu0 %v11960_v37  ;;  %11114 = vmatprep.subr.mxu1 %v11989_v5  ;;  %p11971_p1 = scmp.lt.s32.totalorder %s9204_s3, %s9204_s3 }
 0x315   :  { %11115 = vmatpush3.msra.mxu1 %v9013_v8 }
 0x316   :  { %11116 = vmatprep.subr.mxu1 %v11989_v5 }
 0x317   :  { %11069 = vmatpush3.bf16.msra.mxu0 %v11961_v38  ;;  %11117 = vmatpush3.msra.mxu1 %v9012_v9 }
 0x318   :  { %11070 = vmatprep.subr.bf16.mxu0 %v11962_v39  ;;  %11118 = vmatprep.subr.mxu1 %v11989_v5 }
 0x319   :  { %11119 = vmatpush3.msra.mxu1 %v9011_v10 }
 0x31a   :  { %11120 = vmatprep.subr.mxu1 %v11989_v5 }
 0x31b   :  { %11071 = vmatpush3.bf16.msra.mxu0 %v11963_v40  ;;  %11121 = vmatpush3.msra.mxu1 %v9010_v11 }
 0x31c   :  { %11072 = vmatprep.subr.bf16.mxu0 %v11964_v42  ;;  %11122 = vmatprep.subr.mxu1 %v11989_v5 }
 0x31d   :  { %11123 = vmatpush3.msra.mxu1 %v9009_v12  ;;  %v9109_v12 = vld [vmem:[%s14735_s5 + $0x50] sm:$0xf] }
 0x31e   :  { %11124 = vmatprep.subr.mxu1 %v11989_v5 }
 0x31f   :  { %11073 = vmatpush3.bf16.msra.mxu0 %v11965_v43  ;;  %11125 = vmatpush3.msra.mxu1 %v9008_v13  ;;  %v9108_v13 = vld [vmem:[%s14735_s5 + $0x48] sm:$0xff] }
 0x320   :  { %11126 = vmatprep.subr.mxu1 %v11989_v5 }
 0x321   :  { %11127 = vmatpush3.msra.mxu1 %v9007_v14  ;;  %v9107_v14 = vld [vmem:[%s14735_s5 + $0x40] sm:$0xff] }
 0x322   :  { %v10810_v45 = vpop.f32.mrf.mxu0  ;;  %8994 = vmatmul.mubr.bf16.vlgmr.msra.gmra.mxu0 %v2231_v44  ;;  %11128 = vmatprep.subr.mxu1 %v11989_v5 }
 0x323   :  { %11129 = vmatpush3.msra.mxu1 %v9006_v15  ;;  %v9106_v15 = vld [vmem:[%s14735_s5 + $0x38] sm:$0xff] }
 0x324   :  { %v10811_v46 = vpop.f32.mrf.mxu0  ;;  %v10832_v47 = vpop.f32.mrf.mxu1  ;;  %11130 = vmatprep.subr.mxu1 %v11989_v5 }
 0x325   :  { %v10812_v48 = vadd.f32 %v10811_v46, %v10810_v45  ;;  %11131 = vmatpush3.msra.mxu1 %v9005_v17  ;;  %v9104_v17 = vld [vmem:[%s14735_s5 + $0x28] sm:$0xff] }
 0x326   :  { %v10813_v49 = vpop.f32.mrf.mxu0  ;;  %v10833_v50 = vpop.f32.mrf.mxu1  ;;  %11132 = vmatprep.subr.mxu1 %v11989_v5 }
 0x327   :  { %v8516_v51 = vadd.f32 %v10812_v48, %v8476_v29  ;;  %v10834_v52 = vadd.f32 %v10833_v50, %v10832_v47  ;;  %11133 = vmatpush3.msra.mxu1 %v9004_v21  ;;  %v9100_v21 = vld [vmem:[%s14735_s5 + $0x8] sm:$0xff] }
 0x328   :  { %v10814_v53 = vpop.f32.mrf.mxu0  ;;  %v10835_v54 = vpop.f32.mrf.mxu1  ;;  %11134 = vmatprep.subr.mxu1 %v11989_v5 }
 0x329   :  { %v8556_v55 = vadd.f32 %v10834_v52, %v8516_v51  ;;  %11135 = vmatpush3.msra.mxu1 %v9003_v26 }
 0x32a   :  { %v10836_v56 = vpop.f32.mrf.mxu1  ;;  %11136 = vmatprep.subr.mxu1 %v11989_v5 }
 0x32b   :  { %11137 = vmatpush3.msra.mxu1 %v9002_v30 }
 0x32c   :  { %11141 = vmatprep.subr.mxu1 %v11989_v5 }
 0x342   :  { %v10854_v57 = vpop.f32.mrf.mxu0 }
 0x344   :  { %v10855_v58 = vpop.f32.mrf.mxu0  ;;  %v10876_v59 = vpop.f32.mrf.mxu1 }
 0x345   :  { %v10856_v60 = vadd.f32 %v10855_v58, %v10854_v57 }
 0x346   :  { %v10857_v61 = vpop.f32.mrf.mxu0  ;;  %v10877_v41 = vpop.f32.mrf.mxu1 }
 0x347   :  { %v8596_v62 = vadd.f32 %v10856_v60, %v8556_v55  ;;  %v10878_v63 = vadd.f32 %v10877_v41, %v10876_v59 }
 0x348   :  { %v10858_v0 = vpop.f32.mrf.mxu0  ;;  %v10879_v1 = vpop.f32.mrf.mxu1 }
 0x349   :  { %v8636_v2 = vadd.f32 %v10878_v63, %v8596_v62 }
 0x34a   :  { %v10880_v4 = vpop.f32.mrf.mxu1 }
 0x362   :  { %v10898_v16 = vpop.f32.mrf.mxu0 }
 0x364   :  { %v10899_v18 = vpop.f32.mrf.mxu0  ;;  %v10920_v19 = vpop.f32.mrf.mxu1 }
 0x365   :  { %v10900_v20 = vadd.f32 %v10899_v18, %v10898_v16  ;;  %v9105_v16 = vld [vmem:[%s14735_s5 + $0x30] sm:$0xff]  ;;  %v9103_v18 = vld [vmem:[%s14735_s5 + $0x20] sm:$0xff] }
 0x366   :  { %v10901_v22 = vpop.f32.mrf.mxu0  ;;  %v10921_v23 = vpop.f32.mrf.mxu1 }
 0x367   :  { %v8676_v24 = vadd.f32 %v10900_v20, %v8636_v2  ;;  %v10922_v25 = vadd.f32 %v10921_v23, %v10920_v19  ;;  %v9102_v19 = vld [vmem:[%s14735_s5 + $0x18] sm:$0xff]  ;;  %v9101_v20 = vld [vmem:[%s14735_s5 + $0x10] sm:$0xff]  ;;  %v9099_v22 = vld [vmem:[%s14735_s5] sm:$0xff]  ;;  %s11966_s5 = scalar_lea.vmem %s9204_s3, 32 }
 0x368   :  { %v10902_v27 = vpop.f32.mrf.mxu0  ;;  %v10923_v28 = vpop.f32.mrf.mxu1  ;;  %v9997_v23 = vld [vmem:[%s14734_s4] ss:$0 sm:$0xff]  ;;  %p11967_p0 = scmp.ne.s32.totalorder %s9204_s3, %s11966_s5  ;;  %p11972_p2 = scmp.lt.s32.totalorder %s11966_s5, %s11966_s5 }
 0x369   :  { %v8716_v29 = vadd.f32 %v10922_v25, %v8676_v24  ;;  %v9999_v28 = vld [vmem:[%s14736_s6] ss:$0 sm:$0xff] }
 0x36a   :  { %v10924_v31 = vpop.f32.mrf.mxu1  ;;  %p11973_p3 = por %p11972_p2, %p11971_p1 }
 0x36c   :  { %p11974_p4 = pnand %p11973_p3, %p11967_p0 }
 0x382   :  { %v10942_v32 = vpop.f32.mrf.mxu0 }
 0x384   :  { %v10943_v33 = vpop.f32.mrf.mxu0  ;;  %v10964_v34 = vpop.f32.mrf.mxu1 }
 0x385   :  { %v10944_v35 = vadd.f32 %v10943_v33, %v10942_v32 }
 0x386   :  { %v10945_v36 = vpop.f32.mrf.mxu0  ;;  %v10965_v37 = vpop.f32.mrf.mxu1 }
 0x387   :  { %v8756_v38 = vadd.f32 %v10944_v35, %v8716_v29  ;;  %v10966_v39 = vadd.f32 %v10965_v37, %v10964_v34 }
 0x388   :  { %v10946_v40 = vpop.f32.mrf.mxu0  ;;  %v10967_v42 = vpop.f32.mrf.mxu1 }
 0x389   :  { %v8796_v43 = vadd.f32 %v10966_v39, %v8756_v38 }
 0x38a   :  { %v10968_v44 = vpop.f32.mrf.mxu1 }
 0x3a2   :  { %v10986_v45 = vpop.f32.mrf.mxu0 }
 0x3a4   :  { %v10987_v46 = vpop.f32.mrf.mxu0  ;;  %v11008_v47 = vpop.f32.mrf.mxu1 }
 0x3a5   :  { %v10988_v61 = vadd.f32 %v10987_v46, %v10986_v45 }
 0x3a6   :  { %v10989_v48 = vpop.f32.mrf.mxu0  ;;  %v11009_v49 = vpop.f32.mrf.mxu1 }
 0x3a7   :  { %v8836_v41 = vadd.f32 %v10988_v61, %v8796_v43  ;;  %v11010_v62 = vadd.f32 %v11009_v49, %v11008_v47 }
 0x3a8   :  { %v10990_v50 = vpop.f32.mrf.mxu0  ;;  %v11011_v51 = vpop.f32.mrf.mxu1 }
 0x3a9   :  { %v8876_v0 = vadd.f32 %v11010_v62, %v8836_v41 }
 0x3aa   :  { %v11012_v52 = vpop.f32.mrf.mxu1 }
 0x3c2   :  { %v11030_v53 = vpop.f32.mrf.mxu0 }
 0x3c4   :  { %v11031_v54 = vpop.f32.mrf.mxu0  ;;  %v11052_v55 = vpop.f32.mrf.mxu1 }
 0x3c5   :  { %v11032_v63 = vadd.f32 %v11031_v54, %v11030_v53 }
 0x3c6   :  { %v11033_v56 = vpop.f32.mrf.mxu0  ;;  %v11053_v57 = vpop.f32.mrf.mxu1 }
 0x3c7   :  { %v8916_v1 = vadd.f32 %v11032_v63, %v8876_v0  ;;  %v11054_v2 = vadd.f32 %v11053_v57, %v11052_v55 }
 0x3c8   :  { %v11034_v58 = vpop.f32.mrf.mxu0  ;;  %v11055_v59 = vpop.f32.mrf.mxu1 }
 0x3c9   :  { %v8956_v6 = vadd.f32 %v11054_v2, %v8916_v1 }
 0x3ca   :  { %v11056_v60 = vpop.f32.mrf.mxu1 }
 0x3e2   :  { %v11074_v3 = vpop.f32.mrf.mxu0 }
 0x3e4   :  { %v11075_v4 = vpop.f32.mrf.mxu0 }
 0x3e5   :  { %v11076_v7 = vadd.f32 %v11075_v4, %v11074_v3 }
 0x3e6   :  { %v11077_v8 = vpop.f32.mrf.mxu0 }
 0x3e7   :  { %v8996_v9 = vadd.f32 %v11076_v7, %v8956_v6 }
 0x3e8   :  { %v11078_v10 = vpop.f32.mrf.mxu0 }
 0x3e9   :  { %v9001_v11 = vmax.f32 %v8996_v9, 0.0 }
 0x3eb   :  { %11139 = vmatmul.mubr.msk.f32.vlgmr.msra.gmra.mxu1 %vm9024_vm1, %v9001_v11 }
 0x3ec   :  { %11142 = vmatpush3.msk.msra.mxu1 %vm9121_vm2, %v9109_v12  ;;  %11163 = vmatprep.mubr.msk.f32.mxu1 %vm11990_vm0, %v11989_v5 }
 0x3ed   :  { %11143 = vmatprep.subr.mxu1 %v11989_v5 }
 0x3ee   :  { %11144 = vmatpush3.msra.mxu1 %v9108_v13 }
 0x3ef   :  { %11145 = vmatprep.subr.mxu1 %v11989_v5 }
 0x3f0   :  { %11146 = vmatpush3.msra.mxu1 %v9107_v14 }
 0x3f1   :  { %11147 = vmatprep.subr.mxu1 %v11989_v5 }
 0x3f2   :  { %11148 = vmatpush3.msra.mxu1 %v9106_v15 }
 0x3f3   :  { %11149 = vmatprep.subr.mxu1 %v11989_v5 }
 0x3f4   :  { %11150 = vmatpush3.msra.mxu1 %v9105_v16 }
 0x3f5   :  { %11151 = vmatprep.subr.mxu1 %v11989_v5 }
 0x3f6   :  { %11152 = vmatpush3.msra.mxu1 %v9104_v17 }
 0x3f7   :  { %11153 = vmatprep.subr.mxu1 %v11989_v5 }
 0x3f8   :  { %11154 = vmatpush3.msra.mxu1 %v9103_v18 }
 0x3f9   :  { %11155 = vmatprep.subr.mxu1 %v11989_v5 }
 0x3fa   :  { %11156 = vmatpush3.msra.mxu1 %v9102_v19 }
 0x3fb   :  { %11157 = vmatprep.subr.mxu1 %v11989_v5 }
 0x3fc   :  { %11158 = vmatpush3.msra.mxu1 %v9101_v20 }
 0x3fd   :  { %11159 = vmatprep.subr.mxu1 %v11989_v5 }
 0x3fe   :  { %11160 = vmatpush3.msra.mxu1 %v9100_v21 }
 0x3ff   :  { %11161 = vmatprep.subr.mxu1 %v11989_v5 }
 0x400   :  { %11162 = vmatpush3.msra.mxu1 %v9099_v22 }
 0x4ab   :  { %v9094_v24 = vpop.f32.mrf.mxu1 }
 0x4ac   :  { %v9095_v25 = vadd.f32 %v9997_v23, %v9094_v24 }
 0x4ad   :  { %v11140_v26 = vpop.f32.mrf.mxu1 }
 0x4ae   :  { %v9098_v27 = vmax.f32 %v9095_v25, 0.0 }
 0x4b0   :  { %11164 = vmatmul.mubr.msk.f32.vlgmr.msra.gmra.mxu1 %vm9117_vm3, %v9098_v27 }
 0x570   :  { %v9191_v5 = vpop.f32.mrf.mxu1 }
 0x571   :  { %v9192_v29 = vadd.f32 %v9999_v28, %v9191_v5 }
 0x572   :  { %v11165_v30 = vpop.f32.mrf.mxu1 }
 0x573   :  { %9196 = vst.msk [vmem:[#allocation2] sm:$0x3] %vm9195_vm4, %v9192_v29 }
 0x574   :  { %11977 = shalt.err (!%p11974_p4)
}
 0x575   :  { %9206 = dma.vmem_to_hbm [thread:$0]  %s9204_s3, 32, %s14737_s7, [#allocation3]  }
 0x576   :  { %11986 = dma.done.wait [#allocation3], 32  }
 0x577   :  { %11987 = vsyncadd [#allocation3], 4294967264 }
 0x578   :  { %9210 = vsyncpa [#allocation3], 1 }

</bundles_post_ra>
